<compile_context>
chip_gen: v5e
topology: v5e:2x2
jax: 0.10.0
libtpu: 0.0.40
codegen_flags: <defaults>
</compile_context>

<pallas_src>
import functools

import jax
import jax.numpy as jnp
from jax.experimental import pallas as pl
from jax.experimental.pallas import tpu as pltpu

IN_DIM = 2048
HID_DIM = 512
OUT_DIM = 143
OUT_PAD = 256  # lane-dense (multiple of 128) classifier width


def _round_up(x, m):
    return (x + m - 1) // m * m


def _device_kind():
    try:
        return jax.devices()[0].device_kind.lower()
    except Exception:
        return ""


def _tensorcores_per_chip():
    """Parts whose grid 'parallel' axes are split across 2 TensorCores."""
    kind = _device_kind()
    return 2 if any(t in kind for t in ("v7", "v5p", "v4")) else 1


def pick_batch_tile():
    """Large tiles everywhere (weights are VMEM-resident, so the tile is not
    constrained by MXU shape); 512 on v5e, 1024 on v6e/v7x/v5p/v4."""
    kind = _device_kind()
    if any(t in kind for t in ("v5e", "v5 lite", "v5lite")):
        return 512
    if any(t in kind for t in ("v6", "v7", "v5p", "v4")):
        return 1024
    return 256  # conservative default for older / unknown parts


def _downstream_kernel(x_ref, w1_ref, b1_ref, w2_ref, b2_ref, o_ref):
    # Cast the activations to bf16 in VMEM (x is read once from HBM in its
    # original dtype; the VPU cast is negligible next to the DMA).
    x = x_ref[...].astype(jnp.bfloat16)
    # First linear: [TB, 2048] @ [2048, 512], bf16 operands, f32 accumulation.
    h = jnp.dot(x, w1_ref[...], preferred_element_type=jnp.float32) + b1_ref[...]
    # Classifier: [TB, 512] @ [512, 256] (lane-dense padded), f32 accumulation.
    out = jnp.dot(h.astype(jnp.bfloat16), w2_ref[...],
                  preferred_element_type=jnp.float32)
    o_ref[...] = (out + b2_ref[...]).astype(o_ref.dtype)


def _resident_spec(shape, weight_buffers):
    """Weights/biases: constant block index -> fetched once, VMEM-resident.
    weight_buffers=1 drops the pointless second pipeline buffer."""
    if weight_buffers > 0:
        return pl.BlockSpec(shape, lambda i: (0, 0),
                            pipeline_mode=pl.Buffered(weight_buffers))
    return pl.BlockSpec(shape, lambda i: (0, 0))


@functools.partial(jax.jit, static_argnames=("tb", "n_tiles", "weight_buffers"))
def _forward_call(x, w1, b1, w2p, b2p, *, tb, n_tiles, weight_buffers):
    B = x.shape[0]
    wbuf = weight_buffers if weight_buffers > 0 else 2
    # Actual VMEM footprint: double-buffered x tiles (original dtype),
    # (single-)buffered resident weights, double-buffered bf16 output tiles.
    footprint = (
        2 * tb * IN_DIM * x.dtype.itemsize
        + wbuf * (IN_DIM * HID_DIM * 2 + HID_DIM * OUT_PAD * 2
                  + HID_DIM * 4 + OUT_PAD * 4)
        + 2 * tb * OUT_PAD * 2
    )
    vmem_limit = int(min(32 << 20, max(16 << 20, footprint + (6 << 20))))

    return pl.pallas_call(
        _downstream_kernel,
        out_shape=jax.ShapeDtypeStruct((B, OUT_PAD), jnp.bfloat16),
        grid=(n_tiles,),
        in_specs=[
            # x streams per batch tile (default double-buffering is enough;
            # review's Buffered(3) on x was optional and is skipped).
            pl.BlockSpec((tb, IN_DIM), lambda i: (i, 0)),
            _resident_spec((IN_DIM, HID_DIM), weight_buffers),
            _resident_spec((1, HID_DIM), weight_buffers),
            _resident_spec((HID_DIM, OUT_PAD), weight_buffers),
            _resident_spec((1, OUT_PAD), weight_buffers),
        ],
        out_specs=pl.BlockSpec((tb, OUT_PAD), lambda i: (i, 0)),
        compiler_params=pltpu.CompilerParams(
            dimension_semantics=("parallel",),   # batch sharded across TCs
            vmem_limit_bytes=vmem_limit,
        ),
    )(x, w1, b1, w2p, b2p)


_WEIGHT_SINGLE_BUFFER = True  # flips off if pipeline_mode=pl.Buffered is unsupported


def downstream_forward(x, w1, b1, w2p, b2p, *, block_b=None):
    """x: [B, 2048] (any float dtype; cast to bf16 inside the kernel).
    w1: [2048, 512] bf16, b1: [1, 512] f32,
    w2p: [512, 256] bf16 (143 real cols, zero-padded), b2p: [1, 256] f32.
    Returns the padded [B, 256] bf16 logits; the consumer slices [:, :143]."""
    global _WEIGHT_SINGLE_BUFFER
    B = x.shape[0]
    if block_b is None:
        block_b = pick_batch_tile()

    # Adaptive tiling: no explicit batch padding; the partial last block is
    # masked on store. Force >= 2 tiles on dual-TensorCore parts when B permits.
    n_tiles = pl.cdiv(B, block_b)
    if _tensorcores_per_chip() >= 2 and B >= 32:
        n_tiles = max(n_tiles, 2)
    tb = min(_round_up(pl.cdiv(B, n_tiles), 16), _round_up(B, 8))
    n_tiles = pl.cdiv(B, tb)

    if _WEIGHT_SINGLE_BUFFER:
        try:
            return _forward_call(x, w1, b1, w2p, b2p,
                                 tb=tb, n_tiles=n_tiles, weight_buffers=1)
        except Exception:
            # Installed Pallas rejected pipeline_mode on the weight specs;
            # fall back to default double-buffering (still correct).
            _WEIGHT_SINGLE_BUFFER = False
    return _forward_call(x, w1, b1, w2p, b2p,
                         tb=tb, n_tiles=n_tiles, weight_buffers=0)


def init_params(key):
    """torch.nn.Linear-style init: U(-1/sqrt(fan_in), 1/sqrt(fan_in)).
    Weights stored [in, out] (transpose of torch's [out, in]) in bf16.
    The 143 -> 256 lane padding of W2/b2 is done once here (hoisted out of
    the per-call jitted path)."""
    k1, k2, k3, k4 = jax.random.split(key, 4)
    bound1 = 1.0 / jnp.sqrt(IN_DIM)
    bound2 = 1.0 / jnp.sqrt(HID_DIM)
    w1 = jax.random.uniform(k1, (IN_DIM, HID_DIM), jnp.float32,
                            -bound1, bound1).astype(jnp.bfloat16)
    b1 = jax.random.uniform(k2, (1, HID_DIM), jnp.float32, -bound1, bound1)
    w2 = jax.random.uniform(k3, (HID_DIM, OUT_DIM), jnp.float32,
                            -bound2, bound2).astype(jnp.bfloat16)
    b2 = jax.random.uniform(k4, (1, OUT_DIM), jnp.float32, -bound2, bound2)
    w2p = jnp.pad(w2, ((0, 0), (0, OUT_PAD - OUT_DIM)))
    b2p = jnp.pad(b2, ((0, 0), (0, OUT_PAD - OUT_DIM)))
    return w1, b1, w2p, b2p


def reference_forward(x, w1, b1, w2p, b2p):
    """Plain-JAX reference with the same bf16 casts as the kernel (f32 out)."""
    xb = x.astype(jnp.bfloat16).astype(jnp.float32)
    h = xb @ w1.astype(jnp.float32) + b1
    hb = h.astype(jnp.bfloat16).astype(jnp.float32)
    return hb @ w2p.astype(jnp.float32) + b2p  # [B, OUT_PAD]


if __name__ == "__main__":
    key = jax.random.PRNGKey(0)
    k_params, k_x1, k_x2 = jax.random.split(key, 3)
    params = init_params(k_params)

    cases = (
        # name, batch, key, block_b override
        ("small", 8, k_x1, None),    # single tile, exact 8-row block
        ("tiled", 300, k_x2, 128),   # multi-tile grid with a masked partial block
    )
    for name, B, kx, block_b in cases:
        x = jax.random.normal(kx, (B, IN_DIM), jnp.float32)
        out_padded = downstream_forward(x, *params, block_b=block_b)
        out_padded = jax.block_until_ready(out_padded)
        assert out_padded.shape == (B, OUT_PAD), name
        # Consumer-side slice (fused into the downstream op in a real model).
        out = out_padded[:, :OUT_DIM].astype(jnp.float32)
        ref = reference_forward(x, *params)[:, :OUT_DIM]
        assert jnp.allclose(out, ref, atol=2e-2, rtol=2e-2), name

    print("KERNEL_OK")
</pallas_src>

<mosaic_0001>
module attributes {stable_mosaic.version = 11 : i64} {
  func.func @_downstream_kernel(%arg0: i32, %arg1: memref<8x2048xf32, #tpu.memory_space<vmem>>, %arg2: memref<2048x512xbf16, #tpu.memory_space<vmem>>, %arg3: memref<1x512xf32, #tpu.memory_space<vmem>>, %arg4: memref<512x256xbf16, #tpu.memory_space<vmem>>, %arg5: memref<1x256xf32, #tpu.memory_space<vmem>>, %arg6: memref<8x256xbf16, #tpu.memory_space<vmem>>) attributes {dimension_semantics = [#tpu.dimension_semantics<parallel>], iteration_bounds = array<i64: 1>, scalar_prefetch = 0 : i64, scratch_operands = 0 : i64, tpu.core_type = #tpu.core_type<tc>, window_params = [{transform_indices = @transform_0, window_bounds = array<i64: 8, 2048>}, {pipeline_mode = #tpu.pipeline_mode<synchronous>, transform_indices = @transform_1, window_bounds = array<i64: 2048, 512>}, {pipeline_mode = #tpu.pipeline_mode<synchronous>, transform_indices = @transform_2, window_bounds = array<i64: 1, 512>}, {pipeline_mode = #tpu.pipeline_mode<synchronous>, transform_indices = @transform_3, window_bounds = array<i64: 512, 256>}, {pipeline_mode = #tpu.pipeline_mode<synchronous>, transform_indices = @transform_4, window_bounds = array<i64: 1, 256>}, {transform_indices = @transform_5, window_bounds = array<i64: 8, 256>}]} {
    %c0 = arith.constant 0 : index
    %c0_0 = arith.constant 0 : index
    %0 = vector.load %arg1[%c0, %c0_0] : memref<8x2048xf32, #tpu.memory_space<vmem>>, vector<8x2048xf32>
    %1 = arith.truncf %0 : vector<8x2048xf32> to vector<8x2048xbf16>
    %c0_1 = arith.constant 0 : index
    %c0_2 = arith.constant 0 : index
    %2 = vector.load %arg2[%c0_1, %c0_2] : memref<2048x512xbf16, #tpu.memory_space<vmem>>, vector<2048x512xbf16>
    %cst = arith.constant dense<0.000000e+00> : vector<8x512xf32>
    %3 = tpu.matmul %1, %2, %cst {dimension_numbers = #tpu.dot_dimension_numbers<[1], [0], [0], [1], [0, 0, 1, 1], [], []>} : vector<8x2048xbf16>, vector<2048x512xbf16>, vector<8x512xf32> -> vector<8x512xf32>
    %c0_3 = arith.constant 0 : index
    %c0_4 = arith.constant 0 : index
    %4 = vector.load %arg3[%c0_3, %c0_4] : memref<1x512xf32, #tpu.memory_space<vmem>>, vector<1x512xf32>
    %5 = vector.broadcast %4 : vector<1x512xf32> to vector<8x512xf32>
    %6 = arith.addf %3, %5 : vector<8x512xf32>
    %7 = arith.truncf %6 : vector<8x512xf32> to vector<8x512xbf16>
    %c0_5 = arith.constant 0 : index
    %c0_6 = arith.constant 0 : index
    %8 = vector.load %arg4[%c0_5, %c0_6] : memref<512x256xbf16, #tpu.memory_space<vmem>>, vector<512x256xbf16>
    %cst_7 = arith.constant dense<0.000000e+00> : vector<8x256xf32>
    %9 = tpu.matmul %7, %8, %cst_7 {dimension_numbers = #tpu.dot_dimension_numbers<[1], [0], [0], [1], [0, 0, 1, 1], [], []>} : vector<8x512xbf16>, vector<512x256xbf16>, vector<8x256xf32> -> vector<8x256xf32>
    %c0_8 = arith.constant 0 : index
    %c0_9 = arith.constant 0 : index
    %10 = vector.load %arg5[%c0_8, %c0_9] : memref<1x256xf32, #tpu.memory_space<vmem>>, vector<1x256xf32>
    %11 = vector.broadcast %10 : vector<1x256xf32> to vector<8x256xf32>
    %12 = arith.addf %9, %11 : vector<8x256xf32>
    %13 = arith.truncf %12 : vector<8x256xf32> to vector<8x256xbf16>
    %c0_10 = arith.constant 0 : index
    %c0_11 = arith.constant 0 : index
    %14 = vector.load %arg6[%c0_10, %c0_11] : memref<8x256xbf16, #tpu.memory_space<vmem>>, vector<8x256xbf16>
    tpu.vector_store %arg6[%c0_10, %c0_11], %13 {strides = array<i32>} : memref<8x256xbf16, #tpu.memory_space<vmem>>, vector<8x256xbf16>,
    return
  }
  func.func @transform_0(%arg0: i32) -> (i32, i32) {
    %c0_i32 = arith.constant 0 : i32
    %c0_i32_0 = arith.constant 0 : i32
    return %arg0, %c0_i32 : i32, i32
  }
  func.func @transform_1(%arg0: i32) -> (i32, i32) {
    %c0_i32 = arith.constant 0 : i32
    %c0_i32_0 = arith.constant 0 : i32
    %c0_i32_1 = arith.constant 0 : i32
    return %c0_i32, %c0_i32_0 : i32, i32
  }
  func.func @transform_2(%arg0: i32) -> (i32, i32) {
    %c0_i32 = arith.constant 0 : i32
    %c0_i32_0 = arith.constant 0 : i32
    %c0_i32_1 = arith.constant 0 : i32
    return %c0_i32, %c0_i32_0 : i32, i32
  }
  func.func @transform_3(%arg0: i32) -> (i32, i32) {
    %c0_i32 = arith.constant 0 : i32
    %c0_i32_0 = arith.constant 0 : i32
    %c0_i32_1 = arith.constant 0 : i32
    return %c0_i32, %c0_i32_0 : i32, i32
  }
  func.func @transform_4(%arg0: i32) -> (i32, i32) {
    %c0_i32 = arith.constant 0 : i32
    %c0_i32_0 = arith.constant 0 : i32
    %c0_i32_1 = arith.constant 0 : i32
    return %c0_i32, %c0_i32_0 : i32, i32
  }
  func.func @transform_5(%arg0: i32) -> (i32, i32) {
    %c0_i32 = arith.constant 0 : i32
    %c0_i32_0 = arith.constant 0 : i32
    return %arg0, %c0_i32 : i32, i32
  }
}

module attributes {stable_mosaic.version = 11 : i64} {
  func.func @_downstream_kernel(%arg0: i32, %arg1: memref<8x2048xf32, #tpu.memory_space<vmem>>, %arg2: memref<2048x512xbf16, #tpu.memory_space<vmem>>, %arg3: memref<1x512xf32, #tpu.memory_space<vmem>>, %arg4: memref<512x256xbf16, #tpu.memory_space<vmem>>, %arg5: memref<1x256xf32, #tpu.memory_space<vmem>>, %arg6: memref<8x256xbf16, #tpu.memory_space<vmem>>) attributes {dimension_semantics = [#tpu.dimension_semantics<parallel>], iteration_bounds = array<i64: 1>, scalar_prefetch = 0 : i64, scratch_operands = 0 : i64, tpu.core_type = #tpu.core_type<tc>, window_params = [{transform_indices = @transform_0, window_bounds = array<i64: 8, 2048>}, {pipeline_mode = #tpu.pipeline_mode<synchronous>, transform_indices = @transform_1, window_bounds = array<i64: 2048, 512>}, {pipeline_mode = #tpu.pipeline_mode<synchronous>, transform_indices = @transform_2, window_bounds = array<i64: 1, 512>}, {pipeline_mode = #tpu.pipeline_mode<synchronous>, transform_indices = @transform_3, window_bounds = array<i64: 512, 256>}, {pipeline_mode = #tpu.pipeline_mode<synchronous>, transform_indices = @transform_4, window_bounds = array<i64: 1, 256>}, {transform_indices = @transform_5, window_bounds = array<i64: 8, 256>}]} {
    %c0 = arith.constant 0 : index
    %c0_0 = arith.constant 0 : index
    %0 = vector.load %arg1[%c0, %c0_0] : memref<8x2048xf32, #tpu.memory_space<vmem>>, vector<8x2048xf32>
    %1 = arith.truncf %0 : vector<8x2048xf32> to vector<8x2048xbf16>
    %c0_1 = arith.constant 0 : index
    %c0_2 = arith.constant 0 : index
    %2 = vector.load %arg2[%c0_1, %c0_2] : memref<2048x512xbf16, #tpu.memory_space<vmem>>, vector<2048x512xbf16>
    %cst = arith.constant dense<0.000000e+00> : vector<8x512xf32>
    %3 = tpu.matmul %1, %2, %cst {dimension_numbers = #tpu.dot_dimension_numbers<[1], [0], [0], [1], [0, 0, 1, 1], [], []>} : vector<8x2048xbf16>, vector<2048x512xbf16>, vector<8x512xf32> -> vector<8x512xf32>
    %c0_3 = arith.constant 0 : index
    %c0_4 = arith.constant 0 : index
    %4 = vector.load %arg3[%c0_3, %c0_4] : memref<1x512xf32, #tpu.memory_space<vmem>>, vector<1x512xf32>
    %5 = vector.broadcast %4 : vector<1x512xf32> to vector<8x512xf32>
    %6 = arith.addf %3, %5 : vector<8x512xf32>
    %7 = arith.truncf %6 : vector<8x512xf32> to vector<8x512xbf16>
    %c0_5 = arith.constant 0 : index
    %c0_6 = arith.constant 0 : index
    %8 = vector.load %arg4[%c0_5, %c0_6] : memref<512x256xbf16, #tpu.memory_space<vmem>>, vector<512x256xbf16>
    %cst_7 = arith.constant dense<0.000000e+00> : vector<8x256xf32>
    %9 = tpu.matmul %7, %8, %cst_7 {dimension_numbers = #tpu.dot_dimension_numbers<[1], [0], [0], [1], [0, 0, 1, 1], [], []>} : vector<8x512xbf16>, vector<512x256xbf16>, vector<8x256xf32> -> vector<8x256xf32>
    %c0_8 = arith.constant 0 : index
    %c0_9 = arith.constant 0 : index
    %10 = vector.load %arg5[%c0_8, %c0_9] : memref<1x256xf32, #tpu.memory_space<vmem>>, vector<1x256xf32>
    %11 = vector.broadcast %10 : vector<1x256xf32> to vector<8x256xf32>
    %12 = arith.addf %9, %11 : vector<8x256xf32>
    %13 = arith.truncf %12 : vector<8x256xf32> to vector<8x256xbf16>
    %c0_10 = arith.constant 0 : index
    %c0_11 = arith.constant 0 : index
    %14 = vector.load %arg6[%c0_10, %c0_11] : memref<8x256xbf16, #tpu.memory_space<vmem>>, vector<8x256xbf16>
    tpu.vector_store %arg6[%c0_10, %c0_11], %13 {strides = array<i32>} : memref<8x256xbf16, #tpu.memory_space<vmem>>, vector<8x256xbf16>,
    return
  }
  func.func @transform_0(%arg0: i32) -> (i32, i32) {
    %c0_i32 = arith.constant 0 : i32
    %c0_i32_0 = arith.constant 0 : i32
    return %arg0, %c0_i32 : i32, i32
  }
  func.func @transform_1(%arg0: i32) -> (i32, i32) {
    %c0_i32 = arith.constant 0 : i32
    %c0_i32_0 = arith.constant 0 : i32
    %c0_i32_1 = arith.constant 0 : i32
    return %c0_i32, %c0_i32_0 : i32, i32
  }
  func.func @transform_2(%arg0: i32) -> (i32, i32) {
    %c0_i32 = arith.constant 0 : i32
    %c0_i32_0 = arith.constant 0 : i32
    %c0_i32_1 = arith.constant 0 : i32
    return %c0_i32, %c0_i32_0 : i32, i32
  }
  func.func @transform_3(%arg0: i32) -> (i32, i32) {
    %c0_i32 = arith.constant 0 : i32
    %c0_i32_0 = arith.constant 0 : i32
    %c0_i32_1 = arith.constant 0 : i32
    return %c0_i32, %c0_i32_0 : i32, i32
  }
  func.func @transform_4(%arg0: i32) -> (i32, i32) {
    %c0_i32 = arith.constant 0 : i32
    %c0_i32_0 = arith.constant 0 : i32
    %c0_i32_1 = arith.constant 0 : i32
    return %c0_i32, %c0_i32_0 : i32, i32
  }
  func.func @transform_5(%arg0: i32) -> (i32, i32) {
    %c0_i32 = arith.constant 0 : i32
    %c0_i32_0 = arith.constant 0 : i32
    return %arg0, %c0_i32 : i32, i32
  }
}

</mosaic_0001>

<bundles_post_ra>
// kernel: _forward_call.1
= control target key start
LH: loop header
LB: loop body
LE: loop exit
PB: predicated region body
PF: predicated region fallthrough
CT: control target
= control target key end

     0   :  { %10 = vsyncpa [#allocation3], 0  ;;  %s7825_s0 = inlined_call_operand.hbm [shape: f32[8,2048], index: 0, kind: input, shape index: {}]   ;;  %s7826_s1 = inlined_call_operand.hbm [shape: bf16[2048,512], index: 1, kind: input, shape index: {}]   ;;  %s7827_s2 = inlined_call_operand.hbm [shape: f32[1,512], index: 2, kind: input, shape index: {}]   ;;  %s7828_s3 = inlined_call_operand.hbm [shape: bf16[512,256], index: 3, kind: input, shape index: {}]   ;;  %s7829_s4 = inlined_call_operand.hbm [shape: f32[1,256], index: 4, kind: input, shape index: {}]   ;;  %s7830_s5 = inlined_call_operand.hbm [shape: bf16[8,256], index: 5, kind: output, shape index: {}]  }
   0x1   :  { %11 = vsyncpa [#allocation6], 0 }
   0x2   :  { %12 = vsyncpa [#allocation9], 0  ;;  %s29_s20 = sshll.u32 %s7826_s1, 4  ;;  %s30_s20 = int_to_ptr.hbm [resolvable:$true] %s29_s20 }
   0x3   :  { %13 = vsyncpa [#allocation4], 0  ;;  %s7603_s21 = smov [#allocation5]   ;;  %s53_s25 = sshll.u32 %s7828_s3, 4  ;;  %s54_s25 = int_to_ptr.hbm [resolvable:$true] %s53_s25 }
   0x4   :  { %s31_s22 = sshll.u32 %s7603_s21, 4  ;;  %s7604_s26 = smov 256   ;;  %s32_s22 = int_to_ptr.vmem [resolvable:$true] %s31_s22 }
   0x5   :  { %s7605_s27 = smov 16   ;;  %s7606_s28 = smov [#allocation8]  }
   0x6   :  { %37 = dma.hbm_to_vmem [thread:$0]  %s30_s20, 65536, %s32_s22, [#allocation6], %s7604_s26, %s7604_s26, %s7605_s27  }
   0x7   :  { %s55_s29 = sshll.u32 %s7606_s28, 4  ;;  %s7607_s30 = smov 128   ;;  %s56_s29 = int_to_ptr.vmem [resolvable:$true] %s55_s29 }
   0x8   :  { %s7608_s6 = smov 8   ;;  %s19_s8 = sshll.u32 %s7825_s0, 4  ;;  %s20_s8 = int_to_ptr.hbm [resolvable:$true] %s19_s8 }
   0x9   :  { %61 = dma.hbm_to_vmem [thread:$0]  %s54_s25, 8192, %s56_s29, [#allocation9], %s7607_s30, %s7607_s30, %s7608_s6  }
   0xa   :  { %s7609_s9 = smov [#allocation2]   ;;  %s43_s12 = sshll.u32 %s7827_s2, 4  ;;  %s44_s12 = int_to_ptr.hbm [resolvable:$true] %s43_s12 }
   0xb   :  { %s21_s10 = sshll.u32 %s7609_s9, 4  ;;  %s7610_s13 = smov [#allocation7]   ;;  %s22_s10 = int_to_ptr.vmem [resolvable:$true] %s21_s10 }
   0xc   :  { %24 = dma.hbm_to_vmem [thread:$0]  %s20_s8, 2048, %s22_s10, [#allocation3]  }
   0xd   :  { %s45_s14 = sshll.u32 %s7610_s13, 4  ;;  %s67_s17 = sshll.u32 %s7829_s4, 4  ;;  %s46_s14 = int_to_ptr.vmem [resolvable:$true] %s45_s14  ;;  %s68_s17 = int_to_ptr.hbm [resolvable:$true] %s67_s17 }
   0xe   :  { %48 = dma.hbm_to_vmem [thread:$0]  %s44_s12, 64, %s46_s14, [#allocation6]  }
   0xf   :  { %s7611_s0 = smov [#allocation10]  }
  0x10   :  { %s69_s18 = sshll.u32 %s7611_s0, 4  ;;  %s70_s18 = int_to_ptr.vmem [resolvable:$true] %s69_s18 }
  0x11   :  { %72 = dma.hbm_to_vmem [thread:$0]  %s68_s17, 32, %s70_s18, [#allocation9]  }
  0x12   :  { %7595 = dma.done.wait [#allocation3], 2048  }
  0x13   :  { %7596 = vsyncadd [#allocation3], 4294965248 }
  0x14   :  { %7597 = dma.done.wait [#allocation6], 65600  }
  0x15   :  { %7598 = vsyncadd [#allocation6], 4294901696 }
  0x16   :  { %7599 = dma.done.wait [#allocation9], 8224  }
  0x17   :  { %7600 = vsyncadd [#allocation9], 4294959072  ;;  %v4672_v0 = vld [vmem:[#allocation5 + $0xe0] sm:$0xf]  ;;  %v6892_v1 = vld [vmem:[#allocation5 + $0xec] sm:$0xf0] }
  0x18   :  { %v4800_v2 = vld [vmem:[#allocation5 + $0x1e0] sm:$0xf]  ;;  %v4673_v3 = vor.u32 %v6892_v1, %v4672_v0  ;;  %v6924_v4 = vld [vmem:[#allocation5 + $0x1ec] sm:$0xf0]  ;;  %s7612_s2 = smov [#allocation11]   ;;  %s4546_s21 = sshll.u32 %s7830_s5, 4  ;;  %s4547_s21 = int_to_ptr.hbm [resolvable:$true] %s4546_s21 }
  0x19   :  { %v4928_v5 = vld [vmem:[#allocation5 + $0x2e0] sm:$0xf]  ;;  %v6956_v6 = vld [vmem:[#allocation5 + $0x2ec] sm:$0xf0]  ;;  %v4801_v7 = vor.u32 %v6924_v4, %v4800_v2  ;;  %s4544_s4 = sshll.u32 %s7612_s2, 4  ;;  %s4545_s4 = int_to_ptr.vmem [resolvable:$true] %s4544_s4 }
  0x1a   :  { %v4929_v8 = vor.u32 %v6956_v6, %v4928_v5  ;;  %v5056_v9 = vld [vmem:[#allocation5 + $0x3e0] sm:$0xf]  ;;  %v6988_v10 = vld [vmem:[#allocation5 + $0x3ec] sm:$0xf0]  ;;  %3207 = vmatpush.bf16.msra.mxu0 %v4673_v3 }
  0x1b   :  { %v4656_v11 = vld [vmem:[#allocation5 + $0xc0] sm:$0xf]  ;;  %v5057_v12 = vor.u32 %v6988_v10, %v5056_v9  ;;  %v6888_v13 = vld [vmem:[#allocation5 + $0xcc] sm:$0xf0]  ;;  %3220 = vmatpush.bf16.msra.mxu1 %v4801_v7 }
  0x1c   :  { %v4784_v14 = vld [vmem:[#allocation5 + $0x1c0] sm:$0xf]  ;;  %v6920_v15 = vld [vmem:[#allocation5 + $0x1cc] sm:$0xf0]  ;;  %3233 = vmatpush.bf16.msra.mxu2 %v4929_v8  ;;  %v4657_v16 = vor.u32 %v6888_v13, %v4656_v11 }
  0x1d   :  { %v4785_v17 = vor.u32 %v6920_v15, %v4784_v14  ;;  %v4912_v18 = vld [vmem:[#allocation5 + $0x2c0] sm:$0xf]  ;;  %v6952_v19 = vld [vmem:[#allocation5 + $0x2cc] sm:$0xf0]  ;;  %3246 = vmatpush.bf16.msra.mxu3 %v5057_v12 }
  0x1e   :  { %v5040_v20 = vld [vmem:[#allocation5 + $0x3c0] sm:$0xf]  ;;  %v4913_v21 = vor.u32 %v6952_v19, %v4912_v18  ;;  %v6984_v22 = vld [vmem:[#allocation5 + $0x3cc] sm:$0xf0]  ;;  %3208 = vmatpush.bf16.msra.mxu0 %v4657_v16 }
  0x1f   :  { %v4640_v23 = vld [vmem:[#allocation5 + $0xa0] sm:$0xf]  ;;  %v6884_v24 = vld [vmem:[#allocation5 + $0xac] sm:$0xf0]  ;;  %v5041_v25 = vor.u32 %v6984_v22, %v5040_v20  ;;  %3221 = vmatpush.bf16.msra.mxu1 %v4785_v17 }
  0x20   :  { %v4768_v26 = vld [vmem:[#allocation5 + $0x1a0] sm:$0xf]  ;;  %v6916_v27 = vld [vmem:[#allocation5 + $0x1ac] sm:$0xf0]  ;;  %v4641_v29 = vor.u32 %v6884_v24, %v4640_v23  ;;  %3234 = vmatpush.bf16.msra.mxu2 %v4913_v21 }
  0x21   :  { %v4896_v28 = vld [vmem:[#allocation5 + $0x2a0] sm:$0xf]  ;;  %v6948_v30 = vld [vmem:[#allocation5 + $0x2ac] sm:$0xf0]  ;;  %v4769_v33 = vor.u32 %v6916_v27, %v4768_v26  ;;  %3247 = vmatpush.bf16.msra.mxu3 %v5041_v25 }
  0x22   :  { %v5024_v31 = vld [vmem:[#allocation5 + $0x3a0] sm:$0xf]  ;;  %v6980_v32 = vld [vmem:[#allocation5 + $0x3ac] sm:$0xf0]  ;;  %v4897_v34 = vor.u32 %v6948_v30, %v4896_v28  ;;  %3209 = vmatpush.bf16.msra.mxu0 %v4641_v29 }
  0x23   :  { %v4624_v35 = vld [vmem:[#allocation5 + $0x80] sm:$0xf]  ;;  %v6880_v36 = vld [vmem:[#allocation5 + $0x8c] sm:$0xf0]  ;;  %v5025_v38 = vor.u32 %v6980_v32, %v5024_v31  ;;  %3222 = vmatpush.bf16.msra.mxu1 %v4769_v33 }
  0x24   :  { %v4752_v37 = vld [vmem:[#allocation5 + $0x180] sm:$0xf]  ;;  %v6912_v39 = vld [vmem:[#allocation5 + $0x18c] sm:$0xf0]  ;;  %v4625_v44 = vor.u32 %v6880_v36, %v4624_v35  ;;  %3235 = vmatpush.bf16.msra.mxu2 %v4897_v34 }
  0x25   :  { %v4880_v40 = vld [vmem:[#allocation5 + $0x280] sm:$0xf]  ;;  %v6944_v41 = vld [vmem:[#allocation5 + $0x28c] sm:$0xf0]  ;;  %v4753_v45 = vor.u32 %v6912_v39, %v4752_v37  ;;  %3248 = vmatpush.bf16.msra.mxu3 %v5025_v38 }
  0x26   :  { %v5008_v42 = vld [vmem:[#allocation5 + $0x380] sm:$0xf]  ;;  %v6976_v43 = vld [vmem:[#allocation5 + $0x38c] sm:$0xf0]  ;;  %v4881_v46 = vor.u32 %v6944_v41, %v4880_v40  ;;  %3210 = vmatpush.bf16.msra.mxu0 %v4625_v44 }
  0x27   :  { %v4608_v47 = vld [vmem:[#allocation5 + $0x60] sm:$0xf]  ;;  %v6876_v48 = vld [vmem:[#allocation5 + $0x6c] sm:$0xf0]  ;;  %v5009_v50 = vor.u32 %v6976_v43, %v5008_v42  ;;  %3223 = vmatpush.bf16.msra.mxu1 %v4753_v45 }
  0x28   :  { %v4736_v49 = vld [vmem:[#allocation5 + $0x160] sm:$0xf]  ;;  %v6908_v51 = vld [vmem:[#allocation5 + $0x16c] sm:$0xf0]  ;;  %v4609_v56 = vor.u32 %v6876_v48, %v4608_v47  ;;  %3236 = vmatpush.bf16.msra.mxu2 %v4881_v46 }
  0x29   :  { %v4864_v52 = vld [vmem:[#allocation5 + $0x260] sm:$0xf]  ;;  %v6940_v53 = vld [vmem:[#allocation5 + $0x26c] sm:$0xf0]  ;;  %v4737_v57 = vor.u32 %v6908_v51, %v4736_v49  ;;  %3249 = vmatpush.bf16.msra.mxu3 %v5009_v50 }
  0x2a   :  { %v4992_v54 = vld [vmem:[#allocation5 + $0x360] sm:$0xf]  ;;  %v6972_v55 = vld [vmem:[#allocation5 + $0x36c] sm:$0xf0]  ;;  %v4865_v58 = vor.u32 %v6940_v53, %v4864_v52  ;;  %3211 = vmatpush.bf16.msra.mxu0 %v4609_v56 }
  0x2b   :  { %v4592_v59 = vld [vmem:[#allocation5 + $0x40] sm:$0xf]  ;;  %v6872_v60 = vld [vmem:[#allocation5 + $0x4c] sm:$0xf0]  ;;  %v4993_v62 = vor.u32 %v6972_v55, %v4992_v54  ;;  %3224 = vmatpush.bf16.msra.mxu1 %v4737_v57 }
  0x2c   :  { %v4720_v61 = vld [vmem:[#allocation5 + $0x140] sm:$0xf]  ;;  %v6904_v63 = vld [vmem:[#allocation5 + $0x14c] sm:$0xf0]  ;;  %v4593_v4 = vor.u32 %v6872_v60, %v4592_v59  ;;  %3237 = vmatpush.bf16.msra.mxu2 %v4865_v58 }
  0x2d   :  { %v4848_v0 = vld [vmem:[#allocation5 + $0x240] sm:$0xf]  ;;  %v6936_v1 = vld [vmem:[#allocation5 + $0x24c] sm:$0xf0]  ;;  %v4721_v5 = vor.u32 %v6904_v63, %v4720_v61  ;;  %3250 = vmatpush.bf16.msra.mxu3 %v4993_v62 }
  0x2e   :  { %v4976_v2 = vld [vmem:[#allocation5 + $0x340] sm:$0xf]  ;;  %v6968_v3 = vld [vmem:[#allocation5 + $0x34c] sm:$0xf0]  ;;  %v4849_v6 = vor.u32 %v6936_v1, %v4848_v0  ;;  %3212 = vmatpush.bf16.msra.mxu0 %v4593_v4 }
  0x2f   :  { %v4576_v7 = vld [vmem:[#allocation5 + $0x20] sm:$0xf]  ;;  %v6868_v8 = vld [vmem:[#allocation5 + $0x2c] sm:$0xf0]  ;;  %v4977_v10 = vor.u32 %v6968_v3, %v4976_v2  ;;  %3225 = vmatpush.bf16.msra.mxu1 %v4721_v5 }
  0x30   :  { %v4704_v9 = vld [vmem:[#allocation5 + $0x120] sm:$0xf]  ;;  %v6900_v11 = vld [vmem:[#allocation5 + $0x12c] sm:$0xf0]  ;;  %v4577_v16 = vor.u32 %v6868_v8, %v4576_v7  ;;  %3238 = vmatpush.bf16.msra.mxu2 %v4849_v6 }
  0x31   :  { %v4832_v12 = vld [vmem:[#allocation5 + $0x220] sm:$0xf]  ;;  %v6932_v13 = vld [vmem:[#allocation5 + $0x22c] sm:$0xf0]  ;;  %v4705_v19 = vor.u32 %v6900_v11, %v4704_v9  ;;  %3251 = vmatpush.bf16.msra.mxu3 %v4977_v10  ;;  %v96_v10 = vld [vmem:[#allocation2 + $0x18] sm:$0xff] }
  0x32   :  { %v4960_v14 = vld [vmem:[#allocation5 + $0x320] sm:$0xf]  ;;  %v6964_v15 = vld [vmem:[#allocation5 + $0x32c] sm:$0xf0]  ;;  %v4833_v20 = vor.u32 %v6932_v13, %v4832_v12  ;;  %3213 = vmatpush.bf16.msra.mxu0 %v4577_v16 }
  0x33   :  { %v4560_v17 = vld [vmem:[#allocation5] sm:$0xf]  ;;  %v6864_v18 = vld [vmem:[#allocation5 + $0xc] sm:$0xf0]  ;;  %v4961_v24 = vor.u32 %v6964_v15, %v4960_v14  ;;  %3226 = vmatpush.bf16.msra.mxu1 %v4705_v19  ;;  %v7662_v15 = vpack.c.bf16 %v96_v10, %v96_v10  ;;  %v94_v19 = vld [vmem:[#allocation2 + $0x8] sm:$0xff] }
  0x34   :  { %v4688_v21 = vld [vmem:[#allocation5 + $0x100] sm:$0xf]  ;;  %v6896_v22 = vld [vmem:[#allocation5 + $0x10c] sm:$0xf0]  ;;  %v4561_v31 = vor.u32 %v6864_v18, %v4560_v17  ;;  %3239 = vmatpush.bf16.msra.mxu2 %v4833_v20 }
  0x35   :  { %v4816_v23 = vld [vmem:[#allocation5 + $0x200] sm:$0xf]  ;;  %v6928_v25 = vld [vmem:[#allocation5 + $0x20c] sm:$0xf0]  ;;  %v4689_v35 = vor.u32 %v6896_v22, %v4688_v21  ;;  %3252 = vmatpush.bf16.msra.mxu3 %v4961_v24 }
  0x36   :  { %v4944_v26 = vld [vmem:[#allocation5 + $0x300] sm:$0xf]  ;;  %v6960_v27 = vld [vmem:[#allocation5 + $0x30c] sm:$0xf0]  ;;  %v4817_v36 = vor.u32 %v6928_v25, %v4816_v23  ;;  %3214 = vmatpush.bf16.msra.mxu0 %v4561_v31  ;;  %v7667_v25 = vpack.c.bf16 %v94_v19, %v94_v19 }
  0x37   :  { %v5184_v28 = vld [vmem:[#allocation5 + $0x4e0] sm:$0xf]  ;;  %v7020_v29 = vld [vmem:[#allocation5 + $0x4ec] sm:$0xf0]  ;;  %v4945_v39 = vor.u32 %v6960_v27, %v4944_v26  ;;  %3227 = vmatpush.bf16.msra.mxu1 %v4689_v35 }
  0x38   :  { %v5312_v30 = vld [vmem:[#allocation5 + $0x5e0] sm:$0xf]  ;;  %v7052_v32 = vld [vmem:[#allocation5 + $0x5ec] sm:$0xf0]  ;;  %v5185_v40 = vor.u32 %v7020_v29, %v5184_v28  ;;  %3240 = vmatpush.bf16.msra.mxu2 %v4817_v36 }
  0x39   :  { %v5440_v33 = vld [vmem:[#allocation5 + $0x6e0] sm:$0xf]  ;;  %v7084_v34 = vld [vmem:[#allocation5 + $0x6ec] sm:$0xf0]  ;;  %v5313_v41 = vor.u32 %v7052_v32, %v5312_v30  ;;  %3253 = vmatpush.bf16.msra.mxu3 %v4945_v39 }
  0x3a   :  { %v5568_v37 = vld [vmem:[#allocation5 + $0x7e0] sm:$0xf]  ;;  %v7116_v38 = vld [vmem:[#allocation5 + $0x7ec] sm:$0xf0]  ;;  %v5441_v42 = vor.u32 %v7084_v34, %v5440_v33  ;;  %3259 = vmatpush.bf16.msrb.mxu0 %v5185_v40  ;;  %3228 = vmatmul.bf16.vlgmr.msra.gmra.mxu1 %v7667_v25 }
  0x3b   :  { %v5168_v43 = vld [vmem:[#allocation5 + $0x4c0] sm:$0xf]  ;;  %v7016_v44 = vld [vmem:[#allocation5 + $0x4cc] sm:$0xf0]  ;;  %v5569_v46 = vor.u32 %v7116_v38, %v5568_v37  ;;  %3272 = vmatpush.bf16.msrb.mxu1 %v5313_v41 }
  0x3c   :  { %v5296_v45 = vld [vmem:[#allocation5 + $0x5c0] sm:$0xf]  ;;  %v7048_v47 = vld [vmem:[#allocation5 + $0x5cc] sm:$0xf0]  ;;  %v5169_v52 = vor.u32 %v7016_v44, %v5168_v43  ;;  %3285 = vmatpush.bf16.msrb.mxu2 %v5441_v42  ;;  %3254 = vmatmul.bf16.vlgmr.msra.gmra.mxu3 %v7662_v15 }
  0x3d   :  { %v5424_v48 = vld [vmem:[#allocation5 + $0x6c0] sm:$0xf]  ;;  %v7080_v49 = vld [vmem:[#allocation5 + $0x6cc] sm:$0xf0]  ;;  %v5297_v54 = vor.u32 %v7048_v47, %v5296_v45  ;;  %3298 = vmatpush.bf16.msrb.mxu3 %v5569_v46 }
  0x3e   :  { %v5552_v50 = vld [vmem:[#allocation5 + $0x7c0] sm:$0xf]  ;;  %v7112_v51 = vld [vmem:[#allocation5 + $0x7cc] sm:$0xf0]  ;;  %v5425_v55 = vor.u32 %v7080_v49, %v5424_v48  ;;  %3260 = vmatpush.bf16.msrb.mxu0 %v5169_v52 }
  0x3f   :  { %v5152_v53 = vld [vmem:[#allocation5 + $0x4a0] sm:$0xf]  ;;  %v7012_v56 = vld [vmem:[#allocation5 + $0x4ac] sm:$0xf0]  ;;  %v5553_v59 = vor.u32 %v7112_v51, %v5552_v50  ;;  %3273 = vmatpush.bf16.msrb.mxu1 %v5297_v54 }
  0x40   :  { %v5280_v57 = vld [vmem:[#allocation5 + $0x5a0] sm:$0xf]  ;;  %v7044_v58 = vld [vmem:[#allocation5 + $0x5ac] sm:$0xf0]  ;;  %v5153_v0 = vor.u32 %v7012_v56, %v5152_v53  ;;  %3286 = vmatpush.bf16.msrb.mxu2 %v5425_v55 }
  0x41   :  { %v5408_v60 = vld [vmem:[#allocation5 + $0x6a0] sm:$0xf]  ;;  %v7076_v61 = vld [vmem:[#allocation5 + $0x6ac] sm:$0xf0]  ;;  %v5281_v1 = vor.u32 %v7044_v58, %v5280_v57  ;;  %3299 = vmatpush.bf16.msrb.mxu3 %v5553_v59 }
  0x42   :  { %v5536_v62 = vld [vmem:[#allocation5 + $0x7a0] sm:$0xf]  ;;  %v7108_v63 = vld [vmem:[#allocation5 + $0x7ac] sm:$0xf0]  ;;  %v5409_v5 = vor.u32 %v7076_v61, %v5408_v60  ;;  %3261 = vmatpush.bf16.msrb.mxu0 %v5153_v0 }
  0x43   :  { %v5136_v2 = vld [vmem:[#allocation5 + $0x480] sm:$0xf]  ;;  %v95_v3 = vld [vmem:[#allocation2 + $0x10] sm:$0xff]  ;;  %v5537_v11 = vor.u32 %v7108_v63, %v5536_v62  ;;  %3274 = vmatpush.bf16.msrb.mxu1 %v5281_v1 }
  0x44   :  { %v93_v4 = vld [vmem:[#allocation2] sm:$0xff]  ;;  %v7008_v6 = vld [vmem:[#allocation5 + $0x48c] sm:$0xf0]  ;;  %v7658_v8 = vpack.c.bf16 %v95_v3, %v95_v3  ;;  %3287 = vmatpush.bf16.msrb.mxu2 %v5409_v5 }
  0x45   :  { %v5264_v7 = vld [vmem:[#allocation5 + $0x580] sm:$0xf]  ;;  %v7660_v9 = vpack.c.bf16 %v93_v4, %v93_v4  ;;  %v7040_v12 = vld [vmem:[#allocation5 + $0x58c] sm:$0xf0]  ;;  %v5137_v18 = vor.u32 %v7008_v6, %v5136_v2  ;;  %3300 = vmatpush.bf16.msrb.mxu3 %v5537_v11 }
  0x46   :  { %v5392_v13 = vld [vmem:[#allocation5 + $0x680] sm:$0xf]  ;;  %v7072_v14 = vld [vmem:[#allocation5 + $0x68c] sm:$0xf0]  ;;  %3241 = vmatmul.bf16.vlgmr.msra.gmra.mxu2 %v7658_v8  ;;  %v5265_v20 = vor.u32 %v7040_v12, %v5264_v7 }
  0x47   :  { %v5520_v16 = vld [vmem:[#allocation5 + $0x780] sm:$0xf]  ;;  %v7104_v17 = vld [vmem:[#allocation5 + $0x78c] sm:$0xf0]  ;;  %3215 = vmatmul.bf16.vlgmr.msra.gmra.mxu0 %v7660_v9  ;;  %v5393_v21 = vor.u32 %v7072_v14, %v5392_v13 }
  0x48   :  { %v5120_v22 = vld [vmem:[#allocation5 + $0x460] sm:$0xf]  ;;  %v7004_v23 = vld [vmem:[#allocation5 + $0x46c] sm:$0xf0]  ;;  %v5521_v26 = vor.u32 %v7104_v17, %v5520_v16  ;;  %3262 = vmatpush.bf16.msrb.mxu0 %v5137_v18  ;;  %3275 = vmatpush.bf16.msrb.mxu1 %v5265_v20 }
  0x49   :  { %v5248_v24 = vld [vmem:[#allocation5 + $0x560] sm:$0xf]  ;;  %v7036_v27 = vld [vmem:[#allocation5 + $0x56c] sm:$0xf0]  ;;  %v5121_v32 = vor.u32 %v7004_v23, %v5120_v22  ;;  %3288 = vmatpush.bf16.msrb.mxu2 %v5393_v21  ;;  %v100_v23 = vld [vmem:[#allocation2 + $0x38] sm:$0xff] }
  0x4a   :  { %v5376_v28 = vld [vmem:[#allocation5 + $0x660] sm:$0xf]  ;;  %v7068_v29 = vld [vmem:[#allocation5 + $0x66c] sm:$0xf0]  ;;  %v5249_v33 = vor.u32 %v7036_v27, %v5248_v24  ;;  %3301 = vmatpush.bf16.msrb.mxu3 %v5521_v26 }
  0x4b   :  { %v5504_v30 = vld [vmem:[#allocation5 + $0x760] sm:$0xf]  ;;  %v7100_v31 = vld [vmem:[#allocation5 + $0x76c] sm:$0xf0]  ;;  %v5377_v34 = vor.u32 %v7068_v29, %v5376_v28  ;;  %v98_v29 = vld [vmem:[#allocation2 + $0x28] sm:$0xff] }
  0x4c   :  { %v5104_v35 = vld [vmem:[#allocation5 + $0x440] sm:$0xf]  ;;  %v7000_v36 = vld [vmem:[#allocation5 + $0x44c] sm:$0xf0]  ;;  %v5505_v38 = vor.u32 %v7100_v31, %v5504_v30  ;;  %3263 = vmatpush.bf16.msrb.mxu0 %v5121_v32  ;;  %3276 = vmatpush.bf16.msrb.mxu1 %v5249_v33 }
  0x4d   :  { %v5232_v37 = vld [vmem:[#allocation5 + $0x540] sm:$0xf]  ;;  %v7032_v39 = vld [vmem:[#allocation5 + $0x54c] sm:$0xf0]  ;;  %v5105_v44 = vor.u32 %v7000_v36, %v5104_v35  ;;  %3289 = vmatpush.bf16.msrb.mxu2 %v5377_v34 }
  0x4e   :  { %v5360_v40 = vld [vmem:[#allocation5 + $0x640] sm:$0xf]  ;;  %v7064_v41 = vld [vmem:[#allocation5 + $0x64c] sm:$0xf0]  ;;  %v5233_v45 = vor.u32 %v7032_v39, %v5232_v37  ;;  %3302 = vmatpush.bf16.msrb.mxu3 %v5505_v38  ;;  %v7674_v38 = vpack.c.bf16 %v100_v23, %v100_v23 }
  0x4f   :  { %v5488_v42 = vld [vmem:[#allocation5 + $0x740] sm:$0xf]  ;;  %v7096_v43 = vld [vmem:[#allocation5 + $0x74c] sm:$0xf0]  ;;  %v5361_v46 = vor.u32 %v7064_v41, %v5360_v40  ;;  %v7676_v40 = vpack.c.bf16 %v98_v29, %v98_v29 }
  0x50   :  { %v5088_v47 = vld [vmem:[#allocation5 + $0x420] sm:$0xf]  ;;  %v6996_v48 = vld [vmem:[#allocation5 + $0x42c] sm:$0xf0]  ;;  %v5489_v50 = vor.u32 %v7096_v43, %v5488_v42  ;;  %3264 = vmatpush.bf16.msrb.mxu0 %v5105_v44  ;;  %3277 = vmatpush.bf16.msrb.mxu1 %v5233_v45 }
  0x51   :  { %v5216_v49 = vld [vmem:[#allocation5 + $0x520] sm:$0xf]  ;;  %v7028_v51 = vld [vmem:[#allocation5 + $0x52c] sm:$0xf0]  ;;  %v5089_v56 = vor.u32 %v6996_v48, %v5088_v47  ;;  %3290 = vmatpush.bf16.msrb.mxu2 %v5361_v46 }
  0x52   :  { %v5344_v52 = vld [vmem:[#allocation5 + $0x620] sm:$0xf]  ;;  %v7060_v53 = vld [vmem:[#allocation5 + $0x62c] sm:$0xf0]  ;;  %v5217_v59 = vor.u32 %v7028_v51, %v5216_v49  ;;  %3303 = vmatpush.bf16.msrb.mxu3 %v5489_v50 }
  0x53   :  { %v5472_v54 = vld [vmem:[#allocation5 + $0x720] sm:$0xf]  ;;  %v7092_v55 = vld [vmem:[#allocation5 + $0x72c] sm:$0xf0]  ;;  %v5345_v60 = vor.u32 %v7060_v53, %v5344_v52 }
  0x54   :  { %v5072_v57 = vld [vmem:[#allocation5 + $0x400] sm:$0xf]  ;;  %v6992_v58 = vld [vmem:[#allocation5 + $0x40c] sm:$0xf0]  ;;  %v5473_v0 = vor.u32 %v7092_v55, %v5472_v54  ;;  %3265 = vmatpush.bf16.msrb.mxu0 %v5089_v56  ;;  %3278 = vmatpush.bf16.msrb.mxu1 %v5217_v59 }
  0x55   :  { %v5200_v61 = vld [vmem:[#allocation5 + $0x500] sm:$0xf]  ;;  %v7024_v62 = vld [vmem:[#allocation5 + $0x50c] sm:$0xf0]  ;;  %v5073_v7 = vor.u32 %v6992_v58, %v5072_v57  ;;  %3291 = vmatpush.bf16.msrb.mxu2 %v5345_v60 }
  0x56   :  { %v5328_v63 = vld [vmem:[#allocation5 + $0x600] sm:$0xf]  ;;  %v7056_v1 = vld [vmem:[#allocation5 + $0x60c] sm:$0xf0]  ;;  %v5201_v13 = vor.u32 %v7024_v62, %v5200_v61  ;;  %3304 = vmatpush.bf16.msrb.mxu3 %v5473_v0 }
  0x57   :  { %v5456_v2 = vld [vmem:[#allocation5 + $0x700] sm:$0xf]  ;;  %v7088_v3 = vld [vmem:[#allocation5 + $0x70c] sm:$0xf0]  ;;  %v5329_v14 = vor.u32 %v7056_v1, %v5328_v63 }
  0x58   :  { %v5696_v4 = vld [vmem:[#allocation5 + $0x8e0] sm:$0xf]  ;;  %v7148_v5 = vld [vmem:[#allocation5 + $0x8ec] sm:$0xf0]  ;;  %v5457_v19 = vor.u32 %v7088_v3, %v5456_v2  ;;  %3266 = vmatpush.bf16.msrb.mxu0 %v5073_v7  ;;  %3279 = vmatpush.bf16.msrb.mxu1 %v5201_v13 }
  0x59   :  { %v5824_v6 = vld [vmem:[#allocation5 + $0x9e0] sm:$0xf]  ;;  %v7180_v10 = vld [vmem:[#allocation5 + $0x9ec] sm:$0xf0]  ;;  %v5697_v20 = vor.u32 %v7148_v5, %v5696_v4  ;;  %3292 = vmatpush.bf16.msrb.mxu2 %v5329_v14 }
  0x5a   :  { %v5952_v11 = vld [vmem:[#allocation5 + $0xae0] sm:$0xf]  ;;  %v7212_v12 = vld [vmem:[#allocation5 + $0xaec] sm:$0xf0]  ;;  %v5825_v24 = vor.u32 %v7180_v10, %v5824_v6  ;;  %3305 = vmatpush.bf16.msrb.mxu3 %v5457_v19 }
  0x5b   :  { %v6080_v16 = vld [vmem:[#allocation5 + $0xbe0] sm:$0xf]  ;;  %v7244_v17 = vld [vmem:[#allocation5 + $0xbec] sm:$0xf0]  ;;  %v5953_v26 = vor.u32 %v7212_v12, %v5952_v11  ;;  %3280 = vmatmul.bf16.vlgmr.msrb.gmra.mxu1 %v7676_v40 }
  0x5c   :  { %v99_v18 = vld [vmem:[#allocation2 + $0x30] sm:$0xff]  ;;  %v5680_v21 = vld [vmem:[#allocation5 + $0x8c0] sm:$0xf]  ;;  %v6081_v30 = vor.u32 %v7244_v17, %v6080_v16  ;;  %3311 = vmatpush.bf16.msra.mxu0 %v5697_v20  ;;  %3324 = vmatpush.bf16.msra.mxu1 %v5825_v24 }
  0x5d   :  { %v97_v22 = vld [vmem:[#allocation2 + $0x20] sm:$0xff]  ;;  %v7144_v27 = vld [vmem:[#allocation5 + $0x8cc] sm:$0xf0]  ;;  %v7670_v34 = vpack.c.bf16 %v99_v18, %v99_v18  ;;  %3337 = vmatpush.bf16.msra.mxu2 %v5953_v26  ;;  %3306 = vmatmul.bf16.vlgmr.msrb.gmra.mxu3 %v7674_v38 }
  0x5e   :  { %v5808_v28 = vld [vmem:[#allocation5 + $0x9c0] sm:$0xf]  ;;  %v7176_v31 = vld [vmem:[#allocation5 + $0x9cc] sm:$0xf0]  ;;  %v7672_v37 = vpack.c.bf16 %v97_v22, %v97_v22  ;;  %v5681_v39 = vor.u32 %v7144_v27, %v5680_v21  ;;  %3350 = vmatpush.bf16.msra.mxu3 %v6081_v30 }
  0x5f   :  { %v5936_v32 = vld [vmem:[#allocation5 + $0xac0] sm:$0xf]  ;;  %v7208_v33 = vld [vmem:[#allocation5 + $0xacc] sm:$0xf0]  ;;  %v5809_v41 = vor.u32 %v7176_v31, %v5808_v28  ;;  %3293 = vmatmul.bf16.vlgmr.msrb.gmra.mxu2 %v7670_v34 }
  0x60   :  { %v6064_v35 = vld [vmem:[#allocation5 + $0xbc0] sm:$0xf]  ;;  %v7240_v36 = vld [vmem:[#allocation5 + $0xbcc] sm:$0xf0]  ;;  %v5937_v42 = vor.u32 %v7208_v33, %v5936_v32  ;;  %3267 = vmatmul.bf16.vlgmr.msrb.gmra.mxu0 %v7672_v37 }
  0x61   :  { %v5664_v43 = vld [vmem:[#allocation5 + $0x8a0] sm:$0xf]  ;;  %v7140_v44 = vld [vmem:[#allocation5 + $0x8ac] sm:$0xf0]  ;;  %v6065_v46 = vor.u32 %v7240_v36, %v6064_v35  ;;  %3312 = vmatpush.bf16.msra.mxu0 %v5681_v39  ;;  %3325 = vmatpush.bf16.msra.mxu1 %v5809_v41 }
  0x62   :  { %v5792_v45 = vld [vmem:[#allocation5 + $0x9a0] sm:$0xf]  ;;  %v7172_v47 = vld [vmem:[#allocation5 + $0x9ac] sm:$0xf0]  ;;  %v5665_v52 = vor.u32 %v7140_v44, %v5664_v43  ;;  %3338 = vmatpush.bf16.msra.mxu2 %v5937_v42 }
  0x63   :  { %v5920_v48 = vld [vmem:[#allocation5 + $0xaa0] sm:$0xf]  ;;  %v7204_v49 = vld [vmem:[#allocation5 + $0xaac] sm:$0xf0]  ;;  %v5793_v53 = vor.u32 %v7172_v47, %v5792_v45  ;;  %3351 = vmatpush.bf16.msra.mxu3 %v6065_v46 }
  0x64   :  { %v6048_v50 = vld [vmem:[#allocation5 + $0xba0] sm:$0xf]  ;;  %v7236_v51 = vld [vmem:[#allocation5 + $0xbac] sm:$0xf0]  ;;  %v5921_v54 = vor.u32 %v7204_v49, %v5920_v48 }
  0x65   :  { %v5648_v55 = vld [vmem:[#allocation5 + $0x880] sm:$0xf]  ;;  %v7136_v56 = vld [vmem:[#allocation5 + $0x88c] sm:$0xf0]  ;;  %v6049_v58 = vor.u32 %v7236_v51, %v6048_v50  ;;  %3313 = vmatpush.bf16.msra.mxu0 %v5665_v52  ;;  %3326 = vmatpush.bf16.msra.mxu1 %v5793_v53 }
  0x66   :  { %v5776_v57 = vld [vmem:[#allocation5 + $0x980] sm:$0xf]  ;;  %v7168_v59 = vld [vmem:[#allocation5 + $0x98c] sm:$0xf0]  ;;  %v5649_v0 = vor.u32 %v7136_v56, %v5648_v55  ;;  %3339 = vmatpush.bf16.msra.mxu2 %v5921_v54 }
  0x67   :  { %v5904_v60 = vld [vmem:[#allocation5 + $0xa80] sm:$0xf]  ;;  %v7200_v61 = vld [vmem:[#allocation5 + $0xa8c] sm:$0xf0]  ;;  %v5777_v1 = vor.u32 %v7168_v59, %v5776_v57  ;;  %3352 = vmatpush.bf16.msra.mxu3 %v6049_v58 }
  0x68   :  { %v6032_v62 = vld [vmem:[#allocation5 + $0xb80] sm:$0xf]  ;;  %v7232_v63 = vld [vmem:[#allocation5 + $0xb8c] sm:$0xf0]  ;;  %v5905_v2 = vor.u32 %v7200_v61, %v5904_v60 }
  0x69   :  { %v5632_v3 = vld [vmem:[#allocation5 + $0x860] sm:$0xf]  ;;  %v7132_v4 = vld [vmem:[#allocation5 + $0x86c] sm:$0xf0]  ;;  %v6033_v6 = vor.u32 %v7232_v63, %v6032_v62  ;;  %3314 = vmatpush.bf16.msra.mxu0 %v5649_v0  ;;  %3327 = vmatpush.bf16.msra.mxu1 %v5777_v1 }
  0x6a   :  { %v5760_v5 = vld [vmem:[#allocation5 + $0x960] sm:$0xf]  ;;  %v7164_v7 = vld [vmem:[#allocation5 + $0x96c] sm:$0xf0]  ;;  %v5633_v14 = vor.u32 %v7132_v4, %v5632_v3  ;;  %3340 = vmatpush.bf16.msra.mxu2 %v5905_v2 }
  0x6b   :  { %v5888_v10 = vld [vmem:[#allocation5 + $0xa60] sm:$0xf]  ;;  %v7196_v11 = vld [vmem:[#allocation5 + $0xa6c] sm:$0xf0]  ;;  %v5761_v16 = vor.u32 %v7164_v7, %v5760_v5  ;;  %3353 = vmatpush.bf16.msra.mxu3 %v6033_v6  ;;  %v102_v7 = vld [vmem:[#allocation2 + $0x48] sm:$0xff] }
  0x6c   :  { %v6016_v12 = vld [vmem:[#allocation5 + $0xb60] sm:$0xf]  ;;  %v7228_v13 = vld [vmem:[#allocation5 + $0xb6c] sm:$0xf0]  ;;  %v5889_v17 = vor.u32 %v7196_v11, %v5888_v10  ;;  %v104_v10 = vld [vmem:[#allocation2 + $0x58] sm:$0xff] }
  0x6d   :  { %v5616_v18 = vld [vmem:[#allocation5 + $0x840] sm:$0xf]  ;;  %v7128_v19 = vld [vmem:[#allocation5 + $0x84c] sm:$0xf0]  ;;  %v6017_v21 = vor.u32 %v7228_v13, %v6016_v12  ;;  %3315 = vmatpush.bf16.msra.mxu0 %v5633_v14  ;;  %3328 = vmatpush.bf16.msra.mxu1 %v5761_v16 }
  0x6e   :  { %v5744_v20 = vld [vmem:[#allocation5 + $0x940] sm:$0xf]  ;;  %v7160_v22 = vld [vmem:[#allocation5 + $0x94c] sm:$0xf0]  ;;  %v5617_v28 = vor.u32 %v7128_v19, %v5616_v18  ;;  %3341 = vmatpush.bf16.msra.mxu2 %v5889_v17 }
  0x6f   :  { %v5872_v23 = vld [vmem:[#allocation5 + $0xa40] sm:$0xf]  ;;  %v7192_v24 = vld [vmem:[#allocation5 + $0xa4c] sm:$0xf0]  ;;  %v5745_v29 = vor.u32 %v7160_v22, %v5744_v20  ;;  %3354 = vmatpush.bf16.msra.mxu3 %v6017_v21 }
  0x70   :  { %v6000_v26 = vld [vmem:[#allocation5 + $0xb40] sm:$0xf]  ;;  %v7224_v27 = vld [vmem:[#allocation5 + $0xb4c] sm:$0xf0]  ;;  %v5873_v30 = vor.u32 %v7192_v24, %v5872_v23  ;;  %v7686_v23 = vpack.c.bf16 %v102_v7, %v102_v7 }
  0x71   :  { %v5600_v31 = vld [vmem:[#allocation5 + $0x820] sm:$0xf]  ;;  %v7124_v32 = vld [vmem:[#allocation5 + $0x82c] sm:$0xf0]  ;;  %v6001_v35 = vor.u32 %v7224_v27, %v6000_v26  ;;  %3316 = vmatpush.bf16.msra.mxu0 %v5617_v28  ;;  %3329 = vmatpush.bf16.msra.mxu1 %v5745_v29  ;;  %v7688_v27 = vpack.c.bf16 %v104_v10, %v104_v10 }
  0x72   :  { %v5728_v33 = vld [vmem:[#allocation5 + $0x920] sm:$0xf]  ;;  %v7156_v36 = vld [vmem:[#allocation5 + $0x92c] sm:$0xf0]  ;;  %v5601_v44 = vor.u32 %v7124_v32, %v5600_v31  ;;  %3342 = vmatpush.bf16.msra.mxu2 %v5873_v30 }
  0x73   :  { %v5856_v39 = vld [vmem:[#allocation5 + $0xa20] sm:$0xf]  ;;  %v7188_v41 = vld [vmem:[#allocation5 + $0xa2c] sm:$0xf0]  ;;  %v5729_v47 = vor.u32 %v7156_v36, %v5728_v33  ;;  %3355 = vmatpush.bf16.msra.mxu3 %v6001_v35 }
  0x74   :  { %v5984_v42 = vld [vmem:[#allocation5 + $0xb20] sm:$0xf]  ;;  %v7220_v43 = vld [vmem:[#allocation5 + $0xb2c] sm:$0xf0]  ;;  %v5857_v48 = vor.u32 %v7188_v41, %v5856_v39 }
  0x75   :  { %v5584_v45 = vld [vmem:[#allocation5 + $0x800] sm:$0xf]  ;;  %v7120_v46 = vld [vmem:[#allocation5 + $0x80c] sm:$0xf0]  ;;  %v5985_v52 = vor.u32 %v7220_v43, %v5984_v42  ;;  %3317 = vmatpush.bf16.msra.mxu0 %v5601_v44  ;;  %3330 = vmatpush.bf16.msra.mxu1 %v5729_v47 }
  0x76   :  { %v5712_v49 = vld [vmem:[#allocation5 + $0x900] sm:$0xf]  ;;  %v7152_v50 = vld [vmem:[#allocation5 + $0x90c] sm:$0xf0]  ;;  %v5585_v59 = vor.u32 %v7120_v46, %v5584_v45  ;;  %3343 = vmatpush.bf16.msra.mxu2 %v5857_v48 }
  0x77   :  { %v5840_v51 = vld [vmem:[#allocation5 + $0xa00] sm:$0xf]  ;;  %v7184_v53 = vld [vmem:[#allocation5 + $0xa0c] sm:$0xf0]  ;;  %v5713_v63 = vor.u32 %v7152_v50, %v5712_v49  ;;  %3356 = vmatpush.bf16.msra.mxu3 %v5985_v52 }
  0x78   :  { %v5968_v54 = vld [vmem:[#allocation5 + $0xb00] sm:$0xf]  ;;  %v7216_v55 = vld [vmem:[#allocation5 + $0xb0c] sm:$0xf0]  ;;  %v5841_v0 = vor.u32 %v7184_v53, %v5840_v51 }
  0x79   :  { %v6208_v56 = vld [vmem:[#allocation5 + $0xce0] sm:$0xf]  ;;  %v7276_v57 = vld [vmem:[#allocation5 + $0xcec] sm:$0xf0]  ;;  %v5969_v4 = vor.u32 %v7216_v55, %v5968_v54  ;;  %3318 = vmatpush.bf16.msra.mxu0 %v5585_v59  ;;  %3331 = vmatpush.bf16.msra.mxu1 %v5713_v63 }
  0x7a   :  { %v6336_v58 = vld [vmem:[#allocation5 + $0xde0] sm:$0xf]  ;;  %v7308_v60 = vld [vmem:[#allocation5 + $0xdec] sm:$0xf0]  ;;  %v6209_v5 = vor.u32 %v7276_v57, %v6208_v56  ;;  %3344 = vmatpush.bf16.msra.mxu2 %v5841_v0 }
  0x7b   :  { %v6464_v61 = vld [vmem:[#allocation5 + $0xee0] sm:$0xf]  ;;  %v7340_v62 = vld [vmem:[#allocation5 + $0xeec] sm:$0xf0]  ;;  %v6337_v11 = vor.u32 %v7308_v60, %v6336_v58  ;;  %3357 = vmatpush.bf16.msra.mxu3 %v5969_v4 }
  0x7c   :  { %v6592_v1 = vld [vmem:[#allocation5 + $0xfe0] sm:$0xf]  ;;  %v7372_v2 = vld [vmem:[#allocation5 + $0xfec] sm:$0xf0]  ;;  %v6465_v12 = vor.u32 %v7340_v62, %v6464_v61  ;;  %3332 = vmatmul.bf16.vlgmr.msra.gmra.mxu1 %v7686_v23 }
  0x7d   :  { %v101_v3 = vld [vmem:[#allocation2 + $0x40] sm:$0xff]  ;;  %v103_v6 = vld [vmem:[#allocation2 + $0x50] sm:$0xff]  ;;  %v6593_v17 = vor.u32 %v7372_v2, %v6592_v1  ;;  %3363 = vmatpush.bf16.msrb.mxu0 %v6209_v5  ;;  %3376 = vmatpush.bf16.msrb.mxu1 %v6337_v11 }
  0x7e   :  { %v6192_v13 = vld [vmem:[#allocation5 + $0xcc0] sm:$0xf]  ;;  %v7272_v14 = vld [vmem:[#allocation5 + $0xccc] sm:$0xf0]  ;;  %v7682_v18 = vpack.c.bf16 %v101_v3, %v101_v3  ;;  %v7684_v22 = vpack.c.bf16 %v103_v6, %v103_v6  ;;  %3389 = vmatpush.bf16.msrb.mxu2 %v6465_v12  ;;  %3358 = vmatmul.bf16.vlgmr.msra.gmra.mxu3 %v7688_v27 }
  0x7f   :  { %v6320_v16 = vld [vmem:[#allocation5 + $0xdc0] sm:$0xf]  ;;  %v7304_v19 = vld [vmem:[#allocation5 + $0xdcc] sm:$0xf0]  ;;  %v6193_v28 = vor.u32 %v7272_v14, %v6192_v13  ;;  %3402 = vmatpush.bf16.msrb.mxu3 %v6593_v17 }
  0x80   :  { %v6448_v20 = vld [vmem:[#allocation5 + $0xec0] sm:$0xf]  ;;  %v7336_v21 = vld [vmem:[#allocation5 + $0xecc] sm:$0xf0]  ;;  %v6321_v29 = vor.u32 %v7304_v19, %v6320_v16  ;;  %3319 = vmatmul.bf16.vlgmr.msra.gmra.mxu0 %v7682_v18  ;;  %3345 = vmatmul.bf16.vlgmr.msra.gmra.mxu2 %v7684_v22 }
  0x81   :  { %v6576_v24 = vld [vmem:[#allocation5 + $0xfc0] sm:$0xf]  ;;  %v7368_v26 = vld [vmem:[#allocation5 + $0xfcc] sm:$0xf0]  ;;  %v6449_v30 = vor.u32 %v7336_v21, %v6448_v20  ;;  %3364 = vmatpush.bf16.msrb.mxu0 %v6193_v28 }
  0x82   :  { %v6176_v31 = vld [vmem:[#allocation5 + $0xca0] sm:$0xf]  ;;  %v7268_v32 = vld [vmem:[#allocation5 + $0xcac] sm:$0xf0]  ;;  %v6577_v35 = vor.u32 %v7368_v26, %v6576_v24  ;;  %3377 = vmatpush.bf16.msrb.mxu1 %v6321_v29 }
  0x83   :  { %v6304_v33 = vld [vmem:[#allocation5 + $0xda0] sm:$0xf]  ;;  %v7300_v36 = vld [vmem:[#allocation5 + $0xdac] sm:$0xf0]  ;;  %v6177_v44 = vor.u32 %v7268_v32, %v6176_v31  ;;  %3390 = vmatpush.bf16.msrb.mxu2 %v6449_v30 }
  0x84   :  { %v6432_v39 = vld [vmem:[#allocation5 + $0xea0] sm:$0xf]  ;;  %v7332_v41 = vld [vmem:[#allocation5 + $0xeac] sm:$0xf0]  ;;  %v6305_v45 = vor.u32 %v7300_v36, %v6304_v33  ;;  %3403 = vmatpush.bf16.msrb.mxu3 %v6577_v35 }
  0x85   :  { %v6560_v42 = vld [vmem:[#allocation5 + $0xfa0] sm:$0xf]  ;;  %v7364_v43 = vld [vmem:[#allocation5 + $0xfac] sm:$0xf0]  ;;  %v6433_v46 = vor.u32 %v7332_v41, %v6432_v39  ;;  %3365 = vmatpush.bf16.msrb.mxu0 %v6177_v44 }
  0x86   :  { %v6160_v47 = vld [vmem:[#allocation5 + $0xc80] sm:$0xf]  ;;  %v7264_v48 = vld [vmem:[#allocation5 + $0xc8c] sm:$0xf0]  ;;  %v6561_v50 = vor.u32 %v7364_v43, %v6560_v42  ;;  %3378 = vmatpush.bf16.msrb.mxu1 %v6305_v45 }
  0x87   :  { %v6288_v49 = vld [vmem:[#allocation5 + $0xd80] sm:$0xf]  ;;  %v7296_v51 = vld [vmem:[#allocation5 + $0xd8c] sm:$0xf0]  ;;  %v6161_v56 = vor.u32 %v7264_v48, %v6160_v47  ;;  %3391 = vmatpush.bf16.msrb.mxu2 %v6433_v46 }
  0x88   :  { %v6416_v52 = vld [vmem:[#allocation5 + $0xe80] sm:$0xf]  ;;  %v7328_v53 = vld [vmem:[#allocation5 + $0xe8c] sm:$0xf0]  ;;  %v6289_v57 = vor.u32 %v7296_v51, %v6288_v49  ;;  %3404 = vmatpush.bf16.msrb.mxu3 %v6561_v50 }
  0x89   :  { %v6544_v54 = vld [vmem:[#allocation5 + $0xf80] sm:$0xf]  ;;  %v7360_v55 = vld [vmem:[#allocation5 + $0xf8c] sm:$0xf0]  ;;  %v6417_v58 = vor.u32 %v7328_v53, %v6416_v52  ;;  %3366 = vmatpush.bf16.msrb.mxu0 %v6161_v56  ;;  %v6890_v52 = vld [vmem:[#allocation5 + $0xe4] sm:$0xf] }
  0x8a   :  { %v6144_v59 = vld [vmem:[#allocation5 + $0xc60] sm:$0xf]  ;;  %v7260_v60 = vld [vmem:[#allocation5 + $0xc6c] sm:$0xf0]  ;;  %v6545_v62 = vor.u32 %v7360_v55, %v6544_v54  ;;  %3379 = vmatpush.bf16.msrb.mxu1 %v6289_v57  ;;  %v4674_v53 = vld [vmem:[#allocation5 + $0xf0] sm:$0xf0] }
  0x8b   :  { %v6272_v61 = vld [vmem:[#allocation5 + $0xd60] sm:$0xf]  ;;  %v7292_v63 = vld [vmem:[#allocation5 + $0xd6c] sm:$0xf0]  ;;  %v6145_v4 = vor.u32 %v7260_v60, %v6144_v59  ;;  %3392 = vmatpush.bf16.msrb.mxu2 %v6417_v58  ;;  %v6922_v54 = vld [vmem:[#allocation5 + $0x1e4] sm:$0xf] }
  0x8c   :  { %v6400_v0 = vld [vmem:[#allocation5 + $0xe60] sm:$0xf]  ;;  %v7324_v1 = vld [vmem:[#allocation5 + $0xe6c] sm:$0xf0]  ;;  %v6273_v5 = vor.u32 %v7292_v63, %v6272_v61  ;;  %3405 = vmatpush.bf16.msrb.mxu3 %v6545_v62  ;;  %v4802_v56 = vld [vmem:[#allocation5 + $0x1f0] sm:$0xf0] }
  0x8d   :  { %v6528_v2 = vld [vmem:[#allocation5 + $0xf60] sm:$0xf]  ;;  %v7356_v3 = vld [vmem:[#allocation5 + $0xf6c] sm:$0xf0]  ;;  %v6401_v6 = vor.u32 %v7324_v1, %v6400_v0  ;;  %3367 = vmatpush.bf16.msrb.mxu0 %v6145_v4  ;;  %v6954_v57 = vld [vmem:[#allocation5 + $0x2e4] sm:$0xf]  ;;  %v4677_v1 = vor.u32 %v6890_v52, %v4674_v53 }
  0x8e   :  { %v6128_v7 = vld [vmem:[#allocation5 + $0xc40] sm:$0xf]  ;;  %v7256_v10 = vld [vmem:[#allocation5 + $0xc4c] sm:$0xf0]  ;;  %v6529_v12 = vor.u32 %v7356_v3, %v6528_v2  ;;  %3380 = vmatpush.bf16.msrb.mxu1 %v6273_v5  ;;  %v4930_v58 = vld [vmem:[#allocation5 + $0x2f0] sm:$0xf0]  ;;  %v4805_v5 = vor.u32 %v6922_v54, %v4802_v56 }
  0x8f   :  { %v6256_v11 = vld [vmem:[#allocation5 + $0xd40] sm:$0xf]  ;;  %v7288_v13 = vld [vmem:[#allocation5 + $0xd4c] sm:$0xf0]  ;;  %v6129_v20 = vor.u32 %v7256_v10, %v6128_v7  ;;  %3393 = vmatpush.bf16.msrb.mxu2 %v6401_v6  ;;  %v6986_v61 = vld [vmem:[#allocation5 + $0x3e4] sm:$0xf]  ;;  %v4933_v6 = vor.u32 %v6954_v57, %v4930_v58 }
  0x90   :  { %v6384_v14 = vld [vmem:[#allocation5 + $0xe40] sm:$0xf]  ;;  %v7320_v16 = vld [vmem:[#allocation5 + $0xe4c] sm:$0xf0]  ;;  %v6257_v21 = vor.u32 %v7288_v13, %v6256_v11  ;;  %3406 = vmatpush.bf16.msrb.mxu3 %v6529_v12  ;;  %v5058_v62 = vld [vmem:[#allocation5 + $0x3f0] sm:$0xf0] }
  0x91   :  { %v6512_v17 = vld [vmem:[#allocation5 + $0xf40] sm:$0xf]  ;;  %v7352_v19 = vld [vmem:[#allocation5 + $0xf4c] sm:$0xf0]  ;;  %v6385_v24 = vor.u32 %v7320_v16, %v6384_v14  ;;  %3368 = vmatpush.bf16.msrb.mxu0 %v6129_v20  ;;  %v106_v3 = vld [vmem:[#allocation2 + $0x68] sm:$0xff]  ;;  %v5061_v12 = vor.u32 %v6986_v61, %v5058_v62 }
  0x92   :  { %v6112_v26 = vld [vmem:[#allocation5 + $0xc20] sm:$0xf]  ;;  %v7252_v28 = vld [vmem:[#allocation5 + $0xc2c] sm:$0xf0]  ;;  %v6513_v30 = vor.u32 %v7352_v19, %v6512_v17  ;;  %3381 = vmatpush.bf16.msrb.mxu1 %v6257_v21  ;;  %v108_v4 = vld [vmem:[#allocation2 + $0x78] sm:$0xff]  ;;  %v7698_v20 = vpack.c.bf16 %v106_v3, %v106_v3 }
  0x93   :  { %v6240_v29 = vld [vmem:[#allocation5 + $0xd20] sm:$0xf]  ;;  %v7284_v31 = vld [vmem:[#allocation5 + $0xd2c] sm:$0xf0]  ;;  %v6113_v39 = vor.u32 %v7252_v28, %v6112_v26  ;;  %3394 = vmatpush.bf16.msrb.mxu2 %v6385_v24  ;;  %v6886_v7 = vld [vmem:[#allocation5 + $0xc4] sm:$0xf]  ;;  %v7700_v26 = vpack.c.bf16 %v108_v4, %v108_v4 }
  0x94   :  { %v6368_v32 = vld [vmem:[#allocation5 + $0xe20] sm:$0xf]  ;;  %v7316_v33 = vld [vmem:[#allocation5 + $0xe2c] sm:$0xf0]  ;;  %v6241_v43 = vor.u32 %v7284_v31, %v6240_v29  ;;  %3407 = vmatpush.bf16.msrb.mxu3 %v6513_v30  ;;  %v4658_v10 = vld [vmem:[#allocation5 + $0xd0] sm:$0xf0] }
  0x95   :  { %v6496_v35 = vld [vmem:[#allocation5 + $0xf20] sm:$0xf]  ;;  %v7348_v36 = vld [vmem:[#allocation5 + $0xf2c] sm:$0xf0]  ;;  %v6369_v44 = vor.u32 %v7316_v33, %v6368_v32  ;;  %3369 = vmatpush.bf16.msrb.mxu0 %v6113_v39  ;;  %v6918_v11 = vld [vmem:[#allocation5 + $0x1c4] sm:$0xf]  ;;  %v4661_v28 = vor.u32 %v6886_v7, %v4658_v10 }
  0x96   :  { %v6096_v41 = vld [vmem:[#allocation5 + $0xc00] sm:$0xf]  ;;  %v7248_v42 = vld [vmem:[#allocation5 + $0xc0c] sm:$0xf0]  ;;  %v6497_v48 = vor.u32 %v7348_v36, %v6496_v35  ;;  %3382 = vmatpush.bf16.msrb.mxu1 %v6241_v43  ;;  %v4786_v14 = vld [vmem:[#allocation5 + $0x1d0] sm:$0xf0] }
  0x97   :  { %v6224_v45 = vld [vmem:[#allocation5 + $0xd00] sm:$0xf]  ;;  %v7280_v46 = vld [vmem:[#allocation5 + $0xd0c] sm:$0xf0]  ;;  %v6097_v55 = vor.u32 %v7248_v42, %v6096_v41  ;;  %3395 = vmatpush.bf16.msrb.mxu2 %v6369_v44  ;;  %v6950_v16 = vld [vmem:[#allocation5 + $0x2c4] sm:$0xf]  ;;  %v4789_v29 = vor.u32 %v6918_v11, %v4786_v14 }
  0x98   :  { %v6352_v47 = vld [vmem:[#allocation5 + $0xe00] sm:$0xf]  ;;  %v7312_v49 = vld [vmem:[#allocation5 + $0xe0c] sm:$0xf0]  ;;  %v6225_v59 = vor.u32 %v7280_v46, %v6224_v45  ;;  %3408 = vmatpush.bf16.msrb.mxu3 %v6497_v48  ;;  %v4914_v17 = vld [vmem:[#allocation5 + $0x2d0] sm:$0xf0] }
  0x99   :  { %v6480_v50 = vld [vmem:[#allocation5 + $0xf00] sm:$0xf]  ;;  %v7344_v51 = vld [vmem:[#allocation5 + $0xf0c] sm:$0xf0]  ;;  %v6353_v60 = vor.u32 %v7312_v49, %v6352_v47  ;;  %3370 = vmatpush.bf16.msrb.mxu0 %v6097_v55  ;;  %v6982_v21 = vld [vmem:[#allocation5 + $0x3c4] sm:$0xf]  ;;  %v4917_v30 = vor.u32 %v6950_v16, %v4914_v17 }
  0x9a   :  { %v105_v63 = vld [vmem:[#allocation2 + $0x60] sm:$0xff]  ;;  %v6481_v0 = vor.u32 %v7344_v51, %v6480_v50  ;;  %v107_v2 = vld [vmem:[#allocation2 + $0x70] sm:$0xff]  ;;  %3383 = vmatpush.bf16.msrb.mxu1 %v6225_v59 }
  0x9b   :  { %v7694_v13 = vpack.c.bf16 %v105_v63, %v105_v63  ;;  %3396 = vmatpush.bf16.msrb.mxu2 %v6353_v60  ;;  %v7696_v19 = vpack.c.bf16 %v107_v2, %v107_v2  ;;  %v5042_v24 = vld [vmem:[#allocation5 + $0x3d0] sm:$0xf0]  ;;  %v6882_v31 = vld [vmem:[#allocation5 + $0xa4] sm:$0xf] }
  0x9c   :  { %3409 = vmatpush.bf16.msrb.mxu3 %v6481_v0  ;;  %v4642_v32 = vld [vmem:[#allocation5 + $0xb0] sm:$0xf0]  ;;  %v6914_v33 = vld [vmem:[#allocation5 + $0x1a4] sm:$0xf]  ;;  %v5045_v35 = vor.u32 %v6982_v21, %v5042_v24 }
  0x9d   :  { %3415 = vmatpush.bf16.msra.mxu0 %v4677_v1  ;;  %v4770_v36 = vld [vmem:[#allocation5 + $0x1b0] sm:$0xf0]  ;;  %v6946_v39 = vld [vmem:[#allocation5 + $0x2a4] sm:$0xf]  ;;  %3384 = vmatmul.bf16.vlgmr.msrb.gmra.mxu1 %v7698_v20  ;;  %v4645_v44 = vor.u32 %v6882_v31, %v4642_v32 }
  0x9e   :  { %3428 = vmatpush.bf16.msra.mxu1 %v4805_v5  ;;  %3371 = vmatmul.bf16.vlgmr.msrb.gmra.mxu0 %v7694_v13  ;;  %v4898_v41 = vld [vmem:[#allocation5 + $0x2b0] sm:$0xf0]  ;;  %v6978_v42 = vld [vmem:[#allocation5 + $0x3a4] sm:$0xf]  ;;  %v4773_v45 = vor.u32 %v6914_v33, %v4770_v36 }
  0x9f   :  { %3441 = vmatpush.bf16.msra.mxu2 %v4933_v6  ;;  %v5026_v43 = vld [vmem:[#allocation5 + $0x3b0] sm:$0xf0]  ;;  %3410 = vmatmul.bf16.vlgmr.msrb.gmra.mxu3 %v7700_v26  ;;  %v4901_v46 = vor.u32 %v6946_v39, %v4898_v41  ;;  %v6878_v47 = vld [vmem:[#allocation5 + $0x84] sm:$0xf] }
  0xa0   :  { %3454 = vmatpush.bf16.msra.mxu3 %v5061_v12  ;;  %3397 = vmatmul.bf16.vlgmr.msrb.gmra.mxu2 %v7696_v19  ;;  %v4626_v48 = vld [vmem:[#allocation5 + $0x90] sm:$0xf0]  ;;  %v6910_v49 = vld [vmem:[#allocation5 + $0x184] sm:$0xf]  ;;  %v5029_v50 = vor.u32 %v6978_v42, %v5026_v43 }
  0xa1   :  { %3416 = vmatpush.bf16.msra.mxu0 %v4661_v28  ;;  %v4754_v51 = vld [vmem:[#allocation5 + $0x190] sm:$0xf0]  ;;  %v6942_v52 = vld [vmem:[#allocation5 + $0x284] sm:$0xf]  ;;  %v4629_v56 = vor.u32 %v6878_v47, %v4626_v48 }
  0xa2   :  { %3429 = vmatpush.bf16.msra.mxu1 %v4789_v29  ;;  %v4882_v53 = vld [vmem:[#allocation5 + $0x290] sm:$0xf0]  ;;  %v6974_v54 = vld [vmem:[#allocation5 + $0x384] sm:$0xf]  ;;  %v4757_v57 = vor.u32 %v6910_v49, %v4754_v51 }
  0xa3   :  { %3442 = vmatpush.bf16.msra.mxu2 %v4917_v30  ;;  %v5010_v55 = vld [vmem:[#allocation5 + $0x390] sm:$0xf0]  ;;  %v4885_v58 = vor.u32 %v6942_v52, %v4882_v53  ;;  %v6874_v59 = vld [vmem:[#allocation5 + $0x64] sm:$0xf] }
  0xa4   :  { %3455 = vmatpush.bf16.msra.mxu3 %v5045_v35  ;;  %v4610_v60 = vld [vmem:[#allocation5 + $0x70] sm:$0xf0]  ;;  %v6906_v61 = vld [vmem:[#allocation5 + $0x164] sm:$0xf]  ;;  %v5013_v62 = vor.u32 %v6974_v54, %v5010_v55 }
  0xa5   :  { %3417 = vmatpush.bf16.msra.mxu0 %v4645_v44  ;;  %v4738_v63 = vld [vmem:[#allocation5 + $0x170] sm:$0xf0]  ;;  %v6938_v0 = vld [vmem:[#allocation5 + $0x264] sm:$0xf]  ;;  %v4613_v4 = vor.u32 %v6874_v59, %v4610_v60 }
  0xa6   :  { %3430 = vmatpush.bf16.msra.mxu1 %v4773_v45  ;;  %v4866_v1 = vld [vmem:[#allocation5 + $0x270] sm:$0xf0]  ;;  %v6970_v2 = vld [vmem:[#allocation5 + $0x364] sm:$0xf]  ;;  %v4741_v5 = vor.u32 %v6906_v61, %v4738_v63 }
  0xa7   :  { %3443 = vmatpush.bf16.msra.mxu2 %v4901_v46  ;;  %v4994_v3 = vld [vmem:[#allocation5 + $0x370] sm:$0xf0]  ;;  %v4869_v6 = vor.u32 %v6938_v0, %v4866_v1  ;;  %v6870_v7 = vld [vmem:[#allocation5 + $0x44] sm:$0xf] }
  0xa8   :  { %3456 = vmatpush.bf16.msra.mxu3 %v5029_v50  ;;  %v4594_v10 = vld [vmem:[#allocation5 + $0x50] sm:$0xf0]  ;;  %v6902_v11 = vld [vmem:[#allocation5 + $0x144] sm:$0xf]  ;;  %v4997_v12 = vor.u32 %v6970_v2, %v4994_v3 }
  0xa9   :  { %3418 = vmatpush.bf16.msra.mxu0 %v4629_v56  ;;  %v4722_v14 = vld [vmem:[#allocation5 + $0x150] sm:$0xf0]  ;;  %v6934_v16 = vld [vmem:[#allocation5 + $0x244] sm:$0xf]  ;;  %v4597_v28 = vor.u32 %v6870_v7, %v4594_v10 }
  0xaa   :  { %3431 = vmatpush.bf16.msra.mxu1 %v4757_v57  ;;  %v4850_v17 = vld [vmem:[#allocation5 + $0x250] sm:$0xf0]  ;;  %v6966_v21 = vld [vmem:[#allocation5 + $0x344] sm:$0xf]  ;;  %v4725_v29 = vor.u32 %v6902_v11, %v4722_v14 }
  0xab   :  { %3444 = vmatpush.bf16.msra.mxu2 %v4885_v58  ;;  %v4978_v24 = vld [vmem:[#allocation5 + $0x350] sm:$0xf0]  ;;  %v4853_v30 = vor.u32 %v6934_v16, %v4850_v17  ;;  %v6866_v31 = vld [vmem:[#allocation5 + $0x24] sm:$0xf] }
  0xac   :  { %3457 = vmatpush.bf16.msra.mxu3 %v5013_v62  ;;  %v4578_v32 = vld [vmem:[#allocation5 + $0x30] sm:$0xf0]  ;;  %v6898_v33 = vld [vmem:[#allocation5 + $0x124] sm:$0xf]  ;;  %v4981_v35 = vor.u32 %v6966_v21, %v4978_v24 }
  0xad   :  { %3419 = vmatpush.bf16.msra.mxu0 %v4613_v4  ;;  %v4706_v36 = vld [vmem:[#allocation5 + $0x130] sm:$0xf0]  ;;  %v6930_v39 = vld [vmem:[#allocation5 + $0x224] sm:$0xf]  ;;  %v4581_v44 = vor.u32 %v6866_v31, %v4578_v32 }
  0xae   :  { %3432 = vmatpush.bf16.msra.mxu1 %v4741_v5  ;;  %v4834_v41 = vld [vmem:[#allocation5 + $0x230] sm:$0xf0]  ;;  %v6962_v42 = vld [vmem:[#allocation5 + $0x324] sm:$0xf]  ;;  %v4709_v47 = vor.u32 %v6898_v33, %v4706_v36 }
  0xaf   :  { %3445 = vmatpush.bf16.msra.mxu2 %v4869_v6  ;;  %v4962_v43 = vld [vmem:[#allocation5 + $0x330] sm:$0xf0]  ;;  %v6862_v45 = vld [vmem:[#allocation5 + $0x4] sm:$0xf]  ;;  %v4837_v48 = vor.u32 %v6930_v39, %v4834_v41 }
  0xb0   :  { %3458 = vmatpush.bf16.msra.mxu3 %v4997_v12  ;;  %v4562_v46 = vld [vmem:[#allocation5 + $0x10] sm:$0xf0]  ;;  %v6894_v49 = vld [vmem:[#allocation5 + $0x104] sm:$0xf]  ;;  %v4965_v52 = vor.u32 %v6962_v42, %v4962_v43 }
  0xb1   :  { %3420 = vmatpush.bf16.msra.mxu0 %v4597_v28  ;;  %v4690_v50 = vld [vmem:[#allocation5 + $0x110] sm:$0xf0]  ;;  %v6926_v51 = vld [vmem:[#allocation5 + $0x204] sm:$0xf]  ;;  %v4565_v59 = vor.u32 %v6862_v45, %v4562_v46 }
  0xb2   :  { %3433 = vmatpush.bf16.msra.mxu1 %v4725_v29  ;;  %v4818_v53 = vld [vmem:[#allocation5 + $0x210] sm:$0xf0]  ;;  %v6958_v54 = vld [vmem:[#allocation5 + $0x304] sm:$0xf]  ;;  %v4693_v63 = vor.u32 %v6894_v49, %v4690_v50 }
  0xb3   :  { %3446 = vmatpush.bf16.msra.mxu2 %v4853_v30  ;;  %v4946_v55 = vld [vmem:[#allocation5 + $0x310] sm:$0xf0]  ;;  %v7018_v56 = vld [vmem:[#allocation5 + $0x4e4] sm:$0xf]  ;;  %v4821_v0 = vor.u32 %v6926_v51, %v4818_v53 }
  0xb4   :  { %3459 = vmatpush.bf16.msra.mxu3 %v4981_v35  ;;  %v5186_v57 = vld [vmem:[#allocation5 + $0x4f0] sm:$0xf0]  ;;  %v7050_v58 = vld [vmem:[#allocation5 + $0x5e4] sm:$0xf]  ;;  %v4949_v3 = vor.u32 %v6958_v54, %v4946_v55  ;;  %v637_v54 = vld [vmem:[#allocation7] sm:$0xf] }
  0xb5   :  { %3421 = vmatpush.bf16.msra.mxu0 %v4581_v44  ;;  %v5314_v60 = vld [vmem:[#allocation5 + $0x5f0] sm:$0xf0]  ;;  %v7082_v61 = vld [vmem:[#allocation5 + $0x6e4] sm:$0xf]  ;;  %v5189_v4 = vor.u32 %v7018_v56, %v5186_v57 }
  0xb6   :  { %v5442_v62 = vld [vmem:[#allocation5 + $0x6f0] sm:$0xf0]  ;;  %3434 = vmatpush.bf16.msra.mxu1 %v4709_v47  ;;  %v7114_v1 = vld [vmem:[#allocation5 + $0x7e4] sm:$0xf]  ;;  %v5317_v5 = vor.u32 %v7050_v58, %v5314_v60 }
  0xb7   :  { %3447 = vmatpush.bf16.msra.mxu2 %v4837_v48  ;;  %v5570_v2 = vld [vmem:[#allocation5 + $0x7f0] sm:$0xf0]  ;;  %v5445_v6 = vor.u32 %v7082_v61, %v5442_v62  ;;  %v7014_v7 = vld [vmem:[#allocation5 + $0x4c4] sm:$0xf] }
  0xb8   :  { %3460 = vmatpush.bf16.msra.mxu3 %v4965_v52  ;;  %v5170_v10 = vld [vmem:[#allocation5 + $0x4d0] sm:$0xf0]  ;;  %v7046_v11 = vld [vmem:[#allocation5 + $0x5c4] sm:$0xf]  ;;  %v5573_v12 = vor.u32 %v7114_v1, %v5570_v2 }
  0xb9   :  { %3422 = vmatpush.bf16.msra.mxu0 %v4565_v59  ;;  %v5298_v14 = vld [vmem:[#allocation5 + $0x5d0] sm:$0xf0]  ;;  %v7078_v16 = vld [vmem:[#allocation5 + $0x6c4] sm:$0xf]  ;;  %v5173_v28 = vor.u32 %v7014_v7, %v5170_v10 }
  0xba   :  { %v5426_v17 = vld [vmem:[#allocation5 + $0x6d0] sm:$0xf0]  ;;  %3435 = vmatpush.bf16.msra.mxu1 %v4693_v63  ;;  %v7110_v21 = vld [vmem:[#allocation5 + $0x7c4] sm:$0xf]  ;;  %v5301_v29 = vor.u32 %v7046_v11, %v5298_v14  ;;  %v639_v63 = vperm.slane %v637_v54, 0 }
  0xbb   :  { %3448 = vmatpush.bf16.msra.mxu2 %v4821_v0  ;;  %v5554_v24 = vld [vmem:[#allocation5 + $0x7d0] sm:$0xf0]  ;;  %v5429_v30 = vor.u32 %v7078_v16, %v5426_v17  ;;  %v7010_v31 = vld [vmem:[#allocation5 + $0x4a4] sm:$0xf] }
  0xbc   :  { %3461 = vmatpush.bf16.msra.mxu3 %v4949_v3  ;;  %v5154_v32 = vld [vmem:[#allocation5 + $0x4b0] sm:$0xf0]  ;;  %v7042_v33 = vld [vmem:[#allocation5 + $0x5a4] sm:$0xf]  ;;  %v5557_v35 = vor.u32 %v7110_v21, %v5554_v24  ;;  %3423 = vmatmul.bf16.vlgmr.msra.gmra.mxu0 %v7660_v9 }
  0xbd   :  { %3467 = vmatpush.bf16.msrb.mxu0 %v5189_v4  ;;  %v5282_v36 = vld [vmem:[#allocation5 + $0x5b0] sm:$0xf0]  ;;  %v7074_v39 = vld [vmem:[#allocation5 + $0x6a4] sm:$0xf]  ;;  %v5157_v44 = vor.u32 %v7010_v31, %v5154_v32  ;;  %3436 = vmatmul.bf16.vlgmr.msra.gmra.mxu1 %v7667_v25 }
  0xbe   :  { %3480 = vmatpush.bf16.msrb.mxu1 %v5317_v5  ;;  %v5410_v41 = vld [vmem:[#allocation5 + $0x6b0] sm:$0xf0]  ;;  %3449 = vmatmul.bf16.vlgmr.msra.gmra.mxu2 %v7658_v8  ;;  %v7106_v42 = vld [vmem:[#allocation5 + $0x7a4] sm:$0xf]  ;;  %v5285_v46 = vor.u32 %v7042_v33, %v5282_v36  ;;  %v3229_v33 = vpop.f32.mrf.mxu1 }
  0xbf   :  { %3493 = vmatpush.bf16.msrb.mxu2 %v5445_v6  ;;  %v5538_v43 = vld [vmem:[#allocation5 + $0x7b0] sm:$0xf0]  ;;  %3462 = vmatmul.bf16.vlgmr.msra.gmra.mxu3 %v7662_v15  ;;  %v7006_v45 = vld [vmem:[#allocation5 + $0x484] sm:$0xf]  ;;  %v5413_v47 = vor.u32 %v7074_v39, %v5410_v41 }
  0xc0   :  { %3506 = vmatpush.bf16.msrb.mxu3 %v5573_v12  ;;  %v5138_v48 = vld [vmem:[#allocation5 + $0x490] sm:$0xf0]  ;;  %v7038_v49 = vld [vmem:[#allocation5 + $0x584] sm:$0xf]  ;;  %v5541_v51 = vor.u32 %v7106_v42, %v5538_v43 }
  0xc1   :  { %3468 = vmatpush.bf16.msrb.mxu0 %v5173_v28  ;;  %v5266_v50 = vld [vmem:[#allocation5 + $0x590] sm:$0xf0]  ;;  %v7070_v52 = vld [vmem:[#allocation5 + $0x684] sm:$0xf]  ;;  %v5141_v57 = vor.u32 %v7006_v45, %v5138_v48 }
  0xc2   :  { %3481 = vmatpush.bf16.msrb.mxu1 %v5301_v29  ;;  %v5394_v53 = vld [vmem:[#allocation5 + $0x690] sm:$0xf0]  ;;  %v7102_v55 = vld [vmem:[#allocation5 + $0x784] sm:$0xf]  ;;  %v5269_v59 = vor.u32 %v7038_v49, %v5266_v50 }
  0xc3   :  { %3494 = vmatpush.bf16.msrb.mxu2 %v5429_v30  ;;  %v5522_v56 = vld [vmem:[#allocation5 + $0x790] sm:$0xf0]  ;;  %v7002_v58 = vld [vmem:[#allocation5 + $0x464] sm:$0xf]  ;;  %v5397_v60 = vor.u32 %v7070_v52, %v5394_v53  ;;  %v3255_v52 = vpop.f32.mrf.mxu3 }
  0xc4   :  { %3507 = vmatpush.bf16.msrb.mxu3 %v5557_v35  ;;  %v5122_v61 = vld [vmem:[#allocation5 + $0x470] sm:$0xf0]  ;;  %v7034_v62 = vld [vmem:[#allocation5 + $0x564] sm:$0xf]  ;;  %v5525_v0 = vor.u32 %v7102_v55, %v5522_v56  ;;  %v3216_v7 = vpop.f32.mrf.mxu0 }
  0xc5   :  { %3469 = vmatpush.bf16.msrb.mxu0 %v5157_v44  ;;  %v5250_v1 = vld [vmem:[#allocation5 + $0x570] sm:$0xf0]  ;;  %v7066_v2 = vld [vmem:[#allocation5 + $0x664] sm:$0xf]  ;;  %v5125_v6 = vor.u32 %v7002_v58, %v5122_v61  ;;  %v3217_v17 = vadd.f32 %v3216_v7, %v639_v63 }
  0xc6   :  { %3482 = vmatpush.bf16.msrb.mxu1 %v5285_v46  ;;  %v5378_v3 = vld [vmem:[#allocation5 + $0x670] sm:$0xf0]  ;;  %v7098_v4 = vld [vmem:[#allocation5 + $0x764] sm:$0xf]  ;;  %v5253_v10 = vor.u32 %v7034_v62, %v5250_v1 }
  0xc7   :  { %3495 = vmatpush.bf16.msrb.mxu2 %v5413_v47  ;;  %v5506_v5 = vld [vmem:[#allocation5 + $0x770] sm:$0xf0]  ;;  %v5381_v11 = vor.u32 %v7066_v2, %v5378_v3  ;;  %v6998_v12 = vld [vmem:[#allocation5 + $0x444] sm:$0xf]  ;;  %v3230_v43 = vadd.f32 %v3229_v33, %v3217_v17 }
  0xc8   :  { %3508 = vmatpush.bf16.msrb.mxu3 %v5541_v51  ;;  %v5106_v14 = vld [vmem:[#allocation5 + $0x450] sm:$0xf0]  ;;  %v7030_v16 = vld [vmem:[#allocation5 + $0x544] sm:$0xf]  ;;  %v5509_v21 = vor.u32 %v7098_v4, %v5506_v5 }
  0xc9   :  { %3470 = vmatpush.bf16.msrb.mxu0 %v5141_v57  ;;  %v5234_v24 = vld [vmem:[#allocation5 + $0x550] sm:$0xf0]  ;;  %v7062_v28 = vld [vmem:[#allocation5 + $0x644] sm:$0xf]  ;;  %v5109_v32 = vor.u32 %v6998_v12, %v5106_v14  ;;  %v3242_v48 = vpop.f32.mrf.mxu2  ;;  %v3231_v12 = vpop.f32.mrf.mxu1 }
  0xca   :  { %3483 = vmatpush.bf16.msrb.mxu1 %v5269_v59  ;;  %v5362_v29 = vld [vmem:[#allocation5 + $0x650] sm:$0xf0]  ;;  %v7094_v30 = vld [vmem:[#allocation5 + $0x744] sm:$0xf]  ;;  %v5237_v35 = vor.u32 %v7030_v16, %v5234_v24  ;;  %v3243_v51 = vadd.f32 %v3242_v48, %v3230_v43 }
  0xcb   :  { %3496 = vmatpush.bf16.msrb.mxu2 %v5397_v60  ;;  %v5490_v31 = vld [vmem:[#allocation5 + $0x750] sm:$0xf0]  ;;  %v5365_v36 = vor.u32 %v7062_v28, %v5362_v29  ;;  %v6994_v39 = vld [vmem:[#allocation5 + $0x424] sm:$0xf] }
  0xcc   :  { %3509 = vmatpush.bf16.msrb.mxu3 %v5525_v0  ;;  %v5090_v41 = vld [vmem:[#allocation5 + $0x430] sm:$0xf0]  ;;  %v7026_v42 = vld [vmem:[#allocation5 + $0x524] sm:$0xf]  ;;  %v5493_v44 = vor.u32 %v7094_v30, %v5490_v31  ;;  %v3218_v56 = vpop.f32.mrf.mxu0  ;;  %v7710_v62 = vadd.f32 %v3255_v52, %v3243_v51 }
  0xcd   :  { %3471 = vmatpush.bf16.msrb.mxu0 %v5125_v6  ;;  %v5218_v45 = vld [vmem:[#allocation5 + $0x530] sm:$0xf0]  ;;  %v7058_v46 = vld [vmem:[#allocation5 + $0x624] sm:$0xf]  ;;  %v5093_v53 = vor.u32 %v6994_v39, %v5090_v41 }
  0xce   :  { %3484 = vmatpush.bf16.msrb.mxu1 %v5253_v10  ;;  %v5346_v47 = vld [vmem:[#allocation5 + $0x630] sm:$0xf0]  ;;  %v7090_v49 = vld [vmem:[#allocation5 + $0x724] sm:$0xf]  ;;  %v5221_v57 = vor.u32 %v7026_v42, %v5218_v45 }
  0xcf   :  { %3497 = vmatpush.bf16.msrb.mxu2 %v5381_v11  ;;  %v5474_v50 = vld [vmem:[#allocation5 + $0x730] sm:$0xf0]  ;;  %v6990_v54 = vld [vmem:[#allocation5 + $0x404] sm:$0xf]  ;;  %v5349_v58 = vor.u32 %v7058_v46, %v5346_v47 }
  0xd0   :  { %3510 = vmatpush.bf16.msrb.mxu3 %v5509_v21  ;;  %v5074_v55 = vld [vmem:[#allocation5 + $0x410] sm:$0xf0]  ;;  %v7022_v59 = vld [vmem:[#allocation5 + $0x504] sm:$0xf]  ;;  %v5477_v63 = vor.u32 %v7090_v49, %v5474_v50 }
  0xd1   :  { %3472 = vmatpush.bf16.msrb.mxu0 %v5109_v32  ;;  %v5202_v60 = vld [vmem:[#allocation5 + $0x510] sm:$0xf0]  ;;  %v7054_v61 = vld [vmem:[#allocation5 + $0x604] sm:$0xf]  ;;  %v5077_v6 = vor.u32 %v6990_v54, %v5074_v55  ;;  %v3244_v29 = vpop.f32.mrf.mxu2 }
  0xd2   :  { %3485 = vmatpush.bf16.msrb.mxu1 %v5237_v35  ;;  %v5330_v0 = vld [vmem:[#allocation5 + $0x610] sm:$0xf0]  ;;  %v7086_v1 = vld [vmem:[#allocation5 + $0x704] sm:$0xf]  ;;  %v5205_v14 = vor.u32 %v7022_v59, %v5202_v60 }
  0xd3   :  { %3498 = vmatpush.bf16.msrb.mxu2 %v5365_v36  ;;  %v5458_v2 = vld [vmem:[#allocation5 + $0x710] sm:$0xf0]  ;;  %v7146_v3 = vld [vmem:[#allocation5 + $0x8e4] sm:$0xf]  ;;  %v5333_v16 = vor.u32 %v7054_v61, %v5330_v0  ;;  %v3257_v36 = vpop.f32.mrf.mxu3 }
  0xd4   :  { %3511 = vmatpush.bf16.msrb.mxu3 %v5493_v44  ;;  %v5698_v4 = vld [vmem:[#allocation5 + $0x8f0] sm:$0xf0]  ;;  %v7178_v5 = vld [vmem:[#allocation5 + $0x9e4] sm:$0xf]  ;;  %v5461_v24 = vor.u32 %v7086_v1, %v5458_v2 }
  0xd5   :  { %3473 = vmatpush.bf16.msrb.mxu0 %v5093_v53  ;;  %v5826_v7 = vld [vmem:[#allocation5 + $0x9f0] sm:$0xf0]  ;;  %v7210_v10 = vld [vmem:[#allocation5 + $0xae4] sm:$0xf]  ;;  %v5701_v28 = vor.u32 %v7146_v3, %v5698_v4 }
  0xd6   :  { %v5954_v11 = vld [vmem:[#allocation5 + $0xaf0] sm:$0xf0]  ;;  %3486 = vmatpush.bf16.msrb.mxu1 %v5221_v57  ;;  %v7242_v17 = vld [vmem:[#allocation5 + $0xbe4] sm:$0xf]  ;;  %v5829_v30 = vor.u32 %v7178_v5, %v5826_v7 }
  0xd7   :  { %3499 = vmatpush.bf16.msrb.mxu2 %v5349_v58  ;;  %v6082_v21 = vld [vmem:[#allocation5 + $0xbf0] sm:$0xf0]  ;;  %v5957_v31 = vor.u32 %v7210_v10, %v5954_v11  ;;  %v7142_v32 = vld [vmem:[#allocation5 + $0x8c4] sm:$0xf] }
  0xd8   :  { %3512 = vmatpush.bf16.msrb.mxu3 %v5477_v63  ;;  %v5682_v33 = vld [vmem:[#allocation5 + $0x8d0] sm:$0xf0]  ;;  %v7174_v35 = vld [vmem:[#allocation5 + $0x9c4] sm:$0xf]  ;;  %v6085_v39 = vor.u32 %v7242_v17, %v6082_v21 }
  0xd9   :  { %3474 = vmatpush.bf16.msrb.mxu0 %v5077_v6  ;;  %v5810_v41 = vld [vmem:[#allocation5 + $0x9d0] sm:$0xf0]  ;;  %v7206_v42 = vld [vmem:[#allocation5 + $0xac4] sm:$0xf]  ;;  %v5685_v46 = vor.u32 %v7142_v32, %v5682_v33 }
  0xda   :  { %v5938_v43 = vld [vmem:[#allocation5 + $0xad0] sm:$0xf0]  ;;  %3487 = vmatpush.bf16.msrb.mxu1 %v5205_v14  ;;  %v7238_v44 = vld [vmem:[#allocation5 + $0xbc4] sm:$0xf]  ;;  %v5813_v47 = vor.u32 %v7174_v35, %v5810_v41 }
  0xdb   :  { %3500 = vmatpush.bf16.msrb.mxu2 %v5333_v16  ;;  %v6066_v45 = vld [vmem:[#allocation5 + $0xbd0] sm:$0xf0]  ;;  %v5941_v48 = vor.u32 %v7206_v42, %v5938_v43  ;;  %v7138_v49 = vld [vmem:[#allocation5 + $0x8a4] sm:$0xf] }
  0xdc   :  { %3513 = vmatpush.bf16.msrb.mxu3 %v5461_v24  ;;  %v5666_v50 = vld [vmem:[#allocation5 + $0x8b0] sm:$0xf0]  ;;  %v7170_v51 = vld [vmem:[#allocation5 + $0x9a4] sm:$0xf]  ;;  %v6069_v52 = vor.u32 %v7238_v44, %v6066_v45  ;;  %3475 = vmatmul.bf16.vlgmr.msrb.gmra.mxu0 %v7672_v37  ;;  %v3281_v24 = vpop.f32.mrf.mxu1 }
  0xdd   :  { %3519 = vmatpush.bf16.msra.mxu0 %v5701_v28  ;;  %v5794_v53 = vld [vmem:[#allocation5 + $0x9b0] sm:$0xf0]  ;;  %v7202_v54 = vld [vmem:[#allocation5 + $0xaa4] sm:$0xf]  ;;  %v5669_v58 = vor.u32 %v7138_v49, %v5666_v50  ;;  %3488 = vmatmul.bf16.vlgmr.msrb.gmra.mxu1 %v7676_v40  ;;  %v3268_v10 = vpop.f32.mrf.mxu0 }
  0xde   :  { %3532 = vmatpush.bf16.msra.mxu1 %v5829_v30  ;;  %3501 = vmatmul.bf16.vlgmr.msrb.gmra.mxu2 %v7670_v34  ;;  %v5922_v55 = vld [vmem:[#allocation5 + $0xab0] sm:$0xf0]  ;;  %v7234_v56 = vld [vmem:[#allocation5 + $0xba4] sm:$0xf]  ;;  %v5797_v59 = vor.u32 %v7170_v51, %v5794_v53  ;;  %v3269_v21 = vadd.f32 %v3268_v10, %v7710_v62 }
  0xdf   :  { %3545 = vmatpush.bf16.msra.mxu2 %v5957_v31  ;;  %v6050_v57 = vld [vmem:[#allocation5 + $0xbb0] sm:$0xf0]  ;;  %3514 = vmatmul.bf16.vlgmr.msrb.gmra.mxu3 %v7674_v38  ;;  %v5925_v60 = vor.u32 %v7202_v54, %v5922_v55  ;;  %v7134_v61 = vld [vmem:[#allocation5 + $0x884] sm:$0xf] }
  0xe0   :  { %3558 = vmatpush.bf16.msra.mxu3 %v6085_v39  ;;  %v5650_v63 = vld [vmem:[#allocation5 + $0x890] sm:$0xf0]  ;;  %v7166_v0 = vld [vmem:[#allocation5 + $0x984] sm:$0xf]  ;;  %v6053_v1 = vor.u32 %v7234_v56, %v6050_v57  ;;  %v3282_v35 = vadd.f32 %v3281_v24, %v3269_v21  ;;  %v3307_v50 = vpop.f32.mrf.mxu3 }
  0xe1   :  { %3520 = vmatpush.bf16.msra.mxu0 %v5685_v46  ;;  %v5778_v2 = vld [vmem:[#allocation5 + $0x990] sm:$0xf0]  ;;  %v7198_v3 = vld [vmem:[#allocation5 + $0xa84] sm:$0xf]  ;;  %v5653_v7 = vor.u32 %v7134_v61, %v5650_v63 }
  0xe2   :  { %3533 = vmatpush.bf16.msra.mxu1 %v5813_v47  ;;  %v5906_v4 = vld [vmem:[#allocation5 + $0xa90] sm:$0xf0]  ;;  %v7230_v5 = vld [vmem:[#allocation5 + $0xb84] sm:$0xf]  ;;  %v5781_v11 = vor.u32 %v7166_v0, %v5778_v2  ;;  %v3294_v45 = vpop.f32.mrf.mxu2 }
  0xe3   :  { %3546 = vmatpush.bf16.msra.mxu2 %v5941_v48  ;;  %v6034_v6 = vld [vmem:[#allocation5 + $0xb90] sm:$0xf0]  ;;  %v5909_v12 = vor.u32 %v7198_v3, %v5906_v4  ;;  %v7130_v14 = vld [vmem:[#allocation5 + $0x864] sm:$0xf]  ;;  %v3295_v49 = vadd.f32 %v3294_v45, %v3282_v35 }
  0xe4   :  { %3559 = vmatpush.bf16.msra.mxu3 %v6069_v52  ;;  %v5634_v16 = vld [vmem:[#allocation5 + $0x870] sm:$0xf0]  ;;  %v7162_v17 = vld [vmem:[#allocation5 + $0x964] sm:$0xf]  ;;  %v6037_v28 = vor.u32 %v7230_v5, %v6034_v6  ;;  %v3283_v61 = vpop.f32.mrf.mxu1 }
  0xe5   :  { %3521 = vmatpush.bf16.msra.mxu0 %v5669_v58  ;;  %v5762_v29 = vld [vmem:[#allocation5 + $0x970] sm:$0xf0]  ;;  %v7194_v30 = vld [vmem:[#allocation5 + $0xa64] sm:$0xf]  ;;  %v5637_v36 = vor.u32 %v7130_v14, %v5634_v16  ;;  %v7717_v54 = vadd.f32 %v3307_v50, %v3295_v49  ;;  %v3270_v55 = vpop.f32.mrf.mxu0 }
  0xe6   :  { %3534 = vmatpush.bf16.msra.mxu1 %v5797_v59  ;;  %v5890_v31 = vld [vmem:[#allocation5 + $0xa70] sm:$0xf0]  ;;  %v7226_v32 = vld [vmem:[#allocation5 + $0xb64] sm:$0xf]  ;;  %v5765_v39 = vor.u32 %v7162_v17, %v5762_v29 }
  0xe7   :  { %3547 = vmatpush.bf16.msra.mxu2 %v5925_v60  ;;  %v6018_v33 = vld [vmem:[#allocation5 + $0xb70] sm:$0xf0]  ;;  %v5893_v41 = vor.u32 %v7194_v30, %v5890_v31  ;;  %v7126_v42 = vld [vmem:[#allocation5 + $0x844] sm:$0xf] }
  0xe8   :  { %3560 = vmatpush.bf16.msra.mxu3 %v6053_v1  ;;  %v5618_v43 = vld [vmem:[#allocation5 + $0x850] sm:$0xf0]  ;;  %v7158_v44 = vld [vmem:[#allocation5 + $0x944] sm:$0xf]  ;;  %v6021_v62 = vor.u32 %v7226_v32, %v6018_v33  ;;  %v3309_v30 = vpop.f32.mrf.mxu3 }
  0xe9   :  { %3522 = vmatpush.bf16.msra.mxu0 %v5653_v7  ;;  %v5746_v46 = vld [vmem:[#allocation5 + $0x950] sm:$0xf0]  ;;  %v7190_v47 = vld [vmem:[#allocation5 + $0xa44] sm:$0xf]  ;;  %v5621_v53 = vor.u32 %v7126_v42, %v5618_v43 }
  0xea   :  { %3535 = vmatpush.bf16.msra.mxu1 %v5781_v11  ;;  %v5874_v48 = vld [vmem:[#allocation5 + $0xa50] sm:$0xf0]  ;;  %v7222_v51 = vld [vmem:[#allocation5 + $0xb44] sm:$0xf]  ;;  %v5749_v56 = vor.u32 %v7158_v44, %v5746_v46  ;;  %v3296_v17 = vpop.f32.mrf.mxu2 }
  0xeb   :  { %3548 = vmatpush.bf16.msra.mxu2 %v5909_v12  ;;  %v6002_v52 = vld [vmem:[#allocation5 + $0xb50] sm:$0xf0]  ;;  %v5877_v57 = vor.u32 %v7190_v47, %v5874_v48  ;;  %v7122_v58 = vld [vmem:[#allocation5 + $0x824] sm:$0xf] }
  0xec   :  { %3561 = vmatpush.bf16.msra.mxu3 %v6037_v28  ;;  %v5602_v59 = vld [vmem:[#allocation5 + $0x830] sm:$0xf0]  ;;  %v7154_v60 = vld [vmem:[#allocation5 + $0x924] sm:$0xf]  ;;  %v6005_v63 = vor.u32 %v7222_v51, %v6002_v52 }
  0xed   :  { %3523 = vmatpush.bf16.msra.mxu0 %v5637_v36  ;;  %v5730_v0 = vld [vmem:[#allocation5 + $0x930] sm:$0xf0]  ;;  %v7186_v1 = vld [vmem:[#allocation5 + $0xa24] sm:$0xf]  ;;  %v5605_v5 = vor.u32 %v7122_v58, %v5602_v59 }
  0xee   :  { %3536 = vmatpush.bf16.msra.mxu1 %v5765_v39  ;;  %v5858_v2 = vld [vmem:[#allocation5 + $0xa30] sm:$0xf0]  ;;  %v7218_v3 = vld [vmem:[#allocation5 + $0xb24] sm:$0xf]  ;;  %v5733_v10 = vor.u32 %v7154_v60, %v5730_v0 }
  0xef   :  { %3549 = vmatpush.bf16.msra.mxu2 %v5893_v41  ;;  %v5986_v4 = vld [vmem:[#allocation5 + $0xb30] sm:$0xf0]  ;;  %v7118_v6 = vld [vmem:[#allocation5 + $0x804] sm:$0xf]  ;;  %v5861_v11 = vor.u32 %v7186_v1, %v5858_v2 }
  0xf0   :  { %3562 = vmatpush.bf16.msra.mxu3 %v6021_v62  ;;  %v5586_v7 = vld [vmem:[#allocation5 + $0x810] sm:$0xf0]  ;;  %v7150_v12 = vld [vmem:[#allocation5 + $0x904] sm:$0xf]  ;;  %v5989_v21 = vor.u32 %v7218_v3, %v5986_v4 }
  0xf1   :  { %3524 = vmatpush.bf16.msra.mxu0 %v5621_v53  ;;  %v5714_v14 = vld [vmem:[#allocation5 + $0x910] sm:$0xf0]  ;;  %v7182_v16 = vld [vmem:[#allocation5 + $0xa04] sm:$0xf]  ;;  %v5589_v35 = vor.u32 %v7118_v6, %v5586_v7 }
  0xf2   :  { %3537 = vmatpush.bf16.msra.mxu1 %v5749_v56  ;;  %v5842_v24 = vld [vmem:[#allocation5 + $0xa10] sm:$0xf0]  ;;  %v7214_v28 = vld [vmem:[#allocation5 + $0xb04] sm:$0xf]  ;;  %v5717_v42 = vor.u32 %v7150_v12, %v5714_v14 }
  0xf3   :  { %3550 = vmatpush.bf16.msra.mxu2 %v5877_v57  ;;  %v5970_v29 = vld [vmem:[#allocation5 + $0xb10] sm:$0xf0]  ;;  %v7274_v31 = vld [vmem:[#allocation5 + $0xce4] sm:$0xf]  ;;  %v5845_v43 = vor.u32 %v7182_v16, %v5842_v24 }
  0xf4   :  { %3563 = vmatpush.bf16.msra.mxu3 %v6005_v63  ;;  %v6210_v32 = vld [vmem:[#allocation5 + $0xcf0] sm:$0xf0]  ;;  %v7306_v33 = vld [vmem:[#allocation5 + $0xde4] sm:$0xf]  ;;  %v5973_v62 = vor.u32 %v7214_v28, %v5970_v29 }
  0xf5   :  { %3525 = vmatpush.bf16.msra.mxu0 %v5605_v5  ;;  %v6338_v36 = vld [vmem:[#allocation5 + $0xdf0] sm:$0xf0]  ;;  %v7338_v39 = vld [vmem:[#allocation5 + $0xee4] sm:$0xf]  ;;  %v6213_v46 = vor.u32 %v7274_v31, %v6210_v32 }
  0xf6   :  { %v6466_v41 = vld [vmem:[#allocation5 + $0xef0] sm:$0xf0]  ;;  %3538 = vmatpush.bf16.msra.mxu1 %v5733_v10  ;;  %v7370_v44 = vld [vmem:[#allocation5 + $0xfe4] sm:$0xf]  ;;  %v6341_v47 = vor.u32 %v7306_v33, %v6338_v36 }
  0xf7   :  { %3551 = vmatpush.bf16.msra.mxu2 %v5861_v11  ;;  %v6594_v45 = vld [vmem:[#allocation5 + $0xff0] sm:$0xf0]  ;;  %v6469_v48 = vor.u32 %v7338_v39, %v6466_v41  ;;  %v7270_v49 = vld [vmem:[#allocation5 + $0xcc4] sm:$0xf] }
  0xf8   :  { %3564 = vmatpush.bf16.msra.mxu3 %v5989_v21  ;;  %v6194_v50 = vld [vmem:[#allocation5 + $0xcd0] sm:$0xf0]  ;;  %v7302_v51 = vld [vmem:[#allocation5 + $0xdc4] sm:$0xf]  ;;  %v6597_v52 = vor.u32 %v7370_v44, %v6594_v45 }
  0xf9   :  { %3526 = vmatpush.bf16.msra.mxu0 %v5589_v35  ;;  %v6322_v53 = vld [vmem:[#allocation5 + $0xdd0] sm:$0xf0]  ;;  %v7334_v55 = vld [vmem:[#allocation5 + $0xec4] sm:$0xf]  ;;  %v6197_v59 = vor.u32 %v7270_v49, %v6194_v50  ;;  %v3333_v36 = vpop.f32.mrf.mxu1 }
  0xfa   :  { %v6450_v56 = vld [vmem:[#allocation5 + $0xed0] sm:$0xf0]  ;;  %3539 = vmatpush.bf16.msra.mxu1 %v5717_v42  ;;  %v7366_v57 = vld [vmem:[#allocation5 + $0xfc4] sm:$0xf]  ;;  %v6325_v60 = vor.u32 %v7302_v51, %v6322_v53 }
  0xfb   :  { %3552 = vmatpush.bf16.msra.mxu2 %v5845_v43  ;;  %v6578_v58 = vld [vmem:[#allocation5 + $0xfd0] sm:$0xf0]  ;;  %v6453_v61 = vor.u32 %v7334_v55, %v6450_v56  ;;  %v7266_v63 = vld [vmem:[#allocation5 + $0xca4] sm:$0xf] }
  0xfc   :  { %3565 = vmatpush.bf16.msra.mxu3 %v5973_v62  ;;  %v6178_v0 = vld [vmem:[#allocation5 + $0xcb0] sm:$0xf0]  ;;  %v7298_v1 = vld [vmem:[#allocation5 + $0xda4] sm:$0xf]  ;;  %3527 = vmatmul.bf16.vlgmr.msra.gmra.mxu0 %v7682_v18  ;;  %v6581_v2 = vor.u32 %v7366_v57, %v6578_v58 }
  0xfd   :  { %3571 = vmatpush.bf16.msrb.mxu0 %v6213_v46  ;;  %v6306_v3 = vld [vmem:[#allocation5 + $0xdb0] sm:$0xf0]  ;;  %v7330_v4 = vld [vmem:[#allocation5 + $0xea4] sm:$0xf]  ;;  %3540 = vmatmul.bf16.vlgmr.msra.gmra.mxu1 %v7686_v23  ;;  %v6181_v10 = vor.u32 %v7266_v63, %v6178_v0  ;;  %v3320_v30 = vpop.f32.mrf.mxu0 }
  0xfe   :  { %3584 = vmatpush.bf16.msrb.mxu1 %v6341_v47  ;;  %v6434_v5 = vld [vmem:[#allocation5 + $0xeb0] sm:$0xf0]  ;;  %3553 = vmatmul.bf16.vlgmr.msra.gmra.mxu2 %v7684_v22  ;;  %v7362_v6 = vld [vmem:[#allocation5 + $0xfa4] sm:$0xf]  ;;  %v6309_v11 = vor.u32 %v7298_v1, %v6306_v3  ;;  %v3321_v33 = vadd.f32 %v3320_v30, %v7717_v54 }
  0xff   :  { %3597 = vmatpush.bf16.msrb.mxu2 %v6469_v48  ;;  %v6562_v7 = vld [vmem:[#allocation5 + $0xfb0] sm:$0xf0]  ;;  %3566 = vmatmul.bf16.vlgmr.msra.gmra.mxu3 %v7688_v27  ;;  %v6437_v12 = vor.u32 %v7330_v4, %v6434_v5  ;;  %v7262_v14 = vld [vmem:[#allocation5 + $0xc84] sm:$0xf] }
 0x100   :  { %3610 = vmatpush.bf16.msrb.mxu3 %v6597_v52  ;;  %v6162_v16 = vld [vmem:[#allocation5 + $0xc90] sm:$0xf0]  ;;  %v7294_v17 = vld [vmem:[#allocation5 + $0xd84] sm:$0xf]  ;;  %v6565_v21 = vor.u32 %v7362_v6, %v6562_v7  ;;  %v3334_v62 = vadd.f32 %v3333_v36, %v3321_v33 }
 0x101   :  { %3572 = vmatpush.bf16.msrb.mxu0 %v6197_v59  ;;  %v6290_v24 = vld [vmem:[#allocation5 + $0xd90] sm:$0xf0]  ;;  %v7326_v28 = vld [vmem:[#allocation5 + $0xe84] sm:$0xf]  ;;  %v6165_v35 = vor.u32 %v7262_v14, %v6162_v16  ;;  %v3359_v0 = vpop.f32.mrf.mxu3  ;;  %v3335_v5 = vpop.f32.mrf.mxu1 }
 0x102   :  { %3585 = vmatpush.bf16.msrb.mxu1 %v6325_v60  ;;  %v6418_v29 = vld [vmem:[#allocation5 + $0xe90] sm:$0xf0]  ;;  %v7358_v31 = vld [vmem:[#allocation5 + $0xf84] sm:$0xf]  ;;  %v6293_v39 = vor.u32 %v7294_v17, %v6290_v24  ;;  %v6953_v5 = vld [vmem:[#allocation5 + $0x2d4] sm:$0xf0] }
 0x103   :  { %3598 = vmatpush.bf16.msrb.mxu2 %v6453_v61  ;;  %v6546_v32 = vld [vmem:[#allocation5 + $0xf90] sm:$0xf0]  ;;  %v6421_v41 = vor.u32 %v7326_v28, %v6418_v29  ;;  %v7258_v42 = vld [vmem:[#allocation5 + $0xc64] sm:$0xf]  ;;  %v3346_v58 = vpop.f32.mrf.mxu2 }
 0x104   :  { %3611 = vmatpush.bf16.msrb.mxu3 %v6581_v2  ;;  %v6146_v43 = vld [vmem:[#allocation5 + $0xc70] sm:$0xf0]  ;;  %v7290_v44 = vld [vmem:[#allocation5 + $0xd64] sm:$0xf]  ;;  %v6549_v45 = vor.u32 %v7358_v31, %v6546_v32  ;;  %v3347_v63 = vadd.f32 %v3346_v58, %v3334_v62 }
 0x105   :  { %3573 = vmatpush.bf16.msrb.mxu0 %v6181_v10  ;;  %v6274_v46 = vld [vmem:[#allocation5 + $0xd70] sm:$0xf0]  ;;  %v7322_v47 = vld [vmem:[#allocation5 + $0xe64] sm:$0xf]  ;;  %v6149_v51 = vor.u32 %v7258_v42, %v6146_v43  ;;  %v3322_v3 = vpop.f32.mrf.mxu0 }
 0x106   :  { %3586 = vmatpush.bf16.msrb.mxu1 %v6309_v11  ;;  %v6402_v48 = vld [vmem:[#allocation5 + $0xe70] sm:$0xf0]  ;;  %v7354_v49 = vld [vmem:[#allocation5 + $0xf64] sm:$0xf]  ;;  %v6277_v54 = vor.u32 %v7290_v44, %v6274_v46  ;;  %v7724_v6 = vadd.f32 %v3359_v0, %v3347_v63  ;;  %v4680_v46 = vld [vmem:[#allocation5 + $0xe8] sm:$0xf] }
 0x107   :  { %3599 = vmatpush.bf16.msrb.mxu2 %v6437_v12  ;;  %v6530_v50 = vld [vmem:[#allocation5 + $0xf70] sm:$0xf0]  ;;  %v6405_v52 = vor.u32 %v7322_v47, %v6402_v48  ;;  %v7254_v53 = vld [vmem:[#allocation5 + $0xc44] sm:$0xf]  ;;  %v6893_v47 = vld [vmem:[#allocation5 + $0xf4] sm:$0xf0] }
 0x108   :  { %3612 = vmatpush.bf16.msrb.mxu3 %v6565_v21  ;;  %v6130_v55 = vld [vmem:[#allocation5 + $0xc50] sm:$0xf0]  ;;  %v7286_v56 = vld [vmem:[#allocation5 + $0xd44] sm:$0xf]  ;;  %v6533_v57 = vor.u32 %v7354_v49, %v6530_v50  ;;  %v4808_v48 = vld [vmem:[#allocation5 + $0x1e8] sm:$0xf] }
 0x109   :  { %3574 = vmatpush.bf16.msrb.mxu0 %v6165_v35  ;;  %v6258_v59 = vld [vmem:[#allocation5 + $0xd50] sm:$0xf0]  ;;  %v7318_v60 = vld [vmem:[#allocation5 + $0xe44] sm:$0xf]  ;;  %v6133_v4 = vor.u32 %v7254_v53, %v6130_v55  ;;  %v3361_v49 = vpop.f32.mrf.mxu3  ;;  %v4664_v63 = vld [vmem:[#allocation5 + $0xc8] sm:$0xf] }
 0x10a   :  { %3587 = vmatpush.bf16.msrb.mxu1 %v6293_v39  ;;  %v6386_v61 = vld [vmem:[#allocation5 + $0xe50] sm:$0xf0]  ;;  %v7350_v1 = vld [vmem:[#allocation5 + $0xf44] sm:$0xf]  ;;  %v6261_v7 = vor.u32 %v7286_v56, %v6258_v59  ;;  %v5064_v56 = vld [vmem:[#allocation5 + $0x3e8] sm:$0xf]  ;;  %v4681_v59 = vor.u32 %v6893_v47, %v4680_v46 }
 0x10b   :  { %3600 = vmatpush.bf16.msrb.mxu2 %v6421_v41  ;;  %v6514_v2 = vld [vmem:[#allocation5 + $0xf50] sm:$0xf0]  ;;  %v6389_v10 = vor.u32 %v7318_v60, %v6386_v61  ;;  %v7250_v11 = vld [vmem:[#allocation5 + $0xc24] sm:$0xf]  ;;  %v3348_v62 = vpop.f32.mrf.mxu2  ;;  %v6889_v0 = vld [vmem:[#allocation5 + $0xd4] sm:$0xf0] }
 0x10c   :  { %3613 = vmatpush.bf16.msrb.mxu3 %v6549_v45  ;;  %v6114_v12 = vld [vmem:[#allocation5 + $0xc30] sm:$0xf0]  ;;  %v7282_v14 = vld [vmem:[#allocation5 + $0xd24] sm:$0xf]  ;;  %v6517_v16 = vor.u32 %v7350_v1, %v6514_v2  ;;  %v4792_v1 = vld [vmem:[#allocation5 + $0x1c8] sm:$0xf] }
 0x10d   :  { %3575 = vmatpush.bf16.msrb.mxu0 %v6149_v51  ;;  %v6242_v17 = vld [vmem:[#allocation5 + $0xd30] sm:$0xf0]  ;;  %v7314_v21 = vld [vmem:[#allocation5 + $0xe24] sm:$0xf]  ;;  %v6117_v30 = vor.u32 %v7250_v11, %v6114_v12  ;;  %v6925_v51 = vld [vmem:[#allocation5 + $0x1f4] sm:$0xf0]  ;;  %v4665_v11 = vor.u32 %v6889_v0, %v4664_v63 }
 0x10e   :  { %3588 = vmatpush.bf16.msrb.mxu1 %v6277_v54  ;;  %v6370_v24 = vld [vmem:[#allocation5 + $0xe30] sm:$0xf0]  ;;  %v7346_v28 = vld [vmem:[#allocation5 + $0xf24] sm:$0xf]  ;;  %v6245_v33 = vor.u32 %v7282_v14, %v6242_v17  ;;  %v4936_v54 = vld [vmem:[#allocation5 + $0x2e8] sm:$0xf]  ;;  %v4809_v60 = vor.u32 %v6925_v51, %v4808_v48 }
 0x10f   :  { %3601 = vmatpush.bf16.msrb.mxu2 %v6405_v52  ;;  %v6498_v29 = vld [vmem:[#allocation5 + $0xf30] sm:$0xf0]  ;;  %v7246_v31 = vld [vmem:[#allocation5 + $0xc04] sm:$0xf]  ;;  %v6373_v35 = vor.u32 %v7314_v21, %v6370_v24  ;;  %v6957_v52 = vld [vmem:[#allocation5 + $0x2f4] sm:$0xf0] }
 0x110   :  { %3614 = vmatpush.bf16.msrb.mxu3 %v6533_v57  ;;  %v6098_v32 = vld [vmem:[#allocation5 + $0xc10] sm:$0xf0]  ;;  %v7278_v36 = vld [vmem:[#allocation5 + $0xd04] sm:$0xf]  ;;  %v6501_v42 = vor.u32 %v7346_v28, %v6498_v29  ;;  %v6989_v57 = vld [vmem:[#allocation5 + $0x3f4] sm:$0xf0]  ;;  %v4937_v61 = vor.u32 %v6957_v52, %v4936_v54 }
 0x111   :  { %3576 = vmatpush.bf16.msrb.mxu0 %v6133_v4  ;;  %v6226_v39 = vld [vmem:[#allocation5 + $0xd10] sm:$0xf0]  ;;  %v7310_v41 = vld [vmem:[#allocation5 + $0xe04] sm:$0xf]  ;;  %v6101_v50 = vor.u32 %v7246_v31, %v6098_v32  ;;  %v5065_v2 = vor.u32 %v6989_v57, %v5064_v56  ;;  %v6921_v3 = vld [vmem:[#allocation5 + $0x1d4] sm:$0xf0] }
 0x112   :  { %3589 = vmatpush.bf16.msrb.mxu1 %v6261_v7  ;;  %v6354_v43 = vld [vmem:[#allocation5 + $0xe10] sm:$0xf0]  ;;  %v7342_v44 = vld [vmem:[#allocation5 + $0xf04] sm:$0xf]  ;;  %v6229_v53 = vor.u32 %v7278_v36, %v6226_v39  ;;  %v4920_v4 = vld [vmem:[#allocation5 + $0x2c8] sm:$0xf]  ;;  %v4793_v12 = vor.u32 %v6921_v3, %v4792_v1 }
 0x113   :  { %3602 = vmatpush.bf16.msrb.mxu2 %v6389_v10  ;;  %v6482_v45 = vld [vmem:[#allocation5 + $0xf10] sm:$0xf0]  ;;  %v6357_v55 = vor.u32 %v7310_v41, %v6354_v43  ;;  %v5048_v7 = vld [vmem:[#allocation5 + $0x3c8] sm:$0xf]  ;;  %v6985_v10 = vld [vmem:[#allocation5 + $0x3d4] sm:$0xf0]  ;;  %v4921_v14 = vor.u32 %v6953_v5, %v4920_v4 }
 0x114   :  { %3615 = vmatpush.bf16.msrb.mxu3 %v6517_v16  ;;  %v6485_v58 = vor.u32 %v7342_v44, %v6482_v45  ;;  %v4648_v16 = vld [vmem:[#allocation5 + $0xa8] sm:$0xf]  ;;  %v6885_v17 = vld [vmem:[#allocation5 + $0xb4] sm:$0xf0]  ;;  %v5049_v24 = vor.u32 %v6985_v10, %v5048_v7 }
 0x115   :  { %3577 = vmatpush.bf16.msrb.mxu0 %v6117_v30  ;;  %v4776_v21 = vld [vmem:[#allocation5 + $0x1a8] sm:$0xf]  ;;  %v6917_v28 = vld [vmem:[#allocation5 + $0x1b4] sm:$0xf0] }
 0x116   :  { %3590 = vmatpush.bf16.msrb.mxu1 %v6245_v33  ;;  %v4904_v29 = vld [vmem:[#allocation5 + $0x2a8] sm:$0xf]  ;;  %v6949_v30 = vld [vmem:[#allocation5 + $0x2b4] sm:$0xf0]  ;;  %v4649_v33 = vor.u32 %v6885_v17, %v4648_v16 }
 0x117   :  { %3603 = vmatpush.bf16.msrb.mxu2 %v6373_v35  ;;  %v5032_v31 = vld [vmem:[#allocation5 + $0x3a8] sm:$0xf]  ;;  %v6981_v32 = vld [vmem:[#allocation5 + $0x3b4] sm:$0xf0]  ;;  %v4777_v35 = vor.u32 %v6917_v28, %v4776_v21  ;;  %v4905_v36 = vor.u32 %v6949_v30, %v4904_v29 }
 0x118   :  { %3616 = vmatpush.bf16.msrb.mxu3 %v6501_v42  ;;  %v4632_v39 = vld [vmem:[#allocation5 + $0x88] sm:$0xf]  ;;  %v6881_v41 = vld [vmem:[#allocation5 + $0x94] sm:$0xf0]  ;;  %v5033_v43 = vor.u32 %v6981_v32, %v5032_v31 }
 0x119   :  { %3578 = vmatpush.bf16.msrb.mxu0 %v6101_v50  ;;  %v4760_v42 = vld [vmem:[#allocation5 + $0x188] sm:$0xf]  ;;  %v6913_v44 = vld [vmem:[#allocation5 + $0x194] sm:$0xf0]  ;;  %v4633_v50 = vor.u32 %v6881_v41, %v4632_v39 }
 0x11a   :  { %3591 = vmatpush.bf16.msrb.mxu1 %v6229_v53  ;;  %v4888_v45 = vld [vmem:[#allocation5 + $0x288] sm:$0xf]  ;;  %v6945_v62 = vld [vmem:[#allocation5 + $0x294] sm:$0xf0]  ;;  %v3385_v51 = vpop.f32.mrf.mxu1  ;;  %v4761_v54 = vor.u32 %v6913_v44, %v4760_v42 }
 0x11b   :  { %3604 = vmatpush.bf16.msrb.mxu2 %v6357_v55  ;;  %v3372_v46 = vpop.f32.mrf.mxu0  ;;  %v5016_v47 = vld [vmem:[#allocation5 + $0x388] sm:$0xf]  ;;  %v6977_v48 = vld [vmem:[#allocation5 + $0x394] sm:$0xf0]  ;;  %v4889_v52 = vor.u32 %v6945_v62, %v4888_v45 }
 0x11c   :  { %3617 = vmatpush.bf16.msrb.mxu3 %v6485_v58  ;;  %3579 = vmatmul.bf16.vlgmr.msrb.gmra.mxu0 %v7694_v13  ;;  %v3373_v49 = vadd.f32 %v3372_v46, %v7724_v6  ;;  %v4616_v53 = vld [vmem:[#allocation5 + $0x68] sm:$0xf]  ;;  %v6877_v55 = vld [vmem:[#allocation5 + $0x74] sm:$0xf0]  ;;  %v5017_v57 = vor.u32 %v6977_v48, %v5016_v47 }
 0x11d   :  { %3623 = vmatpush.bf16.msra.mxu0 %v4681_v59  ;;  %3592 = vmatmul.bf16.vlgmr.msrb.gmra.mxu1 %v7698_v20  ;;  %v4744_v56 = vld [vmem:[#allocation5 + $0x168] sm:$0xf]  ;;  %v6909_v59 = vld [vmem:[#allocation5 + $0x174] sm:$0xf0]  ;;  %v4617_v1 = vor.u32 %v6877_v55, %v4616_v53 }
 0x11e   :  { %3636 = vmatpush.bf16.msra.mxu1 %v4809_v60  ;;  %3605 = vmatmul.bf16.vlgmr.msrb.gmra.mxu2 %v7696_v19  ;;  %v3386_v58 = vadd.f32 %v3385_v51, %v3373_v49  ;;  %v4872_v60 = vld [vmem:[#allocation5 + $0x268] sm:$0xf]  ;;  %v6973_v0 = vld [vmem:[#allocation5 + $0x374] sm:$0xf0]  ;;  %v4745_v6 = vor.u32 %v6909_v59, %v4744_v56 }
 0x11f   :  { %3649 = vmatpush.bf16.msra.mxu2 %v4937_v61  ;;  %3618 = vmatmul.bf16.vlgmr.msrb.gmra.mxu3 %v7700_v26  ;;  %v6941_v61 = vld [vmem:[#allocation5 + $0x274] sm:$0xf0]  ;;  %v5000_v63 = vld [vmem:[#allocation5 + $0x368] sm:$0xf] }
 0x120   :  { %3662 = vmatpush.bf16.msra.mxu3 %v5065_v2  ;;  %v4873_v2 = vor.u32 %v6941_v61, %v4872_v60  ;;  %v4600_v3 = vld [vmem:[#allocation5 + $0x48] sm:$0xf]  ;;  %v6873_v4 = vld [vmem:[#allocation5 + $0x54] sm:$0xf0]  ;;  %v5001_v7 = vor.u32 %v6973_v0, %v5000_v63 }
 0x121   :  { %3624 = vmatpush.bf16.msra.mxu0 %v4665_v11  ;;  %v4728_v5 = vld [vmem:[#allocation5 + $0x148] sm:$0xf]  ;;  %v6905_v11 = vld [vmem:[#allocation5 + $0x154] sm:$0xf0]  ;;  %v4601_v29 = vor.u32 %v6873_v4, %v4600_v3 }
 0x122   :  { %3637 = vmatpush.bf16.msra.mxu1 %v4793_v12  ;;  %v4856_v12 = vld [vmem:[#allocation5 + $0x248] sm:$0xf]  ;;  %v3411_v17 = vpop.f32.mrf.mxu3  ;;  %v3387_v30 = vpop.f32.mrf.mxu1  ;;  %v4729_v32 = vor.u32 %v6905_v11, %v4728_v5  ;;  %v6901_v42 = vld [vmem:[#allocation5 + $0x134] sm:$0xf0] }
 0x123   :  { %3650 = vmatpush.bf16.msra.mxu2 %v4921_v14  ;;  %v3398_v10 = vpop.f32.mrf.mxu2  ;;  %v6937_v14 = vld [vmem:[#allocation5 + $0x254] sm:$0xf0]  ;;  %v4984_v21 = vld [vmem:[#allocation5 + $0x348] sm:$0xf]  ;;  %v3374_v28 = vpop.f32.mrf.mxu0 }
 0x124   :  { %3663 = vmatpush.bf16.msra.mxu3 %v5049_v24  ;;  %v3399_v16 = vadd.f32 %v3398_v10, %v3386_v58  ;;  %v6969_v24 = vld [vmem:[#allocation5 + $0x354] sm:$0xf0]  ;;  %v4712_v39 = vld [vmem:[#allocation5 + $0x128] sm:$0xf] }
 0x125   :  { %3625 = vmatpush.bf16.msra.mxu0 %v4649_v33  ;;  %v4857_v33 = vor.u32 %v6937_v14, %v4856_v12  ;;  %v4985_v41 = vor.u32 %v6969_v24, %v4984_v21  ;;  %v6933_v44 = vld [vmem:[#allocation5 + $0x234] sm:$0xf0]  ;;  %v4968_v45 = vld [vmem:[#allocation5 + $0x328] sm:$0xf]  ;;  %v4713_v49 = vor.u32 %v6901_v42, %v4712_v39 }
 0x126   :  { %3638 = vmatpush.bf16.msra.mxu1 %v4777_v35  ;;  %v7731_v31 = vadd.f32 %v3411_v17, %v3399_v16  ;;  %v4584_v35 = vld [vmem:[#allocation5 + $0x28] sm:$0xf]  ;;  %v6965_v62 = vld [vmem:[#allocation5 + $0x334] sm:$0xf0] }
 0x127   :  { %3651 = vmatpush.bf16.msra.mxu2 %v4905_v36  ;;  %v6869_v36 = vld [vmem:[#allocation5 + $0x34] sm:$0xf0]  ;;  %v4568_v47 = vld [vmem:[#allocation5 + $0x8] sm:$0xf]  ;;  %v4969_v53 = vor.u32 %v6965_v62, %v4968_v45 }
 0x128   :  { %3664 = vmatpush.bf16.msra.mxu3 %v5033_v43  ;;  %v4840_v43 = vld [vmem:[#allocation5 + $0x228] sm:$0xf]  ;;  %v4585_v46 = vor.u32 %v6869_v36, %v4584_v35  ;;  %v6865_v48 = vld [vmem:[#allocation5 + $0x14] sm:$0xf0] }
 0x129   :  { %3626 = vmatpush.bf16.msra.mxu0 %v4633_v50  ;;  %v4841_v50 = vor.u32 %v6933_v44, %v4840_v43  ;;  %v4696_v51 = vld [vmem:[#allocation5 + $0x108] sm:$0xf]  ;;  %v6929_v55 = vld [vmem:[#allocation5 + $0x214] sm:$0xf0]  ;;  %v4569_v0 = vor.u32 %v6865_v48, %v4568_v47 }
 0x12a   :  { %3639 = vmatpush.bf16.msra.mxu1 %v4761_v54  ;;  %v6897_v54 = vld [vmem:[#allocation5 + $0x114] sm:$0xf0]  ;;  %v4952_v56 = vld [vmem:[#allocation5 + $0x308] sm:$0xf]  ;;  %v3413_v63 = vpop.f32.mrf.mxu3 }
 0x12b   :  { %3652 = vmatpush.bf16.msra.mxu2 %v4889_v52  ;;  %v4824_v52 = vld [vmem:[#allocation5 + $0x208] sm:$0xf]  ;;  %v3400_v58 = vpop.f32.mrf.mxu2  ;;  %v7021_v60 = vld [vmem:[#allocation5 + $0x4f4] sm:$0xf0]  ;;  %v4697_v3 = vor.u32 %v6897_v54, %v4696_v51 }
 0x12c   :  { %3665 = vmatpush.bf16.msra.mxu3 %v5017_v57  ;;  %v6961_v57 = vld [vmem:[#allocation5 + $0x314] sm:$0xf0]  ;;  %v5192_v59 = vld [vmem:[#allocation5 + $0x4e8] sm:$0xf]  ;;  %v4825_v4 = vor.u32 %v6929_v55, %v4824_v52  ;;  %v7448_v55 = vld [vmem:[#allocation7] sm:$0xf] }
 0x12d   :  { %3627 = vmatpush.bf16.msra.mxu0 %v4617_v1  ;;  %v5320_v61 = vld [vmem:[#allocation5 + $0x5e8] sm:$0xf]  ;;  %v7053_v1 = vld [vmem:[#allocation5 + $0x5f4] sm:$0xf0]  ;;  %v4953_v10 = vor.u32 %v6961_v57, %v4952_v56  ;;  %v5193_v11 = vor.u32 %v7021_v60, %v5192_v59  ;;  %v640_v56 = vperm.slane %v7448_v55, 1 }
 0x12e   :  { %3640 = vmatpush.bf16.msra.mxu1 %v4745_v6  ;;  %v5448_v6 = vld [vmem:[#allocation5 + $0x6e8] sm:$0xf]  ;;  %v5321_v12 = vor.u32 %v7053_v1, %v5320_v61  ;;  %v7017_v17 = vld [vmem:[#allocation5 + $0x4d4] sm:$0xf0] }
 0x12f   :  { %3653 = vmatpush.bf16.msra.mxu2 %v4873_v2  ;;  %v7085_v2 = vld [vmem:[#allocation5 + $0x6f4] sm:$0xf0]  ;;  %v5576_v5 = vld [vmem:[#allocation5 + $0x7e8] sm:$0xf] }
 0x130   :  { %3666 = vmatpush.bf16.msra.mxu3 %v5001_v7  ;;  %v7117_v7 = vld [vmem:[#allocation5 + $0x7f4] sm:$0xf0]  ;;  %v5449_v14 = vor.u32 %v7085_v2, %v5448_v6  ;;  %v5176_v16 = vld [vmem:[#allocation5 + $0x4c8] sm:$0xf] }
 0x131   :  { %3628 = vmatpush.bf16.msra.mxu0 %v4601_v29  ;;  %v5304_v21 = vld [vmem:[#allocation5 + $0x5c8] sm:$0xf]  ;;  %v5577_v24 = vor.u32 %v7117_v7, %v5576_v5  ;;  %v7049_v28 = vld [vmem:[#allocation5 + $0x5d4] sm:$0xf0]  ;;  %v5177_v35 = vor.u32 %v7017_v17, %v5176_v16 }
 0x132   :  { %3641 = vmatpush.bf16.msra.mxu1 %v4729_v32  ;;  %v5432_v29 = vld [vmem:[#allocation5 + $0x6c8] sm:$0xf]  ;;  %v7081_v30 = vld [vmem:[#allocation5 + $0x6d4] sm:$0xf0]  ;;  %v5305_v36 = vor.u32 %v7049_v28, %v5304_v21 }
 0x133   :  { %3654 = vmatpush.bf16.msra.mxu2 %v4857_v33  ;;  %v5560_v32 = vld [vmem:[#allocation5 + $0x7c8] sm:$0xf]  ;;  %v7113_v33 = vld [vmem:[#allocation5 + $0x7d4] sm:$0xf0]  ;;  %v5433_v39 = vor.u32 %v7081_v30, %v5432_v29 }
 0x134   :  { %3667 = vmatpush.bf16.msra.mxu3 %v4985_v41  ;;  %v5160_v41 = vld [vmem:[#allocation5 + $0x4a8] sm:$0xf]  ;;  %v7013_v42 = vld [vmem:[#allocation5 + $0x4b4] sm:$0xf0]  ;;  %v5561_v44 = vor.u32 %v7113_v33, %v5560_v32 }
 0x135   :  { %3629 = vmatpush.bf16.msra.mxu0 %v4585_v46  ;;  %v5288_v43 = vld [vmem:[#allocation5 + $0x5a8] sm:$0xf]  ;;  %v7045_v45 = vld [vmem:[#allocation5 + $0x5b4] sm:$0xf0] }
 0x136   :  { %3642 = vmatpush.bf16.msra.mxu1 %v4713_v49  ;;  %v5416_v62 = vld [vmem:[#allocation5 + $0x6a8] sm:$0xf]  ;;  %v7077_v46 = vld [vmem:[#allocation5 + $0x6b4] sm:$0xf0]  ;;  %v5161_v49 = vor.u32 %v7013_v42, %v5160_v41  ;;  %v5289_v51 = vor.u32 %v7045_v45, %v5288_v43 }
 0x137   :  { %3655 = vmatpush.bf16.msra.mxu2 %v4841_v50  ;;  %v5544_v47 = vld [vmem:[#allocation5 + $0x7a8] sm:$0xf]  ;;  %v7109_v48 = vld [vmem:[#allocation5 + $0x7b4] sm:$0xf0]  ;;  %v5417_v54 = vor.u32 %v7077_v46, %v5416_v62 }
 0x138   :  { %3668 = vmatpush.bf16.msra.mxu3 %v4969_v53  ;;  %v5144_v50 = vld [vmem:[#allocation5 + $0x488] sm:$0xf]  ;;  %v7009_v52 = vld [vmem:[#allocation5 + $0x494] sm:$0xf0]  ;;  %v5545_v57 = vor.u32 %v7109_v48, %v5544_v47 }
 0x139   :  { %3630 = vmatpush.bf16.msra.mxu0 %v4569_v0  ;;  %v5272_v53 = vld [vmem:[#allocation5 + $0x588] sm:$0xf]  ;;  %v7041_v58 = vld [vmem:[#allocation5 + $0x594] sm:$0xf0]  ;;  %v5145_v0 = vor.u32 %v7009_v52, %v5144_v50  ;;  %v3424_v1 = vpop.f32.mrf.mxu0 }
 0x13a   :  { %3643 = vmatpush.bf16.msra.mxu1 %v4697_v3  ;;  %v5400_v59 = vld [vmem:[#allocation5 + $0x688] sm:$0xf]  ;;  %v7073_v60 = vld [vmem:[#allocation5 + $0x694] sm:$0xf0]  ;;  %v5273_v6 = vor.u32 %v7041_v58, %v5272_v53  ;;  %v3425_v7 = vadd.f32 %v3424_v1, %v640_v56 }
 0x13b   :  { %3656 = vmatpush.bf16.msra.mxu2 %v4825_v4  ;;  %v5528_v61 = vld [vmem:[#allocation5 + $0x788] sm:$0xf]  ;;  %v7105_v63 = vld [vmem:[#allocation5 + $0x794] sm:$0xf0]  ;;  %v5401_v2 = vor.u32 %v7073_v60, %v5400_v59 }
 0x13c   :  { %3669 = vmatpush.bf16.msra.mxu3 %v4953_v10  ;;  %3631 = vmatmul.bf16.vlgmr.msra.gmra.mxu0 %v7660_v9  ;;  %v5128_v3 = vld [vmem:[#allocation5 + $0x468] sm:$0xf]  ;;  %v7005_v4 = vld [vmem:[#allocation5 + $0x474] sm:$0xf0]  ;;  %v3437_v10 = vpop.f32.mrf.mxu1 }
 0x13d   :  { %3675 = vmatpush.bf16.msrb.mxu0 %v5193_v11  ;;  %3644 = vmatmul.bf16.vlgmr.msra.gmra.mxu1 %v7667_v25  ;;  %v5256_v5 = vld [vmem:[#allocation5 + $0x568] sm:$0xf]  ;;  %v5529_v11 = vor.u32 %v7105_v63, %v5528_v61  ;;  %v7069_v16 = vld [vmem:[#allocation5 + $0x674] sm:$0xf0]  ;;  %v5129_v28 = vor.u32 %v7005_v4, %v5128_v3 }
 0x13e   :  { %3688 = vmatpush.bf16.msrb.mxu1 %v5321_v12  ;;  %3657 = vmatmul.bf16.vlgmr.msra.gmra.mxu2 %v7658_v8  ;;  %v7037_v12 = vld [vmem:[#allocation5 + $0x574] sm:$0xf0]  ;;  %v5512_v17 = vld [vmem:[#allocation5 + $0x768] sm:$0xf] }
 0x13f   :  { %3701 = vmatpush.bf16.msrb.mxu2 %v5449_v14  ;;  %3670 = vmatmul.bf16.vlgmr.msra.gmra.mxu3 %v7662_v15  ;;  %v5384_v14 = vld [vmem:[#allocation5 + $0x668] sm:$0xf]  ;;  %v7101_v21 = vld [vmem:[#allocation5 + $0x774] sm:$0xf0]  ;;  %v5257_v29 = vor.u32 %v7037_v12, %v5256_v5 }
 0x140   :  { %3714 = vmatpush.bf16.msrb.mxu3 %v5577_v24  ;;  %v3438_v24 = vadd.f32 %v3437_v10, %v3425_v7  ;;  %v5385_v30 = vor.u32 %v7069_v16, %v5384_v14  ;;  %v5112_v32 = vld [vmem:[#allocation5 + $0x448] sm:$0xf]  ;;  %v7001_v33 = vld [vmem:[#allocation5 + $0x454] sm:$0xf0] }
 0x141   :  { %3676 = vmatpush.bf16.msrb.mxu0 %v5177_v35  ;;  %v5240_v35 = vld [vmem:[#allocation5 + $0x548] sm:$0xf]  ;;  %v7033_v41 = vld [vmem:[#allocation5 + $0x554] sm:$0xf0]  ;;  %v5113_v47 = vor.u32 %v7001_v33, %v5112_v32 }
 0x142   :  { %3689 = vmatpush.bf16.msrb.mxu1 %v5305_v36  ;;  %v3450_v36 = vpop.f32.mrf.mxu2  ;;  %v5368_v42 = vld [vmem:[#allocation5 + $0x648] sm:$0xf]  ;;  %v7065_v43 = vld [vmem:[#allocation5 + $0x654] sm:$0xf0]  ;;  %v3463_v45 = vpop.f32.mrf.mxu3  ;;  %v5241_v50 = vor.u32 %v7033_v41, %v5240_v35 }
 0x143   :  { %3702 = vmatpush.bf16.msrb.mxu2 %v5433_v39  ;;  %v5513_v39 = vor.u32 %v7101_v21, %v5512_v17  ;;  %v5496_v62 = vld [vmem:[#allocation5 + $0x748] sm:$0xf]  ;;  %v7097_v46 = vld [vmem:[#allocation5 + $0x754] sm:$0xf0] }
 0x144   :  { %3715 = vmatpush.bf16.msrb.mxu3 %v5561_v44  ;;  %v3451_v44 = vadd.f32 %v3450_v36, %v3438_v24  ;;  %v6997_v52 = vld [vmem:[#allocation5 + $0x434] sm:$0xf0]  ;;  %v5224_v53 = vld [vmem:[#allocation5 + $0x528] sm:$0xf]  ;;  %v3439_v55 = vpop.f32.mrf.mxu1  ;;  %v5497_v56 = vor.u32 %v7097_v46, %v5496_v62 }
 0x145   :  { %3677 = vmatpush.bf16.msrb.mxu0 %v5161_v49  ;;  %v3426_v49 = vpop.f32.mrf.mxu0  ;;  %v5352_v58 = vld [vmem:[#allocation5 + $0x628] sm:$0xf]  ;;  %v7061_v59 = vld [vmem:[#allocation5 + $0x634] sm:$0xf0] }
 0x146   :  { %3690 = vmatpush.bf16.msrb.mxu1 %v5289_v51  ;;  %v7737_v48 = vadd.f32 %v3463_v45, %v3451_v44  ;;  %v5369_v51 = vor.u32 %v7065_v43, %v5368_v42  ;;  %v5480_v60 = vld [vmem:[#allocation5 + $0x728] sm:$0xf]  ;;  %v7093_v61 = vld [vmem:[#allocation5 + $0x734] sm:$0xf0] }
 0x147   :  { %3703 = vmatpush.bf16.msrb.mxu2 %v5417_v54  ;;  %v5096_v54 = vld [vmem:[#allocation5 + $0x428] sm:$0xf]  ;;  %v6993_v1 = vld [vmem:[#allocation5 + $0x414] sm:$0xf0]  ;;  %v5481_v10 = vor.u32 %v7093_v61, %v5480_v60 }
 0x148   :  { %3716 = vmatpush.bf16.msrb.mxu3 %v5545_v57  ;;  %v7029_v57 = vld [vmem:[#allocation5 + $0x534] sm:$0xf0]  ;;  %v5097_v63 = vor.u32 %v6997_v52, %v5096_v54  ;;  %v5208_v3 = vld [vmem:[#allocation5 + $0x508] sm:$0xf] }
 0x149   :  { %3678 = vmatpush.bf16.msrb.mxu0 %v5145_v0  ;;  %v5080_v0 = vld [vmem:[#allocation5 + $0x408] sm:$0xf]  ;;  %v7025_v4 = vld [vmem:[#allocation5 + $0x514] sm:$0xf0] }
 0x14a   :  { %3691 = vmatpush.bf16.msrb.mxu1 %v5273_v6  ;;  %v5225_v6 = vor.u32 %v7029_v57, %v5224_v53  ;;  %v5336_v5 = vld [vmem:[#allocation5 + $0x608] sm:$0xf]  ;;  %v3452_v7 = vpop.f32.mrf.mxu2  ;;  %v7089_v14 = vld [vmem:[#allocation5 + $0x714] sm:$0xf0]  ;;  %v3465_v16 = vpop.f32.mrf.mxu3  ;;  %v5209_v33 = vor.u32 %v7025_v4, %v5208_v3 }
 0x14b   :  { %3704 = vmatpush.bf16.msrb.mxu2 %v5401_v2  ;;  %v5353_v2 = vor.u32 %v7061_v59, %v5352_v58  ;;  %v5464_v12 = vld [vmem:[#allocation5 + $0x708] sm:$0xf]  ;;  %v7149_v21 = vld [vmem:[#allocation5 + $0x8f4] sm:$0xf0] }
 0x14c   :  { %3717 = vmatpush.bf16.msrb.mxu3 %v5529_v11  ;;  %v7057_v11 = vld [vmem:[#allocation5 + $0x614] sm:$0xf0]  ;;  %v5704_v17 = vld [vmem:[#allocation5 + $0x8e8] sm:$0xf]  ;;  %v5465_v41 = vor.u32 %v7089_v14, %v5464_v12 }
 0x14d   :  { %3679 = vmatpush.bf16.msrb.mxu0 %v5129_v28  ;;  %v5832_v24 = vld [vmem:[#allocation5 + $0x9e8] sm:$0xf]  ;;  %v5081_v28 = vor.u32 %v6993_v1, %v5080_v0  ;;  %v7213_v32 = vld [vmem:[#allocation5 + $0xaf4] sm:$0xf0]  ;;  %v5337_v35 = vor.u32 %v7057_v11, %v5336_v5  ;;  %v5705_v42 = vor.u32 %v7149_v21, %v5704_v17 }
 0x14e   :  { %3692 = vmatpush.bf16.msrb.mxu1 %v5257_v29  ;;  %v7181_v29 = vld [vmem:[#allocation5 + $0x9f4] sm:$0xf0]  ;;  %v6088_v36 = vld [vmem:[#allocation5 + $0xbe8] sm:$0xf] }
 0x14f   :  { %3705 = vmatpush.bf16.msrb.mxu2 %v5385_v30  ;;  %v5960_v30 = vld [vmem:[#allocation5 + $0xae8] sm:$0xf]  ;;  %v5833_v43 = vor.u32 %v7181_v29, %v5832_v24  ;;  %v7145_v62 = vld [vmem:[#allocation5 + $0x8d4] sm:$0xf0] }
 0x150   :  { %3718 = vmatpush.bf16.msrb.mxu3 %v5513_v39  ;;  %v7245_v39 = vld [vmem:[#allocation5 + $0xbf4] sm:$0xf0]  ;;  %v5961_v44 = vor.u32 %v7213_v32, %v5960_v30  ;;  %v5688_v45 = vld [vmem:[#allocation5 + $0x8c8] sm:$0xf] }
 0x151   :  { %3680 = vmatpush.bf16.msrb.mxu0 %v5113_v47  ;;  %v5816_v46 = vld [vmem:[#allocation5 + $0x9c8] sm:$0xf]  ;;  %v6089_v47 = vor.u32 %v7245_v39, %v6088_v36  ;;  %v7177_v49 = vld [vmem:[#allocation5 + $0x9d4] sm:$0xf0]  ;;  %v5689_v53 = vor.u32 %v7145_v62, %v5688_v45 }
 0x152   :  { %3693 = vmatpush.bf16.msrb.mxu1 %v5241_v50  ;;  %v5944_v50 = vld [vmem:[#allocation5 + $0xac8] sm:$0xf]  ;;  %v7241_v52 = vld [vmem:[#allocation5 + $0xbd4] sm:$0xf0]  ;;  %v5817_v55 = vor.u32 %v7177_v49, %v5816_v46 }
 0x153   :  { %3706 = vmatpush.bf16.msrb.mxu2 %v5369_v51  ;;  %v7209_v51 = vld [vmem:[#allocation5 + $0xad4] sm:$0xf0]  ;;  %v6072_v54 = vld [vmem:[#allocation5 + $0xbc8] sm:$0xf] }
 0x154   :  { %3719 = vmatpush.bf16.msrb.mxu3 %v5497_v56  ;;  %v5945_v56 = vor.u32 %v7209_v51, %v5944_v50  ;;  %v5672_v57 = vld [vmem:[#allocation5 + $0x8a8] sm:$0xf]  ;;  %v7141_v58 = vld [vmem:[#allocation5 + $0x8b4] sm:$0xf0]  ;;  %v6073_v60 = vor.u32 %v7241_v52, %v6072_v54 }
 0x155   :  { %3681 = vmatpush.bf16.msrb.mxu0 %v5097_v63  ;;  %v5800_v59 = vld [vmem:[#allocation5 + $0x9a8] sm:$0xf]  ;;  %v7173_v61 = vld [vmem:[#allocation5 + $0x9b4] sm:$0xf0] }
 0x156   :  { %3694 = vmatpush.bf16.msrb.mxu1 %v5225_v6  ;;  %v5928_v63 = vld [vmem:[#allocation5 + $0xaa8] sm:$0xf]  ;;  %v7205_v0 = vld [vmem:[#allocation5 + $0xab4] sm:$0xf0]  ;;  %v5801_v3 = vor.u32 %v7173_v61, %v5800_v59 }
 0x157   :  { %3707 = vmatpush.bf16.msrb.mxu2 %v5353_v2  ;;  %v6056_v1 = vld [vmem:[#allocation5 + $0xba8] sm:$0xf]  ;;  %v7237_v6 = vld [vmem:[#allocation5 + $0xbb4] sm:$0xf0]  ;;  %v5673_v2 = vor.u32 %v7141_v58, %v5672_v57  ;;  %v5929_v4 = vor.u32 %v7205_v0, %v5928_v63 }
 0x158   :  { %3720 = vmatpush.bf16.msrb.mxu3 %v5481_v10  ;;  %v5656_v5 = vld [vmem:[#allocation5 + $0x888] sm:$0xf]  ;;  %v7137_v7 = vld [vmem:[#allocation5 + $0x894] sm:$0xf0]  ;;  %v6057_v11 = vor.u32 %v7237_v6, %v6056_v1 }
 0x159   :  { %3682 = vmatpush.bf16.msrb.mxu0 %v5081_v28  ;;  %v5784_v10 = vld [vmem:[#allocation5 + $0x988] sm:$0xf]  ;;  %v7169_v12 = vld [vmem:[#allocation5 + $0x994] sm:$0xf0]  ;;  %v5657_v24 = vor.u32 %v7137_v7, %v5656_v5  ;;  %v3476_v28 = vpop.f32.mrf.mxu0 }
 0x15a   :  { %3695 = vmatpush.bf16.msrb.mxu1 %v5209_v33  ;;  %v5912_v14 = vld [vmem:[#allocation5 + $0xa88] sm:$0xf]  ;;  %v7201_v16 = vld [vmem:[#allocation5 + $0xa94] sm:$0xf0]  ;;  %v5785_v29 = vor.u32 %v7169_v12, %v5784_v10  ;;  %v3477_v36 = vadd.f32 %v3476_v28, %v7737_v48  ;;  %v3489_v39 = vpop.f32.mrf.mxu1 }
 0x15b   :  { %3708 = vmatpush.bf16.msrb.mxu2 %v5337_v35  ;;  %v6040_v17 = vld [vmem:[#allocation5 + $0xb88] sm:$0xf]  ;;  %v7233_v21 = vld [vmem:[#allocation5 + $0xb94] sm:$0xf0]  ;;  %v5913_v30 = vor.u32 %v7201_v16, %v5912_v14 }
 0x15c   :  { %3721 = vmatpush.bf16.msrb.mxu3 %v5465_v41  ;;  %3683 = vmatmul.bf16.vlgmr.msrb.gmra.mxu0 %v7672_v37  ;;  %v5640_v32 = vld [vmem:[#allocation5 + $0x868] sm:$0xf]  ;;  %v7133_v33 = vld [vmem:[#allocation5 + $0x874] sm:$0xf0]  ;;  %v6041_v41 = vor.u32 %v7233_v21, %v6040_v17  ;;  %v3490_v46 = vadd.f32 %v3489_v39, %v3477_v36 }
 0x15d   :  { %3727 = vmatpush.bf16.msra.mxu0 %v5705_v42  ;;  %3696 = vmatmul.bf16.vlgmr.msrb.gmra.mxu1 %v7676_v40  ;;  %v5768_v35 = vld [vmem:[#allocation5 + $0x968] sm:$0xf]  ;;  %v7165_v42 = vld [vmem:[#allocation5 + $0x974] sm:$0xf0] }
 0x15e   :  { %3740 = vmatpush.bf16.msra.mxu1 %v5833_v43  ;;  %3709 = vmatmul.bf16.vlgmr.msrb.gmra.mxu2 %v7670_v34  ;;  %v5896_v43 = vld [vmem:[#allocation5 + $0xa68] sm:$0xf]  ;;  %v7229_v62 = vld [vmem:[#allocation5 + $0xb74] sm:$0xf0]  ;;  %v5769_v49 = vor.u32 %v7165_v42, %v5768_v35 }
 0x15f   :  { %3753 = vmatpush.bf16.msra.mxu2 %v5961_v44  ;;  %3722 = vmatmul.bf16.vlgmr.msrb.gmra.mxu3 %v7674_v38  ;;  %v7197_v44 = vld [vmem:[#allocation5 + $0xa74] sm:$0xf0]  ;;  %v6024_v45 = vld [vmem:[#allocation5 + $0xb68] sm:$0xf] }
 0x160   :  { %3766 = vmatpush.bf16.msra.mxu3 %v6089_v47  ;;  %v5641_v47 = vor.u32 %v7133_v33, %v5640_v32  ;;  %v5897_v50 = vor.u32 %v7197_v44, %v5896_v43  ;;  %v5624_v51 = vld [vmem:[#allocation5 + $0x848] sm:$0xf]  ;;  %v7129_v54 = vld [vmem:[#allocation5 + $0x854] sm:$0xf0]  ;;  %v6025_v48 = vor.u32 %v7229_v62, %v6024_v45 }
 0x161   :  { %3728 = vmatpush.bf16.msra.mxu0 %v5689_v53  ;;  %v5752_v52 = vld [vmem:[#allocation5 + $0x948] sm:$0xf]  ;;  %v3502_v53 = vpop.f32.mrf.mxu2  ;;  %v7193_v57 = vld [vmem:[#allocation5 + $0xa54] sm:$0xf0]  ;;  %v5625_v63 = vor.u32 %v7129_v54, %v5624_v51  ;;  %v3478_v1 = vpop.f32.mrf.mxu0 }
 0x162   :  { %3741 = vmatpush.bf16.msra.mxu1 %v5817_v55  ;;  %v7161_v55 = vld [vmem:[#allocation5 + $0x954] sm:$0xf0]  ;;  %v3503_v58 = vadd.f32 %v3502_v53, %v3490_v46  ;;  %v3515_v59 = vpop.f32.mrf.mxu3  ;;  %v5736_v5 = vld [vmem:[#allocation5 + $0x928] sm:$0xf]  ;;  %v3491_v7 = vpop.f32.mrf.mxu1 }
 0x163   :  { %3754 = vmatpush.bf16.msra.mxu2 %v5945_v56  ;;  %v5880_v56 = vld [vmem:[#allocation5 + $0xa48] sm:$0xf]  ;;  %v7225_v61 = vld [vmem:[#allocation5 + $0xb54] sm:$0xf0]  ;;  %v5753_v6 = vor.u32 %v7161_v55, %v5752_v52 }
 0x164   :  { %3767 = vmatpush.bf16.msra.mxu3 %v6073_v60  ;;  %v6008_v60 = vld [vmem:[#allocation5 + $0xb48] sm:$0xf]  ;;  %v7744_v0 = vadd.f32 %v3515_v59, %v3503_v58  ;;  %v7189_v14 = vld [vmem:[#allocation5 + $0xa34] sm:$0xf0] }
 0x165   :  { %3729 = vmatpush.bf16.msra.mxu0 %v5673_v2  ;;  %v5881_v2 = vor.u32 %v7193_v57, %v5880_v56  ;;  %v6009_v10 = vor.u32 %v7225_v61, %v6008_v60  ;;  %v5864_v12 = vld [vmem:[#allocation5 + $0xa28] sm:$0xf]  ;;  %v7221_v17 = vld [vmem:[#allocation5 + $0xb34] sm:$0xf0] }
 0x166   :  { %3742 = vmatpush.bf16.msra.mxu1 %v5801_v3  ;;  %v5608_v3 = vld [vmem:[#allocation5 + $0x828] sm:$0xf]  ;;  %v7121_v28 = vld [vmem:[#allocation5 + $0x814] sm:$0xf0] }
 0x167   :  { %3755 = vmatpush.bf16.msra.mxu2 %v5929_v4  ;;  %v7125_v4 = vld [vmem:[#allocation5 + $0x834] sm:$0xf0]  ;;  %v5992_v16 = vld [vmem:[#allocation5 + $0xb28] sm:$0xf] }
 0x168   :  { %3768 = vmatpush.bf16.msra.mxu3 %v6057_v11  ;;  %v7157_v11 = vld [vmem:[#allocation5 + $0x934] sm:$0xf0]  ;;  %v5609_v21 = vor.u32 %v7125_v4, %v5608_v3  ;;  %v5720_v32 = vld [vmem:[#allocation5 + $0x908] sm:$0xf]  ;;  %v5993_v39 = vor.u32 %v7221_v17, %v5992_v16 }
 0x169   :  { %3730 = vmatpush.bf16.msra.mxu0 %v5657_v24  ;;  %v5592_v24 = vld [vmem:[#allocation5 + $0x808] sm:$0xf]  ;;  %v7153_v33 = vld [vmem:[#allocation5 + $0x914] sm:$0xf0]  ;;  %v3504_v36 = vpop.f32.mrf.mxu2 }
 0x16a   :  { %3743 = vmatpush.bf16.msra.mxu1 %v5785_v29  ;;  %v5737_v29 = vor.u32 %v7157_v11, %v5736_v5  ;;  %v5848_v35 = vld [vmem:[#allocation5 + $0xa08] sm:$0xf]  ;;  %v7217_v43 = vld [vmem:[#allocation5 + $0xb14] sm:$0xf0]  ;;  %v3517_v44 = vpop.f32.mrf.mxu3  ;;  %v5721_v54 = vor.u32 %v7153_v33, %v5720_v32 }
 0x16b   :  { %3756 = vmatpush.bf16.msra.mxu2 %v5913_v30  ;;  %v5865_v30 = vor.u32 %v7189_v14, %v5864_v12  ;;  %v5976_v42 = vld [vmem:[#allocation5 + $0xb08] sm:$0xf]  ;;  %v7277_v62 = vld [vmem:[#allocation5 + $0xcf4] sm:$0xf0] }
 0x16c   :  { %3769 = vmatpush.bf16.msra.mxu3 %v6041_v41  ;;  %v7185_v41 = vld [vmem:[#allocation5 + $0xa14] sm:$0xf0]  ;;  %v6216_v45 = vld [vmem:[#allocation5 + $0xce8] sm:$0xf]  ;;  %v5977_v55 = vor.u32 %v7217_v43, %v5976_v42 }
 0x16d   :  { %3731 = vmatpush.bf16.msra.mxu0 %v5641_v47  ;;  %v6344_v46 = vld [vmem:[#allocation5 + $0xde8] sm:$0xf]  ;;  %v5593_v47 = vor.u32 %v7121_v28, %v5592_v24  ;;  %v7341_v51 = vld [vmem:[#allocation5 + $0xef4] sm:$0xf0]  ;;  %v5849_v52 = vor.u32 %v7185_v41, %v5848_v35  ;;  %v6217_v56 = vor.u32 %v7277_v62, %v6216_v45 }
 0x16e   :  { %3744 = vmatpush.bf16.msra.mxu1 %v5769_v49  ;;  %v7309_v49 = vld [vmem:[#allocation5 + $0xdf4] sm:$0xf0]  ;;  %v6600_v53 = vld [vmem:[#allocation5 + $0xfe8] sm:$0xf] }
 0x16f   :  { %3757 = vmatpush.bf16.msra.mxu2 %v5897_v50  ;;  %v6472_v50 = vld [vmem:[#allocation5 + $0xee8] sm:$0xf]  ;;  %v6345_v57 = vor.u32 %v7309_v49, %v6344_v46  ;;  %v7273_v60 = vld [vmem:[#allocation5 + $0xcd4] sm:$0xf0] }
 0x170   :  { %3770 = vmatpush.bf16.msra.mxu3 %v6025_v48  ;;  %v7373_v48 = vld [vmem:[#allocation5 + $0xff4] sm:$0xf0]  ;;  %v6473_v58 = vor.u32 %v7341_v51, %v6472_v50  ;;  %v6200_v59 = vld [vmem:[#allocation5 + $0xcc8] sm:$0xf] }
 0x171   :  { %3732 = vmatpush.bf16.msra.mxu0 %v5625_v63  ;;  %v6328_v61 = vld [vmem:[#allocation5 + $0xdc8] sm:$0xf]  ;;  %v6601_v63 = vor.u32 %v7373_v48, %v6600_v53  ;;  %v7305_v1 = vld [vmem:[#allocation5 + $0xdd4] sm:$0xf0]  ;;  %v6201_v5 = vor.u32 %v7273_v60, %v6200_v59 }
 0x172   :  { %3745 = vmatpush.bf16.msra.mxu1 %v5753_v6  ;;  %v6456_v6 = vld [vmem:[#allocation5 + $0xec8] sm:$0xf]  ;;  %v7369_v4 = vld [vmem:[#allocation5 + $0xfd4] sm:$0xf0]  ;;  %v6329_v7 = vor.u32 %v7305_v1, %v6328_v61 }
 0x173   :  { %3758 = vmatpush.bf16.msra.mxu2 %v5881_v2  ;;  %v7337_v2 = vld [vmem:[#allocation5 + $0xed4] sm:$0xf0]  ;;  %v6584_v3 = vld [vmem:[#allocation5 + $0xfc8] sm:$0xf] }
 0x174   :  { %3771 = vmatpush.bf16.msra.mxu3 %v6009_v10  ;;  %v6457_v10 = vor.u32 %v7337_v2, %v6456_v6  ;;  %v6184_v11 = vld [vmem:[#allocation5 + $0xca8] sm:$0xf]  ;;  %v7269_v12 = vld [vmem:[#allocation5 + $0xcb4] sm:$0xf0]  ;;  %v6585_v16 = vor.u32 %v7369_v4, %v6584_v3 }
 0x175   :  { %3733 = vmatpush.bf16.msra.mxu0 %v5609_v21  ;;  %v6312_v14 = vld [vmem:[#allocation5 + $0xda8] sm:$0xf]  ;;  %v7301_v17 = vld [vmem:[#allocation5 + $0xdb4] sm:$0xf0] }
 0x176   :  { %3746 = vmatpush.bf16.msra.mxu1 %v5737_v29  ;;  %v6440_v21 = vld [vmem:[#allocation5 + $0xea8] sm:$0xf]  ;;  %v7333_v24 = vld [vmem:[#allocation5 + $0xeb4] sm:$0xf0]  ;;  %v6313_v32 = vor.u32 %v7301_v17, %v6312_v14 }
 0x177   :  { %3759 = vmatpush.bf16.msra.mxu2 %v5865_v30  ;;  %v6568_v28 = vld [vmem:[#allocation5 + $0xfa8] sm:$0xf]  ;;  %v7365_v29 = vld [vmem:[#allocation5 + $0xfb4] sm:$0xf0]  ;;  %v6185_v30 = vor.u32 %v7269_v12, %v6184_v11  ;;  %v6441_v33 = vor.u32 %v7333_v24, %v6440_v21 }
 0x178   :  { %3772 = vmatpush.bf16.msra.mxu3 %v5993_v39  ;;  %v6168_v35 = vld [vmem:[#allocation5 + $0xc88] sm:$0xf]  ;;  %v7265_v36 = vld [vmem:[#allocation5 + $0xc94] sm:$0xf0]  ;;  %v6569_v41 = vor.u32 %v7365_v29, %v6568_v28 }
 0x179   :  { %3734 = vmatpush.bf16.msra.mxu0 %v5593_v47  ;;  %v6296_v39 = vld [vmem:[#allocation5 + $0xd88] sm:$0xf]  ;;  %v7297_v42 = vld [vmem:[#allocation5 + $0xd94] sm:$0xf0]  ;;  %v3528_v45 = vpop.f32.mrf.mxu0  ;;  %v6169_v49 = vor.u32 %v7265_v36, %v6168_v35 }
 0x17a   :  { %3747 = vmatpush.bf16.msra.mxu1 %v5721_v54  ;;  %v6424_v43 = vld [vmem:[#allocation5 + $0xe88] sm:$0xf]  ;;  %v7329_v44 = vld [vmem:[#allocation5 + $0xe94] sm:$0xf0]  ;;  %v3529_v47 = vadd.f32 %v3528_v45, %v7744_v0  ;;  %v3541_v50 = vpop.f32.mrf.mxu1  ;;  %v6297_v51 = vor.u32 %v7297_v42, %v6296_v39 }
 0x17b   :  { %3760 = vmatpush.bf16.msra.mxu2 %v5849_v52  ;;  %v6552_v62 = vld [vmem:[#allocation5 + $0xf88] sm:$0xf]  ;;  %v7361_v46 = vld [vmem:[#allocation5 + $0xf94] sm:$0xf0]  ;;  %v6425_v54 = vor.u32 %v7329_v44, %v6424_v43 }
 0x17c   :  { %3773 = vmatpush.bf16.msra.mxu3 %v5977_v55  ;;  %3735 = vmatmul.bf16.vlgmr.msra.gmra.mxu0 %v7682_v18  ;;  %v6152_v52 = vld [vmem:[#allocation5 + $0xc68] sm:$0xf]  ;;  %v7261_v53 = vld [vmem:[#allocation5 + $0xc74] sm:$0xf0]  ;;  %v6553_v55 = vor.u32 %v7361_v46, %v6552_v62 }
 0x17d   :  { %3779 = vmatpush.bf16.msrb.mxu0 %v6217_v56  ;;  %3748 = vmatmul.bf16.vlgmr.msra.gmra.mxu1 %v7686_v23  ;;  %v6280_v48 = vld [vmem:[#allocation5 + $0xd68] sm:$0xf]  ;;  %v3542_v56 = vadd.f32 %v3541_v50, %v3529_v47  ;;  %v7325_v59 = vld [vmem:[#allocation5 + $0xe74] sm:$0xf0] }
 0x17e   :  { %3792 = vmatpush.bf16.msrb.mxu1 %v6345_v57  ;;  %3761 = vmatmul.bf16.vlgmr.msra.gmra.mxu2 %v7684_v22  ;;  %v7293_v57 = vld [vmem:[#allocation5 + $0xd74] sm:$0xf0]  ;;  %v6536_v60 = vld [vmem:[#allocation5 + $0xf68] sm:$0xf] }
 0x17f   :  { %3805 = vmatpush.bf16.msrb.mxu2 %v6473_v58  ;;  %3774 = vmatmul.bf16.vlgmr.msra.gmra.mxu3 %v7688_v27  ;;  %v6408_v58 = vld [vmem:[#allocation5 + $0xe68] sm:$0xf]  ;;  %v7357_v61 = vld [vmem:[#allocation5 + $0xf74] sm:$0xf0]  ;;  %v6281_v0 = vor.u32 %v7293_v57, %v6280_v48 }
 0x180   :  { %3818 = vmatpush.bf16.msrb.mxu3 %v6601_v63  ;;  %v6153_v63 = vor.u32 %v7261_v53, %v6152_v52  ;;  %v6409_v1 = vor.u32 %v7325_v59, %v6408_v58  ;;  %v6136_v6 = vld [vmem:[#allocation5 + $0xc48] sm:$0xf]  ;;  %v7257_v2 = vld [vmem:[#allocation5 + $0xc54] sm:$0xf0]  ;;  %v6537_v4 = vor.u32 %v7357_v61, %v6536_v60  ;;  %v6891_v58 = vld [vmem:[#allocation5 + $0xec] sm:$0xf] }
 0x181   :  { %3780 = vmatpush.bf16.msrb.mxu0 %v6201_v5  ;;  %v6264_v3 = vld [vmem:[#allocation5 + $0xd48] sm:$0xf]  ;;  %v3554_v5 = vpop.f32.mrf.mxu2  ;;  %v7321_v11 = vld [vmem:[#allocation5 + $0xe54] sm:$0xf0]  ;;  %v3530_v21 = vpop.f32.mrf.mxu0  ;;  %v6137_v24 = vor.u32 %v7257_v2, %v6136_v6  ;;  %v4682_v59 = vld [vmem:[#allocation5 + $0xf8] sm:$0xf0] }
 0x182   :  { %3793 = vmatpush.bf16.msrb.mxu1 %v6329_v7  ;;  %v7289_v7 = vld [vmem:[#allocation5 + $0xd54] sm:$0xf0]  ;;  %v3555_v12 = vadd.f32 %v3554_v5, %v3542_v56  ;;  %v3567_v14 = vpop.f32.mrf.mxu3  ;;  %v3543_v28 = vpop.f32.mrf.mxu1  ;;  %v6248_v36 = vld [vmem:[#allocation5 + $0xd28] sm:$0xf]  ;;  %v6923_v60 = vld [vmem:[#allocation5 + $0x1ec] sm:$0xf] }
 0x183   :  { %3806 = vmatpush.bf16.msrb.mxu2 %v6457_v10  ;;  %v6392_v10 = vld [vmem:[#allocation5 + $0xe48] sm:$0xf]  ;;  %v7353_v17 = vld [vmem:[#allocation5 + $0xf54] sm:$0xf0]  ;;  %v4938_v6 = vld [vmem:[#allocation5 + $0x2f8] sm:$0xf0] }
 0x184   :  { %3819 = vmatpush.bf16.msrb.mxu3 %v6585_v16  ;;  %v6520_v16 = vld [vmem:[#allocation5 + $0xf48] sm:$0xf]  ;;  %v7751_v29 = vadd.f32 %v3567_v14, %v3555_v12  ;;  %v7253_v35 = vld [vmem:[#allocation5 + $0xc34] sm:$0xf0]  ;;  %v5066_v5 = vld [vmem:[#allocation5 + $0x3f8] sm:$0xf0] }
 0x185   :  { %3781 = vmatpush.bf16.msrb.mxu0 %v6185_v30  ;;  %v6265_v30 = vor.u32 %v7289_v7, %v6264_v3  ;;  %v6521_v39 = vor.u32 %v7353_v17, %v6520_v16  ;;  %v6376_v42 = vld [vmem:[#allocation5 + $0xe28] sm:$0xf]  ;;  %v7317_v43 = vld [vmem:[#allocation5 + $0xe34] sm:$0xf0]  ;;  %v6887_v14 = vld [vmem:[#allocation5 + $0xcc] sm:$0xf] }
 0x186   :  { %3794 = vmatpush.bf16.msrb.mxu1 %v6313_v32  ;;  %v6393_v32 = vor.u32 %v7321_v11, %v6392_v10  ;;  %v6504_v44 = vld [vmem:[#allocation5 + $0xf28] sm:$0xf]  ;;  %v7349_v45 = vld [vmem:[#allocation5 + $0xf34] sm:$0xf0]  ;;  %v6377_v50 = vor.u32 %v7317_v43, %v6376_v42  ;;  %v4685_v10 = vor.u32 %v6891_v58, %v4682_v59  ;;  %v4666_v16 = vld [vmem:[#allocation5 + $0xd8] sm:$0xf0] }
 0x187   :  { %3807 = vmatpush.bf16.msrb.mxu2 %v6441_v33  ;;  %v6120_v33 = vld [vmem:[#allocation5 + $0xc28] sm:$0xf]  ;;  %v7249_v47 = vld [vmem:[#allocation5 + $0xc14] sm:$0xf0]  ;;  %v6505_v53 = vor.u32 %v7349_v45, %v6504_v44  ;;  %v6919_v17 = vld [vmem:[#allocation5 + $0x1cc] sm:$0xf] }
 0x188   :  { %3820 = vmatpush.bf16.msrb.mxu3 %v6569_v41  ;;  %v7285_v41 = vld [vmem:[#allocation5 + $0xd34] sm:$0xf0]  ;;  %v6121_v62 = vor.u32 %v7253_v35, %v6120_v33  ;;  %v6104_v46 = vld [vmem:[#allocation5 + $0xc08] sm:$0xf]  ;;  %v6951_v28 = vld [vmem:[#allocation5 + $0x2cc] sm:$0xf]  ;;  %v4669_v35 = vor.u32 %v6887_v14, %v4666_v16 }
 0x189   :  { %3782 = vmatpush.bf16.msrb.mxu0 %v6169_v49  ;;  %v6249_v49 = vor.u32 %v7285_v41, %v6248_v36  ;;  %v6360_v52 = vld [vmem:[#allocation5 + $0xe08] sm:$0xf]  ;;  %v7313_v48 = vld [vmem:[#allocation5 + $0xe14] sm:$0xf0]  ;;  %v3556_v57 = vpop.f32.mrf.mxu2  ;;  %v5050_v33 = vld [vmem:[#allocation5 + $0x3d8] sm:$0xf0] }
 0x18a   :  { %3795 = vmatpush.bf16.msrb.mxu1 %v6297_v51  ;;  %v6232_v51 = vld [vmem:[#allocation5 + $0xd08] sm:$0xf]  ;;  %v7345_v56 = vld [vmem:[#allocation5 + $0xf14] sm:$0xf0]  ;;  %v3569_v61 = vpop.f32.mrf.mxu3  ;;  %v6361_v3 = vor.u32 %v7313_v48, %v6360_v52  ;;  %v6883_v41 = vld [vmem:[#allocation5 + $0xac] sm:$0xf] }
 0x18b   :  { %3808 = vmatpush.bf16.msrb.mxu2 %v6425_v54  ;;  %v7281_v54 = vld [vmem:[#allocation5 + $0xd14] sm:$0xf0]  ;;  %v4650_v42 = vld [vmem:[#allocation5 + $0xb8] sm:$0xf0]  ;;  %v6915_v43 = vld [vmem:[#allocation5 + $0x1ac] sm:$0xf] }
 0x18c   :  { %3821 = vmatpush.bf16.msrb.mxu3 %v6553_v55  ;;  %v6488_v55 = vld [vmem:[#allocation5 + $0xf08] sm:$0xf]  ;;  %v6233_v2 = vor.u32 %v7281_v54, %v6232_v51  ;;  %v4778_v45 = vld [vmem:[#allocation5 + $0x1b8] sm:$0xf0]  ;;  %v6879_v52 = vld [vmem:[#allocation5 + $0x8c] sm:$0xf] }
 0x18d   :  { %3783 = vmatpush.bf16.msrb.mxu0 %v6153_v63  ;;  %v6105_v63 = vor.u32 %v7249_v47, %v6104_v46  ;;  %v6489_v7 = vor.u32 %v7345_v56, %v6488_v55  ;;  %v4906_v46 = vld [vmem:[#allocation5 + $0x2b8] sm:$0xf0]  ;;  %v6979_v47 = vld [vmem:[#allocation5 + $0x3ac] sm:$0xf]  ;;  %v4781_v51 = vor.u32 %v6915_v43, %v4778_v45 }
 0x18e   :  { %3796 = vmatpush.bf16.msrb.mxu1 %v6281_v0  ;;  %v4810_v0 = vld [vmem:[#allocation5 + $0x1f8] sm:$0xf0]  ;;  %v6911_v48 = vld [vmem:[#allocation5 + $0x18c] sm:$0xf] }
 0x18f   :  { %3809 = vmatpush.bf16.msrb.mxu2 %v6409_v1  ;;  %v6955_v1 = vld [vmem:[#allocation5 + $0x2ec] sm:$0xf]  ;;  %v4813_v11 = vor.u32 %v6923_v60, %v4810_v0  ;;  %v4762_v56 = vld [vmem:[#allocation5 + $0x198] sm:$0xf0] }
 0x190   :  { %3822 = vmatpush.bf16.msrb.mxu3 %v6537_v4  ;;  %v6987_v4 = vld [vmem:[#allocation5 + $0x3ec] sm:$0xf]  ;;  %v4941_v12 = vor.u32 %v6955_v1, %v4938_v6  ;;  %v4890_v58 = vld [vmem:[#allocation5 + $0x298] sm:$0xf0]  ;;  %v4765_v6 = vor.u32 %v6911_v48, %v4762_v56 }
 0x191   :  { %3784 = vmatpush.bf16.msrb.mxu0 %v6137_v24  ;;  %v5069_v21 = vor.u32 %v6987_v4, %v5066_v5  ;;  %v4794_v24 = vld [vmem:[#allocation5 + $0x1d8] sm:$0xf0]  ;;  %v6943_v57 = vld [vmem:[#allocation5 + $0x28c] sm:$0xf] }
 0x192   :  { %3797 = vmatpush.bf16.msrb.mxu1 %v6265_v30  ;;  %v4922_v30 = vld [vmem:[#allocation5 + $0x2d8] sm:$0xf0]  ;;  %v4797_v36 = vor.u32 %v6919_v17, %v4794_v24  ;;  %v6975_v60 = vld [vmem:[#allocation5 + $0x38c] sm:$0xf] }
 0x193   :  { %3810 = vmatpush.bf16.msrb.mxu2 %v6393_v32  ;;  %v6983_v32 = vld [vmem:[#allocation5 + $0x3cc] sm:$0xf]  ;;  %v5018_v61 = vld [vmem:[#allocation5 + $0x398] sm:$0xf0] }
 0x194   :  { %3823 = vmatpush.bf16.msrb.mxu3 %v6521_v39  ;;  %v4925_v39 = vor.u32 %v6951_v28, %v4922_v30  ;;  %v5053_v44 = vor.u32 %v6983_v32, %v5050_v33  ;;  %v4618_v4 = vld [vmem:[#allocation5 + $0x78] sm:$0xf0]  ;;  %v6907_v5 = vld [vmem:[#allocation5 + $0x16c] sm:$0xf] }
 0x195   :  { %3785 = vmatpush.bf16.msrb.mxu0 %v6121_v62  ;;  %v6947_v62 = vld [vmem:[#allocation5 + $0x2ac] sm:$0xf]  ;;  %v4874_v14 = vld [vmem:[#allocation5 + $0x278] sm:$0xf0] }
 0x196   :  { %3798 = vmatpush.bf16.msrb.mxu1 %v6249_v49  ;;  %v5034_v49 = vld [vmem:[#allocation5 + $0x3b8] sm:$0xf0]  ;;  %v4909_v54 = vor.u32 %v6947_v62, %v4906_v46  ;;  %v6971_v16 = vld [vmem:[#allocation5 + $0x36c] sm:$0xf] }
 0x197   :  { %3811 = vmatpush.bf16.msrb.mxu2 %v6377_v50  ;;  %v4653_v50 = vor.u32 %v6883_v41, %v4650_v42  ;;  %v5037_v55 = vor.u32 %v6979_v47, %v5034_v49  ;;  %v5002_v17 = vld [vmem:[#allocation5 + $0x378] sm:$0xf0]  ;;  %v6871_v28 = vld [vmem:[#allocation5 + $0x4c] sm:$0xf] }
 0x198   :  { %3824 = vmatpush.bf16.msrb.mxu3 %v6505_v53  ;;  %v4634_v53 = vld [vmem:[#allocation5 + $0x98] sm:$0xf0]  ;;  %v6903_v32 = vld [vmem:[#allocation5 + $0x14c] sm:$0xf]  ;;  %v5005_v33 = vor.u32 %v6971_v16, %v5002_v17 }
 0x199   :  { %3786 = vmatpush.bf16.msrb.mxu0 %v6105_v63  ;;  %v3580_v59 = vpop.f32.mrf.mxu0  ;;  %v4637_v0 = vor.u32 %v6879_v52, %v4634_v53  ;;  %v4602_v30 = vld [vmem:[#allocation5 + $0x58] sm:$0xf0]  ;;  %v6899_v53 = vld [vmem:[#allocation5 + $0x12c] sm:$0xf] }
 0x19a   :  { %3799 = vmatpush.bf16.msrb.mxu1 %v6233_v2  ;;  %v3581_v63 = vadd.f32 %v3580_v59, %v7751_v29  ;;  %v3593_v1 = vpop.f32.mrf.mxu1  ;;  %v4893_v2 = vor.u32 %v6943_v57, %v4890_v58  ;;  %v4858_v41 = vld [vmem:[#allocation5 + $0x258] sm:$0xf0]  ;;  %v4605_v46 = vor.u32 %v6871_v28, %v4602_v30  ;;  %v6931_v56 = vld [vmem:[#allocation5 + $0x22c] sm:$0xf] }
 0x19b   :  { %3812 = vmatpush.bf16.msrb.mxu2 %v6361_v3  ;;  %v6875_v3 = vld [vmem:[#allocation5 + $0x6c] sm:$0xf]  ;;  %v4986_v45 = vld [vmem:[#allocation5 + $0x358] sm:$0xf0] }
 0x19c   :  { %3825 = vmatpush.bf16.msrb.mxu3 %v6489_v7  ;;  %3787 = vmatmul.bf16.vlgmr.msrb.gmra.mxu0 %v7694_v13  ;;  %v5021_v7 = vor.u32 %v6975_v60, %v5018_v61  ;;  %v4586_v52 = vld [vmem:[#allocation5 + $0x38] sm:$0xf0]  ;;  %v6963_v58 = vld [vmem:[#allocation5 + $0x32c] sm:$0xf] }
 0x19d   :  { %3831 = vmatpush.bf16.msra.mxu0 %v4685_v10  ;;  %3800 = vmatmul.bf16.vlgmr.msrb.gmra.mxu1 %v7698_v20  ;;  %v3594_v10 = vadd.f32 %v3593_v1, %v3581_v63  ;;  %v4842_v57 = vld [vmem:[#allocation5 + $0x238] sm:$0xf0]  ;;  %v6863_v61 = vld [vmem:[#allocation5 + $0xc] sm:$0xf] }
 0x19e   :  { %3844 = vmatpush.bf16.msra.mxu1 %v4813_v11  ;;  %3813 = vmatmul.bf16.vlgmr.msrb.gmra.mxu2 %v7696_v19  ;;  %v4746_v11 = vld [vmem:[#allocation5 + $0x178] sm:$0xf0]  ;;  %v4845_v1 = vor.u32 %v6931_v56, %v4842_v57  ;;  %v7051_v16 = vld [vmem:[#allocation5 + $0x5ec] sm:$0xf] }
 0x19f   :  { %3857 = vmatpush.bf16.msra.mxu2 %v4941_v12  ;;  %3826 = vmatmul.bf16.vlgmr.msrb.gmra.mxu3 %v7700_v26  ;;  %v6939_v12 = vld [vmem:[#allocation5 + $0x26c] sm:$0xf]  ;;  %v4749_v29 = vor.u32 %v6907_v5, %v4746_v11  ;;  %v4970_v59 = vld [vmem:[#allocation5 + $0x338] sm:$0xf0] }
 0x1a0   :  { %3870 = vmatpush.bf16.msra.mxu3 %v5069_v21  ;;  %v4621_v21 = vor.u32 %v6875_v3, %v4618_v4  ;;  %v4877_v24 = vor.u32 %v6939_v12, %v4874_v14  ;;  %v4570_v63 = vld [vmem:[#allocation5 + $0x18] sm:$0xf0]  ;;  %v6927_v3 = vld [vmem:[#allocation5 + $0x20c] sm:$0xf]  ;;  %v4973_v4 = vor.u32 %v6963_v58, %v4970_v59 }
 0x1a1   :  { %3832 = vmatpush.bf16.msra.mxu0 %v4669_v35  ;;  %v3606_v35 = vpop.f32.mrf.mxu2  ;;  %v3582_v62 = vpop.f32.mrf.mxu0  ;;  %v4826_v5 = vld [vmem:[#allocation5 + $0x218] sm:$0xf0]  ;;  %v7019_v12 = vld [vmem:[#allocation5 + $0x4ec] sm:$0xf] }
 0x1a2   :  { %3845 = vmatpush.bf16.msra.mxu1 %v4797_v36  ;;  %v4730_v36 = vld [vmem:[#allocation5 + $0x158] sm:$0xf0]  ;;  %v3607_v42 = vadd.f32 %v3606_v35, %v3594_v10  ;;  %v3619_v43 = vpop.f32.mrf.mxu3  ;;  %v3595_v47 = vpop.f32.mrf.mxu1  ;;  %v7043_v57 = vld [vmem:[#allocation5 + $0x5ac] sm:$0xf] }
 0x1a3   :  { %3858 = vmatpush.bf16.msra.mxu2 %v4925_v39  ;;  %v6935_v39 = vld [vmem:[#allocation5 + $0x24c] sm:$0xf]  ;;  %v4954_v10 = vld [vmem:[#allocation5 + $0x318] sm:$0xf0] }
 0x1a4   :  { %3871 = vmatpush.bf16.msra.mxu3 %v5053_v44  ;;  %v6967_v44 = vld [vmem:[#allocation5 + $0x34c] sm:$0xf]  ;;  %v7758_v49 = vadd.f32 %v3619_v43, %v3607_v42  ;;  %v5194_v14 = vld [vmem:[#allocation5 + $0x4f8] sm:$0xf0] }
 0x1a5   :  { %3833 = vmatpush.bf16.msra.mxu0 %v4653_v50  ;;  %v4733_v50 = vor.u32 %v6903_v32, %v4730_v36  ;;  %v4989_v48 = vor.u32 %v6967_v44, %v4986_v45  ;;  %v5450_v28 = vld [vmem:[#allocation5 + $0x6f8] sm:$0xf0]  ;;  %v4829_v32 = vor.u32 %v6927_v3, %v4826_v5  ;;  %v7015_v43 = vld [vmem:[#allocation5 + $0x4cc] sm:$0xf] }
 0x1a6   :  { %3846 = vmatpush.bf16.msra.mxu1 %v4781_v51  ;;  %v4861_v51 = vor.u32 %v6935_v39, %v4858_v41  ;;  %v5578_v35 = vld [vmem:[#allocation5 + $0x7f8] sm:$0xf0]  ;;  %v5197_v39 = vor.u32 %v7019_v12, %v5194_v14  ;;  %v7047_v45 = vld [vmem:[#allocation5 + $0x5cc] sm:$0xf] }
 0x1a7   :  { %3859 = vmatpush.bf16.msra.mxu2 %v4909_v54  ;;  %v6867_v54 = vld [vmem:[#allocation5 + $0x2c] sm:$0xf]  ;;  %v5178_v44 = vld [vmem:[#allocation5 + $0x4d8] sm:$0xf0] }
 0x1a8   :  { %3872 = vmatpush.bf16.msra.mxu3 %v5037_v55  ;;  %v4714_v55 = vld [vmem:[#allocation5 + $0x138] sm:$0xf0]  ;;  %v4589_v60 = vor.u32 %v6867_v54, %v4586_v52  ;;  %v7079_v47 = vld [vmem:[#allocation5 + $0x6cc] sm:$0xf]  ;;  %v5181_v52 = vor.u32 %v7015_v43, %v5178_v44 }
 0x1a9   :  { %3834 = vmatpush.bf16.msra.mxu0 %v4637_v0  ;;  %v4717_v0 = vor.u32 %v6899_v53, %v4714_v55  ;;  %v3608_v11 = vpop.f32.mrf.mxu2  ;;  %v5562_v54 = vld [vmem:[#allocation5 + $0x7d8] sm:$0xf0]  ;;  %v7011_v55 = vld [vmem:[#allocation5 + $0x4ac] sm:$0xf] }
 0x1aa   :  { %3847 = vmatpush.bf16.msra.mxu1 %v4765_v6  ;;  %v6895_v6 = vld [vmem:[#allocation5 + $0x10c] sm:$0xf]  ;;  %v3621_v17 = vpop.f32.mrf.mxu3  ;;  %v5162_v56 = vld [vmem:[#allocation5 + $0x4b8] sm:$0xf0] }
 0x1ab   :  { %3860 = vmatpush.bf16.msra.mxu2 %v4893_v2  ;;  %v4698_v2 = vld [vmem:[#allocation5 + $0x118] sm:$0xf0]  ;;  %v7039_v5 = vld [vmem:[#allocation5 + $0x58c] sm:$0xf] }
 0x1ac   :  { %3873 = vmatpush.bf16.msra.mxu3 %v5021_v7  ;;  %v6959_v7 = vld [vmem:[#allocation5 + $0x30c] sm:$0xf]  ;;  %v4701_v30 = vor.u32 %v6895_v6, %v4698_v2  ;;  %v5290_v59 = vld [vmem:[#allocation5 + $0x5b8] sm:$0xf0] }
 0x1ad   :  { %3835 = vmatpush.bf16.msra.mxu0 %v4621_v21  ;;  %v4573_v21 = vor.u32 %v6863_v61, %v4570_v63  ;;  %v4957_v36 = vor.u32 %v6959_v7, %v4954_v10  ;;  %v5418_v61 = vld [vmem:[#allocation5 + $0x6b8] sm:$0xf0]  ;;  %v7107_v63 = vld [vmem:[#allocation5 + $0x7ac] sm:$0xf]  ;;  %v5293_v2 = vor.u32 %v7043_v57, %v5290_v59  ;;  %v7449_v7 = vld [vmem:[#allocation7] sm:$0xf] }
 0x1ae   :  { %3848 = vmatpush.bf16.msra.mxu1 %v4749_v29  ;;  %v5322_v29 = vld [vmem:[#allocation5 + $0x5f8] sm:$0xf0]  ;;  %v7007_v6 = vld [vmem:[#allocation5 + $0x48c] sm:$0xf]  ;;  %v641_v10 = vperm.slane %v7449_v7, 2 }
 0x1af   :  { %3861 = vmatpush.bf16.msra.mxu2 %v4877_v24  ;;  %v7083_v24 = vld [vmem:[#allocation5 + $0x6ec] sm:$0xf]  ;;  %v5325_v41 = vor.u32 %v7051_v16, %v5322_v29  ;;  %v5274_v11 = vld [vmem:[#allocation5 + $0x598] sm:$0xf0] }
 0x1b0   :  { %3874 = vmatpush.bf16.msra.mxu3 %v5005_v33  ;;  %v7115_v33 = vld [vmem:[#allocation5 + $0x7ec] sm:$0xf]  ;;  %v5453_v42 = vor.u32 %v7083_v24, %v5450_v28  ;;  %v5130_v24 = vld [vmem:[#allocation5 + $0x478] sm:$0xf0] }
 0x1b1   :  { %3836 = vmatpush.bf16.msra.mxu0 %v4605_v46  ;;  %v5581_v62 = vor.u32 %v7115_v33, %v5578_v35  ;;  %v5306_v46 = vld [vmem:[#allocation5 + $0x5d8] sm:$0xf0]  ;;  %v7071_v12 = vld [vmem:[#allocation5 + $0x68c] sm:$0xf] }
 0x1b2   :  { %3849 = vmatpush.bf16.msra.mxu1 %v4733_v50  ;;  %v5434_v50 = vld [vmem:[#allocation5 + $0x6d8] sm:$0xf0]  ;;  %v5309_v53 = vor.u32 %v7047_v45, %v5306_v46  ;;  %v7103_v14 = vld [vmem:[#allocation5 + $0x78c] sm:$0xf] }
 0x1b3   :  { %3862 = vmatpush.bf16.msra.mxu2 %v4861_v51  ;;  %v7111_v51 = vld [vmem:[#allocation5 + $0x7cc] sm:$0xf]  ;;  %v5258_v35 = vld [vmem:[#allocation5 + $0x578] sm:$0xf0] }
 0x1b4   :  { %3875 = vmatpush.bf16.msra.mxu3 %v4989_v48  ;;  %v5437_v48 = vor.u32 %v7079_v47, %v5434_v50  ;;  %v5565_v58 = vor.u32 %v7111_v51, %v5562_v54  ;;  %v7003_v29 = vld [vmem:[#allocation5 + $0x46c] sm:$0xf]  ;;  %v5114_v47 = vld [vmem:[#allocation5 + $0x458] sm:$0xf0] }
 0x1b5   :  { %3837 = vmatpush.bf16.msra.mxu0 %v4589_v60  ;;  %v7075_v60 = vld [vmem:[#allocation5 + $0x6ac] sm:$0xf]  ;;  %v5133_v44 = vor.u32 %v7003_v29, %v5130_v24 }
 0x1b6   :  { %3850 = vmatpush.bf16.msra.mxu1 %v4717_v0  ;;  %v5546_v0 = vld [vmem:[#allocation5 + $0x7b8] sm:$0xf0]  ;;  %v5421_v3 = vor.u32 %v7075_v60, %v5418_v61  ;;  %v7035_v28 = vld [vmem:[#allocation5 + $0x56c] sm:$0xf] }
 0x1b7   :  { %3863 = vmatpush.bf16.msra.mxu2 %v4845_v1  ;;  %v5165_v1 = vor.u32 %v7011_v55, %v5162_v56  ;;  %v5261_v45 = vor.u32 %v7035_v28, %v5258_v35  ;;  %v6999_v46 = vld [vmem:[#allocation5 + $0x44c] sm:$0xf]  ;;  %v5338_v28 = vld [vmem:[#allocation5 + $0x618] sm:$0xf0] }
 0x1b8   :  { %3876 = vmatpush.bf16.msra.mxu3 %v4973_v4  ;;  %v5146_v4 = vld [vmem:[#allocation5 + $0x498] sm:$0xf0]  ;;  %v7031_v50 = vld [vmem:[#allocation5 + $0x54c] sm:$0xf]  ;;  %v5117_v59 = vor.u32 %v6999_v46, %v5114_v47 }
 0x1b9   :  { %3838 = vmatpush.bf16.msra.mxu0 %v4573_v21  ;;  %v5149_v16 = vor.u32 %v7007_v6, %v5146_v4  ;;  %v3632_v17 = vpop.f32.mrf.mxu0  ;;  %v7095_v57 = vld [vmem:[#allocation5 + $0x74c] sm:$0xf]  ;;  %v5098_v6 = vld [vmem:[#allocation5 + $0x438] sm:$0xf0] }
 0x1ba   :  { %3851 = vmatpush.bf16.msra.mxu1 %v4701_v30  ;;  %v3633_v30 = vadd.f32 %v3632_v17, %v641_v10  ;;  %v7059_v7 = vld [vmem:[#allocation5 + $0x62c] sm:$0xf]  ;;  %v5354_v10 = vld [vmem:[#allocation5 + $0x638] sm:$0xf0] }
 0x1bb   :  { %3864 = vmatpush.bf16.msra.mxu2 %v4829_v32  ;;  %v3645_v32 = vpop.f32.mrf.mxu1  ;;  %v7023_v17 = vld [vmem:[#allocation5 + $0x50c] sm:$0xf]  ;;  %v6090_v47 = vld [vmem:[#allocation5 + $0xbf8] sm:$0xf0] }
 0x1bc   :  { %3877 = vmatpush.bf16.msra.mxu3 %v4957_v36  ;;  %3839 = vmatmul.bf16.vlgmr.msra.gmra.mxu0 %v7660_v9  ;;  %v5402_v9 = vld [vmem:[#allocation5 + $0x698] sm:$0xf0]  ;;  %v7067_v36 = vld [vmem:[#allocation5 + $0x66c] sm:$0xf]  ;;  %v3646_v43 = vadd.f32 %v3645_v32, %v3633_v30 }
 0x1bd   :  { %3883 = vmatpush.bf16.msrb.mxu0 %v5197_v39  ;;  %3852 = vmatmul.bf16.vlgmr.msra.gmra.mxu1 %v7667_v25  ;;  %v5277_v25 = vor.u32 %v7039_v5, %v5274_v11  ;;  %v5405_v21 = vor.u32 %v7071_v12, %v5402_v9  ;;  %v5386_v39 = vld [vmem:[#allocation5 + $0x678] sm:$0xf0]  ;;  %v6991_v9 = vld [vmem:[#allocation5 + $0x40c] sm:$0xf] }
 0x1be   :  { %3896 = vmatpush.bf16.msrb.mxu1 %v5325_v41  ;;  %3865 = vmatmul.bf16.vlgmr.msra.gmra.mxu2 %v7658_v8  ;;  %v5549_v8 = vor.u32 %v7107_v63, %v5546_v0  ;;  %v7099_v41 = vld [vmem:[#allocation5 + $0x76c] sm:$0xf]  ;;  %v5226_v5 = vld [vmem:[#allocation5 + $0x538] sm:$0xf0] }
 0x1bf   :  { %3909 = vmatpush.bf16.msrb.mxu2 %v5453_v42  ;;  %3878 = vmatmul.bf16.vlgmr.msra.gmra.mxu3 %v7662_v15  ;;  %v5530_v15 = vld [vmem:[#allocation5 + $0x798] sm:$0xf0]  ;;  %v7087_v30 = vld [vmem:[#allocation5 + $0x70c] sm:$0xf] }
 0x1c0   :  { %3922 = vmatpush.bf16.msrb.mxu3 %v5581_v62  ;;  %v5533_v33 = vor.u32 %v7103_v14, %v5530_v15  ;;  %v5514_v42 = vld [vmem:[#allocation5 + $0x778] sm:$0xf0]  ;;  %v5389_v62 = vor.u32 %v7067_v36, %v5386_v39  ;;  %v7147_v35 = vld [vmem:[#allocation5 + $0x8ec] sm:$0xf] }
 0x1c1   :  { %3884 = vmatpush.bf16.msrb.mxu0 %v5181_v52  ;;  %v3658_v51 = vpop.f32.mrf.mxu2  ;;  %v5517_v54 = vor.u32 %v7099_v41, %v5514_v42  ;;  %v5242_v52 = vld [vmem:[#allocation5 + $0x558] sm:$0xf0]  ;;  %v3634_v61 = vpop.f32.mrf.mxu0  ;;  %v7179_v39 = vld [vmem:[#allocation5 + $0x9ec] sm:$0xf] }
 0x1c2   :  { %3897 = vmatpush.bf16.msrb.mxu1 %v5309_v53  ;;  %v7063_v53 = vld [vmem:[#allocation5 + $0x64c] sm:$0xf]  ;;  %v3659_v55 = vadd.f32 %v3658_v51, %v3646_v43  ;;  %v3671_v56 = vpop.f32.mrf.mxu3  ;;  %v5245_v63 = vor.u32 %v7031_v50, %v5242_v52  ;;  %v5482_v11 = vld [vmem:[#allocation5 + $0x738] sm:$0xf0] }
 0x1c3   :  { %3910 = vmatpush.bf16.msrb.mxu2 %v5437_v48  ;;  %v5370_v48 = vld [vmem:[#allocation5 + $0x658] sm:$0xf0]  ;;  %v7211_v43 = vld [vmem:[#allocation5 + $0xaec] sm:$0xf] }
 0x1c4   :  { %3923 = vmatpush.bf16.msrb.mxu3 %v5565_v58  ;;  %v5498_v58 = vld [vmem:[#allocation5 + $0x758] sm:$0xf0]  ;;  %v7764_v60 = vadd.f32 %v3671_v56, %v3659_v55  ;;  %v5373_v0 = vor.u32 %v7063_v53, %v5370_v48  ;;  %v7243_v46 = vld [vmem:[#allocation5 + $0xbec] sm:$0xf] }
 0x1c5   :  { %3885 = vmatpush.bf16.msrb.mxu0 %v5165_v1  ;;  %v6995_v1 = vld [vmem:[#allocation5 + $0x42c] sm:$0xf]  ;;  %v5501_v4 = vor.u32 %v7095_v57, %v5498_v58  ;;  %v5082_v14 = vld [vmem:[#allocation5 + $0x418] sm:$0xf0]  ;;  %v6093_v56 = vor.u32 %v7243_v46, %v6090_v47 }
 0x1c6   :  { %3898 = vmatpush.bf16.msrb.mxu1 %v5293_v2  ;;  %v7027_v2 = vld [vmem:[#allocation5 + $0x52c] sm:$0xf]  ;;  %v5101_v12 = vor.u32 %v6995_v1, %v5098_v6  ;;  %v5466_v32 = vld [vmem:[#allocation5 + $0x718] sm:$0xf0]  ;;  %v5085_v41 = vor.u32 %v6991_v9, %v5082_v14 }
 0x1c7   :  { %3911 = vmatpush.bf16.msrb.mxu2 %v5421_v3  ;;  %v3647_v3 = vpop.f32.mrf.mxu1  ;;  %v5229_v15 = vor.u32 %v7027_v2, %v5226_v5  ;;  %v5706_v36 = vld [vmem:[#allocation5 + $0x8f8] sm:$0xf0]  ;;  %v5469_v50 = vor.u32 %v7087_v30, %v5466_v32  ;;  %v7143_v53 = vld [vmem:[#allocation5 + $0x8cc] sm:$0xf] }
 0x1c8   :  { %3924 = vmatpush.bf16.msrb.mxu3 %v5549_v8  ;;  %v7091_v8 = vld [vmem:[#allocation5 + $0x72c] sm:$0xf]  ;;  %v5834_v42 = vld [vmem:[#allocation5 + $0x9f8] sm:$0xf0]  ;;  %v5709_v51 = vor.u32 %v7147_v35, %v5706_v36 }
 0x1c9   :  { %3886 = vmatpush.bf16.msrb.mxu0 %v5149_v16  ;;  %v5357_v16 = vor.u32 %v7059_v7, %v5354_v10  ;;  %v3660_v29 = vpop.f32.mrf.mxu2  ;;  %v5485_v24 = vor.u32 %v7091_v8, %v5482_v11  ;;  %v5690_v48 = vld [vmem:[#allocation5 + $0x8d8] sm:$0xf0]  ;;  %v7175_v55 = vld [vmem:[#allocation5 + $0x9cc] sm:$0xf] }
 0x1ca   :  { %3899 = vmatpush.bf16.msrb.mxu1 %v5277_v25  ;;  %v5210_v25 = vld [vmem:[#allocation5 + $0x518] sm:$0xf0]  ;;  %v7207_v58 = vld [vmem:[#allocation5 + $0xacc] sm:$0xf] }
 0x1cb   :  { %3912 = vmatpush.bf16.msrb.mxu2 %v5405_v21  ;;  %v7055_v21 = vld [vmem:[#allocation5 + $0x60c] sm:$0xf]  ;;  %v5818_v57 = vld [vmem:[#allocation5 + $0x9d8] sm:$0xf0] }
 0x1cc   :  { %3925 = vmatpush.bf16.msrb.mxu3 %v5533_v33  ;;  %v3673_v33 = vpop.f32.mrf.mxu3  ;;  %v7239_v61 = vld [vmem:[#allocation5 + $0xbcc] sm:$0xf]  ;;  %v5821_v1 = vor.u32 %v7175_v55, %v5818_v57  ;;  %v5674_v3 = vld [vmem:[#allocation5 + $0x8b8] sm:$0xf0] }
 0x1cd   :  { %3887 = vmatpush.bf16.msrb.mxu0 %v5133_v44  ;;  %v5962_v44 = vld [vmem:[#allocation5 + $0xaf8] sm:$0xf0]  ;;  %v7139_v2 = vld [vmem:[#allocation5 + $0x8ac] sm:$0xf] }
 0x1ce   :  { %3900 = vmatpush.bf16.msrb.mxu1 %v5261_v45  ;;  %v5213_v45 = vor.u32 %v7023_v17, %v5210_v25  ;;  %v5965_v52 = vor.u32 %v7211_v43, %v5962_v44  ;;  %v5802_v7 = vld [vmem:[#allocation5 + $0x9b8] sm:$0xf0]  ;;  %v7203_v10 = vld [vmem:[#allocation5 + $0xaac] sm:$0xf]  ;;  %v5677_v9 = vor.u32 %v7139_v2, %v5674_v3 }
 0x1cf   :  { %3913 = vmatpush.bf16.msrb.mxu2 %v5389_v62  ;;  %v5341_v62 = vor.u32 %v7055_v21, %v5338_v28  ;;  %v5930_v8 = vld [vmem:[#allocation5 + $0xab8] sm:$0xf0]  ;;  %v7235_v11 = vld [vmem:[#allocation5 + $0xbac] sm:$0xf] }
 0x1d0   :  { %3926 = vmatpush.bf16.msrb.mxu3 %v5517_v54  ;;  %v5837_v54 = vor.u32 %v7179_v39, %v5834_v42  ;;  %v5658_v17 = vld [vmem:[#allocation5 + $0x898] sm:$0xf0]  ;;  %v7199_v29 = vld [vmem:[#allocation5 + $0xa8c] sm:$0xf] }
 0x1d1   :  { %3888 = vmatpush.bf16.msrb.mxu0 %v5117_v59  ;;  %v5946_v59 = vld [vmem:[#allocation5 + $0xad8] sm:$0xf0]  ;;  %v7231_v28 = vld [vmem:[#allocation5 + $0xb8c] sm:$0xf] }
 0x1d2   :  { %3901 = vmatpush.bf16.msrb.mxu1 %v5245_v63  ;;  %v6074_v63 = vld [vmem:[#allocation5 + $0xbd8] sm:$0xf0]  ;;  %v5949_v6 = vor.u32 %v7207_v58, %v5946_v59  ;;  %v7131_v33 = vld [vmem:[#allocation5 + $0x86c] sm:$0xf] }
 0x1d3   :  { %3914 = vmatpush.bf16.msrb.mxu2 %v5373_v0  ;;  %v5693_v0 = vor.u32 %v7143_v53, %v5690_v48  ;;  %v6077_v5 = vor.u32 %v7239_v61, %v6074_v63  ;;  %v5786_v21 = vld [vmem:[#allocation5 + $0x998] sm:$0xf0]  ;;  %v7163_v36 = vld [vmem:[#allocation5 + $0x96c] sm:$0xf] }
 0x1d4   :  { %3927 = vmatpush.bf16.msrb.mxu3 %v5501_v4  ;;  %v7171_v4 = vld [vmem:[#allocation5 + $0x9ac] sm:$0xf]  ;;  %v5642_v35 = vld [vmem:[#allocation5 + $0x878] sm:$0xf0] }
 0x1d5   :  { %3889 = vmatpush.bf16.msrb.mxu0 %v5101_v12  ;;  %v6058_v12 = vld [vmem:[#allocation5 + $0xbb8] sm:$0xf0]  ;;  %v5805_v14 = vor.u32 %v7171_v4, %v5802_v7  ;;  %v7195_v43 = vld [vmem:[#allocation5 + $0xa6c] sm:$0xf]  ;;  %v5645_v46 = vor.u32 %v7131_v33, %v5642_v35 }
 0x1d6   :  { %3902 = vmatpush.bf16.msrb.mxu1 %v5229_v15  ;;  %v5933_v15 = vor.u32 %v7203_v10, %v5930_v8  ;;  %v6061_v25 = vor.u32 %v7235_v11, %v6058_v12  ;;  %v5770_v42 = vld [vmem:[#allocation5 + $0x978] sm:$0xf0]  ;;  %v7223_v59 = vld [vmem:[#allocation5 + $0xb4c] sm:$0xf] }
 0x1d7   :  { %3915 = vmatpush.bf16.msrb.mxu2 %v5357_v16  ;;  %v7135_v16 = vld [vmem:[#allocation5 + $0x88c] sm:$0xf]  ;;  %v5898_v44 = vld [vmem:[#allocation5 + $0xa78] sm:$0xf0]  ;;  %v5773_v47 = vor.u32 %v7163_v36, %v5770_v42 }
 0x1d8   :  { %3928 = vmatpush.bf16.msrb.mxu3 %v5485_v24  ;;  %v5914_v24 = vld [vmem:[#allocation5 + $0xa98] sm:$0xf0]  ;;  %v7123_v2 = vld [vmem:[#allocation5 + $0x82c] sm:$0xf] }
 0x1d9   :  { %3890 = vmatpush.bf16.msrb.mxu0 %v5085_v41  ;;  %v7770_v30 = vpop.f32.mrf.mxu0  ;;  %v5917_v32 = vor.u32 %v7199_v29, %v5914_v24  ;;  %v5754_v55 = vld [vmem:[#allocation5 + $0x958] sm:$0xf0]  ;;  %v7155_v4 = vld [vmem:[#allocation5 + $0x92c] sm:$0xf] }
 0x1da   :  { %3903 = vmatpush.bf16.msrb.mxu1 %v5213_v45  ;;  %v7772_v39 = vpop.f32.mrf.mxu1  ;;  %v7227_v45 = vld [vmem:[#allocation5 + $0xb6c] sm:$0xf]  ;;  %v5882_v57 = vld [vmem:[#allocation5 + $0xa58] sm:$0xf0] }
 0x1db   :  { %3916 = vmatpush.bf16.msrb.mxu2 %v5341_v62  ;;  %v6026_v62 = vld [vmem:[#allocation5 + $0xb78] sm:$0xf0]  ;;  %v7187_v8 = vld [vmem:[#allocation5 + $0xa2c] sm:$0xf] }
 0x1dc   :  { %3929 = vmatpush.bf16.msrb.mxu3 %v5469_v50  ;;  %3891 = vmatmul.bf16.vlgmr.msrb.gmra.mxu0 %v7672_v37  ;;  %v6042_v37 = vld [vmem:[#allocation5 + $0xb98] sm:$0xf0]  ;;  %v5901_v50 = vor.u32 %v7195_v43, %v5898_v44  ;;  %v6029_v48 = vor.u32 %v7227_v45, %v6026_v62  ;;  %v7219_v12 = vld [vmem:[#allocation5 + $0xb2c] sm:$0xf] }
 0x1dd   :  { %3935 = vmatpush.bf16.msra.mxu0 %v5709_v51  ;;  %3904 = vmatmul.bf16.vlgmr.msrb.gmra.mxu1 %v7676_v40  ;;  %v6045_v41 = vor.u32 %v7231_v28, %v6042_v37  ;;  %v7127_v51 = vld [vmem:[#allocation5 + $0x84c] sm:$0xf]  ;;  %v6010_v61 = vld [vmem:[#allocation5 + $0xb58] sm:$0xf0] }
 0x1de   :  { %3948 = vmatpush.bf16.msra.mxu1 %v5837_v54  ;;  %3917 = vmatmul.bf16.vlgmr.msrb.gmra.mxu2 %v7670_v34  ;;  %v7167_v34 = vld [vmem:[#allocation5 + $0x98c] sm:$0xf]  ;;  %v5626_v54 = vld [vmem:[#allocation5 + $0x858] sm:$0xf0]  ;;  %v6013_v7 = vor.u32 %v7223_v59, %v6010_v61 }
 0x1df   :  { %3961 = vmatpush.bf16.msra.mxu2 %v5965_v52  ;;  %3930 = vmatmul.bf16.vlgmr.msrb.gmra.mxu3 %v7674_v38  ;;  %v5661_v38 = vor.u32 %v7135_v16, %v5658_v17  ;;  %v5789_v40 = vor.u32 %v7167_v34, %v5786_v21  ;;  %v7159_v52 = vld [vmem:[#allocation5 + $0x94c] sm:$0xf]  ;;  %v5629_v63 = vor.u32 %v7127_v51, %v5626_v54  ;;  %v5610_v3 = vld [vmem:[#allocation5 + $0x838] sm:$0xf0] }
 0x1e0   :  { %3974 = vmatpush.bf16.msra.mxu3 %v6093_v56  ;;  %v7191_v56 = vld [vmem:[#allocation5 + $0xa4c] sm:$0xf]  ;;  %v5738_v10 = vld [vmem:[#allocation5 + $0x938] sm:$0xf0] }
 0x1e1   :  { %3936 = vmatpush.bf16.msra.mxu0 %v5693_v0  ;;  %v7774_v53 = vpop.f32.mrf.mxu2  ;;  %v3686_v0 = vpop.f32.mrf.mxu0  ;;  %v5866_v11 = vld [vmem:[#allocation5 + $0xa38] sm:$0xf0]  ;;  %v5741_v17 = vor.u32 %v7155_v4, %v5738_v10  ;;  %v7183_v29 = vld [vmem:[#allocation5 + $0xa0c] sm:$0xf] }
 0x1e2   :  { %3949 = vmatpush.bf16.msra.mxu1 %v5821_v1  ;;  %v7776_v58 = vpop.f32.mrf.mxu3  ;;  %v5757_v1 = vor.u32 %v7159_v52, %v5754_v55  ;;  %v5594_v16 = vld [vmem:[#allocation5 + $0x818] sm:$0xf0]  ;;  %v5869_v34 = vor.u32 %v7187_v8, %v5866_v11  ;;  %v7275_v33 = vld [vmem:[#allocation5 + $0xcec] sm:$0xf] }
 0x1e3   :  { %3962 = vmatpush.bf16.msra.mxu2 %v5949_v6  ;;  %v5885_v6 = vor.u32 %v7191_v56, %v5882_v57  ;;  %v5722_v21 = vld [vmem:[#allocation5 + $0x918] sm:$0xf0]  ;;  %v7307_v36 = vld [vmem:[#allocation5 + $0xdec] sm:$0xf] }
 0x1e4   :  { %3975 = vmatpush.bf16.msra.mxu3 %v6077_v5  ;;  %v3699_v5 = vpop.f32.mrf.mxu1  ;;  %v5850_v37 = vld [vmem:[#allocation5 + $0xa18] sm:$0xf0]  ;;  %v7339_v43 = vld [vmem:[#allocation5 + $0xeec] sm:$0xf] }
 0x1e5   :  { %3937 = vmatpush.bf16.msra.mxu0 %v5677_v9  ;;  %v5994_v9 = vld [vmem:[#allocation5 + $0xb38] sm:$0xf0]  ;;  %v5853_v62 = vor.u32 %v7183_v29, %v5850_v37  ;;  %v7303_v56 = vld [vmem:[#allocation5 + $0xdcc] sm:$0xf] }
 0x1e6   :  { %3950 = vmatpush.bf16.msra.mxu1 %v5805_v14  ;;  %v5613_v14 = vor.u32 %v7123_v2, %v5610_v3  ;;  %v5997_v28 = vor.u32 %v7219_v12, %v5994_v9  ;;  %v6218_v35 = vld [vmem:[#allocation5 + $0xcf8] sm:$0xf0]  ;;  %v7335_v61 = vld [vmem:[#allocation5 + $0xecc] sm:$0xf] }
 0x1e7   :  { %3963 = vmatpush.bf16.msra.mxu2 %v5933_v15  ;;  %v7119_v15 = vld [vmem:[#allocation5 + $0x80c] sm:$0xf]  ;;  %v6346_v42 = vld [vmem:[#allocation5 + $0xdf8] sm:$0xf0]  ;;  %v6221_v51 = vor.u32 %v7275_v33, %v6218_v35 }
 0x1e8   :  { %3976 = vmatpush.bf16.msra.mxu3 %v6061_v25  ;;  %v7151_v25 = vld [vmem:[#allocation5 + $0x90c] sm:$0xf]  ;;  %v6474_v44 = vld [vmem:[#allocation5 + $0xef8] sm:$0xf0]  ;;  %v6349_v54 = vor.u32 %v7307_v36, %v6346_v42 }
 0x1e9   :  { %3938 = vmatpush.bf16.msra.mxu0 %v5661_v38  ;;  %v3712_v24 = vpop.f32.mrf.mxu2  ;;  %v7215_v38 = vld [vmem:[#allocation5 + $0xb0c] sm:$0xf]  ;;  %v5725_v45 = vor.u32 %v7151_v25, %v5722_v21  ;;  %v6477_v52 = vor.u32 %v7339_v43, %v6474_v44  ;;  %v6202_v55 = vld [vmem:[#allocation5 + $0xcd8] sm:$0xf0] }
 0x1ea   :  { %3951 = vmatpush.bf16.msra.mxu1 %v5789_v40  ;;  %v5978_v40 = vld [vmem:[#allocation5 + $0xb18] sm:$0xf0]  ;;  %v7367_v0 = vld [vmem:[#allocation5 + $0xfcc] sm:$0xf] }
 0x1eb   :  { %3964 = vmatpush.bf16.msra.mxu2 %v5917_v32  ;;  %v3725_v32 = vpop.f32.mrf.mxu3  ;;  %v6330_v59 = vld [vmem:[#allocation5 + $0xdd8] sm:$0xf0]  ;;  %v7267_v4 = vld [vmem:[#allocation5 + $0xcac] sm:$0xf] }
 0x1ec   :  { %3977 = vmatpush.bf16.msra.mxu3 %v6045_v41  ;;  %v5597_v41 = vor.u32 %v7119_v15, %v5594_v16  ;;  %v6333_v2 = vor.u32 %v7303_v56, %v6330_v59  ;;  %v6186_v5 = vld [vmem:[#allocation5 + $0xcb8] sm:$0xf0]  ;;  %v7331_v11 = vld [vmem:[#allocation5 + $0xeac] sm:$0xf] }
 0x1ed   :  { %3939 = vmatpush.bf16.msra.mxu0 %v5645_v46  ;;  %v7371_v46 = vld [vmem:[#allocation5 + $0xfec] sm:$0xf]  ;;  %v6314_v8 = vld [vmem:[#allocation5 + $0xdb8] sm:$0xf0]  ;;  %v6189_v15 = vor.u32 %v7267_v4, %v6186_v5 }
 0x1ee   :  { %3952 = vmatpush.bf16.msra.mxu1 %v5773_v47  ;;  %v6602_v47 = vld [vmem:[#allocation5 + $0xff8] sm:$0xf0]  ;;  %v7363_v9 = vld [vmem:[#allocation5 + $0xfac] sm:$0xf] }
 0x1ef   :  { %3965 = vmatpush.bf16.msra.mxu2 %v5901_v50  ;;  %v5981_v50 = vor.u32 %v7215_v38, %v5978_v40  ;;  %v6605_v57 = vor.u32 %v7371_v46, %v6602_v47  ;;  %v6442_v12 = vld [vmem:[#allocation5 + $0xeb8] sm:$0xf0]  ;;  %v7295_v25 = vld [vmem:[#allocation5 + $0xd8c] sm:$0xf] }
 0x1f0   :  { %3978 = vmatpush.bf16.msra.mxu3 %v6029_v48  ;;  %v7271_v48 = vld [vmem:[#allocation5 + $0xccc] sm:$0xf]  ;;  %v6298_v29 = vld [vmem:[#allocation5 + $0xd98] sm:$0xf0] }
 0x1f1   :  { %3940 = vmatpush.bf16.msra.mxu0 %v5629_v63  ;;  %v6458_v63 = vld [vmem:[#allocation5 + $0xed8] sm:$0xf0]  ;;  %v7327_v24 = vld [vmem:[#allocation5 + $0xe8c] sm:$0xf]  ;;  %v6301_v40 = vor.u32 %v7295_v25, %v6298_v29 }
 0x1f2   :  { %3953 = vmatpush.bf16.msra.mxu1 %v5757_v1  ;;  %v6586_v1 = vld [vmem:[#allocation5 + $0xfd8] sm:$0xf0]  ;;  %v6461_v3 = vor.u32 %v7335_v61, %v6458_v63  ;;  %v7259_v33 = vld [vmem:[#allocation5 + $0xc6c] sm:$0xf] }
 0x1f3   :  { %3966 = vmatpush.bf16.msra.mxu2 %v5885_v6  ;;  %v6205_v6 = vor.u32 %v7271_v48, %v6202_v55  ;;  %v6589_v10 = vor.u32 %v7367_v0, %v6586_v1  ;;  %v6554_v37 = vld [vmem:[#allocation5 + $0xf98] sm:$0xf0]  ;;  %v7291_v36 = vld [vmem:[#allocation5 + $0xd6c] sm:$0xf] }
 0x1f4   :  { %3979 = vmatpush.bf16.msra.mxu3 %v6013_v7  ;;  %v7299_v7 = vld [vmem:[#allocation5 + $0xdac] sm:$0xf]  ;;  %v6154_v35 = vld [vmem:[#allocation5 + $0xc78] sm:$0xf0] }
 0x1f5   :  { %3941 = vmatpush.bf16.msra.mxu0 %v5613_v14  ;;  %v6570_v14 = vld [vmem:[#allocation5 + $0xfb8] sm:$0xf0]  ;;  %v6317_v16 = vor.u32 %v7299_v7, %v6314_v8  ;;  %v7323_v43 = vld [vmem:[#allocation5 + $0xe6c] sm:$0xf]  ;;  %v6157_v46 = vor.u32 %v7259_v33, %v6154_v35  ;;  %v6664_v33 = vld [vmem:[#allocation8 + $0x70] sm:$0xf] }
 0x1f6   :  { %3954 = vmatpush.bf16.msra.mxu1 %v5741_v17  ;;  %v6445_v17 = vor.u32 %v7331_v11, %v6442_v12  ;;  %v6573_v21 = vor.u32 %v7363_v9, %v6570_v14  ;;  %v6282_v42 = vld [vmem:[#allocation5 + $0xd78] sm:$0xf0]  ;;  %v7351_v63 = vld [vmem:[#allocation5 + $0xf4c] sm:$0xf] }
 0x1f7   :  { %3967 = vmatpush.bf16.msra.mxu2 %v5869_v34  ;;  %v7263_v34 = vld [vmem:[#allocation5 + $0xc8c] sm:$0xf]  ;;  %v6410_v44 = vld [vmem:[#allocation5 + $0xe78] sm:$0xf0]  ;;  %v6285_v47 = vor.u32 %v7291_v36, %v6282_v42 }
 0x1f8   :  { %3980 = vmatpush.bf16.msra.mxu3 %v5997_v28  ;;  %v6266_v56 = vld [vmem:[#allocation5 + $0xd58] sm:$0xf0]  ;;  %v7251_v5 = vld [vmem:[#allocation5 + $0xc2c] sm:$0xf] }
 0x1f9   :  { %3942 = vmatpush.bf16.msra.mxu0 %v5597_v41  ;;  %v7782_v28 = vpop.f32.mrf.mxu0  ;;  %v6394_v59 = vld [vmem:[#allocation5 + $0xe58] sm:$0xf0]  ;;  %v7315_v12 = vld [vmem:[#allocation5 + $0xe2c] sm:$0xf] }
 0x1fa   :  { %3955 = vmatpush.bf16.msra.mxu1 %v5725_v45  ;;  %v7784_v38 = vpop.f32.mrf.mxu1  ;;  %v7355_v45 = vld [vmem:[#allocation5 + $0xf6c] sm:$0xf]  ;;  %v6522_v0 = vld [vmem:[#allocation5 + $0xf58] sm:$0xf0] }
 0x1fb   :  { %3968 = vmatpush.bf16.msra.mxu2 %v5853_v62  ;;  %v6538_v62 = vld [vmem:[#allocation5 + $0xf78] sm:$0xf0]  ;;  %v6525_v8 = vor.u32 %v7351_v63, %v6522_v0  ;;  %v7347_v14 = vld [vmem:[#allocation5 + $0xf2c] sm:$0xf] }
 0x1fc   :  { %3981 = vmatpush.bf16.msra.mxu3 %v5981_v50  ;;  %3943 = vmatmul.bf16.vlgmr.msra.gmra.mxu0 %v7682_v18  ;;  %v6170_v18 = vld [vmem:[#allocation5 + $0xc98] sm:$0xf0]  ;;  %v6413_v50 = vor.u32 %v7323_v43, %v6410_v44  ;;  %v6541_v48 = vor.u32 %v7355_v45, %v6538_v62  ;;  %v7279_v29 = vld [vmem:[#allocation5 + $0xd0c] sm:$0xf]  ;;  %v6792_v43 = vld [vmem:[#allocation8 + $0x170] sm:$0xf] }
 0x1fd   :  { %3987 = vmatpush.bf16.msrb.mxu0 %v6221_v51  ;;  %3956 = vmatmul.bf16.vlgmr.msra.gmra.mxu1 %v7686_v23  ;;  %v7359_v23 = vld [vmem:[#allocation5 + $0xf8c] sm:$0xf]  ;;  %v6122_v7 = vld [vmem:[#allocation5 + $0xc38] sm:$0xf0] }
 0x1fe   :  { %4000 = vmatpush.bf16.msrb.mxu1 %v6349_v54  ;;  %3969 = vmatmul.bf16.vlgmr.msra.gmra.mxu2 %v7684_v22  ;;  %v6426_v22 = vld [vmem:[#allocation5 + $0xe98] sm:$0xf0]  ;;  %v6557_v41 = vor.u32 %v7359_v23, %v6554_v37  ;;  %v7255_v51 = vld [vmem:[#allocation5 + $0xc4c] sm:$0xf] }
 0x1ff   :  { %4013 = vmatpush.bf16.msrb.mxu2 %v6477_v52  ;;  %3982 = vmatmul.bf16.vlgmr.msra.gmra.mxu3 %v7688_v27  ;;  %v6173_v27 = vor.u32 %v7263_v34, %v6170_v18  ;;  %v6429_v32 = vor.u32 %v7327_v24, %v6426_v22  ;;  %v6138_v54 = vld [vmem:[#allocation5 + $0xc58] sm:$0xf0]  ;;  %v7287_v52 = vld [vmem:[#allocation5 + $0xd4c] sm:$0xf] }
 0x200   :  { %4026 = vmatpush.bf16.msrb.mxu3 %v6605_v57  ;;  %v7319_v57 = vld [vmem:[#allocation5 + $0xe4c] sm:$0xf]  ;;  %v6250_v11 = vld [vmem:[#allocation5 + $0xd38] sm:$0xf0] }
 0x201   :  { %3988 = vmatpush.bf16.msrb.mxu0 %v6205_v6  ;;  %v7786_v55 = vpop.f32.mrf.mxu2  ;;  %v3738_v1 = vpop.f32.mrf.mxu0  ;;  %v6141_v6 = vor.u32 %v7255_v51, %v6138_v54  ;;  %v6397_v4 = vor.u32 %v7319_v57, %v6394_v59  ;;  %v6378_v9 = vld [vmem:[#allocation5 + $0xe38] sm:$0xf0]  ;;  %v7247_v34 = vld [vmem:[#allocation5 + $0xc0c] sm:$0xf]  ;;  %v6656_v54 = vld [vmem:[#allocation8 + $0x60] sm:$0xf] }
 0x202   :  { %4001 = vmatpush.bf16.msrb.mxu1 %v6333_v2  ;;  %v7788_v61 = vpop.f32.mrf.mxu3  ;;  %v3751_v2 = vpop.f32.mrf.mxu1  ;;  %v6106_v18 = vld [vmem:[#allocation5 + $0xc18] sm:$0xf0]  ;;  %v7311_v22 = vld [vmem:[#allocation5 + $0xe0c] sm:$0xf]  ;;  %v6784_v57 = vld [vmem:[#allocation8 + $0x160] sm:$0xf] }
 0x203   :  { %4014 = vmatpush.bf16.msrb.mxu2 %v6461_v3  ;;  %v6269_v3 = vor.u32 %v7287_v52, %v6266_v56  ;;  %v6234_v24 = vld [vmem:[#allocation5 + $0xd18] sm:$0xf0]  ;;  %v7387_v52 = vld [vmem:[#allocation8 + $0x64] sm:$0xf0] }
 0x204   :  { %4027 = vmatpush.bf16.msrb.mxu3 %v6589_v10  ;;  %v7283_v10 = vld [vmem:[#allocation5 + $0xd2c] sm:$0xf]  ;;  %v6362_v37 = vld [vmem:[#allocation5 + $0xe18] sm:$0xf0]  ;;  %v6237_v45 = vor.u32 %v7279_v29, %v6234_v24  ;;  %v6657_v63 = vor.u32 %v7387_v52, %v6656_v54  ;;  %v6744_v52 = vld [vmem:[#allocation8 + $0x110] sm:$0xf] }
 0x205   :  { %3989 = vmatpush.bf16.msrb.mxu0 %v6189_v15  ;;  %v6506_v15 = vld [vmem:[#allocation5 + $0xf38] sm:$0xf0]  ;;  %v6253_v25 = vor.u32 %v7283_v10, %v6250_v11  ;;  %v6365_v62 = vor.u32 %v7311_v22, %v6362_v37  ;;  %v7419_v59 = vld [vmem:[#allocation8 + $0x164] sm:$0xf0]  ;;  %v6760_v22 = vld [vmem:[#allocation8 + $0x130] sm:$0xf] }
 0x206   :  { %4002 = vmatpush.bf16.msrb.mxu1 %v6317_v16  ;;  %v3685_v16 = vadd.f32 %v7770_v30, %v7764_v60  ;;  %v6509_v23 = vor.u32 %v7347_v14, %v6506_v15  ;;  %v7389_v35 = vld [vmem:[#allocation8 + $0x74] sm:$0xf0]  ;;  %v6728_v60 = vld [vmem:[#allocation8 + $0xf0] sm:$0xf]  ;;  %v6785_v1 = vor.u32 %v7419_v59, %v6784_v57  ;;  %v7399_v14 = vld [vmem:[#allocation8 + $0xc4] sm:$0xf0] }
 0x207   :  { %4015 = vmatpush.bf16.msrb.mxu2 %v6445_v17  ;;  %v6125_v17 = vor.u32 %v7251_v5, %v6122_v7  ;;  %v7405_v42 = vld [vmem:[#allocation8 + $0xf4] sm:$0xf0]  ;;  %v6776_v5 = vld [vmem:[#allocation8 + $0x150] sm:$0xf]  ;;  %v7415_v15 = vld [vmem:[#allocation8 + $0x144] sm:$0xf0] }
 0x208   :  { %4028 = vmatpush.bf16.msrb.mxu3 %v6573_v21  ;;  %v6381_v21 = vor.u32 %v7315_v12, %v6378_v9  ;;  %v3698_v36 = vadd.f32 %v7772_v39, %v3685_v16  ;;  %v7421_v44 = vld [vmem:[#allocation8 + $0x174] sm:$0xf0]  ;;  %v7403_v39 = vld [vmem:[#allocation8 + $0xe4] sm:$0xf0] }
 0x209   :  { %3990 = vmatpush.bf16.msrb.mxu0 %v6173_v27  ;;  %v7343_v27 = vld [vmem:[#allocation5 + $0xf0c] sm:$0xf]  ;;  %v6793_v51 = vor.u32 %v7421_v44, %v6792_v43  ;;  %v7385_v2 = vld [vmem:[#allocation8 + $0x54] sm:$0xf0] }
 0x20a   :  { %4003 = vmatpush.bf16.msrb.mxu1 %v6301_v40  ;;  %v6490_v40 = vld [vmem:[#allocation5 + $0xf18] sm:$0xf0]  ;;  %v3777_v30 = vpop.f32.mrf.mxu3  ;;  %v3711_v56 = vadd.f32 %v7774_v53, %v3698_v36  ;;  %v7383_v9 = vld [vmem:[#allocation8 + $0x44] sm:$0xf0]  ;;  %v6752_v36 = vld [vmem:[#allocation8 + $0x120] sm:$0xf] }
 0x20b   :  { %4016 = vmatpush.bf16.msrb.mxu2 %v6429_v32  ;;  %v3764_v32 = vpop.f32.mrf.mxu2  ;;  %v7401_v53 = vld [vmem:[#allocation8 + $0xd4] sm:$0xf0]  ;;  %v7395_v30 = vld [vmem:[#allocation8 + $0xa4] sm:$0xf0] }
 0x20c   :  { %4029 = vmatpush.bf16.msrb.mxu3 %v6557_v41  ;;  %v6109_v41 = vor.u32 %v7247_v34, %v6106_v18  ;;  %v7417_v7 = vld [vmem:[#allocation8 + $0x154] sm:$0xf0]  ;;  %v6632_v18 = vld [vmem:[#allocation8 + $0x30] sm:$0xf]  ;;  %v7379_v32 = vld [vmem:[#allocation8 + $0x24] sm:$0xf0] }
 0x20d   :  { %3991 = vmatpush.bf16.msrb.mxu0 %v6157_v46  ;;  %v6493_v46 = vor.u32 %v7343_v27, %v6490_v40  ;;  %v6777_v12 = vor.u32 %v7417_v7, %v6776_v5  ;;  %v7397_v24 = vld [vmem:[#allocation8 + $0xb4] sm:$0xf0]  ;;  %v6624_v40 = vld [vmem:[#allocation8 + $0x20] sm:$0xf]  ;;  %v6666_v5 = vld [vmem:[#allocation8 + $0x78] sm:$0xf0] }
 0x20e   :  { %4004 = vmatpush.bf16.msrb.mxu1 %v6285_v47  ;;  %v6665_v47 = vor.u32 %v7389_v35, %v6664_v33  ;;  %v6688_v33 = vld [vmem:[#allocation8 + $0xa0] sm:$0xf]  ;;  %v6625_v44 = vor.u32 %v7379_v32, %v6624_v40  ;;  %v7393_v54 = vld [vmem:[#allocation8 + $0x94] sm:$0xf0]  ;;  %v7404_v7 = vld [vmem:[#allocation8 + $0xf4] sm:$0xf] }
 0x20f   :  { %4017 = vmatpush.bf16.msrb.mxu2 %v6413_v50  ;;  %v6729_v50 = vor.u32 %v7405_v42, %v6728_v60  ;;  %v6778_v40 = vld [vmem:[#allocation8 + $0x158] sm:$0xf0] }
 0x210   :  { %4030 = vmatpush.bf16.msrb.mxu3 %v6541_v48  ;;  %v6720_v48 = vld [vmem:[#allocation8 + $0xe0] sm:$0xf] }
 0x211   :  { %3992 = vmatpush.bf16.msrb.mxu0 %v6141_v6  ;;  %v6721_v0 = vor.u32 %v7403_v39, %v6720_v48  ;;  %v6648_v6 = vld [vmem:[#allocation8 + $0x50] sm:$0xf]  ;;  %v6608_v39 = vld [vmem:[#allocation8] sm:$0xf] }
 0x212   :  { %4005 = vmatpush.bf16.msrb.mxu1 %v6269_v3  ;;  %v6712_v3 = vld [vmem:[#allocation8 + $0xd0] sm:$0xf] }
 0x213   :  { %4018 = vmatpush.bf16.msrb.mxu2 %v6397_v4  ;;  %v3724_v4 = vadd.f32 %v7776_v58, %v3711_v56  ;;  %v6713_v11 = vor.u32 %v7401_v53, %v6712_v3  ;;  %v6640_v58 = vld [vmem:[#allocation8 + $0x40] sm:$0xf]  ;;  %v7407_v3 = vld [vmem:[#allocation8 + $0x104] sm:$0xf0] }
 0x214   :  { %4031 = vmatpush.bf16.msrb.mxu3 %v6525_v8  ;;  %v6649_v8 = vor.u32 %v7385_v2, %v6648_v6  ;;  %v6736_v2 = vld [vmem:[#allocation8 + $0x100] sm:$0xf] }
 0x215   :  { %3993 = vmatpush.bf16.msrb.mxu0 %v6125_v17  ;;  %v3737_v10 = vadd.f32 %v7782_v28, %v3724_v4  ;;  %v7388_v4 = vld [vmem:[#allocation8 + $0x74] sm:$0xf] }
 0x216   :  { %4006 = vmatpush.bf16.msrb.mxu1 %v6253_v25  ;;  %v7381_v25 = vld [vmem:[#allocation8 + $0x34] sm:$0xf0] }
 0x217   :  { %4019 = vmatpush.bf16.msrb.mxu2 %v6381_v21  ;;  %v3750_v17 = vadd.f32 %v7784_v38, %v3737_v10  ;;  %v6696_v21 = vld [vmem:[#allocation8 + $0xb0] sm:$0xf]  ;;  %v6633_v37 = vor.u32 %v7381_v25, %v6632_v18  ;;  %v6730_v10 = vld [vmem:[#allocation8 + $0xf8] sm:$0xf0]  ;;  %v6786_v18 = vld [vmem:[#allocation8 + $0x168] sm:$0xf0]  ;;  %v7805_v25 = vpack.c.bf16 %v7731_v31, %v7731_v31 }
 0x218   :  { %4032 = vmatpush.bf16.msrb.mxu3 %v6509_v23  ;;  %v7413_v23 = vld [vmem:[#allocation8 + $0x134] sm:$0xf0]  ;;  %v6697_v38 = vor.u32 %v7397_v24, %v6696_v21  ;;  %v7809_v21 = vpack.c.bf16 %v7758_v49, %v7758_v49  ;;  %v7400_v31 = vld [vmem:[#allocation8 + $0xd4] sm:$0xf] }
 0x219   :  { %3994 = vmatpush.bf16.msrb.mxu0 %v6109_v41  ;;  %v3788_v16 = vpop.f32.mrf.mxu0  ;;  %v3763_v29 = vadd.f32 %v7786_v55, %v3750_v17  ;;  %v6761_v27 = vor.u32 %v7413_v23, %v6760_v22  ;;  %v7411_v41 = vld [vmem:[#allocation8 + $0x124] sm:$0xf0]  ;;  %v7384_v23 = vld [vmem:[#allocation8 + $0x54] sm:$0xf] }
 0x21a   :  { %4007 = vmatpush.bf16.msrb.mxu1 %v6237_v45  ;;  %v7416_v49 = vld [vmem:[#allocation8 + $0x154] sm:$0xf] }
 0x21b   :  { %4020 = vmatpush.bf16.msrb.mxu2 %v6365_v62  ;;  %v3776_v35 = vadd.f32 %v7788_v61, %v3763_v29  ;;  %v6689_v62 = vor.u32 %v7395_v30, %v6688_v33  ;;  %v7409_v61 = vld [vmem:[#allocation8 + $0x114] sm:$0xf0]  ;;  %v6781_v30 = vor.u32 %v7416_v49, %v6778_v40  ;;  %v7406_v49 = vld [vmem:[#allocation8 + $0x104] sm:$0xf]  ;;  %v6738_v40 = vld [vmem:[#allocation8 + $0x108] sm:$0xf0] }
 0x21c   :  { %4033 = vmatpush.bf16.msrb.mxu3 %v6493_v46  ;;  %3995 = vmatmul.bf16.vlgmr.msrb.gmra.mxu0 %v7694_v13  ;;  %v6704_v13 = vld [vmem:[#allocation8 + $0xc0] sm:$0xf]  ;;  %v6753_v46 = vor.u32 %v7411_v41, %v6752_v36  ;;  %v6745_v59 = vor.u32 %v7409_v61, %v6744_v52  ;;  %v7398_v36 = vld [vmem:[#allocation8 + $0xc4] sm:$0xf]  ;;  %v6706_v41 = vld [vmem:[#allocation8 + $0xc8] sm:$0xf0] }
 0x21d   :  { %4433 = vmatpush.bf16.msra.mxu0 %v6665_v47  ;;  %4008 = vmatmul.bf16.vlgmr.msrb.gmra.mxu1 %v7698_v20  ;;  %v6768_v20 = vld [vmem:[#allocation8 + $0x140] sm:$0xf]  ;;  %v6705_v28 = vor.u32 %v7399_v14, %v6704_v13  ;;  %v3789_v43 = vadd.f32 %v3788_v16, %v3776_v35  ;;  %v6616_v47 = vld [vmem:[#allocation8 + $0x10] sm:$0xf]  ;;  %v6737_v13 = vor.u32 %v7407_v3, %v6736_v2  ;;  %v7386_v16 = vld [vmem:[#allocation8 + $0x64] sm:$0xf] }
 0x21e   :  { %4446 = vmatpush.bf16.msra.mxu1 %v6729_v50  ;;  %4021 = vmatmul.bf16.vlgmr.msrb.gmra.mxu2 %v7696_v19  ;;  %v6641_v19 = vor.u32 %v7383_v9, %v6640_v58  ;;  %v6769_v34 = vor.u32 %v7415_v15, %v6768_v20  ;;  %v7377_v50 = vld [vmem:[#allocation8 + $0x14] sm:$0xf0]  ;;  %v6794_v58 = vld [vmem:[#allocation8 + $0x178] sm:$0xf0]  ;;  %v6669_v20 = vor.u32 %v7388_v4, %v6666_v5  ;;  %v7382_v35 = vld [vmem:[#allocation8 + $0x44] sm:$0xf] }
 0x21f   :  { %4459 = vmatpush.bf16.msra.mxu2 %v6793_v51  ;;  %4034 = vmatmul.bf16.vlgmr.msrb.gmra.mxu3 %v7700_v26  ;;  %v3801_v26 = vpop.f32.mrf.mxu1  ;;  %v6680_v51 = vld [vmem:[#allocation8 + $0x90] sm:$0xf]  ;;  %v6617_v56 = vor.u32 %v7377_v50, %v6616_v47  ;;  %v6733_v15 = vor.u32 %v7404_v7, %v6730_v10  ;;  %v6698_v52 = vld [vmem:[#allocation8 + $0xb8] sm:$0xf0]  ;;  %v7394_v2 = vld [vmem:[#allocation8 + $0xa4] sm:$0xf] }
 0x220   :  { %v3802_v48 = vadd.f32 %v3801_v26, %v3789_v43  ;;  %v6681_v57 = vor.u32 %v7393_v54, %v6680_v51  ;;  %v7402_v26 = vld [vmem:[#allocation8 + $0xe4] sm:$0xf]  ;;  %v6634_v51 = vld [vmem:[#allocation8 + $0x38] sm:$0xf0]  ;;  %v7396_v54 = vld [vmem:[#allocation8 + $0xb4] sm:$0xf] }
 0x221   :  { %4434 = vmatpush.bf16.msra.mxu0 %v6657_v63  ;;  %v3814_v60 = vpop.f32.mrf.mxu2  ;;  %v3790_v55 = vpop.f32.mrf.mxu0  ;;  %v7375_v63 = vld [vmem:[#allocation8 + $0x4] sm:$0xf0]  ;;  %v7414_v43 = vld [vmem:[#allocation8 + $0x144] sm:$0xf]  ;;  %v6690_v3 = vld [vmem:[#allocation8 + $0xa8] sm:$0xf0] }
 0x222   :  { %4447 = vmatpush.bf16.msra.mxu1 %v6721_v0  ;;  %v3827_v42 = vpop.f32.mrf.mxu3  ;;  %v6672_v0 = vld [vmem:[#allocation8 + $0x80] sm:$0xf]  ;;  %v3815_v6 = vadd.f32 %v3814_v60, %v3802_v48  ;;  %v6642_v60 = vld [vmem:[#allocation8 + $0x48] sm:$0xf0] }
 0x223   :  { %4460 = vmatpush.bf16.msra.mxu2 %v6785_v1  ;;  %v7391_v1 = vld [vmem:[#allocation8 + $0x84] sm:$0xf0]  ;;  %v6754_v5 = vld [vmem:[#allocation8 + $0x128] sm:$0xf0] }
 0x224   :  { %v6673_v9 = vor.u32 %v7391_v1, %v6672_v0  ;;  %v3828_v14 = vadd.f32 %v3827_v42, %v3815_v6  ;;  %v7450_v42 = vld [vmem:[#allocation7] sm:$0xf]  ;;  %v7378_v0 = vld [vmem:[#allocation8 + $0x24] sm:$0xf]  ;;  %v6626_v6 = vld [vmem:[#allocation8 + $0x28] sm:$0xf0] }
 0x225   :  { %4435 = vmatpush.bf16.msra.mxu0 %v6649_v8  ;;  %v642_v55 = vperm.slane %v7450_v42, 3 }
 0x226   :  { %4448 = vmatpush.bf16.msra.mxu1 %v6713_v11  ;;  %v6609_v11 = vor.u32 %v7375_v63, %v6608_v39  ;;  %v7811_v29 = vpack.c.bf16 %v3828_v14, %v3828_v14  ;;  %v6762_v39 = vld [vmem:[#allocation8 + $0x138] sm:$0xf0]  ;;  %v6701_v63 = vor.u32 %v7396_v54, %v6698_v52 }
 0x227   :  { %4461 = vmatpush.bf16.msra.mxu2 %v6777_v12  ;;  %v3803_v45 = vpop.f32.mrf.mxu1  ;;  %v7420_v12 = vld [vmem:[#allocation8 + $0x174] sm:$0xf]  ;;  %v6618_v14 = vld [vmem:[#allocation8 + $0x18] sm:$0xf0] }
 0x228   :  { %v6797_v17 = vor.u32 %v7420_v12, %v6794_v58  ;;  %v6645_v45 = vor.u32 %v7382_v35, %v6642_v60  ;;  %v7376_v12 = vld [vmem:[#allocation8 + $0x14] sm:$0xf]  ;;  %v6741_v60 = vor.u32 %v7406_v49, %v6738_v40  ;;  %v6810_v49 = vld [vmem:[#allocation8 + $0x198] sm:$0xf0] }
 0x229   :  { %4436 = vmatpush.bf16.msra.mxu0 %v6641_v19  ;;  %v3816_v53 = vpop.f32.mrf.mxu2  ;;  %v6658_v19 = vld [vmem:[#allocation8 + $0x68] sm:$0xf0] }
 0x22a   :  { %4449 = vmatpush.bf16.msra.mxu1 %v6705_v28  ;;  %v3829_v8 = vpop.f32.mrf.mxu3  ;;  %v6722_v28 = vld [vmem:[#allocation8 + $0xe8] sm:$0xf0]  ;;  %v6661_v24 = vor.u32 %v7386_v16, %v6658_v19  ;;  %v7410_v53 = vld [vmem:[#allocation8 + $0x124] sm:$0xf]  ;;  %v6746_v19 = vld [vmem:[#allocation8 + $0x118] sm:$0xf0] }
 0x22b   :  { %4462 = vmatpush.bf16.msra.mxu2 %v6769_v34  ;;  %v7418_v34 = vld [vmem:[#allocation8 + $0x164] sm:$0xf]  ;;  %v6725_v22 = vor.u32 %v7402_v26, %v6722_v28  ;;  %v6629_v8 = vor.u32 %v7378_v0, %v6626_v6  ;;  %v6856_v26 = vld [vmem:[#allocation8 + $0x1f0] sm:$0xf]  ;;  %v7437_v28 = vld [vmem:[#allocation8 + $0x1f4] sm:$0xf0] }
 0x22c   :  { %v7423_v6 = vld [vmem:[#allocation8 + $0x184] sm:$0xf0] }
 0x22d   :  { %4437 = vmatpush.bf16.msra.mxu0 %v6633_v37  ;;  %v6789_v37 = vor.u32 %v7418_v34, %v6786_v18  ;;  %v6621_v34 = vor.u32 %v7376_v12, %v6618_v14  ;;  %v7432_v12 = vld [vmem:[#allocation8 + $0x1d4] sm:$0xf] }
 0x22e   :  { %4450 = vmatpush.bf16.msra.mxu1 %v6697_v38  ;;  %v6650_v38 = vld [vmem:[#allocation8 + $0x58] sm:$0xf0] }
 0x22f   :  { %4463 = vmatpush.bf16.msra.mxu2 %v6761_v27  ;;  %v6714_v27 = vld [vmem:[#allocation8 + $0xd8] sm:$0xf0]  ;;  %v6653_v32 = vor.u32 %v7384_v23, %v6650_v38  ;;  %v7390_v38 = vld [vmem:[#allocation8 + $0x84] sm:$0xf] }
 0x230   :  { %v6717_v33 = vor.u32 %v7400_v31, %v6714_v27  ;;  %v6674_v31 = vld [vmem:[#allocation8 + $0x88] sm:$0xf0] }
 0x231   :  { %4438 = vmatpush.bf16.msra.mxu0 %v6625_v44  ;;  %v6770_v44 = vld [vmem:[#allocation8 + $0x148] sm:$0xf0]  ;;  %v6677_v35 = vor.u32 %v7390_v38, %v6674_v31 }
 0x232   :  { %4451 = vmatpush.bf16.msra.mxu1 %v6689_v62  ;;  %v6709_v62 = vor.u32 %v7398_v36, %v6706_v41  ;;  %v6773_v50 = vor.u32 %v7414_v43, %v6770_v44  ;;  %v7435_v36 = vld [vmem:[#allocation8 + $0x1e4] sm:$0xf0]  ;;  %v6840_v43 = vld [vmem:[#allocation8 + $0x1d0] sm:$0xf]  ;;  %v7433_v44 = vld [vmem:[#allocation8 + $0x1d4] sm:$0xf0] }
 0x233   :  { %4464 = vmatpush.bf16.msra.mxu2 %v6753_v46  ;;  %v7380_v46 = vld [vmem:[#allocation8 + $0x34] sm:$0xf] }
 0x235   :  { %4439 = vmatpush.bf16.msra.mxu0 %v6617_v56  ;;  %v7412_v56 = vld [vmem:[#allocation8 + $0x134] sm:$0xf] }
 0x236   :  { %4452 = vmatpush.bf16.msra.mxu1 %v6681_v57  ;;  %v6765_v1 = vor.u32 %v7412_v56, %v6762_v39 }
 0x237   :  { %4465 = vmatpush.bf16.msra.mxu2 %v6745_v59  ;;  %v6637_v59 = vor.u32 %v7380_v46, %v6634_v51  ;;  %v6824_v51 = vld [vmem:[#allocation8 + $0x1b0] sm:$0xf] }
 0x239   :  { %4440 = vmatpush.bf16.msra.mxu0 %v6609_v11  ;;  %v3840_v47 = vpop.f32.mrf.mxu0  ;;  %v6693_v11 = vor.u32 %v7394_v2, %v6690_v3  ;;  %v7436_v2 = vld [vmem:[#allocation8 + $0x1f4] sm:$0xf]  ;;  %v6858_v3 = vld [vmem:[#allocation8 + $0x1f8] sm:$0xf0] }
 0x23a   :  { %4453 = vmatpush.bf16.msra.mxu1 %v6673_v9  ;;  %v3841_v61 = vadd.f32 %v3840_v47, %v642_v55  ;;  %v3853_v48 = vpop.f32.mrf.mxu1  ;;  %v6832_v47 = vld [vmem:[#allocation8 + $0x1c0] sm:$0xf] }
 0x23b   :  { %4466 = vmatpush.bf16.msra.mxu2 %v6737_v13  ;;  %v6757_v13 = vor.u32 %v7410_v53, %v6754_v5  ;;  %v6861_v53 = vor.u32 %v7436_v2, %v6858_v3  ;;  %v7434_v5 = vld [vmem:[#allocation8 + $0x1e4] sm:$0xf] }
 0x23c   :  { %4441 = vmatmul.bf16.vlgmr.msra.gmra.mxu0 %v7805_v25  ;;  %v3854_v57 = vadd.f32 %v3853_v48, %v3841_v61  ;;  %v6816_v61 = vld [vmem:[#allocation8 + $0x1a0] sm:$0xf]  ;;  %v7427_v48 = vld [vmem:[#allocation8 + $0x1a4] sm:$0xf0] }
 0x23d   :  { %4485 = vmatpush.bf16.msrb.mxu0 %v6669_v20  ;;  %4454 = vmatmul.bf16.vlgmr.msra.gmra.mxu1 %v7809_v21  ;;  %v7392_v20 = vld [vmem:[#allocation8 + $0x94] sm:$0xf] }
 0x23e   :  { %4498 = vmatpush.bf16.msrb.mxu1 %v6733_v15  ;;  %4467 = vmatmul.bf16.vlgmr.msra.gmra.mxu2 %v7811_v29  ;;  %v6682_v15 = vld [vmem:[#allocation8 + $0x98] sm:$0xf0] }
 0x23f   :  { %4511 = vmatpush.bf16.msrb.mxu2 %v6797_v17  ;;  %v7408_v17 = vld [vmem:[#allocation8 + $0x114] sm:$0xf]  ;;  %v6685_v18 = vor.u32 %v7392_v20, %v6682_v15  ;;  %v7430_v15 = vld [vmem:[#allocation8 + $0x1c4] sm:$0xf] }
 0x240   :  { %v6749_v23 = vor.u32 %v7408_v17, %v6746_v19 }
 0x241   :  { %4486 = vmatpush.bf16.msrb.mxu0 %v6661_v24  ;;  %v3866_v4 = vpop.f32.mrf.mxu2  ;;  %v3842_v9 = vpop.f32.mrf.mxu0  ;;  %v7374_v24 = vld [vmem:[#allocation8 + $0x4] sm:$0xf] }
 0x242   :  { %4499 = vmatpush.bf16.msrb.mxu1 %v6725_v22  ;;  %v3867_v7 = vadd.f32 %v3866_v4, %v3854_v57  ;;  %v3879_v10 = vpop.f32.mrf.mxu3  ;;  %v3855_v16 = vpop.f32.mrf.mxu1  ;;  %v6857_v22 = vor.u32 %v7437_v28, %v6856_v26  ;;  %v6817_v57 = vor.u32 %v7427_v48, %v6816_v61  ;;  %v6842_v9 = vld [vmem:[#allocation8 + $0x1d8] sm:$0xf0]  ;;  %v4107_v61 = vld [vmem:[#allocation10] sm:$0x3] }
 0x243   :  { %4512 = vmatpush.bf16.msrb.mxu2 %v6789_v37  ;;  %v6610_v37 = vld [vmem:[#allocation8 + $0x8] sm:$0xf0]  ;;  %v4109_v48 = vperm.slane %v4107_v61, 0  ;;  %v4110_v3 = vperm.slane %v4107_v61, 1 }
 0x244   :  { %v7816_v58 = vadd.f32 %v3879_v10, %v3867_v7  ;;  %4472 = vmatpush.bf16.msra.mxu3 %v6857_v22  ;;  %v6850_v7 = vld [vmem:[#allocation8 + $0x1e8] sm:$0xf0] }
 0x245   :  { %4487 = vmatpush.bf16.msrb.mxu0 %v6653_v32  ;;  %v6834_v16 = vld [vmem:[#allocation8 + $0x1c8] sm:$0xf0] }
 0x246   :  { %4500 = vmatpush.bf16.msrb.mxu1 %v6717_v33  ;;  %v6613_v33 = vor.u32 %v7374_v24, %v6610_v37  ;;  %v6837_v26 = vor.u32 %v7430_v15, %v6834_v16  ;;  %v6826_v24 = vld [vmem:[#allocation8 + $0x1b8] sm:$0xf0]  ;;  %v6818_v37 = vld [vmem:[#allocation8 + $0x1a8] sm:$0xf0] }
 0x247   :  { %4513 = vmatpush.bf16.msrb.mxu2 %v6781_v30  ;;  %v6848_v30 = vld [vmem:[#allocation8 + $0x1e0] sm:$0xf] }
 0x248   :  { %v6849_v42 = vor.u32 %v7435_v36, %v6848_v30 }
 0x249   :  { %4488 = vmatpush.bf16.msrb.mxu0 %v6645_v45  ;;  %v3868_v27 = vpop.f32.mrf.mxu2  ;;  %v6841_v45 = vor.u32 %v7433_v44, %v6840_v43 }
 0x24a   :  { %4501 = vmatpush.bf16.msrb.mxu1 %v6709_v62  ;;  %v3881_v32 = vpop.f32.mrf.mxu3  ;;  %4473 = vmatpush.bf16.msra.mxu3 %v6849_v42 }
 0x24b   :  { %4514 = vmatpush.bf16.msrb.mxu2 %v6773_v50  ;;  %v7431_v50 = vld [vmem:[#allocation8 + $0x1c4] sm:$0xf0] }
 0x24c   :  { %v6833_v54 = vor.u32 %v7431_v50, %v6832_v47 }
 0x24d   :  { %4489 = vmatpush.bf16.msrb.mxu0 %v6637_v59  ;;  %v6808_v59 = vld [vmem:[#allocation8 + $0x190] sm:$0xf] }
 0x24e   :  { %4502 = vmatpush.bf16.msrb.mxu1 %v6701_v63  ;;  %4474 = vmatpush.bf16.msra.mxu3 %v6841_v45  ;;  %v7425_v63 = vld [vmem:[#allocation8 + $0x194] sm:$0xf0] }
 0x24f   :  { %4515 = vmatpush.bf16.msrb.mxu2 %v6765_v1  ;;  %v6809_v0 = vor.u32 %v7425_v63, %v6808_v59  ;;  %v6800_v1 = vld [vmem:[#allocation8 + $0x180] sm:$0xf] }
 0x250   :  { %v6801_v4 = vor.u32 %v7423_v6, %v6800_v1 }
 0x251   :  { %4490 = vmatpush.bf16.msrb.mxu0 %v6629_v8  ;;  %v6853_v8 = vor.u32 %v7434_v5, %v6850_v7 }
 0x252   :  { %4503 = vmatpush.bf16.msrb.mxu1 %v6693_v11  ;;  %4475 = vmatpush.bf16.msra.mxu3 %v6833_v54 }
 0x253   :  { %4516 = vmatpush.bf16.msrb.mxu2 %v6757_v13  ;;  %v6845_v13 = vor.u32 %v7432_v12, %v6842_v9 }
 0x255   :  { %4491 = vmatpush.bf16.msrb.mxu0 %v6621_v34 }
 0x256   :  { %4504 = vmatpush.bf16.msrb.mxu1 %v6685_v18  ;;  %v7428_v18 = vld [vmem:[#allocation8 + $0x1b4] sm:$0xf] }
 0x257   :  { %4517 = vmatpush.bf16.msrb.mxu2 %v6749_v23  ;;  %v6829_v22 = vor.u32 %v7428_v18, %v6826_v24  ;;  %v7426_v23 = vld [vmem:[#allocation8 + $0x1a4] sm:$0xf] }
 0x258   :  { %v6821_v31 = vor.u32 %v7426_v23, %v6818_v37 }
 0x259   :  { %4492 = vmatpush.bf16.msrb.mxu0 %v6613_v33  ;;  %v3892_v41 = vpop.f32.mrf.mxu0 }
 0x25a   :  { %4505 = vmatpush.bf16.msrb.mxu1 %v6677_v35  ;;  %v3905_v55 = vpop.f32.mrf.mxu1  ;;  %v3893_v14 = vadd.f32 %v3892_v41, %v7816_v58  ;;  %v7424_v58 = vld [vmem:[#allocation8 + $0x194] sm:$0xf]  ;;  %v7422_v35 = vld [vmem:[#allocation8 + $0x184] sm:$0xf] }
 0x25b   :  { %4518 = vmatpush.bf16.msrb.mxu2 %v6741_v60  ;;  %v6813_v33 = vor.u32 %v7424_v58, %v6810_v49  ;;  %v6802_v60 = vld [vmem:[#allocation8 + $0x188] sm:$0xf0] }
 0x25c   :  { %4493 = vmatmul.bf16.vlgmr.msrb.gmra.mxu0 %v7805_v25  ;;  %v3906_v34 = vadd.f32 %v3905_v55, %v3893_v14  ;;  %v6805_v36 = vor.u32 %v7422_v35, %v6802_v60 }
 0x25d   :  { %4506 = vmatmul.bf16.vlgmr.msrb.gmra.mxu1 %v7809_v21  ;;  %v7429_v21 = vld [vmem:[#allocation8 + $0x1b4] sm:$0xf0] }
 0x25e   :  { %4519 = vmatmul.bf16.vlgmr.msrb.gmra.mxu2 %v7811_v29  ;;  %v6825_v29 = vor.u32 %v7429_v21, %v6824_v51 }
 0x260   :  { %4476 = vmatpush.bf16.msra.mxu3 %v6825_v29 }
 0x261   :  { %v3918_v62 = vpop.f32.mrf.mxu2  ;;  %v3894_v25 = vpop.f32.mrf.mxu0 }
 0x262   :  { %v3931_v46 = vpop.f32.mrf.mxu3  ;;  %v3907_v52 = vpop.f32.mrf.mxu1  ;;  %v3919_v38 = vadd.f32 %v3918_v62, %v3906_v34 }
 0x264   :  { %4477 = vmatpush.bf16.msra.mxu3 %v6817_v57  ;;  %v3932_v32 = vadd.f32 %v3931_v46, %v3919_v38 }
 0x268   :  { %4478 = vmatpush.bf16.msra.mxu3 %v6809_v0 }
 0x269   :  { %v3920_v56 = vpop.f32.mrf.mxu2 }
 0x26a   :  { %v3933_v39 = vpop.f32.mrf.mxu3 }
 0x26c   :  { %4479 = vmatpush.bf16.msra.mxu3 %v6801_v4 }
 0x270   :  { %4524 = vmatpush.bf16.msrb.mxu3 %v6861_v53 }
 0x274   :  { %4525 = vmatpush.bf16.msrb.mxu3 %v6853_v8 }
 0x278   :  { %4526 = vmatpush.bf16.msrb.mxu3 %v6845_v13 }
 0x279   :  { %v3944_v10 = vpop.f32.mrf.mxu0 }
 0x27a   :  { %v3957_v11 = vpop.f32.mrf.mxu1  ;;  %v3945_v30 = vadd.f32 %v3944_v10, %v3932_v32 }
 0x27c   :  { %4527 = vmatpush.bf16.msrb.mxu3 %v6837_v26  ;;  %v3958_v41 = vadd.f32 %v3957_v11, %v3945_v30 }
 0x280   :  { %4528 = vmatpush.bf16.msrb.mxu3 %v6829_v22 }
 0x281   :  { %v3970_v20 = vpop.f32.mrf.mxu2  ;;  %v3946_v19 = vpop.f32.mrf.mxu0 }
 0x282   :  { %v3983_v17 = vpop.f32.mrf.mxu3  ;;  %v3959_v28 = vpop.f32.mrf.mxu1  ;;  %v3971_v42 = vadd.f32 %v3970_v20, %v3958_v41 }
 0x284   :  { %4529 = vmatpush.bf16.msrb.mxu3 %v6821_v31  ;;  %v3984_v55 = vadd.f32 %v3983_v17, %v3971_v42 }
 0x288   :  { %4530 = vmatpush.bf16.msrb.mxu3 %v6813_v33 }
 0x289   :  { %v3972_v27 = vpop.f32.mrf.mxu2 }
 0x28a   :  { %v3985_v40 = vpop.f32.mrf.mxu3 }
 0x28c   :  { %4531 = vmatpush.bf16.msrb.mxu3 %v6805_v36 }
 0x299   :  { %v3996_v43 = vpop.f32.mrf.mxu0 }
 0x29a   :  { %v4009_v44 = vpop.f32.mrf.mxu1  ;;  %v3997_v45 = vadd.f32 %v3996_v43, %v3984_v55 }
 0x29c   :  { %v4010_v62 = vadd.f32 %v4009_v44, %v3997_v45 }
 0x2a1   :  { %v4022_v47 = vpop.f32.mrf.mxu2  ;;  %v3998_v25 = vpop.f32.mrf.mxu0 }
 0x2a2   :  { %v4035_v50 = vpop.f32.mrf.mxu3  ;;  %v4023_v51 = vadd.f32 %v4022_v47, %v4010_v62  ;;  %v4011_v46 = vpop.f32.mrf.mxu1 }
 0x2a4   :  { %v4036_v54 = vadd.f32 %v4035_v50, %v4023_v51 }
 0x2a6   :  { %v4042_v21 = vpack.c.bf16 %v4036_v54, %v4036_v54 }
 0x2a8   :  { %4480 = vmatmul.bf16.vlgmr.msra.gmra.mxu3 %v4042_v21 }
 0x2a9   :  { %v4024_v52 = vpop.f32.mrf.mxu2 }
 0x2aa   :  { %v4037_v29 = vpop.f32.mrf.mxu3 }
 0x2b8   :  { %4532 = vmatmul.bf16.vlgmr.msrb.gmra.mxu3 %v4042_v21 }
 0x2b9   :  { %v4442_v56 = vpop.f32.mrf.mxu0 }
 0x2ba   :  { %v4443_v39 = vadd.f32 %v4442_v56, %v4109_v48  ;;  %v4455_v57 = vpop.f32.mrf.mxu1 }
 0x2bc   :  { %v4456_v59 = vadd.f32 %v4455_v57, %v4443_v39 }
 0x2c1   :  { %v4468_v63 = vpop.f32.mrf.mxu2  ;;  %v4444_v1 = vpop.f32.mrf.mxu0 }
 0x2c2   :  { %v4469_v0 = vadd.f32 %v4468_v63, %v4456_v59  ;;  %v4457_v6 = vpop.f32.mrf.mxu1 }
 0x2c9   :  { %v4470_v2 = vpop.f32.mrf.mxu2 }
 0x2d9   :  { %v4494_v4 = vpop.f32.mrf.mxu0 }
 0x2da   :  { %v4507_v53 = vpop.f32.mrf.mxu1  ;;  %v4495_v5 = vadd.f32 %v4494_v4, %v4110_v3 }
 0x2dc   :  { %v4508_v7 = vadd.f32 %v4507_v53, %v4495_v5 }
 0x2e1   :  { %v4520_v10 = vpop.f32.mrf.mxu2  ;;  %v4496_v11 = vpop.f32.mrf.mxu0 }
 0x2e2   :  { %v4521_v8 = vadd.f32 %v4520_v10, %v4508_v7  ;;  %v4509_v12 = vpop.f32.mrf.mxu1 }
 0x2e9   :  { %v4522_v9 = vpop.f32.mrf.mxu2 }
 0x32b   :  { %v4481_v13 = vpop.f32.mrf.mxu3 }
 0x32c   :  { %v4482_v15 = vadd.f32 %v4481_v13, %v4469_v0 }
 0x333   :  { %v4483_v14 = vpop.f32.mrf.mxu3 }
 0x33b   :  { %v4533_v20 = vpop.f32.mrf.mxu3 }
 0x33c   :  { %v4534_v16 = vadd.f32 %v4533_v20, %v4521_v8 }
 0x33e   :  { %v4537_v17 = vpack.c.bf16 %v4534_v16, %v4482_v15 }
 0x340   :  { %4538 = vst [vmem:[#allocation11] sm:$0xff] %v4537_v17 }
 0x341   :  { %4549 = dma.vmem_to_hbm [thread:$0]  %s4545_s4, 128, %s4547_s21, [#allocation4]  }
 0x343   :  { %v4535_v19 = vpop.f32.mrf.mxu3 }
 0x344   :  { %7601 = dma.done.wait [#allocation4], 128  }
 0x345   :  { %7602 = vsyncadd [#allocation4], 4294967168 }
 0x346   :  { %4554 = vsyncpa [#allocation3], 1 }
 0x347   :  { %4555 = vsyncpa [#allocation6], 1 }
 0x348   :  { %4556 = vsyncpa [#allocation9], 1 }
 0x349   :  { %4557 = vsyncpa [#allocation4], 1 }

// kernel: _forward_call.1
= control target key start
LH: loop header
LB: loop body
LE: loop exit
PB: predicated region body
PF: predicated region fallthrough
CT: control target
= control target key end

     0   :  { %10 = vsyncpa [#allocation3], 0  ;;  %s7825_s0 = inlined_call_operand.hbm [shape: f32[8,2048], index: 0, kind: input, shape index: {}]   ;;  %s7826_s1 = inlined_call_operand.hbm [shape: bf16[2048,512], index: 1, kind: input, shape index: {}]   ;;  %s7827_s2 = inlined_call_operand.hbm [shape: f32[1,512], index: 2, kind: input, shape index: {}]   ;;  %s7828_s3 = inlined_call_operand.hbm [shape: bf16[512,256], index: 3, kind: input, shape index: {}]   ;;  %s7829_s4 = inlined_call_operand.hbm [shape: f32[1,256], index: 4, kind: input, shape index: {}]   ;;  %s7830_s5 = inlined_call_operand.hbm [shape: bf16[8,256], index: 5, kind: output, shape index: {}]  }
   0x1   :  { %11 = vsyncpa [#allocation6], 0 }
   0x2   :  { %12 = vsyncpa [#allocation9], 0  ;;  %s29_s20 = sshll.u32 %s7826_s1, 4  ;;  %s30_s20 = int_to_ptr.hbm [resolvable:$true] %s29_s20 }
   0x3   :  { %13 = vsyncpa [#allocation4], 0  ;;  %s7603_s21 = smov [#allocation5]   ;;  %s53_s25 = sshll.u32 %s7828_s3, 4  ;;  %s54_s25 = int_to_ptr.hbm [resolvable:$true] %s53_s25 }
   0x4   :  { %s31_s22 = sshll.u32 %s7603_s21, 4  ;;  %s7604_s26 = smov 256   ;;  %s32_s22 = int_to_ptr.vmem [resolvable:$true] %s31_s22 }
   0x5   :  { %s7605_s27 = smov 16   ;;  %s7606_s28 = smov [#allocation8]  }
   0x6   :  { %37 = dma.hbm_to_vmem [thread:$0]  %s30_s20, 65536, %s32_s22, [#allocation6], %s7604_s26, %s7604_s26, %s7605_s27  }
   0x7   :  { %s55_s29 = sshll.u32 %s7606_s28, 4  ;;  %s7607_s30 = smov 128   ;;  %s56_s29 = int_to_ptr.vmem [resolvable:$true] %s55_s29 }
   0x8   :  { %s7608_s6 = smov 8   ;;  %s19_s8 = sshll.u32 %s7825_s0, 4  ;;  %s20_s8 = int_to_ptr.hbm [resolvable:$true] %s19_s8 }
   0x9   :  { %61 = dma.hbm_to_vmem [thread:$0]  %s54_s25, 8192, %s56_s29, [#allocation9], %s7607_s30, %s7607_s30, %s7608_s6  }
   0xa   :  { %s7609_s9 = smov [#allocation2]   ;;  %s43_s12 = sshll.u32 %s7827_s2, 4  ;;  %s44_s12 = int_to_ptr.hbm [resolvable:$true] %s43_s12 }
   0xb   :  { %s21_s10 = sshll.u32 %s7609_s9, 4  ;;  %s7610_s13 = smov [#allocation7]   ;;  %s22_s10 = int_to_ptr.vmem [resolvable:$true] %s21_s10 }
   0xc   :  { %24 = dma.hbm_to_vmem [thread:$0]  %s20_s8, 2048, %s22_s10, [#allocation3]  }
   0xd   :  { %s45_s14 = sshll.u32 %s7610_s13, 4  ;;  %s67_s17 = sshll.u32 %s7829_s4, 4  ;;  %s46_s14 = int_to_ptr.vmem [resolvable:$true] %s45_s14  ;;  %s68_s17 = int_to_ptr.hbm [resolvable:$true] %s67_s17 }
   0xe   :  { %48 = dma.hbm_to_vmem [thread:$0]  %s44_s12, 64, %s46_s14, [#allocation6]  }
   0xf   :  { %s7611_s0 = smov [#allocation10]  }
  0x10   :  { %s69_s18 = sshll.u32 %s7611_s0, 4  ;;  %s70_s18 = int_to_ptr.vmem [resolvable:$true] %s69_s18 }
  0x11   :  { %72 = dma.hbm_to_vmem [thread:$0]  %s68_s17, 32, %s70_s18, [#allocation9]  }
  0x12   :  { %7595 = dma.done.wait [#allocation3], 2048  }
  0x13   :  { %7596 = vsyncadd [#allocation3], 4294965248 }
  0x14   :  { %7597 = dma.done.wait [#allocation6], 65600  }
  0x15   :  { %7598 = vsyncadd [#allocation6], 4294901696 }
  0x16   :  { %7599 = dma.done.wait [#allocation9], 8224  }
  0x17   :  { %7600 = vsyncadd [#allocation9], 4294959072  ;;  %v4672_v0 = vld [vmem:[#allocation5 + $0xe0] sm:$0xf]  ;;  %v6892_v1 = vld [vmem:[#allocation5 + $0xec] sm:$0xf0] }
  0x18   :  { %v4800_v2 = vld [vmem:[#allocation5 + $0x1e0] sm:$0xf]  ;;  %v4673_v3 = vor.u32 %v6892_v1, %v4672_v0  ;;  %v6924_v4 = vld [vmem:[#allocation5 + $0x1ec] sm:$0xf0]  ;;  %s7612_s2 = smov [#allocation11]   ;;  %s4546_s21 = sshll.u32 %s7830_s5, 4  ;;  %s4547_s21 = int_to_ptr.hbm [resolvable:$true] %s4546_s21 }
  0x19   :  { %v4928_v5 = vld [vmem:[#allocation5 + $0x2e0] sm:$0xf]  ;;  %v6956_v6 = vld [vmem:[#allocation5 + $0x2ec] sm:$0xf0]  ;;  %v4801_v7 = vor.u32 %v6924_v4, %v4800_v2  ;;  %s4544_s4 = sshll.u32 %s7612_s2, 4  ;;  %s4545_s4 = int_to_ptr.vmem [resolvable:$true] %s4544_s4 }
  0x1a   :  { %v4929_v8 = vor.u32 %v6956_v6, %v4928_v5  ;;  %v5056_v9 = vld [vmem:[#allocation5 + $0x3e0] sm:$0xf]  ;;  %v6988_v10 = vld [vmem:[#allocation5 + $0x3ec] sm:$0xf0]  ;;  %3207 = vmatpush.bf16.msra.mxu0 %v4673_v3 }
  0x1b   :  { %v4656_v11 = vld [vmem:[#allocation5 + $0xc0] sm:$0xf]  ;;  %v5057_v12 = vor.u32 %v6988_v10, %v5056_v9  ;;  %v6888_v13 = vld [vmem:[#allocation5 + $0xcc] sm:$0xf0]  ;;  %3220 = vmatpush.bf16.msra.mxu1 %v4801_v7 }
  0x1c   :  { %v4784_v14 = vld [vmem:[#allocation5 + $0x1c0] sm:$0xf]  ;;  %v6920_v15 = vld [vmem:[#allocation5 + $0x1cc] sm:$0xf0]  ;;  %3233 = vmatpush.bf16.msra.mxu2 %v4929_v8  ;;  %v4657_v16 = vor.u32 %v6888_v13, %v4656_v11 }
  0x1d   :  { %v4785_v17 = vor.u32 %v6920_v15, %v4784_v14  ;;  %v4912_v18 = vld [vmem:[#allocation5 + $0x2c0] sm:$0xf]  ;;  %v6952_v19 = vld [vmem:[#allocation5 + $0x2cc] sm:$0xf0]  ;;  %3246 = vmatpush.bf16.msra.mxu3 %v5057_v12 }
  0x1e   :  { %v5040_v20 = vld [vmem:[#allocation5 + $0x3c0] sm:$0xf]  ;;  %v4913_v21 = vor.u32 %v6952_v19, %v4912_v18  ;;  %v6984_v22 = vld [vmem:[#allocation5 + $0x3cc] sm:$0xf0]  ;;  %3208 = vmatpush.bf16.msra.mxu0 %v4657_v16 }
  0x1f   :  { %v4640_v23 = vld [vmem:[#allocation5 + $0xa0] sm:$0xf]  ;;  %v6884_v24 = vld [vmem:[#allocation5 + $0xac] sm:$0xf0]  ;;  %v5041_v25 = vor.u32 %v6984_v22, %v5040_v20  ;;  %3221 = vmatpush.bf16.msra.mxu1 %v4785_v17 }
  0x20   :  { %v4768_v26 = vld [vmem:[#allocation5 + $0x1a0] sm:$0xf]  ;;  %v6916_v27 = vld [vmem:[#allocation5 + $0x1ac] sm:$0xf0]  ;;  %v4641_v29 = vor.u32 %v6884_v24, %v4640_v23  ;;  %3234 = vmatpush.bf16.msra.mxu2 %v4913_v21 }
  0x21   :  { %v4896_v28 = vld [vmem:[#allocation5 + $0x2a0] sm:$0xf]  ;;  %v6948_v30 = vld [vmem:[#allocation5 + $0x2ac] sm:$0xf0]  ;;  %v4769_v33 = vor.u32 %v6916_v27, %v4768_v26  ;;  %3247 = vmatpush.bf16.msra.mxu3 %v5041_v25 }
  0x22   :  { %v5024_v31 = vld [vmem:[#allocation5 + $0x3a0] sm:$0xf]  ;;  %v6980_v32 = vld [vmem:[#allocation5 + $0x3ac] sm:$0xf0]  ;;  %v4897_v34 = vor.u32 %v6948_v30, %v4896_v28  ;;  %3209 = vmatpush.bf16.msra.mxu0 %v4641_v29 }
  0x23   :  { %v4624_v35 = vld [vmem:[#allocation5 + $0x80] sm:$0xf]  ;;  %v6880_v36 = vld [vmem:[#allocation5 + $0x8c] sm:$0xf0]  ;;  %v5025_v38 = vor.u32 %v6980_v32, %v5024_v31  ;;  %3222 = vmatpush.bf16.msra.mxu1 %v4769_v33 }
  0x24   :  { %v4752_v37 = vld [vmem:[#allocation5 + $0x180] sm:$0xf]  ;;  %v6912_v39 = vld [vmem:[#allocation5 + $0x18c] sm:$0xf0]  ;;  %v4625_v44 = vor.u32 %v6880_v36, %v4624_v35  ;;  %3235 = vmatpush.bf16.msra.mxu2 %v4897_v34 }
  0x25   :  { %v4880_v40 = vld [vmem:[#allocation5 + $0x280] sm:$0xf]  ;;  %v6944_v41 = vld [vmem:[#allocation5 + $0x28c] sm:$0xf0]  ;;  %v4753_v45 = vor.u32 %v6912_v39, %v4752_v37  ;;  %3248 = vmatpush.bf16.msra.mxu3 %v5025_v38 }
  0x26   :  { %v5008_v42 = vld [vmem:[#allocation5 + $0x380] sm:$0xf]  ;;  %v6976_v43 = vld [vmem:[#allocation5 + $0x38c] sm:$0xf0]  ;;  %v4881_v46 = vor.u32 %v6944_v41, %v4880_v40  ;;  %3210 = vmatpush.bf16.msra.mxu0 %v4625_v44 }
  0x27   :  { %v4608_v47 = vld [vmem:[#allocation5 + $0x60] sm:$0xf]  ;;  %v6876_v48 = vld [vmem:[#allocation5 + $0x6c] sm:$0xf0]  ;;  %v5009_v50 = vor.u32 %v6976_v43, %v5008_v42  ;;  %3223 = vmatpush.bf16.msra.mxu1 %v4753_v45 }
  0x28   :  { %v4736_v49 = vld [vmem:[#allocation5 + $0x160] sm:$0xf]  ;;  %v6908_v51 = vld [vmem:[#allocation5 + $0x16c] sm:$0xf0]  ;;  %v4609_v56 = vor.u32 %v6876_v48, %v4608_v47  ;;  %3236 = vmatpush.bf16.msra.mxu2 %v4881_v46 }
  0x29   :  { %v4864_v52 = vld [vmem:[#allocation5 + $0x260] sm:$0xf]  ;;  %v6940_v53 = vld [vmem:[#allocation5 + $0x26c] sm:$0xf0]  ;;  %v4737_v57 = vor.u32 %v6908_v51, %v4736_v49  ;;  %3249 = vmatpush.bf16.msra.mxu3 %v5009_v50 }
  0x2a   :  { %v4992_v54 = vld [vmem:[#allocation5 + $0x360] sm:$0xf]  ;;  %v6972_v55 = vld [vmem:[#allocation5 + $0x36c] sm:$0xf0]  ;;  %v4865_v58 = vor.u32 %v6940_v53, %v4864_v52  ;;  %3211 = vmatpush.bf16.msra.mxu0 %v4609_v56 }
  0x2b   :  { %v4592_v59 = vld [vmem:[#allocation5 + $0x40] sm:$0xf]  ;;  %v6872_v60 = vld [vmem:[#allocation5 + $0x4c] sm:$0xf0]  ;;  %v4993_v62 = vor.u32 %v6972_v55, %v4992_v54  ;;  %3224 = vmatpush.bf16.msra.mxu1 %v4737_v57 }
  0x2c   :  { %v4720_v61 = vld [vmem:[#allocation5 + $0x140] sm:$0xf]  ;;  %v6904_v63 = vld [vmem:[#allocation5 + $0x14c] sm:$0xf0]  ;;  %v4593_v4 = vor.u32 %v6872_v60, %v4592_v59  ;;  %3237 = vmatpush.bf16.msra.mxu2 %v4865_v58 }
  0x2d   :  { %v4848_v0 = vld [vmem:[#allocation5 + $0x240] sm:$0xf]  ;;  %v6936_v1 = vld [vmem:[#allocation5 + $0x24c] sm:$0xf0]  ;;  %v4721_v5 = vor.u32 %v6904_v63, %v4720_v61  ;;  %3250 = vmatpush.bf16.msra.mxu3 %v4993_v62 }
  0x2e   :  { %v4976_v2 = vld [vmem:[#allocation5 + $0x340] sm:$0xf]  ;;  %v6968_v3 = vld [vmem:[#allocation5 + $0x34c] sm:$0xf0]  ;;  %v4849_v6 = vor.u32 %v6936_v1, %v4848_v0  ;;  %3212 = vmatpush.bf16.msra.mxu0 %v4593_v4 }
  0x2f   :  { %v4576_v7 = vld [vmem:[#allocation5 + $0x20] sm:$0xf]  ;;  %v6868_v8 = vld [vmem:[#allocation5 + $0x2c] sm:$0xf0]  ;;  %v4977_v10 = vor.u32 %v6968_v3, %v4976_v2  ;;  %3225 = vmatpush.bf16.msra.mxu1 %v4721_v5 }
  0x30   :  { %v4704_v9 = vld [vmem:[#allocation5 + $0x120] sm:$0xf]  ;;  %v6900_v11 = vld [vmem:[#allocation5 + $0x12c] sm:$0xf0]  ;;  %v4577_v16 = vor.u32 %v6868_v8, %v4576_v7  ;;  %3238 = vmatpush.bf16.msra.mxu2 %v4849_v6 }
  0x31   :  { %v4832_v12 = vld [vmem:[#allocation5 + $0x220] sm:$0xf]  ;;  %v6932_v13 = vld [vmem:[#allocation5 + $0x22c] sm:$0xf0]  ;;  %v4705_v19 = vor.u32 %v6900_v11, %v4704_v9  ;;  %3251 = vmatpush.bf16.msra.mxu3 %v4977_v10  ;;  %v96_v10 = vld [vmem:[#allocation2 + $0x18] sm:$0xff] }
  0x32   :  { %v4960_v14 = vld [vmem:[#allocation5 + $0x320] sm:$0xf]  ;;  %v6964_v15 = vld [vmem:[#allocation5 + $0x32c] sm:$0xf0]  ;;  %v4833_v20 = vor.u32 %v6932_v13, %v4832_v12  ;;  %3213 = vmatpush.bf16.msra.mxu0 %v4577_v16 }
  0x33   :  { %v4560_v17 = vld [vmem:[#allocation5] sm:$0xf]  ;;  %v6864_v18 = vld [vmem:[#allocation5 + $0xc] sm:$0xf0]  ;;  %v4961_v24 = vor.u32 %v6964_v15, %v4960_v14  ;;  %3226 = vmatpush.bf16.msra.mxu1 %v4705_v19  ;;  %v7662_v15 = vpack.c.bf16 %v96_v10, %v96_v10  ;;  %v94_v19 = vld [vmem:[#allocation2 + $0x8] sm:$0xff] }
  0x34   :  { %v4688_v21 = vld [vmem:[#allocation5 + $0x100] sm:$0xf]  ;;  %v6896_v22 = vld [vmem:[#allocation5 + $0x10c] sm:$0xf0]  ;;  %v4561_v31 = vor.u32 %v6864_v18, %v4560_v17  ;;  %3239 = vmatpush.bf16.msra.mxu2 %v4833_v20 }
  0x35   :  { %v4816_v23 = vld [vmem:[#allocation5 + $0x200] sm:$0xf]  ;;  %v6928_v25 = vld [vmem:[#allocation5 + $0x20c] sm:$0xf0]  ;;  %v4689_v35 = vor.u32 %v6896_v22, %v4688_v21  ;;  %3252 = vmatpush.bf16.msra.mxu3 %v4961_v24 }
  0x36   :  { %v4944_v26 = vld [vmem:[#allocation5 + $0x300] sm:$0xf]  ;;  %v6960_v27 = vld [vmem:[#allocation5 + $0x30c] sm:$0xf0]  ;;  %v4817_v36 = vor.u32 %v6928_v25, %v4816_v23  ;;  %3214 = vmatpush.bf16.msra.mxu0 %v4561_v31  ;;  %v7667_v25 = vpack.c.bf16 %v94_v19, %v94_v19 }
  0x37   :  { %v5184_v28 = vld [vmem:[#allocation5 + $0x4e0] sm:$0xf]  ;;  %v7020_v29 = vld [vmem:[#allocation5 + $0x4ec] sm:$0xf0]  ;;  %v4945_v39 = vor.u32 %v6960_v27, %v4944_v26  ;;  %3227 = vmatpush.bf16.msra.mxu1 %v4689_v35 }
  0x38   :  { %v5312_v30 = vld [vmem:[#allocation5 + $0x5e0] sm:$0xf]  ;;  %v7052_v32 = vld [vmem:[#allocation5 + $0x5ec] sm:$0xf0]  ;;  %v5185_v40 = vor.u32 %v7020_v29, %v5184_v28  ;;  %3240 = vmatpush.bf16.msra.mxu2 %v4817_v36 }
  0x39   :  { %v5440_v33 = vld [vmem:[#allocation5 + $0x6e0] sm:$0xf]  ;;  %v7084_v34 = vld [vmem:[#allocation5 + $0x6ec] sm:$0xf0]  ;;  %v5313_v41 = vor.u32 %v7052_v32, %v5312_v30  ;;  %3253 = vmatpush.bf16.msra.mxu3 %v4945_v39 }
  0x3a   :  { %v5568_v37 = vld [vmem:[#allocation5 + $0x7e0] sm:$0xf]  ;;  %v7116_v38 = vld [vmem:[#allocation5 + $0x7ec] sm:$0xf0]  ;;  %v5441_v42 = vor.u32 %v7084_v34, %v5440_v33  ;;  %3259 = vmatpush.bf16.msrb.mxu0 %v5185_v40  ;;  %3228 = vmatmul.bf16.vlgmr.msra.gmra.mxu1 %v7667_v25 }
  0x3b   :  { %v5168_v43 = vld [vmem:[#allocation5 + $0x4c0] sm:$0xf]  ;;  %v7016_v44 = vld [vmem:[#allocation5 + $0x4cc] sm:$0xf0]  ;;  %v5569_v46 = vor.u32 %v7116_v38, %v5568_v37  ;;  %3272 = vmatpush.bf16.msrb.mxu1 %v5313_v41 }
  0x3c   :  { %v5296_v45 = vld [vmem:[#allocation5 + $0x5c0] sm:$0xf]  ;;  %v7048_v47 = vld [vmem:[#allocation5 + $0x5cc] sm:$0xf0]  ;;  %v5169_v52 = vor.u32 %v7016_v44, %v5168_v43  ;;  %3285 = vmatpush.bf16.msrb.mxu2 %v5441_v42  ;;  %3254 = vmatmul.bf16.vlgmr.msra.gmra.mxu3 %v7662_v15 }
  0x3d   :  { %v5424_v48 = vld [vmem:[#allocation5 + $0x6c0] sm:$0xf]  ;;  %v7080_v49 = vld [vmem:[#allocation5 + $0x6cc] sm:$0xf0]  ;;  %v5297_v54 = vor.u32 %v7048_v47, %v5296_v45  ;;  %3298 = vmatpush.bf16.msrb.mxu3 %v5569_v46 }
  0x3e   :  { %v5552_v50 = vld [vmem:[#allocation5 + $0x7c0] sm:$0xf]  ;;  %v7112_v51 = vld [vmem:[#allocation5 + $0x7cc] sm:$0xf0]  ;;  %v5425_v55 = vor.u32 %v7080_v49, %v5424_v48  ;;  %3260 = vmatpush.bf16.msrb.mxu0 %v5169_v52 }
  0x3f   :  { %v5152_v53 = vld [vmem:[#allocation5 + $0x4a0] sm:$0xf]  ;;  %v7012_v56 = vld [vmem:[#allocation5 + $0x4ac] sm:$0xf0]  ;;  %v5553_v59 = vor.u32 %v7112_v51, %v5552_v50  ;;  %3273 = vmatpush.bf16.msrb.mxu1 %v5297_v54 }
  0x40   :  { %v5280_v57 = vld [vmem:[#allocation5 + $0x5a0] sm:$0xf]  ;;  %v7044_v58 = vld [vmem:[#allocation5 + $0x5ac] sm:$0xf0]  ;;  %v5153_v0 = vor.u32 %v7012_v56, %v5152_v53  ;;  %3286 = vmatpush.bf16.msrb.mxu2 %v5425_v55 }
  0x41   :  { %v5408_v60 = vld [vmem:[#allocation5 + $0x6a0] sm:$0xf]  ;;  %v7076_v61 = vld [vmem:[#allocation5 + $0x6ac] sm:$0xf0]  ;;  %v5281_v1 = vor.u32 %v7044_v58, %v5280_v57  ;;  %3299 = vmatpush.bf16.msrb.mxu3 %v5553_v59 }
  0x42   :  { %v5536_v62 = vld [vmem:[#allocation5 + $0x7a0] sm:$0xf]  ;;  %v7108_v63 = vld [vmem:[#allocation5 + $0x7ac] sm:$0xf0]  ;;  %v5409_v5 = vor.u32 %v7076_v61, %v5408_v60  ;;  %3261 = vmatpush.bf16.msrb.mxu0 %v5153_v0 }
  0x43   :  { %v5136_v2 = vld [vmem:[#allocation5 + $0x480] sm:$0xf]  ;;  %v95_v3 = vld [vmem:[#allocation2 + $0x10] sm:$0xff]  ;;  %v5537_v11 = vor.u32 %v7108_v63, %v5536_v62  ;;  %3274 = vmatpush.bf16.msrb.mxu1 %v5281_v1 }
  0x44   :  { %v93_v4 = vld [vmem:[#allocation2] sm:$0xff]  ;;  %v7008_v6 = vld [vmem:[#allocation5 + $0x48c] sm:$0xf0]  ;;  %v7658_v8 = vpack.c.bf16 %v95_v3, %v95_v3  ;;  %3287 = vmatpush.bf16.msrb.mxu2 %v5409_v5 }
  0x45   :  { %v5264_v7 = vld [vmem:[#allocation5 + $0x580] sm:$0xf]  ;;  %v7660_v9 = vpack.c.bf16 %v93_v4, %v93_v4  ;;  %v7040_v12 = vld [vmem:[#allocation5 + $0x58c] sm:$0xf0]  ;;  %v5137_v18 = vor.u32 %v7008_v6, %v5136_v2  ;;  %3300 = vmatpush.bf16.msrb.mxu3 %v5537_v11 }
  0x46   :  { %v5392_v13 = vld [vmem:[#allocation5 + $0x680] sm:$0xf]  ;;  %v7072_v14 = vld [vmem:[#allocation5 + $0x68c] sm:$0xf0]  ;;  %3241 = vmatmul.bf16.vlgmr.msra.gmra.mxu2 %v7658_v8  ;;  %v5265_v20 = vor.u32 %v7040_v12, %v5264_v7 }
  0x47   :  { %v5520_v16 = vld [vmem:[#allocation5 + $0x780] sm:$0xf]  ;;  %v7104_v17 = vld [vmem:[#allocation5 + $0x78c] sm:$0xf0]  ;;  %3215 = vmatmul.bf16.vlgmr.msra.gmra.mxu0 %v7660_v9  ;;  %v5393_v21 = vor.u32 %v7072_v14, %v5392_v13 }
  0x48   :  { %v5120_v22 = vld [vmem:[#allocation5 + $0x460] sm:$0xf]  ;;  %v7004_v23 = vld [vmem:[#allocation5 + $0x46c] sm:$0xf0]  ;;  %v5521_v26 = vor.u32 %v7104_v17, %v5520_v16  ;;  %3262 = vmatpush.bf16.msrb.mxu0 %v5137_v18  ;;  %3275 = vmatpush.bf16.msrb.mxu1 %v5265_v20 }
  0x49   :  { %v5248_v24 = vld [vmem:[#allocation5 + $0x560] sm:$0xf]  ;;  %v7036_v27 = vld [vmem:[#allocation5 + $0x56c] sm:$0xf0]  ;;  %v5121_v32 = vor.u32 %v7004_v23, %v5120_v22  ;;  %3288 = vmatpush.bf16.msrb.mxu2 %v5393_v21  ;;  %v100_v23 = vld [vmem:[#allocation2 + $0x38] sm:$0xff] }
  0x4a   :  { %v5376_v28 = vld [vmem:[#allocation5 + $0x660] sm:$0xf]  ;;  %v7068_v29 = vld [vmem:[#allocation5 + $0x66c] sm:$0xf0]  ;;  %v5249_v33 = vor.u32 %v7036_v27, %v5248_v24  ;;  %3301 = vmatpush.bf16.msrb.mxu3 %v5521_v26 }
  0x4b   :  { %v5504_v30 = vld [vmem:[#allocation5 + $0x760] sm:$0xf]  ;;  %v7100_v31 = vld [vmem:[#allocation5 + $0x76c] sm:$0xf0]  ;;  %v5377_v34 = vor.u32 %v7068_v29, %v5376_v28  ;;  %v98_v29 = vld [vmem:[#allocation2 + $0x28] sm:$0xff] }
  0x4c   :  { %v5104_v35 = vld [vmem:[#allocation5 + $0x440] sm:$0xf]  ;;  %v7000_v36 = vld [vmem:[#allocation5 + $0x44c] sm:$0xf0]  ;;  %v5505_v38 = vor.u32 %v7100_v31, %v5504_v30  ;;  %3263 = vmatpush.bf16.msrb.mxu0 %v5121_v32  ;;  %3276 = vmatpush.bf16.msrb.mxu1 %v5249_v33 }
  0x4d   :  { %v5232_v37 = vld [vmem:[#allocation5 + $0x540] sm:$0xf]  ;;  %v7032_v39 = vld [vmem:[#allocation5 + $0x54c] sm:$0xf0]  ;;  %v5105_v44 = vor.u32 %v7000_v36, %v5104_v35  ;;  %3289 = vmatpush.bf16.msrb.mxu2 %v5377_v34 }
  0x4e   :  { %v5360_v40 = vld [vmem:[#allocation5 + $0x640] sm:$0xf]  ;;  %v7064_v41 = vld [vmem:[#allocation5 + $0x64c] sm:$0xf0]  ;;  %v5233_v45 = vor.u32 %v7032_v39, %v5232_v37  ;;  %3302 = vmatpush.bf16.msrb.mxu3 %v5505_v38  ;;  %v7674_v38 = vpack.c.bf16 %v100_v23, %v100_v23 }
  0x4f   :  { %v5488_v42 = vld [vmem:[#allocation5 + $0x740] sm:$0xf]  ;;  %v7096_v43 = vld [vmem:[#allocation5 + $0x74c] sm:$0xf0]  ;;  %v5361_v46 = vor.u32 %v7064_v41, %v5360_v40  ;;  %v7676_v40 = vpack.c.bf16 %v98_v29, %v98_v29 }
  0x50   :  { %v5088_v47 = vld [vmem:[#allocation5 + $0x420] sm:$0xf]  ;;  %v6996_v48 = vld [vmem:[#allocation5 + $0x42c] sm:$0xf0]  ;;  %v5489_v50 = vor.u32 %v7096_v43, %v5488_v42  ;;  %3264 = vmatpush.bf16.msrb.mxu0 %v5105_v44  ;;  %3277 = vmatpush.bf16.msrb.mxu1 %v5233_v45 }
  0x51   :  { %v5216_v49 = vld [vmem:[#allocation5 + $0x520] sm:$0xf]  ;;  %v7028_v51 = vld [vmem:[#allocation5 + $0x52c] sm:$0xf0]  ;;  %v5089_v56 = vor.u32 %v6996_v48, %v5088_v47  ;;  %3290 = vmatpush.bf16.msrb.mxu2 %v5361_v46 }
  0x52   :  { %v5344_v52 = vld [vmem:[#allocation5 + $0x620] sm:$0xf]  ;;  %v7060_v53 = vld [vmem:[#allocation5 + $0x62c] sm:$0xf0]  ;;  %v5217_v59 = vor.u32 %v7028_v51, %v5216_v49  ;;  %3303 = vmatpush.bf16.msrb.mxu3 %v5489_v50 }
  0x53   :  { %v5472_v54 = vld [vmem:[#allocation5 + $0x720] sm:$0xf]  ;;  %v7092_v55 = vld [vmem:[#allocation5 + $0x72c] sm:$0xf0]  ;;  %v5345_v60 = vor.u32 %v7060_v53, %v5344_v52 }
  0x54   :  { %v5072_v57 = vld [vmem:[#allocation5 + $0x400] sm:$0xf]  ;;  %v6992_v58 = vld [vmem:[#allocation5 + $0x40c] sm:$0xf0]  ;;  %v5473_v0 = vor.u32 %v7092_v55, %v5472_v54  ;;  %3265 = vmatpush.bf16.msrb.mxu0 %v5089_v56  ;;  %3278 = vmatpush.bf16.msrb.mxu1 %v5217_v59 }
  0x55   :  { %v5200_v61 = vld [vmem:[#allocation5 + $0x500] sm:$0xf]  ;;  %v7024_v62 = vld [vmem:[#allocation5 + $0x50c] sm:$0xf0]  ;;  %v5073_v7 = vor.u32 %v6992_v58, %v5072_v57  ;;  %3291 = vmatpush.bf16.msrb.mxu2 %v5345_v60 }
  0x56   :  { %v5328_v63 = vld [vmem:[#allocation5 + $0x600] sm:$0xf]  ;;  %v7056_v1 = vld [vmem:[#allocation5 + $0x60c] sm:$0xf0]  ;;  %v5201_v13 = vor.u32 %v7024_v62, %v5200_v61  ;;  %3304 = vmatpush.bf16.msrb.mxu3 %v5473_v0 }
  0x57   :  { %v5456_v2 = vld [vmem:[#allocation5 + $0x700] sm:$0xf]  ;;  %v7088_v3 = vld [vmem:[#allocation5 + $0x70c] sm:$0xf0]  ;;  %v5329_v14 = vor.u32 %v7056_v1, %v5328_v63 }
  0x58   :  { %v5696_v4 = vld [vmem:[#allocation5 + $0x8e0] sm:$0xf]  ;;  %v7148_v5 = vld [vmem:[#allocation5 + $0x8ec] sm:$0xf0]  ;;  %v5457_v19 = vor.u32 %v7088_v3, %v5456_v2  ;;  %3266 = vmatpush.bf16.msrb.mxu0 %v5073_v7  ;;  %3279 = vmatpush.bf16.msrb.mxu1 %v5201_v13 }
  0x59   :  { %v5824_v6 = vld [vmem:[#allocation5 + $0x9e0] sm:$0xf]  ;;  %v7180_v10 = vld [vmem:[#allocation5 + $0x9ec] sm:$0xf0]  ;;  %v5697_v20 = vor.u32 %v7148_v5, %v5696_v4  ;;  %3292 = vmatpush.bf16.msrb.mxu2 %v5329_v14 }
  0x5a   :  { %v5952_v11 = vld [vmem:[#allocation5 + $0xae0] sm:$0xf]  ;;  %v7212_v12 = vld [vmem:[#allocation5 + $0xaec] sm:$0xf0]  ;;  %v5825_v24 = vor.u32 %v7180_v10, %v5824_v6  ;;  %3305 = vmatpush.bf16.msrb.mxu3 %v5457_v19 }
  0x5b   :  { %v6080_v16 = vld [vmem:[#allocation5 + $0xbe0] sm:$0xf]  ;;  %v7244_v17 = vld [vmem:[#allocation5 + $0xbec] sm:$0xf0]  ;;  %v5953_v26 = vor.u32 %v7212_v12, %v5952_v11  ;;  %3280 = vmatmul.bf16.vlgmr.msrb.gmra.mxu1 %v7676_v40 }
  0x5c   :  { %v99_v18 = vld [vmem:[#allocation2 + $0x30] sm:$0xff]  ;;  %v5680_v21 = vld [vmem:[#allocation5 + $0x8c0] sm:$0xf]  ;;  %v6081_v30 = vor.u32 %v7244_v17, %v6080_v16  ;;  %3311 = vmatpush.bf16.msra.mxu0 %v5697_v20  ;;  %3324 = vmatpush.bf16.msra.mxu1 %v5825_v24 }
  0x5d   :  { %v97_v22 = vld [vmem:[#allocation2 + $0x20] sm:$0xff]  ;;  %v7144_v27 = vld [vmem:[#allocation5 + $0x8cc] sm:$0xf0]  ;;  %v7670_v34 = vpack.c.bf16 %v99_v18, %v99_v18  ;;  %3337 = vmatpush.bf16.msra.mxu2 %v5953_v26  ;;  %3306 = vmatmul.bf16.vlgmr.msrb.gmra.mxu3 %v7674_v38 }
  0x5e   :  { %v5808_v28 = vld [vmem:[#allocation5 + $0x9c0] sm:$0xf]  ;;  %v7176_v31 = vld [vmem:[#allocation5 + $0x9cc] sm:$0xf0]  ;;  %v7672_v37 = vpack.c.bf16 %v97_v22, %v97_v22  ;;  %v5681_v39 = vor.u32 %v7144_v27, %v5680_v21  ;;  %3350 = vmatpush.bf16.msra.mxu3 %v6081_v30 }
  0x5f   :  { %v5936_v32 = vld [vmem:[#allocation5 + $0xac0] sm:$0xf]  ;;  %v7208_v33 = vld [vmem:[#allocation5 + $0xacc] sm:$0xf0]  ;;  %v5809_v41 = vor.u32 %v7176_v31, %v5808_v28  ;;  %3293 = vmatmul.bf16.vlgmr.msrb.gmra.mxu2 %v7670_v34 }
  0x60   :  { %v6064_v35 = vld [vmem:[#allocation5 + $0xbc0] sm:$0xf]  ;;  %v7240_v36 = vld [vmem:[#allocation5 + $0xbcc] sm:$0xf0]  ;;  %v5937_v42 = vor.u32 %v7208_v33, %v5936_v32  ;;  %3267 = vmatmul.bf16.vlgmr.msrb.gmra.mxu0 %v7672_v37 }
  0x61   :  { %v5664_v43 = vld [vmem:[#allocation5 + $0x8a0] sm:$0xf]  ;;  %v7140_v44 = vld [vmem:[#allocation5 + $0x8ac] sm:$0xf0]  ;;  %v6065_v46 = vor.u32 %v7240_v36, %v6064_v35  ;;  %3312 = vmatpush.bf16.msra.mxu0 %v5681_v39  ;;  %3325 = vmatpush.bf16.msra.mxu1 %v5809_v41 }
  0x62   :  { %v5792_v45 = vld [vmem:[#allocation5 + $0x9a0] sm:$0xf]  ;;  %v7172_v47 = vld [vmem:[#allocation5 + $0x9ac] sm:$0xf0]  ;;  %v5665_v52 = vor.u32 %v7140_v44, %v5664_v43  ;;  %3338 = vmatpush.bf16.msra.mxu2 %v5937_v42 }
  0x63   :  { %v5920_v48 = vld [vmem:[#allocation5 + $0xaa0] sm:$0xf]  ;;  %v7204_v49 = vld [vmem:[#allocation5 + $0xaac] sm:$0xf0]  ;;  %v5793_v53 = vor.u32 %v7172_v47, %v5792_v45  ;;  %3351 = vmatpush.bf16.msra.mxu3 %v6065_v46 }
  0x64   :  { %v6048_v50 = vld [vmem:[#allocation5 + $0xba0] sm:$0xf]  ;;  %v7236_v51 = vld [vmem:[#allocation5 + $0xbac] sm:$0xf0]  ;;  %v5921_v54 = vor.u32 %v7204_v49, %v5920_v48 }
  0x65   :  { %v5648_v55 = vld [vmem:[#allocation5 + $0x880] sm:$0xf]  ;;  %v7136_v56 = vld [vmem:[#allocation5 + $0x88c] sm:$0xf0]  ;;  %v6049_v58 = vor.u32 %v7236_v51, %v6048_v50  ;;  %3313 = vmatpush.bf16.msra.mxu0 %v5665_v52  ;;  %3326 = vmatpush.bf16.msra.mxu1 %v5793_v53 }
  0x66   :  { %v5776_v57 = vld [vmem:[#allocation5 + $0x980] sm:$0xf]  ;;  %v7168_v59 = vld [vmem:[#allocation5 + $0x98c] sm:$0xf0]  ;;  %v5649_v0 = vor.u32 %v7136_v56, %v5648_v55  ;;  %3339 = vmatpush.bf16.msra.mxu2 %v5921_v54 }
  0x67   :  { %v5904_v60 = vld [vmem:[#allocation5 + $0xa80] sm:$0xf]  ;;  %v7200_v61 = vld [vmem:[#allocation5 + $0xa8c] sm:$0xf0]  ;;  %v5777_v1 = vor.u32 %v7168_v59, %v5776_v57  ;;  %3352 = vmatpush.bf16.msra.mxu3 %v6049_v58 }
  0x68   :  { %v6032_v62 = vld [vmem:[#allocation5 + $0xb80] sm:$0xf]  ;;  %v7232_v63 = vld [vmem:[#allocation5 + $0xb8c] sm:$0xf0]  ;;  %v5905_v2 = vor.u32 %v7200_v61, %v5904_v60 }
  0x69   :  { %v5632_v3 = vld [vmem:[#allocation5 + $0x860] sm:$0xf]  ;;  %v7132_v4 = vld [vmem:[#allocation5 + $0x86c] sm:$0xf0]  ;;  %v6033_v6 = vor.u32 %v7232_v63, %v6032_v62  ;;  %3314 = vmatpush.bf16.msra.mxu0 %v5649_v0  ;;  %3327 = vmatpush.bf16.msra.mxu1 %v5777_v1 }
  0x6a   :  { %v5760_v5 = vld [vmem:[#allocation5 + $0x960] sm:$0xf]  ;;  %v7164_v7 = vld [vmem:[#allocation5 + $0x96c] sm:$0xf0]  ;;  %v5633_v14 = vor.u32 %v7132_v4, %v5632_v3  ;;  %3340 = vmatpush.bf16.msra.mxu2 %v5905_v2 }
  0x6b   :  { %v5888_v10 = vld [vmem:[#allocation5 + $0xa60] sm:$0xf]  ;;  %v7196_v11 = vld [vmem:[#allocation5 + $0xa6c] sm:$0xf0]  ;;  %v5761_v16 = vor.u32 %v7164_v7, %v5760_v5  ;;  %3353 = vmatpush.bf16.msra.mxu3 %v6033_v6  ;;  %v102_v7 = vld [vmem:[#allocation2 + $0x48] sm:$0xff] }
  0x6c   :  { %v6016_v12 = vld [vmem:[#allocation5 + $0xb60] sm:$0xf]  ;;  %v7228_v13 = vld [vmem:[#allocation5 + $0xb6c] sm:$0xf0]  ;;  %v5889_v17 = vor.u32 %v7196_v11, %v5888_v10  ;;  %v104_v10 = vld [vmem:[#allocation2 + $0x58] sm:$0xff] }
  0x6d   :  { %v5616_v18 = vld [vmem:[#allocation5 + $0x840] sm:$0xf]  ;;  %v7128_v19 = vld [vmem:[#allocation5 + $0x84c] sm:$0xf0]  ;;  %v6017_v21 = vor.u32 %v7228_v13, %v6016_v12  ;;  %3315 = vmatpush.bf16.msra.mxu0 %v5633_v14  ;;  %3328 = vmatpush.bf16.msra.mxu1 %v5761_v16 }
  0x6e   :  { %v5744_v20 = vld [vmem:[#allocation5 + $0x940] sm:$0xf]  ;;  %v7160_v22 = vld [vmem:[#allocation5 + $0x94c] sm:$0xf0]  ;;  %v5617_v28 = vor.u32 %v7128_v19, %v5616_v18  ;;  %3341 = vmatpush.bf16.msra.mxu2 %v5889_v17 }
  0x6f   :  { %v5872_v23 = vld [vmem:[#allocation5 + $0xa40] sm:$0xf]  ;;  %v7192_v24 = vld [vmem:[#allocation5 + $0xa4c] sm:$0xf0]  ;;  %v5745_v29 = vor.u32 %v7160_v22, %v5744_v20  ;;  %3354 = vmatpush.bf16.msra.mxu3 %v6017_v21 }
  0x70   :  { %v6000_v26 = vld [vmem:[#allocation5 + $0xb40] sm:$0xf]  ;;  %v7224_v27 = vld [vmem:[#allocation5 + $0xb4c] sm:$0xf0]  ;;  %v5873_v30 = vor.u32 %v7192_v24, %v5872_v23  ;;  %v7686_v23 = vpack.c.bf16 %v102_v7, %v102_v7 }
  0x71   :  { %v5600_v31 = vld [vmem:[#allocation5 + $0x820] sm:$0xf]  ;;  %v7124_v32 = vld [vmem:[#allocation5 + $0x82c] sm:$0xf0]  ;;  %v6001_v35 = vor.u32 %v7224_v27, %v6000_v26  ;;  %3316 = vmatpush.bf16.msra.mxu0 %v5617_v28  ;;  %3329 = vmatpush.bf16.msra.mxu1 %v5745_v29  ;;  %v7688_v27 = vpack.c.bf16 %v104_v10, %v104_v10 }
  0x72   :  { %v5728_v33 = vld [vmem:[#allocation5 + $0x920] sm:$0xf]  ;;  %v7156_v36 = vld [vmem:[#allocation5 + $0x92c] sm:$0xf0]  ;;  %v5601_v44 = vor.u32 %v7124_v32, %v5600_v31  ;;  %3342 = vmatpush.bf16.msra.mxu2 %v5873_v30 }
  0x73   :  { %v5856_v39 = vld [vmem:[#allocation5 + $0xa20] sm:$0xf]  ;;  %v7188_v41 = vld [vmem:[#allocation5 + $0xa2c] sm:$0xf0]  ;;  %v5729_v47 = vor.u32 %v7156_v36, %v5728_v33  ;;  %3355 = vmatpush.bf16.msra.mxu3 %v6001_v35 }
  0x74   :  { %v5984_v42 = vld [vmem:[#allocation5 + $0xb20] sm:$0xf]  ;;  %v7220_v43 = vld [vmem:[#allocation5 + $0xb2c] sm:$0xf0]  ;;  %v5857_v48 = vor.u32 %v7188_v41, %v5856_v39 }
  0x75   :  { %v5584_v45 = vld [vmem:[#allocation5 + $0x800] sm:$0xf]  ;;  %v7120_v46 = vld [vmem:[#allocation5 + $0x80c] sm:$0xf0]  ;;  %v5985_v52 = vor.u32 %v7220_v43, %v5984_v42  ;;  %3317 = vmatpush.bf16.msra.mxu0 %v5601_v44  ;;  %3330 = vmatpush.bf16.msra.mxu1 %v5729_v47 }
  0x76   :  { %v5712_v49 = vld [vmem:[#allocation5 + $0x900] sm:$0xf]  ;;  %v7152_v50 = vld [vmem:[#allocation5 + $0x90c] sm:$0xf0]  ;;  %v5585_v59 = vor.u32 %v7120_v46, %v5584_v45  ;;  %3343 = vmatpush.bf16.msra.mxu2 %v5857_v48 }
  0x77   :  { %v5840_v51 = vld [vmem:[#allocation5 + $0xa00] sm:$0xf]  ;;  %v7184_v53 = vld [vmem:[#allocation5 + $0xa0c] sm:$0xf0]  ;;  %v5713_v63 = vor.u32 %v7152_v50, %v5712_v49  ;;  %3356 = vmatpush.bf16.msra.mxu3 %v5985_v52 }
  0x78   :  { %v5968_v54 = vld [vmem:[#allocation5 + $0xb00] sm:$0xf]  ;;  %v7216_v55 = vld [vmem:[#allocation5 + $0xb0c] sm:$0xf0]  ;;  %v5841_v0 = vor.u32 %v7184_v53, %v5840_v51 }
  0x79   :  { %v6208_v56 = vld [vmem:[#allocation5 + $0xce0] sm:$0xf]  ;;  %v7276_v57 = vld [vmem:[#allocation5 + $0xcec] sm:$0xf0]  ;;  %v5969_v4 = vor.u32 %v7216_v55, %v5968_v54  ;;  %3318 = vmatpush.bf16.msra.mxu0 %v5585_v59  ;;  %3331 = vmatpush.bf16.msra.mxu1 %v5713_v63 }
  0x7a   :  { %v6336_v58 = vld [vmem:[#allocation5 + $0xde0] sm:$0xf]  ;;  %v7308_v60 = vld [vmem:[#allocation5 + $0xdec] sm:$0xf0]  ;;  %v6209_v5 = vor.u32 %v7276_v57, %v6208_v56  ;;  %3344 = vmatpush.bf16.msra.mxu2 %v5841_v0 }
  0x7b   :  { %v6464_v61 = vld [vmem:[#allocation5 + $0xee0] sm:$0xf]  ;;  %v7340_v62 = vld [vmem:[#allocation5 + $0xeec] sm:$0xf0]  ;;  %v6337_v11 = vor.u32 %v7308_v60, %v6336_v58  ;;  %3357 = vmatpush.bf16.msra.mxu3 %v5969_v4 }
  0x7c   :  { %v6592_v1 = vld [vmem:[#allocation5 + $0xfe0] sm:$0xf]  ;;  %v7372_v2 = vld [vmem:[#allocation5 + $0xfec] sm:$0xf0]  ;;  %v6465_v12 = vor.u32 %v7340_v62, %v6464_v61  ;;  %3332 = vmatmul.bf16.vlgmr.msra.gmra.mxu1 %v7686_v23 }
  0x7d   :  { %v101_v3 = vld [vmem:[#allocation2 + $0x40] sm:$0xff]  ;;  %v103_v6 = vld [vmem:[#allocation2 + $0x50] sm:$0xff]  ;;  %v6593_v17 = vor.u32 %v7372_v2, %v6592_v1  ;;  %3363 = vmatpush.bf16.msrb.mxu0 %v6209_v5  ;;  %3376 = vmatpush.bf16.msrb.mxu1 %v6337_v11 }
  0x7e   :  { %v6192_v13 = vld [vmem:[#allocation5 + $0xcc0] sm:$0xf]  ;;  %v7272_v14 = vld [vmem:[#allocation5 + $0xccc] sm:$0xf0]  ;;  %v7682_v18 = vpack.c.bf16 %v101_v3, %v101_v3  ;;  %v7684_v22 = vpack.c.bf16 %v103_v6, %v103_v6  ;;  %3389 = vmatpush.bf16.msrb.mxu2 %v6465_v12  ;;  %3358 = vmatmul.bf16.vlgmr.msra.gmra.mxu3 %v7688_v27 }
  0x7f   :  { %v6320_v16 = vld [vmem:[#allocation5 + $0xdc0] sm:$0xf]  ;;  %v7304_v19 = vld [vmem:[#allocation5 + $0xdcc] sm:$0xf0]  ;;  %v6193_v28 = vor.u32 %v7272_v14, %v6192_v13  ;;  %3402 = vmatpush.bf16.msrb.mxu3 %v6593_v17 }
  0x80   :  { %v6448_v20 = vld [vmem:[#allocation5 + $0xec0] sm:$0xf]  ;;  %v7336_v21 = vld [vmem:[#allocation5 + $0xecc] sm:$0xf0]  ;;  %v6321_v29 = vor.u32 %v7304_v19, %v6320_v16  ;;  %3319 = vmatmul.bf16.vlgmr.msra.gmra.mxu0 %v7682_v18  ;;  %3345 = vmatmul.bf16.vlgmr.msra.gmra.mxu2 %v7684_v22 }
  0x81   :  { %v6576_v24 = vld [vmem:[#allocation5 + $0xfc0] sm:$0xf]  ;;  %v7368_v26 = vld [vmem:[#allocation5 + $0xfcc] sm:$0xf0]  ;;  %v6449_v30 = vor.u32 %v7336_v21, %v6448_v20  ;;  %3364 = vmatpush.bf16.msrb.mxu0 %v6193_v28 }
  0x82   :  { %v6176_v31 = vld [vmem:[#allocation5 + $0xca0] sm:$0xf]  ;;  %v7268_v32 = vld [vmem:[#allocation5 + $0xcac] sm:$0xf0]  ;;  %v6577_v35 = vor.u32 %v7368_v26, %v6576_v24  ;;  %3377 = vmatpush.bf16.msrb.mxu1 %v6321_v29 }
  0x83   :  { %v6304_v33 = vld [vmem:[#allocation5 + $0xda0] sm:$0xf]  ;;  %v7300_v36 = vld [vmem:[#allocation5 + $0xdac] sm:$0xf0]  ;;  %v6177_v44 = vor.u32 %v7268_v32, %v6176_v31  ;;  %3390 = vmatpush.bf16.msrb.mxu2 %v6449_v30 }
  0x84   :  { %v6432_v39 = vld [vmem:[#allocation5 + $0xea0] sm:$0xf]  ;;  %v7332_v41 = vld [vmem:[#allocation5 + $0xeac] sm:$0xf0]  ;;  %v6305_v45 = vor.u32 %v7300_v36, %v6304_v33  ;;  %3403 = vmatpush.bf16.msrb.mxu3 %v6577_v35 }
  0x85   :  { %v6560_v42 = vld [vmem:[#allocation5 + $0xfa0] sm:$0xf]  ;;  %v7364_v43 = vld [vmem:[#allocation5 + $0xfac] sm:$0xf0]  ;;  %v6433_v46 = vor.u32 %v7332_v41, %v6432_v39  ;;  %3365 = vmatpush.bf16.msrb.mxu0 %v6177_v44 }
  0x86   :  { %v6160_v47 = vld [vmem:[#allocation5 + $0xc80] sm:$0xf]  ;;  %v7264_v48 = vld [vmem:[#allocation5 + $0xc8c] sm:$0xf0]  ;;  %v6561_v50 = vor.u32 %v7364_v43, %v6560_v42  ;;  %3378 = vmatpush.bf16.msrb.mxu1 %v6305_v45 }
  0x87   :  { %v6288_v49 = vld [vmem:[#allocation5 + $0xd80] sm:$0xf]  ;;  %v7296_v51 = vld [vmem:[#allocation5 + $0xd8c] sm:$0xf0]  ;;  %v6161_v56 = vor.u32 %v7264_v48, %v6160_v47  ;;  %3391 = vmatpush.bf16.msrb.mxu2 %v6433_v46 }
  0x88   :  { %v6416_v52 = vld [vmem:[#allocation5 + $0xe80] sm:$0xf]  ;;  %v7328_v53 = vld [vmem:[#allocation5 + $0xe8c] sm:$0xf0]  ;;  %v6289_v57 = vor.u32 %v7296_v51, %v6288_v49  ;;  %3404 = vmatpush.bf16.msrb.mxu3 %v6561_v50 }
  0x89   :  { %v6544_v54 = vld [vmem:[#allocation5 + $0xf80] sm:$0xf]  ;;  %v7360_v55 = vld [vmem:[#allocation5 + $0xf8c] sm:$0xf0]  ;;  %v6417_v58 = vor.u32 %v7328_v53, %v6416_v52  ;;  %3366 = vmatpush.bf16.msrb.mxu0 %v6161_v56  ;;  %v6890_v52 = vld [vmem:[#allocation5 + $0xe4] sm:$0xf] }
  0x8a   :  { %v6144_v59 = vld [vmem:[#allocation5 + $0xc60] sm:$0xf]  ;;  %v7260_v60 = vld [vmem:[#allocation5 + $0xc6c] sm:$0xf0]  ;;  %v6545_v62 = vor.u32 %v7360_v55, %v6544_v54  ;;  %3379 = vmatpush.bf16.msrb.mxu1 %v6289_v57  ;;  %v4674_v53 = vld [vmem:[#allocation5 + $0xf0] sm:$0xf0] }
  0x8b   :  { %v6272_v61 = vld [vmem:[#allocation5 + $0xd60] sm:$0xf]  ;;  %v7292_v63 = vld [vmem:[#allocation5 + $0xd6c] sm:$0xf0]  ;;  %v6145_v4 = vor.u32 %v7260_v60, %v6144_v59  ;;  %3392 = vmatpush.bf16.msrb.mxu2 %v6417_v58  ;;  %v6922_v54 = vld [vmem:[#allocation5 + $0x1e4] sm:$0xf] }
  0x8c   :  { %v6400_v0 = vld [vmem:[#allocation5 + $0xe60] sm:$0xf]  ;;  %v7324_v1 = vld [vmem:[#allocation5 + $0xe6c] sm:$0xf0]  ;;  %v6273_v5 = vor.u32 %v7292_v63, %v6272_v61  ;;  %3405 = vmatpush.bf16.msrb.mxu3 %v6545_v62  ;;  %v4802_v56 = vld [vmem:[#allocation5 + $0x1f0] sm:$0xf0] }
  0x8d   :  { %v6528_v2 = vld [vmem:[#allocation5 + $0xf60] sm:$0xf]  ;;  %v7356_v3 = vld [vmem:[#allocation5 + $0xf6c] sm:$0xf0]  ;;  %v6401_v6 = vor.u32 %v7324_v1, %v6400_v0  ;;  %3367 = vmatpush.bf16.msrb.mxu0 %v6145_v4  ;;  %v6954_v57 = vld [vmem:[#allocation5 + $0x2e4] sm:$0xf]  ;;  %v4677_v1 = vor.u32 %v6890_v52, %v4674_v53 }
  0x8e   :  { %v6128_v7 = vld [vmem:[#allocation5 + $0xc40] sm:$0xf]  ;;  %v7256_v10 = vld [vmem:[#allocation5 + $0xc4c] sm:$0xf0]  ;;  %v6529_v12 = vor.u32 %v7356_v3, %v6528_v2  ;;  %3380 = vmatpush.bf16.msrb.mxu1 %v6273_v5  ;;  %v4930_v58 = vld [vmem:[#allocation5 + $0x2f0] sm:$0xf0]  ;;  %v4805_v5 = vor.u32 %v6922_v54, %v4802_v56 }
  0x8f   :  { %v6256_v11 = vld [vmem:[#allocation5 + $0xd40] sm:$0xf]  ;;  %v7288_v13 = vld [vmem:[#allocation5 + $0xd4c] sm:$0xf0]  ;;  %v6129_v20 = vor.u32 %v7256_v10, %v6128_v7  ;;  %3393 = vmatpush.bf16.msrb.mxu2 %v6401_v6  ;;  %v6986_v61 = vld [vmem:[#allocation5 + $0x3e4] sm:$0xf]  ;;  %v4933_v6 = vor.u32 %v6954_v57, %v4930_v58 }
  0x90   :  { %v6384_v14 = vld [vmem:[#allocation5 + $0xe40] sm:$0xf]  ;;  %v7320_v16 = vld [vmem:[#allocation5 + $0xe4c] sm:$0xf0]  ;;  %v6257_v21 = vor.u32 %v7288_v13, %v6256_v11  ;;  %3406 = vmatpush.bf16.msrb.mxu3 %v6529_v12  ;;  %v5058_v62 = vld [vmem:[#allocation5 + $0x3f0] sm:$0xf0] }
  0x91   :  { %v6512_v17 = vld [vmem:[#allocation5 + $0xf40] sm:$0xf]  ;;  %v7352_v19 = vld [vmem:[#allocation5 + $0xf4c] sm:$0xf0]  ;;  %v6385_v24 = vor.u32 %v7320_v16, %v6384_v14  ;;  %3368 = vmatpush.bf16.msrb.mxu0 %v6129_v20  ;;  %v106_v3 = vld [vmem:[#allocation2 + $0x68] sm:$0xff]  ;;  %v5061_v12 = vor.u32 %v6986_v61, %v5058_v62 }
  0x92   :  { %v6112_v26 = vld [vmem:[#allocation5 + $0xc20] sm:$0xf]  ;;  %v7252_v28 = vld [vmem:[#allocation5 + $0xc2c] sm:$0xf0]  ;;  %v6513_v30 = vor.u32 %v7352_v19, %v6512_v17  ;;  %3381 = vmatpush.bf16.msrb.mxu1 %v6257_v21  ;;  %v108_v4 = vld [vmem:[#allocation2 + $0x78] sm:$0xff]  ;;  %v7698_v20 = vpack.c.bf16 %v106_v3, %v106_v3 }
  0x93   :  { %v6240_v29 = vld [vmem:[#allocation5 + $0xd20] sm:$0xf]  ;;  %v7284_v31 = vld [vmem:[#allocation5 + $0xd2c] sm:$0xf0]  ;;  %v6113_v39 = vor.u32 %v7252_v28, %v6112_v26  ;;  %3394 = vmatpush.bf16.msrb.mxu2 %v6385_v24  ;;  %v6886_v7 = vld [vmem:[#allocation5 + $0xc4] sm:$0xf]  ;;  %v7700_v26 = vpack.c.bf16 %v108_v4, %v108_v4 }
  0x94   :  { %v6368_v32 = vld [vmem:[#allocation5 + $0xe20] sm:$0xf]  ;;  %v7316_v33 = vld [vmem:[#allocation5 + $0xe2c] sm:$0xf0]  ;;  %v6241_v43 = vor.u32 %v7284_v31, %v6240_v29  ;;  %3407 = vmatpush.bf16.msrb.mxu3 %v6513_v30  ;;  %v4658_v10 = vld [vmem:[#allocation5 + $0xd0] sm:$0xf0] }
  0x95   :  { %v6496_v35 = vld [vmem:[#allocation5 + $0xf20] sm:$0xf]  ;;  %v7348_v36 = vld [vmem:[#allocation5 + $0xf2c] sm:$0xf0]  ;;  %v6369_v44 = vor.u32 %v7316_v33, %v6368_v32  ;;  %3369 = vmatpush.bf16.msrb.mxu0 %v6113_v39  ;;  %v6918_v11 = vld [vmem:[#allocation5 + $0x1c4] sm:$0xf]  ;;  %v4661_v28 = vor.u32 %v6886_v7, %v4658_v10 }
  0x96   :  { %v6096_v41 = vld [vmem:[#allocation5 + $0xc00] sm:$0xf]  ;;  %v7248_v42 = vld [vmem:[#allocation5 + $0xc0c] sm:$0xf0]  ;;  %v6497_v48 = vor.u32 %v7348_v36, %v6496_v35  ;;  %3382 = vmatpush.bf16.msrb.mxu1 %v6241_v43  ;;  %v4786_v14 = vld [vmem:[#allocation5 + $0x1d0] sm:$0xf0] }
  0x97   :  { %v6224_v45 = vld [vmem:[#allocation5 + $0xd00] sm:$0xf]  ;;  %v7280_v46 = vld [vmem:[#allocation5 + $0xd0c] sm:$0xf0]  ;;  %v6097_v55 = vor.u32 %v7248_v42, %v6096_v41  ;;  %3395 = vmatpush.bf16.msrb.mxu2 %v6369_v44  ;;  %v6950_v16 = vld [vmem:[#allocation5 + $0x2c4] sm:$0xf]  ;;  %v4789_v29 = vor.u32 %v6918_v11, %v4786_v14 }
  0x98   :  { %v6352_v47 = vld [vmem:[#allocation5 + $0xe00] sm:$0xf]  ;;  %v7312_v49 = vld [vmem:[#allocation5 + $0xe0c] sm:$0xf0]  ;;  %v6225_v59 = vor.u32 %v7280_v46, %v6224_v45  ;;  %3408 = vmatpush.bf16.msrb.mxu3 %v6497_v48  ;;  %v4914_v17 = vld [vmem:[#allocation5 + $0x2d0] sm:$0xf0] }
  0x99   :  { %v6480_v50 = vld [vmem:[#allocation5 + $0xf00] sm:$0xf]  ;;  %v7344_v51 = vld [vmem:[#allocation5 + $0xf0c] sm:$0xf0]  ;;  %v6353_v60 = vor.u32 %v7312_v49, %v6352_v47  ;;  %3370 = vmatpush.bf16.msrb.mxu0 %v6097_v55  ;;  %v6982_v21 = vld [vmem:[#allocation5 + $0x3c4] sm:$0xf]  ;;  %v4917_v30 = vor.u32 %v6950_v16, %v4914_v17 }
  0x9a   :  { %v105_v63 = vld [vmem:[#allocation2 + $0x60] sm:$0xff]  ;;  %v6481_v0 = vor.u32 %v7344_v51, %v6480_v50  ;;  %v107_v2 = vld [vmem:[#allocation2 + $0x70] sm:$0xff]  ;;  %3383 = vmatpush.bf16.msrb.mxu1 %v6225_v59 }
  0x9b   :  { %v7694_v13 = vpack.c.bf16 %v105_v63, %v105_v63  ;;  %3396 = vmatpush.bf16.msrb.mxu2 %v6353_v60  ;;  %v7696_v19 = vpack.c.bf16 %v107_v2, %v107_v2  ;;  %v5042_v24 = vld [vmem:[#allocation5 + $0x3d0] sm:$0xf0]  ;;  %v6882_v31 = vld [vmem:[#allocation5 + $0xa4] sm:$0xf] }
  0x9c   :  { %3409 = vmatpush.bf16.msrb.mxu3 %v6481_v0  ;;  %v4642_v32 = vld [vmem:[#allocation5 + $0xb0] sm:$0xf0]  ;;  %v6914_v33 = vld [vmem:[#allocation5 + $0x1a4] sm:$0xf]  ;;  %v5045_v35 = vor.u32 %v6982_v21, %v5042_v24 }
  0x9d   :  { %3415 = vmatpush.bf16.msra.mxu0 %v4677_v1  ;;  %v4770_v36 = vld [vmem:[#allocation5 + $0x1b0] sm:$0xf0]  ;;  %v6946_v39 = vld [vmem:[#allocation5 + $0x2a4] sm:$0xf]  ;;  %3384 = vmatmul.bf16.vlgmr.msrb.gmra.mxu1 %v7698_v20  ;;  %v4645_v44 = vor.u32 %v6882_v31, %v4642_v32 }
  0x9e   :  { %3428 = vmatpush.bf16.msra.mxu1 %v4805_v5  ;;  %3371 = vmatmul.bf16.vlgmr.msrb.gmra.mxu0 %v7694_v13  ;;  %v4898_v41 = vld [vmem:[#allocation5 + $0x2b0] sm:$0xf0]  ;;  %v6978_v42 = vld [vmem:[#allocation5 + $0x3a4] sm:$0xf]  ;;  %v4773_v45 = vor.u32 %v6914_v33, %v4770_v36 }
  0x9f   :  { %3441 = vmatpush.bf16.msra.mxu2 %v4933_v6  ;;  %v5026_v43 = vld [vmem:[#allocation5 + $0x3b0] sm:$0xf0]  ;;  %3410 = vmatmul.bf16.vlgmr.msrb.gmra.mxu3 %v7700_v26  ;;  %v4901_v46 = vor.u32 %v6946_v39, %v4898_v41  ;;  %v6878_v47 = vld [vmem:[#allocation5 + $0x84] sm:$0xf] }
  0xa0   :  { %3454 = vmatpush.bf16.msra.mxu3 %v5061_v12  ;;  %3397 = vmatmul.bf16.vlgmr.msrb.gmra.mxu2 %v7696_v19  ;;  %v4626_v48 = vld [vmem:[#allocation5 + $0x90] sm:$0xf0]  ;;  %v6910_v49 = vld [vmem:[#allocation5 + $0x184] sm:$0xf]  ;;  %v5029_v50 = vor.u32 %v6978_v42, %v5026_v43 }
  0xa1   :  { %3416 = vmatpush.bf16.msra.mxu0 %v4661_v28  ;;  %v4754_v51 = vld [vmem:[#allocation5 + $0x190] sm:$0xf0]  ;;  %v6942_v52 = vld [vmem:[#allocation5 + $0x284] sm:$0xf]  ;;  %v4629_v56 = vor.u32 %v6878_v47, %v4626_v48 }
  0xa2   :  { %3429 = vmatpush.bf16.msra.mxu1 %v4789_v29  ;;  %v4882_v53 = vld [vmem:[#allocation5 + $0x290] sm:$0xf0]  ;;  %v6974_v54 = vld [vmem:[#allocation5 + $0x384] sm:$0xf]  ;;  %v4757_v57 = vor.u32 %v6910_v49, %v4754_v51 }
  0xa3   :  { %3442 = vmatpush.bf16.msra.mxu2 %v4917_v30  ;;  %v5010_v55 = vld [vmem:[#allocation5 + $0x390] sm:$0xf0]  ;;  %v4885_v58 = vor.u32 %v6942_v52, %v4882_v53  ;;  %v6874_v59 = vld [vmem:[#allocation5 + $0x64] sm:$0xf] }
  0xa4   :  { %3455 = vmatpush.bf16.msra.mxu3 %v5045_v35  ;;  %v4610_v60 = vld [vmem:[#allocation5 + $0x70] sm:$0xf0]  ;;  %v6906_v61 = vld [vmem:[#allocation5 + $0x164] sm:$0xf]  ;;  %v5013_v62 = vor.u32 %v6974_v54, %v5010_v55 }
  0xa5   :  { %3417 = vmatpush.bf16.msra.mxu0 %v4645_v44  ;;  %v4738_v63 = vld [vmem:[#allocation5 + $0x170] sm:$0xf0]  ;;  %v6938_v0 = vld [vmem:[#allocation5 + $0x264] sm:$0xf]  ;;  %v4613_v4 = vor.u32 %v6874_v59, %v4610_v60 }
  0xa6   :  { %3430 = vmatpush.bf16.msra.mxu1 %v4773_v45  ;;  %v4866_v1 = vld [vmem:[#allocation5 + $0x270] sm:$0xf0]  ;;  %v6970_v2 = vld [vmem:[#allocation5 + $0x364] sm:$0xf]  ;;  %v4741_v5 = vor.u32 %v6906_v61, %v4738_v63 }
  0xa7   :  { %3443 = vmatpush.bf16.msra.mxu2 %v4901_v46  ;;  %v4994_v3 = vld [vmem:[#allocation5 + $0x370] sm:$0xf0]  ;;  %v4869_v6 = vor.u32 %v6938_v0, %v4866_v1  ;;  %v6870_v7 = vld [vmem:[#allocation5 + $0x44] sm:$0xf] }
  0xa8   :  { %3456 = vmatpush.bf16.msra.mxu3 %v5029_v50  ;;  %v4594_v10 = vld [vmem:[#allocation5 + $0x50] sm:$0xf0]  ;;  %v6902_v11 = vld [vmem:[#allocation5 + $0x144] sm:$0xf]  ;;  %v4997_v12 = vor.u32 %v6970_v2, %v4994_v3 }
  0xa9   :  { %3418 = vmatpush.bf16.msra.mxu0 %v4629_v56  ;;  %v4722_v14 = vld [vmem:[#allocation5 + $0x150] sm:$0xf0]  ;;  %v6934_v16 = vld [vmem:[#allocation5 + $0x244] sm:$0xf]  ;;  %v4597_v28 = vor.u32 %v6870_v7, %v4594_v10 }
  0xaa   :  { %3431 = vmatpush.bf16.msra.mxu1 %v4757_v57  ;;  %v4850_v17 = vld [vmem:[#allocation5 + $0x250] sm:$0xf0]  ;;  %v6966_v21 = vld [vmem:[#allocation5 + $0x344] sm:$0xf]  ;;  %v4725_v29 = vor.u32 %v6902_v11, %v4722_v14 }
  0xab   :  { %3444 = vmatpush.bf16.msra.mxu2 %v4885_v58  ;;  %v4978_v24 = vld [vmem:[#allocation5 + $0x350] sm:$0xf0]  ;;  %v4853_v30 = vor.u32 %v6934_v16, %v4850_v17  ;;  %v6866_v31 = vld [vmem:[#allocation5 + $0x24] sm:$0xf] }
  0xac   :  { %3457 = vmatpush.bf16.msra.mxu3 %v5013_v62  ;;  %v4578_v32 = vld [vmem:[#allocation5 + $0x30] sm:$0xf0]  ;;  %v6898_v33 = vld [vmem:[#allocation5 + $0x124] sm:$0xf]  ;;  %v4981_v35 = vor.u32 %v6966_v21, %v4978_v24 }
  0xad   :  { %3419 = vmatpush.bf16.msra.mxu0 %v4613_v4  ;;  %v4706_v36 = vld [vmem:[#allocation5 + $0x130] sm:$0xf0]  ;;  %v6930_v39 = vld [vmem:[#allocation5 + $0x224] sm:$0xf]  ;;  %v4581_v44 = vor.u32 %v6866_v31, %v4578_v32 }
  0xae   :  { %3432 = vmatpush.bf16.msra.mxu1 %v4741_v5  ;;  %v4834_v41 = vld [vmem:[#allocation5 + $0x230] sm:$0xf0]  ;;  %v6962_v42 = vld [vmem:[#allocation5 + $0x324] sm:$0xf]  ;;  %v4709_v47 = vor.u32 %v6898_v33, %v4706_v36 }
  0xaf   :  { %3445 = vmatpush.bf16.msra.mxu2 %v4869_v6  ;;  %v4962_v43 = vld [vmem:[#allocation5 + $0x330] sm:$0xf0]  ;;  %v6862_v45 = vld [vmem:[#allocation5 + $0x4] sm:$0xf]  ;;  %v4837_v48 = vor.u32 %v6930_v39, %v4834_v41 }
  0xb0   :  { %3458 = vmatpush.bf16.msra.mxu3 %v4997_v12  ;;  %v4562_v46 = vld [vmem:[#allocation5 + $0x10] sm:$0xf0]  ;;  %v6894_v49 = vld [vmem:[#allocation5 + $0x104] sm:$0xf]  ;;  %v4965_v52 = vor.u32 %v6962_v42, %v4962_v43 }
  0xb1   :  { %3420 = vmatpush.bf16.msra.mxu0 %v4597_v28  ;;  %v4690_v50 = vld [vmem:[#allocation5 + $0x110] sm:$0xf0]  ;;  %v6926_v51 = vld [vmem:[#allocation5 + $0x204] sm:$0xf]  ;;  %v4565_v59 = vor.u32 %v6862_v45, %v4562_v46 }
  0xb2   :  { %3433 = vmatpush.bf16.msra.mxu1 %v4725_v29  ;;  %v4818_v53 = vld [vmem:[#allocation5 + $0x210] sm:$0xf0]  ;;  %v6958_v54 = vld [vmem:[#allocation5 + $0x304] sm:$0xf]  ;;  %v4693_v63 = vor.u32 %v6894_v49, %v4690_v50 }
  0xb3   :  { %3446 = vmatpush.bf16.msra.mxu2 %v4853_v30  ;;  %v4946_v55 = vld [vmem:[#allocation5 + $0x310] sm:$0xf0]  ;;  %v7018_v56 = vld [vmem:[#allocation5 + $0x4e4] sm:$0xf]  ;;  %v4821_v0 = vor.u32 %v6926_v51, %v4818_v53 }
  0xb4   :  { %3459 = vmatpush.bf16.msra.mxu3 %v4981_v35  ;;  %v5186_v57 = vld [vmem:[#allocation5 + $0x4f0] sm:$0xf0]  ;;  %v7050_v58 = vld [vmem:[#allocation5 + $0x5e4] sm:$0xf]  ;;  %v4949_v3 = vor.u32 %v6958_v54, %v4946_v55  ;;  %v637_v54 = vld [vmem:[#allocation7] sm:$0xf] }
  0xb5   :  { %3421 = vmatpush.bf16.msra.mxu0 %v4581_v44  ;;  %v5314_v60 = vld [vmem:[#allocation5 + $0x5f0] sm:$0xf0]  ;;  %v7082_v61 = vld [vmem:[#allocation5 + $0x6e4] sm:$0xf]  ;;  %v5189_v4 = vor.u32 %v7018_v56, %v5186_v57 }
  0xb6   :  { %v5442_v62 = vld [vmem:[#allocation5 + $0x6f0] sm:$0xf0]  ;;  %3434 = vmatpush.bf16.msra.mxu1 %v4709_v47  ;;  %v7114_v1 = vld [vmem:[#allocation5 + $0x7e4] sm:$0xf]  ;;  %v5317_v5 = vor.u32 %v7050_v58, %v5314_v60 }
  0xb7   :  { %3447 = vmatpush.bf16.msra.mxu2 %v4837_v48  ;;  %v5570_v2 = vld [vmem:[#allocation5 + $0x7f0] sm:$0xf0]  ;;  %v5445_v6 = vor.u32 %v7082_v61, %v5442_v62  ;;  %v7014_v7 = vld [vmem:[#allocation5 + $0x4c4] sm:$0xf] }
  0xb8   :  { %3460 = vmatpush.bf16.msra.mxu3 %v4965_v52  ;;  %v5170_v10 = vld [vmem:[#allocation5 + $0x4d0] sm:$0xf0]  ;;  %v7046_v11 = vld [vmem:[#allocation5 + $0x5c4] sm:$0xf]  ;;  %v5573_v12 = vor.u32 %v7114_v1, %v5570_v2 }
  0xb9   :  { %3422 = vmatpush.bf16.msra.mxu0 %v4565_v59  ;;  %v5298_v14 = vld [vmem:[#allocation5 + $0x5d0] sm:$0xf0]  ;;  %v7078_v16 = vld [vmem:[#allocation5 + $0x6c4] sm:$0xf]  ;;  %v5173_v28 = vor.u32 %v7014_v7, %v5170_v10 }
  0xba   :  { %v5426_v17 = vld [vmem:[#allocation5 + $0x6d0] sm:$0xf0]  ;;  %3435 = vmatpush.bf16.msra.mxu1 %v4693_v63  ;;  %v7110_v21 = vld [vmem:[#allocation5 + $0x7c4] sm:$0xf]  ;;  %v5301_v29 = vor.u32 %v7046_v11, %v5298_v14  ;;  %v639_v63 = vperm.slane %v637_v54, 0 }
  0xbb   :  { %3448 = vmatpush.bf16.msra.mxu2 %v4821_v0  ;;  %v5554_v24 = vld [vmem:[#allocation5 + $0x7d0] sm:$0xf0]  ;;  %v5429_v30 = vor.u32 %v7078_v16, %v5426_v17  ;;  %v7010_v31 = vld [vmem:[#allocation5 + $0x4a4] sm:$0xf] }
  0xbc   :  { %3461 = vmatpush.bf16.msra.mxu3 %v4949_v3  ;;  %v5154_v32 = vld [vmem:[#allocation5 + $0x4b0] sm:$0xf0]  ;;  %v7042_v33 = vld [vmem:[#allocation5 + $0x5a4] sm:$0xf]  ;;  %v5557_v35 = vor.u32 %v7110_v21, %v5554_v24  ;;  %3423 = vmatmul.bf16.vlgmr.msra.gmra.mxu0 %v7660_v9 }
  0xbd   :  { %3467 = vmatpush.bf16.msrb.mxu0 %v5189_v4  ;;  %v5282_v36 = vld [vmem:[#allocation5 + $0x5b0] sm:$0xf0]  ;;  %v7074_v39 = vld [vmem:[#allocation5 + $0x6a4] sm:$0xf]  ;;  %v5157_v44 = vor.u32 %v7010_v31, %v5154_v32  ;;  %3436 = vmatmul.bf16.vlgmr.msra.gmra.mxu1 %v7667_v25 }
  0xbe   :  { %3480 = vmatpush.bf16.msrb.mxu1 %v5317_v5  ;;  %v5410_v41 = vld [vmem:[#allocation5 + $0x6b0] sm:$0xf0]  ;;  %3449 = vmatmul.bf16.vlgmr.msra.gmra.mxu2 %v7658_v8  ;;  %v7106_v42 = vld [vmem:[#allocation5 + $0x7a4] sm:$0xf]  ;;  %v5285_v46 = vor.u32 %v7042_v33, %v5282_v36  ;;  %v3229_v33 = vpop.f32.mrf.mxu1 }
  0xbf   :  { %3493 = vmatpush.bf16.msrb.mxu2 %v5445_v6  ;;  %v5538_v43 = vld [vmem:[#allocation5 + $0x7b0] sm:$0xf0]  ;;  %3462 = vmatmul.bf16.vlgmr.msra.gmra.mxu3 %v7662_v15  ;;  %v7006_v45 = vld [vmem:[#allocation5 + $0x484] sm:$0xf]  ;;  %v5413_v47 = vor.u32 %v7074_v39, %v5410_v41 }
  0xc0   :  { %3506 = vmatpush.bf16.msrb.mxu3 %v5573_v12  ;;  %v5138_v48 = vld [vmem:[#allocation5 + $0x490] sm:$0xf0]  ;;  %v7038_v49 = vld [vmem:[#allocation5 + $0x584] sm:$0xf]  ;;  %v5541_v51 = vor.u32 %v7106_v42, %v5538_v43 }
  0xc1   :  { %3468 = vmatpush.bf16.msrb.mxu0 %v5173_v28  ;;  %v5266_v50 = vld [vmem:[#allocation5 + $0x590] sm:$0xf0]  ;;  %v7070_v52 = vld [vmem:[#allocation5 + $0x684] sm:$0xf]  ;;  %v5141_v57 = vor.u32 %v7006_v45, %v5138_v48 }
  0xc2   :  { %3481 = vmatpush.bf16.msrb.mxu1 %v5301_v29  ;;  %v5394_v53 = vld [vmem:[#allocation5 + $0x690] sm:$0xf0]  ;;  %v7102_v55 = vld [vmem:[#allocation5 + $0x784] sm:$0xf]  ;;  %v5269_v59 = vor.u32 %v7038_v49, %v5266_v50 }
  0xc3   :  { %3494 = vmatpush.bf16.msrb.mxu2 %v5429_v30  ;;  %v5522_v56 = vld [vmem:[#allocation5 + $0x790] sm:$0xf0]  ;;  %v7002_v58 = vld [vmem:[#allocation5 + $0x464] sm:$0xf]  ;;  %v5397_v60 = vor.u32 %v7070_v52, %v5394_v53  ;;  %v3255_v52 = vpop.f32.mrf.mxu3 }
  0xc4   :  { %3507 = vmatpush.bf16.msrb.mxu3 %v5557_v35  ;;  %v5122_v61 = vld [vmem:[#allocation5 + $0x470] sm:$0xf0]  ;;  %v7034_v62 = vld [vmem:[#allocation5 + $0x564] sm:$0xf]  ;;  %v5525_v0 = vor.u32 %v7102_v55, %v5522_v56  ;;  %v3216_v7 = vpop.f32.mrf.mxu0 }
  0xc5   :  { %3469 = vmatpush.bf16.msrb.mxu0 %v5157_v44  ;;  %v5250_v1 = vld [vmem:[#allocation5 + $0x570] sm:$0xf0]  ;;  %v7066_v2 = vld [vmem:[#allocation5 + $0x664] sm:$0xf]  ;;  %v5125_v6 = vor.u32 %v7002_v58, %v5122_v61  ;;  %v3217_v17 = vadd.f32 %v3216_v7, %v639_v63 }
  0xc6   :  { %3482 = vmatpush.bf16.msrb.mxu1 %v5285_v46  ;;  %v5378_v3 = vld [vmem:[#allocation5 + $0x670] sm:$0xf0]  ;;  %v7098_v4 = vld [vmem:[#allocation5 + $0x764] sm:$0xf]  ;;  %v5253_v10 = vor.u32 %v7034_v62, %v5250_v1 }
  0xc7   :  { %3495 = vmatpush.bf16.msrb.mxu2 %v5413_v47  ;;  %v5506_v5 = vld [vmem:[#allocation5 + $0x770] sm:$0xf0]  ;;  %v5381_v11 = vor.u32 %v7066_v2, %v5378_v3  ;;  %v6998_v12 = vld [vmem:[#allocation5 + $0x444] sm:$0xf]  ;;  %v3230_v43 = vadd.f32 %v3229_v33, %v3217_v17 }
  0xc8   :  { %3508 = vmatpush.bf16.msrb.mxu3 %v5541_v51  ;;  %v5106_v14 = vld [vmem:[#allocation5 + $0x450] sm:$0xf0]  ;;  %v7030_v16 = vld [vmem:[#allocation5 + $0x544] sm:$0xf]  ;;  %v5509_v21 = vor.u32 %v7098_v4, %v5506_v5 }
  0xc9   :  { %3470 = vmatpush.bf16.msrb.mxu0 %v5141_v57  ;;  %v5234_v24 = vld [vmem:[#allocation5 + $0x550] sm:$0xf0]  ;;  %v7062_v28 = vld [vmem:[#allocation5 + $0x644] sm:$0xf]  ;;  %v5109_v32 = vor.u32 %v6998_v12, %v5106_v14  ;;  %v3242_v48 = vpop.f32.mrf.mxu2  ;;  %v3231_v12 = vpop.f32.mrf.mxu1 }
  0xca   :  { %3483 = vmatpush.bf16.msrb.mxu1 %v5269_v59  ;;  %v5362_v29 = vld [vmem:[#allocation5 + $0x650] sm:$0xf0]  ;;  %v7094_v30 = vld [vmem:[#allocation5 + $0x744] sm:$0xf]  ;;  %v5237_v35 = vor.u32 %v7030_v16, %v5234_v24  ;;  %v3243_v51 = vadd.f32 %v3242_v48, %v3230_v43 }
  0xcb   :  { %3496 = vmatpush.bf16.msrb.mxu2 %v5397_v60  ;;  %v5490_v31 = vld [vmem:[#allocation5 + $0x750] sm:$0xf0]  ;;  %v5365_v36 = vor.u32 %v7062_v28, %v5362_v29  ;;  %v6994_v39 = vld [vmem:[#allocation5 + $0x424] sm:$0xf] }
  0xcc   :  { %3509 = vmatpush.bf16.msrb.mxu3 %v5525_v0  ;;  %v5090_v41 = vld [vmem:[#allocation5 + $0x430] sm:$0xf0]  ;;  %v7026_v42 = vld [vmem:[#allocation5 + $0x524] sm:$0xf]  ;;  %v5493_v44 = vor.u32 %v7094_v30, %v5490_v31  ;;  %v3218_v56 = vpop.f32.mrf.mxu0  ;;  %v7710_v62 = vadd.f32 %v3255_v52, %v3243_v51 }
  0xcd   :  { %3471 = vmatpush.bf16.msrb.mxu0 %v5125_v6  ;;  %v5218_v45 = vld [vmem:[#allocation5 + $0x530] sm:$0xf0]  ;;  %v7058_v46 = vld [vmem:[#allocation5 + $0x624] sm:$0xf]  ;;  %v5093_v53 = vor.u32 %v6994_v39, %v5090_v41 }
  0xce   :  { %3484 = vmatpush.bf16.msrb.mxu1 %v5253_v10  ;;  %v5346_v47 = vld [vmem:[#allocation5 + $0x630] sm:$0xf0]  ;;  %v7090_v49 = vld [vmem:[#allocation5 + $0x724] sm:$0xf]  ;;  %v5221_v57 = vor.u32 %v7026_v42, %v5218_v45 }
  0xcf   :  { %3497 = vmatpush.bf16.msrb.mxu2 %v5381_v11  ;;  %v5474_v50 = vld [vmem:[#allocation5 + $0x730] sm:$0xf0]  ;;  %v6990_v54 = vld [vmem:[#allocation5 + $0x404] sm:$0xf]  ;;  %v5349_v58 = vor.u32 %v7058_v46, %v5346_v47 }
  0xd0   :  { %3510 = vmatpush.bf16.msrb.mxu3 %v5509_v21  ;;  %v5074_v55 = vld [vmem:[#allocation5 + $0x410] sm:$0xf0]  ;;  %v7022_v59 = vld [vmem:[#allocation5 + $0x504] sm:$0xf]  ;;  %v5477_v63 = vor.u32 %v7090_v49, %v5474_v50 }
  0xd1   :  { %3472 = vmatpush.bf16.msrb.mxu0 %v5109_v32  ;;  %v5202_v60 = vld [vmem:[#allocation5 + $0x510] sm:$0xf0]  ;;  %v7054_v61 = vld [vmem:[#allocation5 + $0x604] sm:$0xf]  ;;  %v5077_v6 = vor.u32 %v6990_v54, %v5074_v55  ;;  %v3244_v29 = vpop.f32.mrf.mxu2 }
  0xd2   :  { %3485 = vmatpush.bf16.msrb.mxu1 %v5237_v35  ;;  %v5330_v0 = vld [vmem:[#allocation5 + $0x610] sm:$0xf0]  ;;  %v7086_v1 = vld [vmem:[#allocation5 + $0x704] sm:$0xf]  ;;  %v5205_v14 = vor.u32 %v7022_v59, %v5202_v60 }
  0xd3   :  { %3498 = vmatpush.bf16.msrb.mxu2 %v5365_v36  ;;  %v5458_v2 = vld [vmem:[#allocation5 + $0x710] sm:$0xf0]  ;;  %v7146_v3 = vld [vmem:[#allocation5 + $0x8e4] sm:$0xf]  ;;  %v5333_v16 = vor.u32 %v7054_v61, %v5330_v0  ;;  %v3257_v36 = vpop.f32.mrf.mxu3 }
  0xd4   :  { %3511 = vmatpush.bf16.msrb.mxu3 %v5493_v44  ;;  %v5698_v4 = vld [vmem:[#allocation5 + $0x8f0] sm:$0xf0]  ;;  %v7178_v5 = vld [vmem:[#allocation5 + $0x9e4] sm:$0xf]  ;;  %v5461_v24 = vor.u32 %v7086_v1, %v5458_v2 }
  0xd5   :  { %3473 = vmatpush.bf16.msrb.mxu0 %v5093_v53  ;;  %v5826_v7 = vld [vmem:[#allocation5 + $0x9f0] sm:$0xf0]  ;;  %v7210_v10 = vld [vmem:[#allocation5 + $0xae4] sm:$0xf]  ;;  %v5701_v28 = vor.u32 %v7146_v3, %v5698_v4 }
  0xd6   :  { %v5954_v11 = vld [vmem:[#allocation5 + $0xaf0] sm:$0xf0]  ;;  %3486 = vmatpush.bf16.msrb.mxu1 %v5221_v57  ;;  %v7242_v17 = vld [vmem:[#allocation5 + $0xbe4] sm:$0xf]  ;;  %v5829_v30 = vor.u32 %v7178_v5, %v5826_v7 }
  0xd7   :  { %3499 = vmatpush.bf16.msrb.mxu2 %v5349_v58  ;;  %v6082_v21 = vld [vmem:[#allocation5 + $0xbf0] sm:$0xf0]  ;;  %v5957_v31 = vor.u32 %v7210_v10, %v5954_v11  ;;  %v7142_v32 = vld [vmem:[#allocation5 + $0x8c4] sm:$0xf] }
  0xd8   :  { %3512 = vmatpush.bf16.msrb.mxu3 %v5477_v63  ;;  %v5682_v33 = vld [vmem:[#allocation5 + $0x8d0] sm:$0xf0]  ;;  %v7174_v35 = vld [vmem:[#allocation5 + $0x9c4] sm:$0xf]  ;;  %v6085_v39 = vor.u32 %v7242_v17, %v6082_v21 }
  0xd9   :  { %3474 = vmatpush.bf16.msrb.mxu0 %v5077_v6  ;;  %v5810_v41 = vld [vmem:[#allocation5 + $0x9d0] sm:$0xf0]  ;;  %v7206_v42 = vld [vmem:[#allocation5 + $0xac4] sm:$0xf]  ;;  %v5685_v46 = vor.u32 %v7142_v32, %v5682_v33 }
  0xda   :  { %v5938_v43 = vld [vmem:[#allocation5 + $0xad0] sm:$0xf0]  ;;  %3487 = vmatpush.bf16.msrb.mxu1 %v5205_v14  ;;  %v7238_v44 = vld [vmem:[#allocation5 + $0xbc4] sm:$0xf]  ;;  %v5813_v47 = vor.u32 %v7174_v35, %v5810_v41 }
  0xdb   :  { %3500 = vmatpush.bf16.msrb.mxu2 %v5333_v16  ;;  %v6066_v45 = vld [vmem:[#allocation5 + $0xbd0] sm:$0xf0]  ;;  %v5941_v48 = vor.u32 %v7206_v42, %v5938_v43  ;;  %v7138_v49 = vld [vmem:[#allocation5 + $0x8a4] sm:$0xf] }
  0xdc   :  { %3513 = vmatpush.bf16.msrb.mxu3 %v5461_v24  ;;  %v5666_v50 = vld [vmem:[#allocation5 + $0x8b0] sm:$0xf0]  ;;  %v7170_v51 = vld [vmem:[#allocation5 + $0x9a4] sm:$0xf]  ;;  %v6069_v52 = vor.u32 %v7238_v44, %v6066_v45  ;;  %3475 = vmatmul.bf16.vlgmr.msrb.gmra.mxu0 %v7672_v37  ;;  %v3281_v24 = vpop.f32.mrf.mxu1 }
  0xdd   :  { %3519 = vmatpush.bf16.msra.mxu0 %v5701_v28  ;;  %v5794_v53 = vld [vmem:[#allocation5 + $0x9b0] sm:$0xf0]  ;;  %v7202_v54 = vld [vmem:[#allocation5 + $0xaa4] sm:$0xf]  ;;  %v5669_v58 = vor.u32 %v7138_v49, %v5666_v50  ;;  %3488 = vmatmul.bf16.vlgmr.msrb.gmra.mxu1 %v7676_v40  ;;  %v3268_v10 = vpop.f32.mrf.mxu0 }
  0xde   :  { %3532 = vmatpush.bf16.msra.mxu1 %v5829_v30  ;;  %3501 = vmatmul.bf16.vlgmr.msrb.gmra.mxu2 %v7670_v34  ;;  %v5922_v55 = vld [vmem:[#allocation5 + $0xab0] sm:$0xf0]  ;;  %v7234_v56 = vld [vmem:[#allocation5 + $0xba4] sm:$0xf]  ;;  %v5797_v59 = vor.u32 %v7170_v51, %v5794_v53  ;;  %v3269_v21 = vadd.f32 %v3268_v10, %v7710_v62 }
  0xdf   :  { %3545 = vmatpush.bf16.msra.mxu2 %v5957_v31  ;;  %v6050_v57 = vld [vmem:[#allocation5 + $0xbb0] sm:$0xf0]  ;;  %3514 = vmatmul.bf16.vlgmr.msrb.gmra.mxu3 %v7674_v38  ;;  %v5925_v60 = vor.u32 %v7202_v54, %v5922_v55  ;;  %v7134_v61 = vld [vmem:[#allocation5 + $0x884] sm:$0xf] }
  0xe0   :  { %3558 = vmatpush.bf16.msra.mxu3 %v6085_v39  ;;  %v5650_v63 = vld [vmem:[#allocation5 + $0x890] sm:$0xf0]  ;;  %v7166_v0 = vld [vmem:[#allocation5 + $0x984] sm:$0xf]  ;;  %v6053_v1 = vor.u32 %v7234_v56, %v6050_v57  ;;  %v3282_v35 = vadd.f32 %v3281_v24, %v3269_v21  ;;  %v3307_v50 = vpop.f32.mrf.mxu3 }
  0xe1   :  { %3520 = vmatpush.bf16.msra.mxu0 %v5685_v46  ;;  %v5778_v2 = vld [vmem:[#allocation5 + $0x990] sm:$0xf0]  ;;  %v7198_v3 = vld [vmem:[#allocation5 + $0xa84] sm:$0xf]  ;;  %v5653_v7 = vor.u32 %v7134_v61, %v5650_v63 }
  0xe2   :  { %3533 = vmatpush.bf16.msra.mxu1 %v5813_v47  ;;  %v5906_v4 = vld [vmem:[#allocation5 + $0xa90] sm:$0xf0]  ;;  %v7230_v5 = vld [vmem:[#allocation5 + $0xb84] sm:$0xf]  ;;  %v5781_v11 = vor.u32 %v7166_v0, %v5778_v2  ;;  %v3294_v45 = vpop.f32.mrf.mxu2 }
  0xe3   :  { %3546 = vmatpush.bf16.msra.mxu2 %v5941_v48  ;;  %v6034_v6 = vld [vmem:[#allocation5 + $0xb90] sm:$0xf0]  ;;  %v5909_v12 = vor.u32 %v7198_v3, %v5906_v4  ;;  %v7130_v14 = vld [vmem:[#allocation5 + $0x864] sm:$0xf]  ;;  %v3295_v49 = vadd.f32 %v3294_v45, %v3282_v35 }
  0xe4   :  { %3559 = vmatpush.bf16.msra.mxu3 %v6069_v52  ;;  %v5634_v16 = vld [vmem:[#allocation5 + $0x870] sm:$0xf0]  ;;  %v7162_v17 = vld [vmem:[#allocation5 + $0x964] sm:$0xf]  ;;  %v6037_v28 = vor.u32 %v7230_v5, %v6034_v6  ;;  %v3283_v61 = vpop.f32.mrf.mxu1 }
  0xe5   :  { %3521 = vmatpush.bf16.msra.mxu0 %v5669_v58  ;;  %v5762_v29 = vld [vmem:[#allocation5 + $0x970] sm:$0xf0]  ;;  %v7194_v30 = vld [vmem:[#allocation5 + $0xa64] sm:$0xf]  ;;  %v5637_v36 = vor.u32 %v7130_v14, %v5634_v16  ;;  %v7717_v54 = vadd.f32 %v3307_v50, %v3295_v49  ;;  %v3270_v55 = vpop.f32.mrf.mxu0 }
  0xe6   :  { %3534 = vmatpush.bf16.msra.mxu1 %v5797_v59  ;;  %v5890_v31 = vld [vmem:[#allocation5 + $0xa70] sm:$0xf0]  ;;  %v7226_v32 = vld [vmem:[#allocation5 + $0xb64] sm:$0xf]  ;;  %v5765_v39 = vor.u32 %v7162_v17, %v5762_v29 }
  0xe7   :  { %3547 = vmatpush.bf16.msra.mxu2 %v5925_v60  ;;  %v6018_v33 = vld [vmem:[#allocation5 + $0xb70] sm:$0xf0]  ;;  %v5893_v41 = vor.u32 %v7194_v30, %v5890_v31  ;;  %v7126_v42 = vld [vmem:[#allocation5 + $0x844] sm:$0xf] }
  0xe8   :  { %3560 = vmatpush.bf16.msra.mxu3 %v6053_v1  ;;  %v5618_v43 = vld [vmem:[#allocation5 + $0x850] sm:$0xf0]  ;;  %v7158_v44 = vld [vmem:[#allocation5 + $0x944] sm:$0xf]  ;;  %v6021_v62 = vor.u32 %v7226_v32, %v6018_v33  ;;  %v3309_v30 = vpop.f32.mrf.mxu3 }
  0xe9   :  { %3522 = vmatpush.bf16.msra.mxu0 %v5653_v7  ;;  %v5746_v46 = vld [vmem:[#allocation5 + $0x950] sm:$0xf0]  ;;  %v7190_v47 = vld [vmem:[#allocation5 + $0xa44] sm:$0xf]  ;;  %v5621_v53 = vor.u32 %v7126_v42, %v5618_v43 }
  0xea   :  { %3535 = vmatpush.bf16.msra.mxu1 %v5781_v11  ;;  %v5874_v48 = vld [vmem:[#allocation5 + $0xa50] sm:$0xf0]  ;;  %v7222_v51 = vld [vmem:[#allocation5 + $0xb44] sm:$0xf]  ;;  %v5749_v56 = vor.u32 %v7158_v44, %v5746_v46  ;;  %v3296_v17 = vpop.f32.mrf.mxu2 }
  0xeb   :  { %3548 = vmatpush.bf16.msra.mxu2 %v5909_v12  ;;  %v6002_v52 = vld [vmem:[#allocation5 + $0xb50] sm:$0xf0]  ;;  %v5877_v57 = vor.u32 %v7190_v47, %v5874_v48  ;;  %v7122_v58 = vld [vmem:[#allocation5 + $0x824] sm:$0xf] }
  0xec   :  { %3561 = vmatpush.bf16.msra.mxu3 %v6037_v28  ;;  %v5602_v59 = vld [vmem:[#allocation5 + $0x830] sm:$0xf0]  ;;  %v7154_v60 = vld [vmem:[#allocation5 + $0x924] sm:$0xf]  ;;  %v6005_v63 = vor.u32 %v7222_v51, %v6002_v52 }
  0xed   :  { %3523 = vmatpush.bf16.msra.mxu0 %v5637_v36  ;;  %v5730_v0 = vld [vmem:[#allocation5 + $0x930] sm:$0xf0]  ;;  %v7186_v1 = vld [vmem:[#allocation5 + $0xa24] sm:$0xf]  ;;  %v5605_v5 = vor.u32 %v7122_v58, %v5602_v59 }
  0xee   :  { %3536 = vmatpush.bf16.msra.mxu1 %v5765_v39  ;;  %v5858_v2 = vld [vmem:[#allocation5 + $0xa30] sm:$0xf0]  ;;  %v7218_v3 = vld [vmem:[#allocation5 + $0xb24] sm:$0xf]  ;;  %v5733_v10 = vor.u32 %v7154_v60, %v5730_v0 }
  0xef   :  { %3549 = vmatpush.bf16.msra.mxu2 %v5893_v41  ;;  %v5986_v4 = vld [vmem:[#allocation5 + $0xb30] sm:$0xf0]  ;;  %v7118_v6 = vld [vmem:[#allocation5 + $0x804] sm:$0xf]  ;;  %v5861_v11 = vor.u32 %v7186_v1, %v5858_v2 }
  0xf0   :  { %3562 = vmatpush.bf16.msra.mxu3 %v6021_v62  ;;  %v5586_v7 = vld [vmem:[#allocation5 + $0x810] sm:$0xf0]  ;;  %v7150_v12 = vld [vmem:[#allocation5 + $0x904] sm:$0xf]  ;;  %v5989_v21 = vor.u32 %v7218_v3, %v5986_v4 }
  0xf1   :  { %3524 = vmatpush.bf16.msra.mxu0 %v5621_v53  ;;  %v5714_v14 = vld [vmem:[#allocation5 + $0x910] sm:$0xf0]  ;;  %v7182_v16 = vld [vmem:[#allocation5 + $0xa04] sm:$0xf]  ;;  %v5589_v35 = vor.u32 %v7118_v6, %v5586_v7 }
  0xf2   :  { %3537 = vmatpush.bf16.msra.mxu1 %v5749_v56  ;;  %v5842_v24 = vld [vmem:[#allocation5 + $0xa10] sm:$0xf0]  ;;  %v7214_v28 = vld [vmem:[#allocation5 + $0xb04] sm:$0xf]  ;;  %v5717_v42 = vor.u32 %v7150_v12, %v5714_v14 }
  0xf3   :  { %3550 = vmatpush.bf16.msra.mxu2 %v5877_v57  ;;  %v5970_v29 = vld [vmem:[#allocation5 + $0xb10] sm:$0xf0]  ;;  %v7274_v31 = vld [vmem:[#allocation5 + $0xce4] sm:$0xf]  ;;  %v5845_v43 = vor.u32 %v7182_v16, %v5842_v24 }
  0xf4   :  { %3563 = vmatpush.bf16.msra.mxu3 %v6005_v63  ;;  %v6210_v32 = vld [vmem:[#allocation5 + $0xcf0] sm:$0xf0]  ;;  %v7306_v33 = vld [vmem:[#allocation5 + $0xde4] sm:$0xf]  ;;  %v5973_v62 = vor.u32 %v7214_v28, %v5970_v29 }
  0xf5   :  { %3525 = vmatpush.bf16.msra.mxu0 %v5605_v5  ;;  %v6338_v36 = vld [vmem:[#allocation5 + $0xdf0] sm:$0xf0]  ;;  %v7338_v39 = vld [vmem:[#allocation5 + $0xee4] sm:$0xf]  ;;  %v6213_v46 = vor.u32 %v7274_v31, %v6210_v32 }
  0xf6   :  { %v6466_v41 = vld [vmem:[#allocation5 + $0xef0] sm:$0xf0]  ;;  %3538 = vmatpush.bf16.msra.mxu1 %v5733_v10  ;;  %v7370_v44 = vld [vmem:[#allocation5 + $0xfe4] sm:$0xf]  ;;  %v6341_v47 = vor.u32 %v7306_v33, %v6338_v36 }
  0xf7   :  { %3551 = vmatpush.bf16.msra.mxu2 %v5861_v11  ;;  %v6594_v45 = vld [vmem:[#allocation5 + $0xff0] sm:$0xf0]  ;;  %v6469_v48 = vor.u32 %v7338_v39, %v6466_v41  ;;  %v7270_v49 = vld [vmem:[#allocation5 + $0xcc4] sm:$0xf] }
  0xf8   :  { %3564 = vmatpush.bf16.msra.mxu3 %v5989_v21  ;;  %v6194_v50 = vld [vmem:[#allocation5 + $0xcd0] sm:$0xf0]  ;;  %v7302_v51 = vld [vmem:[#allocation5 + $0xdc4] sm:$0xf]  ;;  %v6597_v52 = vor.u32 %v7370_v44, %v6594_v45 }
  0xf9   :  { %3526 = vmatpush.bf16.msra.mxu0 %v5589_v35  ;;  %v6322_v53 = vld [vmem:[#allocation5 + $0xdd0] sm:$0xf0]  ;;  %v7334_v55 = vld [vmem:[#allocation5 + $0xec4] sm:$0xf]  ;;  %v6197_v59 = vor.u32 %v7270_v49, %v6194_v50  ;;  %v3333_v36 = vpop.f32.mrf.mxu1 }
  0xfa   :  { %v6450_v56 = vld [vmem:[#allocation5 + $0xed0] sm:$0xf0]  ;;  %3539 = vmatpush.bf16.msra.mxu1 %v5717_v42  ;;  %v7366_v57 = vld [vmem:[#allocation5 + $0xfc4] sm:$0xf]  ;;  %v6325_v60 = vor.u32 %v7302_v51, %v6322_v53 }
  0xfb   :  { %3552 = vmatpush.bf16.msra.mxu2 %v5845_v43  ;;  %v6578_v58 = vld [vmem:[#allocation5 + $0xfd0] sm:$0xf0]  ;;  %v6453_v61 = vor.u32 %v7334_v55, %v6450_v56  ;;  %v7266_v63 = vld [vmem:[#allocation5 + $0xca4] sm:$0xf] }
  0xfc   :  { %3565 = vmatpush.bf16.msra.mxu3 %v5973_v62  ;;  %v6178_v0 = vld [vmem:[#allocation5 + $0xcb0] sm:$0xf0]  ;;  %v7298_v1 = vld [vmem:[#allocation5 + $0xda4] sm:$0xf]  ;;  %3527 = vmatmul.bf16.vlgmr.msra.gmra.mxu0 %v7682_v18  ;;  %v6581_v2 = vor.u32 %v7366_v57, %v6578_v58 }
  0xfd   :  { %3571 = vmatpush.bf16.msrb.mxu0 %v6213_v46  ;;  %v6306_v3 = vld [vmem:[#allocation5 + $0xdb0] sm:$0xf0]  ;;  %v7330_v4 = vld [vmem:[#allocation5 + $0xea4] sm:$0xf]  ;;  %3540 = vmatmul.bf16.vlgmr.msra.gmra.mxu1 %v7686_v23  ;;  %v6181_v10 = vor.u32 %v7266_v63, %v6178_v0  ;;  %v3320_v30 = vpop.f32.mrf.mxu0 }
  0xfe   :  { %3584 = vmatpush.bf16.msrb.mxu1 %v6341_v47  ;;  %v6434_v5 = vld [vmem:[#allocation5 + $0xeb0] sm:$0xf0]  ;;  %3553 = vmatmul.bf16.vlgmr.msra.gmra.mxu2 %v7684_v22  ;;  %v7362_v6 = vld [vmem:[#allocation5 + $0xfa4] sm:$0xf]  ;;  %v6309_v11 = vor.u32 %v7298_v1, %v6306_v3  ;;  %v3321_v33 = vadd.f32 %v3320_v30, %v7717_v54 }
  0xff   :  { %3597 = vmatpush.bf16.msrb.mxu2 %v6469_v48  ;;  %v6562_v7 = vld [vmem:[#allocation5 + $0xfb0] sm:$0xf0]  ;;  %3566 = vmatmul.bf16.vlgmr.msra.gmra.mxu3 %v7688_v27  ;;  %v6437_v12 = vor.u32 %v7330_v4, %v6434_v5  ;;  %v7262_v14 = vld [vmem:[#allocation5 + $0xc84] sm:$0xf] }
 0x100   :  { %3610 = vmatpush.bf16.msrb.mxu3 %v6597_v52  ;;  %v6162_v16 = vld [vmem:[#allocation5 + $0xc90] sm:$0xf0]  ;;  %v7294_v17 = vld [vmem:[#allocation5 + $0xd84] sm:$0xf]  ;;  %v6565_v21 = vor.u32 %v7362_v6, %v6562_v7  ;;  %v3334_v62 = vadd.f32 %v3333_v36, %v3321_v33 }
 0x101   :  { %3572 = vmatpush.bf16.msrb.mxu0 %v6197_v59  ;;  %v6290_v24 = vld [vmem:[#allocation5 + $0xd90] sm:$0xf0]  ;;  %v7326_v28 = vld [vmem:[#allocation5 + $0xe84] sm:$0xf]  ;;  %v6165_v35 = vor.u32 %v7262_v14, %v6162_v16  ;;  %v3359_v0 = vpop.f32.mrf.mxu3  ;;  %v3335_v5 = vpop.f32.mrf.mxu1 }
 0x102   :  { %3585 = vmatpush.bf16.msrb.mxu1 %v6325_v60  ;;  %v6418_v29 = vld [vmem:[#allocation5 + $0xe90] sm:$0xf0]  ;;  %v7358_v31 = vld [vmem:[#allocation5 + $0xf84] sm:$0xf]  ;;  %v6293_v39 = vor.u32 %v7294_v17, %v6290_v24  ;;  %v6953_v5 = vld [vmem:[#allocation5 + $0x2d4] sm:$0xf0] }
 0x103   :  { %3598 = vmatpush.bf16.msrb.mxu2 %v6453_v61  ;;  %v6546_v32 = vld [vmem:[#allocation5 + $0xf90] sm:$0xf0]  ;;  %v6421_v41 = vor.u32 %v7326_v28, %v6418_v29  ;;  %v7258_v42 = vld [vmem:[#allocation5 + $0xc64] sm:$0xf]  ;;  %v3346_v58 = vpop.f32.mrf.mxu2 }
 0x104   :  { %3611 = vmatpush.bf16.msrb.mxu3 %v6581_v2  ;;  %v6146_v43 = vld [vmem:[#allocation5 + $0xc70] sm:$0xf0]  ;;  %v7290_v44 = vld [vmem:[#allocation5 + $0xd64] sm:$0xf]  ;;  %v6549_v45 = vor.u32 %v7358_v31, %v6546_v32  ;;  %v3347_v63 = vadd.f32 %v3346_v58, %v3334_v62 }
 0x105   :  { %3573 = vmatpush.bf16.msrb.mxu0 %v6181_v10  ;;  %v6274_v46 = vld [vmem:[#allocation5 + $0xd70] sm:$0xf0]  ;;  %v7322_v47 = vld [vmem:[#allocation5 + $0xe64] sm:$0xf]  ;;  %v6149_v51 = vor.u32 %v7258_v42, %v6146_v43  ;;  %v3322_v3 = vpop.f32.mrf.mxu0 }
 0x106   :  { %3586 = vmatpush.bf16.msrb.mxu1 %v6309_v11  ;;  %v6402_v48 = vld [vmem:[#allocation5 + $0xe70] sm:$0xf0]  ;;  %v7354_v49 = vld [vmem:[#allocation5 + $0xf64] sm:$0xf]  ;;  %v6277_v54 = vor.u32 %v7290_v44, %v6274_v46  ;;  %v7724_v6 = vadd.f32 %v3359_v0, %v3347_v63  ;;  %v4680_v46 = vld [vmem:[#allocation5 + $0xe8] sm:$0xf] }
 0x107   :  { %3599 = vmatpush.bf16.msrb.mxu2 %v6437_v12  ;;  %v6530_v50 = vld [vmem:[#allocation5 + $0xf70] sm:$0xf0]  ;;  %v6405_v52 = vor.u32 %v7322_v47, %v6402_v48  ;;  %v7254_v53 = vld [vmem:[#allocation5 + $0xc44] sm:$0xf]  ;;  %v6893_v47 = vld [vmem:[#allocation5 + $0xf4] sm:$0xf0] }
 0x108   :  { %3612 = vmatpush.bf16.msrb.mxu3 %v6565_v21  ;;  %v6130_v55 = vld [vmem:[#allocation5 + $0xc50] sm:$0xf0]  ;;  %v7286_v56 = vld [vmem:[#allocation5 + $0xd44] sm:$0xf]  ;;  %v6533_v57 = vor.u32 %v7354_v49, %v6530_v50  ;;  %v4808_v48 = vld [vmem:[#allocation5 + $0x1e8] sm:$0xf] }
 0x109   :  { %3574 = vmatpush.bf16.msrb.mxu0 %v6165_v35  ;;  %v6258_v59 = vld [vmem:[#allocation5 + $0xd50] sm:$0xf0]  ;;  %v7318_v60 = vld [vmem:[#allocation5 + $0xe44] sm:$0xf]  ;;  %v6133_v4 = vor.u32 %v7254_v53, %v6130_v55  ;;  %v3361_v49 = vpop.f32.mrf.mxu3  ;;  %v4664_v63 = vld [vmem:[#allocation5 + $0xc8] sm:$0xf] }
 0x10a   :  { %3587 = vmatpush.bf16.msrb.mxu1 %v6293_v39  ;;  %v6386_v61 = vld [vmem:[#allocation5 + $0xe50] sm:$0xf0]  ;;  %v7350_v1 = vld [vmem:[#allocation5 + $0xf44] sm:$0xf]  ;;  %v6261_v7 = vor.u32 %v7286_v56, %v6258_v59  ;;  %v5064_v56 = vld [vmem:[#allocation5 + $0x3e8] sm:$0xf]  ;;  %v4681_v59 = vor.u32 %v6893_v47, %v4680_v46 }
 0x10b   :  { %3600 = vmatpush.bf16.msrb.mxu2 %v6421_v41  ;;  %v6514_v2 = vld [vmem:[#allocation5 + $0xf50] sm:$0xf0]  ;;  %v6389_v10 = vor.u32 %v7318_v60, %v6386_v61  ;;  %v7250_v11 = vld [vmem:[#allocation5 + $0xc24] sm:$0xf]  ;;  %v3348_v62 = vpop.f32.mrf.mxu2  ;;  %v6889_v0 = vld [vmem:[#allocation5 + $0xd4] sm:$0xf0] }
 0x10c   :  { %3613 = vmatpush.bf16.msrb.mxu3 %v6549_v45  ;;  %v6114_v12 = vld [vmem:[#allocation5 + $0xc30] sm:$0xf0]  ;;  %v7282_v14 = vld [vmem:[#allocation5 + $0xd24] sm:$0xf]  ;;  %v6517_v16 = vor.u32 %v7350_v1, %v6514_v2  ;;  %v4792_v1 = vld [vmem:[#allocation5 + $0x1c8] sm:$0xf] }
 0x10d   :  { %3575 = vmatpush.bf16.msrb.mxu0 %v6149_v51  ;;  %v6242_v17 = vld [vmem:[#allocation5 + $0xd30] sm:$0xf0]  ;;  %v7314_v21 = vld [vmem:[#allocation5 + $0xe24] sm:$0xf]  ;;  %v6117_v30 = vor.u32 %v7250_v11, %v6114_v12  ;;  %v6925_v51 = vld [vmem:[#allocation5 + $0x1f4] sm:$0xf0]  ;;  %v4665_v11 = vor.u32 %v6889_v0, %v4664_v63 }
 0x10e   :  { %3588 = vmatpush.bf16.msrb.mxu1 %v6277_v54  ;;  %v6370_v24 = vld [vmem:[#allocation5 + $0xe30] sm:$0xf0]  ;;  %v7346_v28 = vld [vmem:[#allocation5 + $0xf24] sm:$0xf]  ;;  %v6245_v33 = vor.u32 %v7282_v14, %v6242_v17  ;;  %v4936_v54 = vld [vmem:[#allocation5 + $0x2e8] sm:$0xf]  ;;  %v4809_v60 = vor.u32 %v6925_v51, %v4808_v48 }
 0x10f   :  { %3601 = vmatpush.bf16.msrb.mxu2 %v6405_v52  ;;  %v6498_v29 = vld [vmem:[#allocation5 + $0xf30] sm:$0xf0]  ;;  %v7246_v31 = vld [vmem:[#allocation5 + $0xc04] sm:$0xf]  ;;  %v6373_v35 = vor.u32 %v7314_v21, %v6370_v24  ;;  %v6957_v52 = vld [vmem:[#allocation5 + $0x2f4] sm:$0xf0] }
 0x110   :  { %3614 = vmatpush.bf16.msrb.mxu3 %v6533_v57  ;;  %v6098_v32 = vld [vmem:[#allocation5 + $0xc10] sm:$0xf0]  ;;  %v7278_v36 = vld [vmem:[#allocation5 + $0xd04] sm:$0xf]  ;;  %v6501_v42 = vor.u32 %v7346_v28, %v6498_v29  ;;  %v6989_v57 = vld [vmem:[#allocation5 + $0x3f4] sm:$0xf0]  ;;  %v4937_v61 = vor.u32 %v6957_v52, %v4936_v54 }
 0x111   :  { %3576 = vmatpush.bf16.msrb.mxu0 %v6133_v4  ;;  %v6226_v39 = vld [vmem:[#allocation5 + $0xd10] sm:$0xf0]  ;;  %v7310_v41 = vld [vmem:[#allocation5 + $0xe04] sm:$0xf]  ;;  %v6101_v50 = vor.u32 %v7246_v31, %v6098_v32  ;;  %v5065_v2 = vor.u32 %v6989_v57, %v5064_v56  ;;  %v6921_v3 = vld [vmem:[#allocation5 + $0x1d4] sm:$0xf0] }
 0x112   :  { %3589 = vmatpush.bf16.msrb.mxu1 %v6261_v7  ;;  %v6354_v43 = vld [vmem:[#allocation5 + $0xe10] sm:$0xf0]  ;;  %v7342_v44 = vld [vmem:[#allocation5 + $0xf04] sm:$0xf]  ;;  %v6229_v53 = vor.u32 %v7278_v36, %v6226_v39  ;;  %v4920_v4 = vld [vmem:[#allocation5 + $0x2c8] sm:$0xf]  ;;  %v4793_v12 = vor.u32 %v6921_v3, %v4792_v1 }
 0x113   :  { %3602 = vmatpush.bf16.msrb.mxu2 %v6389_v10  ;;  %v6482_v45 = vld [vmem:[#allocation5 + $0xf10] sm:$0xf0]  ;;  %v6357_v55 = vor.u32 %v7310_v41, %v6354_v43  ;;  %v5048_v7 = vld [vmem:[#allocation5 + $0x3c8] sm:$0xf]  ;;  %v6985_v10 = vld [vmem:[#allocation5 + $0x3d4] sm:$0xf0]  ;;  %v4921_v14 = vor.u32 %v6953_v5, %v4920_v4 }
 0x114   :  { %3615 = vmatpush.bf16.msrb.mxu3 %v6517_v16  ;;  %v6485_v58 = vor.u32 %v7342_v44, %v6482_v45  ;;  %v4648_v16 = vld [vmem:[#allocation5 + $0xa8] sm:$0xf]  ;;  %v6885_v17 = vld [vmem:[#allocation5 + $0xb4] sm:$0xf0]  ;;  %v5049_v24 = vor.u32 %v6985_v10, %v5048_v7 }
 0x115   :  { %3577 = vmatpush.bf16.msrb.mxu0 %v6117_v30  ;;  %v4776_v21 = vld [vmem:[#allocation5 + $0x1a8] sm:$0xf]  ;;  %v6917_v28 = vld [vmem:[#allocation5 + $0x1b4] sm:$0xf0] }
 0x116   :  { %3590 = vmatpush.bf16.msrb.mxu1 %v6245_v33  ;;  %v4904_v29 = vld [vmem:[#allocation5 + $0x2a8] sm:$0xf]  ;;  %v6949_v30 = vld [vmem:[#allocation5 + $0x2b4] sm:$0xf0]  ;;  %v4649_v33 = vor.u32 %v6885_v17, %v4648_v16 }
 0x117   :  { %3603 = vmatpush.bf16.msrb.mxu2 %v6373_v35  ;;  %v5032_v31 = vld [vmem:[#allocation5 + $0x3a8] sm:$0xf]  ;;  %v6981_v32 = vld [vmem:[#allocation5 + $0x3b4] sm:$0xf0]  ;;  %v4777_v35 = vor.u32 %v6917_v28, %v4776_v21  ;;  %v4905_v36 = vor.u32 %v6949_v30, %v4904_v29 }
 0x118   :  { %3616 = vmatpush.bf16.msrb.mxu3 %v6501_v42  ;;  %v4632_v39 = vld [vmem:[#allocation5 + $0x88] sm:$0xf]  ;;  %v6881_v41 = vld [vmem:[#allocation5 + $0x94] sm:$0xf0]  ;;  %v5033_v43 = vor.u32 %v6981_v32, %v5032_v31 }
 0x119   :  { %3578 = vmatpush.bf16.msrb.mxu0 %v6101_v50  ;;  %v4760_v42 = vld [vmem:[#allocation5 + $0x188] sm:$0xf]  ;;  %v6913_v44 = vld [vmem:[#allocation5 + $0x194] sm:$0xf0]  ;;  %v4633_v50 = vor.u32 %v6881_v41, %v4632_v39 }
 0x11a   :  { %3591 = vmatpush.bf16.msrb.mxu1 %v6229_v53  ;;  %v4888_v45 = vld [vmem:[#allocation5 + $0x288] sm:$0xf]  ;;  %v6945_v62 = vld [vmem:[#allocation5 + $0x294] sm:$0xf0]  ;;  %v3385_v51 = vpop.f32.mrf.mxu1  ;;  %v4761_v54 = vor.u32 %v6913_v44, %v4760_v42 }
 0x11b   :  { %3604 = vmatpush.bf16.msrb.mxu2 %v6357_v55  ;;  %v3372_v46 = vpop.f32.mrf.mxu0  ;;  %v5016_v47 = vld [vmem:[#allocation5 + $0x388] sm:$0xf]  ;;  %v6977_v48 = vld [vmem:[#allocation5 + $0x394] sm:$0xf0]  ;;  %v4889_v52 = vor.u32 %v6945_v62, %v4888_v45 }
 0x11c   :  { %3617 = vmatpush.bf16.msrb.mxu3 %v6485_v58  ;;  %3579 = vmatmul.bf16.vlgmr.msrb.gmra.mxu0 %v7694_v13  ;;  %v3373_v49 = vadd.f32 %v3372_v46, %v7724_v6  ;;  %v4616_v53 = vld [vmem:[#allocation5 + $0x68] sm:$0xf]  ;;  %v6877_v55 = vld [vmem:[#allocation5 + $0x74] sm:$0xf0]  ;;  %v5017_v57 = vor.u32 %v6977_v48, %v5016_v47 }
 0x11d   :  { %3623 = vmatpush.bf16.msra.mxu0 %v4681_v59  ;;  %3592 = vmatmul.bf16.vlgmr.msrb.gmra.mxu1 %v7698_v20  ;;  %v4744_v56 = vld [vmem:[#allocation5 + $0x168] sm:$0xf]  ;;  %v6909_v59 = vld [vmem:[#allocation5 + $0x174] sm:$0xf0]  ;;  %v4617_v1 = vor.u32 %v6877_v55, %v4616_v53 }
 0x11e   :  { %3636 = vmatpush.bf16.msra.mxu1 %v4809_v60  ;;  %3605 = vmatmul.bf16.vlgmr.msrb.gmra.mxu2 %v7696_v19  ;;  %v3386_v58 = vadd.f32 %v3385_v51, %v3373_v49  ;;  %v4872_v60 = vld [vmem:[#allocation5 + $0x268] sm:$0xf]  ;;  %v6973_v0 = vld [vmem:[#allocation5 + $0x374] sm:$0xf0]  ;;  %v4745_v6 = vor.u32 %v6909_v59, %v4744_v56 }
 0x11f   :  { %3649 = vmatpush.bf16.msra.mxu2 %v4937_v61  ;;  %3618 = vmatmul.bf16.vlgmr.msrb.gmra.mxu3 %v7700_v26  ;;  %v6941_v61 = vld [vmem:[#allocation5 + $0x274] sm:$0xf0]  ;;  %v5000_v63 = vld [vmem:[#allocation5 + $0x368] sm:$0xf] }
 0x120   :  { %3662 = vmatpush.bf16.msra.mxu3 %v5065_v2  ;;  %v4873_v2 = vor.u32 %v6941_v61, %v4872_v60  ;;  %v4600_v3 = vld [vmem:[#allocation5 + $0x48] sm:$0xf]  ;;  %v6873_v4 = vld [vmem:[#allocation5 + $0x54] sm:$0xf0]  ;;  %v5001_v7 = vor.u32 %v6973_v0, %v5000_v63 }
 0x121   :  { %3624 = vmatpush.bf16.msra.mxu0 %v4665_v11  ;;  %v4728_v5 = vld [vmem:[#allocation5 + $0x148] sm:$0xf]  ;;  %v6905_v11 = vld [vmem:[#allocation5 + $0x154] sm:$0xf0]  ;;  %v4601_v29 = vor.u32 %v6873_v4, %v4600_v3 }
 0x122   :  { %3637 = vmatpush.bf16.msra.mxu1 %v4793_v12  ;;  %v4856_v12 = vld [vmem:[#allocation5 + $0x248] sm:$0xf]  ;;  %v3411_v17 = vpop.f32.mrf.mxu3  ;;  %v3387_v30 = vpop.f32.mrf.mxu1  ;;  %v4729_v32 = vor.u32 %v6905_v11, %v4728_v5  ;;  %v6901_v42 = vld [vmem:[#allocation5 + $0x134] sm:$0xf0] }
 0x123   :  { %3650 = vmatpush.bf16.msra.mxu2 %v4921_v14  ;;  %v3398_v10 = vpop.f32.mrf.mxu2  ;;  %v6937_v14 = vld [vmem:[#allocation5 + $0x254] sm:$0xf0]  ;;  %v4984_v21 = vld [vmem:[#allocation5 + $0x348] sm:$0xf]  ;;  %v3374_v28 = vpop.f32.mrf.mxu0 }
 0x124   :  { %3663 = vmatpush.bf16.msra.mxu3 %v5049_v24  ;;  %v3399_v16 = vadd.f32 %v3398_v10, %v3386_v58  ;;  %v6969_v24 = vld [vmem:[#allocation5 + $0x354] sm:$0xf0]  ;;  %v4712_v39 = vld [vmem:[#allocation5 + $0x128] sm:$0xf] }
 0x125   :  { %3625 = vmatpush.bf16.msra.mxu0 %v4649_v33  ;;  %v4857_v33 = vor.u32 %v6937_v14, %v4856_v12  ;;  %v4985_v41 = vor.u32 %v6969_v24, %v4984_v21  ;;  %v6933_v44 = vld [vmem:[#allocation5 + $0x234] sm:$0xf0]  ;;  %v4968_v45 = vld [vmem:[#allocation5 + $0x328] sm:$0xf]  ;;  %v4713_v49 = vor.u32 %v6901_v42, %v4712_v39 }
 0x126   :  { %3638 = vmatpush.bf16.msra.mxu1 %v4777_v35  ;;  %v7731_v31 = vadd.f32 %v3411_v17, %v3399_v16  ;;  %v4584_v35 = vld [vmem:[#allocation5 + $0x28] sm:$0xf]  ;;  %v6965_v62 = vld [vmem:[#allocation5 + $0x334] sm:$0xf0] }
 0x127   :  { %3651 = vmatpush.bf16.msra.mxu2 %v4905_v36  ;;  %v6869_v36 = vld [vmem:[#allocation5 + $0x34] sm:$0xf0]  ;;  %v4568_v47 = vld [vmem:[#allocation5 + $0x8] sm:$0xf]  ;;  %v4969_v53 = vor.u32 %v6965_v62, %v4968_v45 }
 0x128   :  { %3664 = vmatpush.bf16.msra.mxu3 %v5033_v43  ;;  %v4840_v43 = vld [vmem:[#allocation5 + $0x228] sm:$0xf]  ;;  %v4585_v46 = vor.u32 %v6869_v36, %v4584_v35  ;;  %v6865_v48 = vld [vmem:[#allocation5 + $0x14] sm:$0xf0] }
 0x129   :  { %3626 = vmatpush.bf16.msra.mxu0 %v4633_v50  ;;  %v4841_v50 = vor.u32 %v6933_v44, %v4840_v43  ;;  %v4696_v51 = vld [vmem:[#allocation5 + $0x108] sm:$0xf]  ;;  %v6929_v55 = vld [vmem:[#allocation5 + $0x214] sm:$0xf0]  ;;  %v4569_v0 = vor.u32 %v6865_v48, %v4568_v47 }
 0x12a   :  { %3639 = vmatpush.bf16.msra.mxu1 %v4761_v54  ;;  %v6897_v54 = vld [vmem:[#allocation5 + $0x114] sm:$0xf0]  ;;  %v4952_v56 = vld [vmem:[#allocation5 + $0x308] sm:$0xf]  ;;  %v3413_v63 = vpop.f32.mrf.mxu3 }
 0x12b   :  { %3652 = vmatpush.bf16.msra.mxu2 %v4889_v52  ;;  %v4824_v52 = vld [vmem:[#allocation5 + $0x208] sm:$0xf]  ;;  %v3400_v58 = vpop.f32.mrf.mxu2  ;;  %v7021_v60 = vld [vmem:[#allocation5 + $0x4f4] sm:$0xf0]  ;;  %v4697_v3 = vor.u32 %v6897_v54, %v4696_v51 }
 0x12c   :  { %3665 = vmatpush.bf16.msra.mxu3 %v5017_v57  ;;  %v6961_v57 = vld [vmem:[#allocation5 + $0x314] sm:$0xf0]  ;;  %v5192_v59 = vld [vmem:[#allocation5 + $0x4e8] sm:$0xf]  ;;  %v4825_v4 = vor.u32 %v6929_v55, %v4824_v52  ;;  %v7448_v55 = vld [vmem:[#allocation7] sm:$0xf] }
 0x12d   :  { %3627 = vmatpush.bf16.msra.mxu0 %v4617_v1  ;;  %v5320_v61 = vld [vmem:[#allocation5 + $0x5e8] sm:$0xf]  ;;  %v7053_v1 = vld [vmem:[#allocation5 + $0x5f4] sm:$0xf0]  ;;  %v4953_v10 = vor.u32 %v6961_v57, %v4952_v56  ;;  %v5193_v11 = vor.u32 %v7021_v60, %v5192_v59  ;;  %v640_v56 = vperm.slane %v7448_v55, 1 }
 0x12e   :  { %3640 = vmatpush.bf16.msra.mxu1 %v4745_v6  ;;  %v5448_v6 = vld [vmem:[#allocation5 + $0x6e8] sm:$0xf]  ;;  %v5321_v12 = vor.u32 %v7053_v1, %v5320_v61  ;;  %v7017_v17 = vld [vmem:[#allocation5 + $0x4d4] sm:$0xf0] }
 0x12f   :  { %3653 = vmatpush.bf16.msra.mxu2 %v4873_v2  ;;  %v7085_v2 = vld [vmem:[#allocation5 + $0x6f4] sm:$0xf0]  ;;  %v5576_v5 = vld [vmem:[#allocation5 + $0x7e8] sm:$0xf] }
 0x130   :  { %3666 = vmatpush.bf16.msra.mxu3 %v5001_v7  ;;  %v7117_v7 = vld [vmem:[#allocation5 + $0x7f4] sm:$0xf0]  ;;  %v5449_v14 = vor.u32 %v7085_v2, %v5448_v6  ;;  %v5176_v16 = vld [vmem:[#allocation5 + $0x4c8] sm:$0xf] }
 0x131   :  { %3628 = vmatpush.bf16.msra.mxu0 %v4601_v29  ;;  %v5304_v21 = vld [vmem:[#allocation5 + $0x5c8] sm:$0xf]  ;;  %v5577_v24 = vor.u32 %v7117_v7, %v5576_v5  ;;  %v7049_v28 = vld [vmem:[#allocation5 + $0x5d4] sm:$0xf0]  ;;  %v5177_v35 = vor.u32 %v7017_v17, %v5176_v16 }
 0x132   :  { %3641 = vmatpush.bf16.msra.mxu1 %v4729_v32  ;;  %v5432_v29 = vld [vmem:[#allocation5 + $0x6c8] sm:$0xf]  ;;  %v7081_v30 = vld [vmem:[#allocation5 + $0x6d4] sm:$0xf0]  ;;  %v5305_v36 = vor.u32 %v7049_v28, %v5304_v21 }
 0x133   :  { %3654 = vmatpush.bf16.msra.mxu2 %v4857_v33  ;;  %v5560_v32 = vld [vmem:[#allocation5 + $0x7c8] sm:$0xf]  ;;  %v7113_v33 = vld [vmem:[#allocation5 + $0x7d4] sm:$0xf0]  ;;  %v5433_v39 = vor.u32 %v7081_v30, %v5432_v29 }
 0x134   :  { %3667 = vmatpush.bf16.msra.mxu3 %v4985_v41  ;;  %v5160_v41 = vld [vmem:[#allocation5 + $0x4a8] sm:$0xf]  ;;  %v7013_v42 = vld [vmem:[#allocation5 + $0x4b4] sm:$0xf0]  ;;  %v5561_v44 = vor.u32 %v7113_v33, %v5560_v32 }
 0x135   :  { %3629 = vmatpush.bf16.msra.mxu0 %v4585_v46  ;;  %v5288_v43 = vld [vmem:[#allocation5 + $0x5a8] sm:$0xf]  ;;  %v7045_v45 = vld [vmem:[#allocation5 + $0x5b4] sm:$0xf0] }
 0x136   :  { %3642 = vmatpush.bf16.msra.mxu1 %v4713_v49  ;;  %v5416_v62 = vld [vmem:[#allocation5 + $0x6a8] sm:$0xf]  ;;  %v7077_v46 = vld [vmem:[#allocation5 + $0x6b4] sm:$0xf0]  ;;  %v5161_v49 = vor.u32 %v7013_v42, %v5160_v41  ;;  %v5289_v51 = vor.u32 %v7045_v45, %v5288_v43 }
 0x137   :  { %3655 = vmatpush.bf16.msra.mxu2 %v4841_v50  ;;  %v5544_v47 = vld [vmem:[#allocation5 + $0x7a8] sm:$0xf]  ;;  %v7109_v48 = vld [vmem:[#allocation5 + $0x7b4] sm:$0xf0]  ;;  %v5417_v54 = vor.u32 %v7077_v46, %v5416_v62 }
 0x138   :  { %3668 = vmatpush.bf16.msra.mxu3 %v4969_v53  ;;  %v5144_v50 = vld [vmem:[#allocation5 + $0x488] sm:$0xf]  ;;  %v7009_v52 = vld [vmem:[#allocation5 + $0x494] sm:$0xf0]  ;;  %v5545_v57 = vor.u32 %v7109_v48, %v5544_v47 }
 0x139   :  { %3630 = vmatpush.bf16.msra.mxu0 %v4569_v0  ;;  %v5272_v53 = vld [vmem:[#allocation5 + $0x588] sm:$0xf]  ;;  %v7041_v58 = vld [vmem:[#allocation5 + $0x594] sm:$0xf0]  ;;  %v5145_v0 = vor.u32 %v7009_v52, %v5144_v50  ;;  %v3424_v1 = vpop.f32.mrf.mxu0 }
 0x13a   :  { %3643 = vmatpush.bf16.msra.mxu1 %v4697_v3  ;;  %v5400_v59 = vld [vmem:[#allocation5 + $0x688] sm:$0xf]  ;;  %v7073_v60 = vld [vmem:[#allocation5 + $0x694] sm:$0xf0]  ;;  %v5273_v6 = vor.u32 %v7041_v58, %v5272_v53  ;;  %v3425_v7 = vadd.f32 %v3424_v1, %v640_v56 }
 0x13b   :  { %3656 = vmatpush.bf16.msra.mxu2 %v4825_v4  ;;  %v5528_v61 = vld [vmem:[#allocation5 + $0x788] sm:$0xf]  ;;  %v7105_v63 = vld [vmem:[#allocation5 + $0x794] sm:$0xf0]  ;;  %v5401_v2 = vor.u32 %v7073_v60, %v5400_v59 }
 0x13c   :  { %3669 = vmatpush.bf16.msra.mxu3 %v4953_v10  ;;  %3631 = vmatmul.bf16.vlgmr.msra.gmra.mxu0 %v7660_v9  ;;  %v5128_v3 = vld [vmem:[#allocation5 + $0x468] sm:$0xf]  ;;  %v7005_v4 = vld [vmem:[#allocation5 + $0x474] sm:$0xf0]  ;;  %v3437_v10 = vpop.f32.mrf.mxu1 }
 0x13d   :  { %3675 = vmatpush.bf16.msrb.mxu0 %v5193_v11  ;;  %3644 = vmatmul.bf16.vlgmr.msra.gmra.mxu1 %v7667_v25  ;;  %v5256_v5 = vld [vmem:[#allocation5 + $0x568] sm:$0xf]  ;;  %v5529_v11 = vor.u32 %v7105_v63, %v5528_v61  ;;  %v7069_v16 = vld [vmem:[#allocation5 + $0x674] sm:$0xf0]  ;;  %v5129_v28 = vor.u32 %v7005_v4, %v5128_v3 }
 0x13e   :  { %3688 = vmatpush.bf16.msrb.mxu1 %v5321_v12  ;;  %3657 = vmatmul.bf16.vlgmr.msra.gmra.mxu2 %v7658_v8  ;;  %v7037_v12 = vld [vmem:[#allocation5 + $0x574] sm:$0xf0]  ;;  %v5512_v17 = vld [vmem:[#allocation5 + $0x768] sm:$0xf] }
 0x13f   :  { %3701 = vmatpush.bf16.msrb.mxu2 %v5449_v14  ;;  %3670 = vmatmul.bf16.vlgmr.msra.gmra.mxu3 %v7662_v15  ;;  %v5384_v14 = vld [vmem:[#allocation5 + $0x668] sm:$0xf]  ;;  %v7101_v21 = vld [vmem:[#allocation5 + $0x774] sm:$0xf0]  ;;  %v5257_v29 = vor.u32 %v7037_v12, %v5256_v5 }
 0x140   :  { %3714 = vmatpush.bf16.msrb.mxu3 %v5577_v24  ;;  %v3438_v24 = vadd.f32 %v3437_v10, %v3425_v7  ;;  %v5385_v30 = vor.u32 %v7069_v16, %v5384_v14  ;;  %v5112_v32 = vld [vmem:[#allocation5 + $0x448] sm:$0xf]  ;;  %v7001_v33 = vld [vmem:[#allocation5 + $0x454] sm:$0xf0] }
 0x141   :  { %3676 = vmatpush.bf16.msrb.mxu0 %v5177_v35  ;;  %v5240_v35 = vld [vmem:[#allocation5 + $0x548] sm:$0xf]  ;;  %v7033_v41 = vld [vmem:[#allocation5 + $0x554] sm:$0xf0]  ;;  %v5113_v47 = vor.u32 %v7001_v33, %v5112_v32 }
 0x142   :  { %3689 = vmatpush.bf16.msrb.mxu1 %v5305_v36  ;;  %v3450_v36 = vpop.f32.mrf.mxu2  ;;  %v5368_v42 = vld [vmem:[#allocation5 + $0x648] sm:$0xf]  ;;  %v7065_v43 = vld [vmem:[#allocation5 + $0x654] sm:$0xf0]  ;;  %v3463_v45 = vpop.f32.mrf.mxu3  ;;  %v5241_v50 = vor.u32 %v7033_v41, %v5240_v35 }
 0x143   :  { %3702 = vmatpush.bf16.msrb.mxu2 %v5433_v39  ;;  %v5513_v39 = vor.u32 %v7101_v21, %v5512_v17  ;;  %v5496_v62 = vld [vmem:[#allocation5 + $0x748] sm:$0xf]  ;;  %v7097_v46 = vld [vmem:[#allocation5 + $0x754] sm:$0xf0] }
 0x144   :  { %3715 = vmatpush.bf16.msrb.mxu3 %v5561_v44  ;;  %v3451_v44 = vadd.f32 %v3450_v36, %v3438_v24  ;;  %v6997_v52 = vld [vmem:[#allocation5 + $0x434] sm:$0xf0]  ;;  %v5224_v53 = vld [vmem:[#allocation5 + $0x528] sm:$0xf]  ;;  %v3439_v55 = vpop.f32.mrf.mxu1  ;;  %v5497_v56 = vor.u32 %v7097_v46, %v5496_v62 }
 0x145   :  { %3677 = vmatpush.bf16.msrb.mxu0 %v5161_v49  ;;  %v3426_v49 = vpop.f32.mrf.mxu0  ;;  %v5352_v58 = vld [vmem:[#allocation5 + $0x628] sm:$0xf]  ;;  %v7061_v59 = vld [vmem:[#allocation5 + $0x634] sm:$0xf0] }
 0x146   :  { %3690 = vmatpush.bf16.msrb.mxu1 %v5289_v51  ;;  %v7737_v48 = vadd.f32 %v3463_v45, %v3451_v44  ;;  %v5369_v51 = vor.u32 %v7065_v43, %v5368_v42  ;;  %v5480_v60 = vld [vmem:[#allocation5 + $0x728] sm:$0xf]  ;;  %v7093_v61 = vld [vmem:[#allocation5 + $0x734] sm:$0xf0] }
 0x147   :  { %3703 = vmatpush.bf16.msrb.mxu2 %v5417_v54  ;;  %v5096_v54 = vld [vmem:[#allocation5 + $0x428] sm:$0xf]  ;;  %v6993_v1 = vld [vmem:[#allocation5 + $0x414] sm:$0xf0]  ;;  %v5481_v10 = vor.u32 %v7093_v61, %v5480_v60 }
 0x148   :  { %3716 = vmatpush.bf16.msrb.mxu3 %v5545_v57  ;;  %v7029_v57 = vld [vmem:[#allocation5 + $0x534] sm:$0xf0]  ;;  %v5097_v63 = vor.u32 %v6997_v52, %v5096_v54  ;;  %v5208_v3 = vld [vmem:[#allocation5 + $0x508] sm:$0xf] }
 0x149   :  { %3678 = vmatpush.bf16.msrb.mxu0 %v5145_v0  ;;  %v5080_v0 = vld [vmem:[#allocation5 + $0x408] sm:$0xf]  ;;  %v7025_v4 = vld [vmem:[#allocation5 + $0x514] sm:$0xf0] }
 0x14a   :  { %3691 = vmatpush.bf16.msrb.mxu1 %v5273_v6  ;;  %v5225_v6 = vor.u32 %v7029_v57, %v5224_v53  ;;  %v5336_v5 = vld [vmem:[#allocation5 + $0x608] sm:$0xf]  ;;  %v3452_v7 = vpop.f32.mrf.mxu2  ;;  %v7089_v14 = vld [vmem:[#allocation5 + $0x714] sm:$0xf0]  ;;  %v3465_v16 = vpop.f32.mrf.mxu3  ;;  %v5209_v33 = vor.u32 %v7025_v4, %v5208_v3 }
 0x14b   :  { %3704 = vmatpush.bf16.msrb.mxu2 %v5401_v2  ;;  %v5353_v2 = vor.u32 %v7061_v59, %v5352_v58  ;;  %v5464_v12 = vld [vmem:[#allocation5 + $0x708] sm:$0xf]  ;;  %v7149_v21 = vld [vmem:[#allocation5 + $0x8f4] sm:$0xf0] }
 0x14c   :  { %3717 = vmatpush.bf16.msrb.mxu3 %v5529_v11  ;;  %v7057_v11 = vld [vmem:[#allocation5 + $0x614] sm:$0xf0]  ;;  %v5704_v17 = vld [vmem:[#allocation5 + $0x8e8] sm:$0xf]  ;;  %v5465_v41 = vor.u32 %v7089_v14, %v5464_v12 }
 0x14d   :  { %3679 = vmatpush.bf16.msrb.mxu0 %v5129_v28  ;;  %v5832_v24 = vld [vmem:[#allocation5 + $0x9e8] sm:$0xf]  ;;  %v5081_v28 = vor.u32 %v6993_v1, %v5080_v0  ;;  %v7213_v32 = vld [vmem:[#allocation5 + $0xaf4] sm:$0xf0]  ;;  %v5337_v35 = vor.u32 %v7057_v11, %v5336_v5  ;;  %v5705_v42 = vor.u32 %v7149_v21, %v5704_v17 }
 0x14e   :  { %3692 = vmatpush.bf16.msrb.mxu1 %v5257_v29  ;;  %v7181_v29 = vld [vmem:[#allocation5 + $0x9f4] sm:$0xf0]  ;;  %v6088_v36 = vld [vmem:[#allocation5 + $0xbe8] sm:$0xf] }
 0x14f   :  { %3705 = vmatpush.bf16.msrb.mxu2 %v5385_v30  ;;  %v5960_v30 = vld [vmem:[#allocation5 + $0xae8] sm:$0xf]  ;;  %v5833_v43 = vor.u32 %v7181_v29, %v5832_v24  ;;  %v7145_v62 = vld [vmem:[#allocation5 + $0x8d4] sm:$0xf0] }
 0x150   :  { %3718 = vmatpush.bf16.msrb.mxu3 %v5513_v39  ;;  %v7245_v39 = vld [vmem:[#allocation5 + $0xbf4] sm:$0xf0]  ;;  %v5961_v44 = vor.u32 %v7213_v32, %v5960_v30  ;;  %v5688_v45 = vld [vmem:[#allocation5 + $0x8c8] sm:$0xf] }
 0x151   :  { %3680 = vmatpush.bf16.msrb.mxu0 %v5113_v47  ;;  %v5816_v46 = vld [vmem:[#allocation5 + $0x9c8] sm:$0xf]  ;;  %v6089_v47 = vor.u32 %v7245_v39, %v6088_v36  ;;  %v7177_v49 = vld [vmem:[#allocation5 + $0x9d4] sm:$0xf0]  ;;  %v5689_v53 = vor.u32 %v7145_v62, %v5688_v45 }
 0x152   :  { %3693 = vmatpush.bf16.msrb.mxu1 %v5241_v50  ;;  %v5944_v50 = vld [vmem:[#allocation5 + $0xac8] sm:$0xf]  ;;  %v7241_v52 = vld [vmem:[#allocation5 + $0xbd4] sm:$0xf0]  ;;  %v5817_v55 = vor.u32 %v7177_v49, %v5816_v46 }
 0x153   :  { %3706 = vmatpush.bf16.msrb.mxu2 %v5369_v51  ;;  %v7209_v51 = vld [vmem:[#allocation5 + $0xad4] sm:$0xf0]  ;;  %v6072_v54 = vld [vmem:[#allocation5 + $0xbc8] sm:$0xf] }
 0x154   :  { %3719 = vmatpush.bf16.msrb.mxu3 %v5497_v56  ;;  %v5945_v56 = vor.u32 %v7209_v51, %v5944_v50  ;;  %v5672_v57 = vld [vmem:[#allocation5 + $0x8a8] sm:$0xf]  ;;  %v7141_v58 = vld [vmem:[#allocation5 + $0x8b4] sm:$0xf0]  ;;  %v6073_v60 = vor.u32 %v7241_v52, %v6072_v54 }
 0x155   :  { %3681 = vmatpush.bf16.msrb.mxu0 %v5097_v63  ;;  %v5800_v59 = vld [vmem:[#allocation5 + $0x9a8] sm:$0xf]  ;;  %v7173_v61 = vld [vmem:[#allocation5 + $0x9b4] sm:$0xf0] }
 0x156   :  { %3694 = vmatpush.bf16.msrb.mxu1 %v5225_v6  ;;  %v5928_v63 = vld [vmem:[#allocation5 + $0xaa8] sm:$0xf]  ;;  %v7205_v0 = vld [vmem:[#allocation5 + $0xab4] sm:$0xf0]  ;;  %v5801_v3 = vor.u32 %v7173_v61, %v5800_v59 }
 0x157   :  { %3707 = vmatpush.bf16.msrb.mxu2 %v5353_v2  ;;  %v6056_v1 = vld [vmem:[#allocation5 + $0xba8] sm:$0xf]  ;;  %v7237_v6 = vld [vmem:[#allocation5 + $0xbb4] sm:$0xf0]  ;;  %v5673_v2 = vor.u32 %v7141_v58, %v5672_v57  ;;  %v5929_v4 = vor.u32 %v7205_v0, %v5928_v63 }
 0x158   :  { %3720 = vmatpush.bf16.msrb.mxu3 %v5481_v10  ;;  %v5656_v5 = vld [vmem:[#allocation5 + $0x888] sm:$0xf]  ;;  %v7137_v7 = vld [vmem:[#allocation5 + $0x894] sm:$0xf0]  ;;  %v6057_v11 = vor.u32 %v7237_v6, %v6056_v1 }
 0x159   :  { %3682 = vmatpush.bf16.msrb.mxu0 %v5081_v28  ;;  %v5784_v10 = vld [vmem:[#allocation5 + $0x988] sm:$0xf]  ;;  %v7169_v12 = vld [vmem:[#allocation5 + $0x994] sm:$0xf0]  ;;  %v5657_v24 = vor.u32 %v7137_v7, %v5656_v5  ;;  %v3476_v28 = vpop.f32.mrf.mxu0 }
 0x15a   :  { %3695 = vmatpush.bf16.msrb.mxu1 %v5209_v33  ;;  %v5912_v14 = vld [vmem:[#allocation5 + $0xa88] sm:$0xf]  ;;  %v7201_v16 = vld [vmem:[#allocation5 + $0xa94] sm:$0xf0]  ;;  %v5785_v29 = vor.u32 %v7169_v12, %v5784_v10  ;;  %v3477_v36 = vadd.f32 %v3476_v28, %v7737_v48  ;;  %v3489_v39 = vpop.f32.mrf.mxu1 }
 0x15b   :  { %3708 = vmatpush.bf16.msrb.mxu2 %v5337_v35  ;;  %v6040_v17 = vld [vmem:[#allocation5 + $0xb88] sm:$0xf]  ;;  %v7233_v21 = vld [vmem:[#allocation5 + $0xb94] sm:$0xf0]  ;;  %v5913_v30 = vor.u32 %v7201_v16, %v5912_v14 }
 0x15c   :  { %3721 = vmatpush.bf16.msrb.mxu3 %v5465_v41  ;;  %3683 = vmatmul.bf16.vlgmr.msrb.gmra.mxu0 %v7672_v37  ;;  %v5640_v32 = vld [vmem:[#allocation5 + $0x868] sm:$0xf]  ;;  %v7133_v33 = vld [vmem:[#allocation5 + $0x874] sm:$0xf0]  ;;  %v6041_v41 = vor.u32 %v7233_v21, %v6040_v17  ;;  %v3490_v46 = vadd.f32 %v3489_v39, %v3477_v36 }
 0x15d   :  { %3727 = vmatpush.bf16.msra.mxu0 %v5705_v42  ;;  %3696 = vmatmul.bf16.vlgmr.msrb.gmra.mxu1 %v7676_v40  ;;  %v5768_v35 = vld [vmem:[#allocation5 + $0x968] sm:$0xf]  ;;  %v7165_v42 = vld [vmem:[#allocation5 + $0x974] sm:$0xf0] }
 0x15e   :  { %3740 = vmatpush.bf16.msra.mxu1 %v5833_v43  ;;  %3709 = vmatmul.bf16.vlgmr.msrb.gmra.mxu2 %v7670_v34  ;;  %v5896_v43 = vld [vmem:[#allocation5 + $0xa68] sm:$0xf]  ;;  %v7229_v62 = vld [vmem:[#allocation5 + $0xb74] sm:$0xf0]  ;;  %v5769_v49 = vor.u32 %v7165_v42, %v5768_v35 }
 0x15f   :  { %3753 = vmatpush.bf16.msra.mxu2 %v5961_v44  ;;  %3722 = vmatmul.bf16.vlgmr.msrb.gmra.mxu3 %v7674_v38  ;;  %v7197_v44 = vld [vmem:[#allocation5 + $0xa74] sm:$0xf0]  ;;  %v6024_v45 = vld [vmem:[#allocation5 + $0xb68] sm:$0xf] }
 0x160   :  { %3766 = vmatpush.bf16.msra.mxu3 %v6089_v47  ;;  %v5641_v47 = vor.u32 %v7133_v33, %v5640_v32  ;;  %v5897_v50 = vor.u32 %v7197_v44, %v5896_v43  ;;  %v5624_v51 = vld [vmem:[#allocation5 + $0x848] sm:$0xf]  ;;  %v7129_v54 = vld [vmem:[#allocation5 + $0x854] sm:$0xf0]  ;;  %v6025_v48 = vor.u32 %v7229_v62, %v6024_v45 }
 0x161   :  { %3728 = vmatpush.bf16.msra.mxu0 %v5689_v53  ;;  %v5752_v52 = vld [vmem:[#allocation5 + $0x948] sm:$0xf]  ;;  %v3502_v53 = vpop.f32.mrf.mxu2  ;;  %v7193_v57 = vld [vmem:[#allocation5 + $0xa54] sm:$0xf0]  ;;  %v5625_v63 = vor.u32 %v7129_v54, %v5624_v51  ;;  %v3478_v1 = vpop.f32.mrf.mxu0 }
 0x162   :  { %3741 = vmatpush.bf16.msra.mxu1 %v5817_v55  ;;  %v7161_v55 = vld [vmem:[#allocation5 + $0x954] sm:$0xf0]  ;;  %v3503_v58 = vadd.f32 %v3502_v53, %v3490_v46  ;;  %v3515_v59 = vpop.f32.mrf.mxu3  ;;  %v5736_v5 = vld [vmem:[#allocation5 + $0x928] sm:$0xf]  ;;  %v3491_v7 = vpop.f32.mrf.mxu1 }
 0x163   :  { %3754 = vmatpush.bf16.msra.mxu2 %v5945_v56  ;;  %v5880_v56 = vld [vmem:[#allocation5 + $0xa48] sm:$0xf]  ;;  %v7225_v61 = vld [vmem:[#allocation5 + $0xb54] sm:$0xf0]  ;;  %v5753_v6 = vor.u32 %v7161_v55, %v5752_v52 }
 0x164   :  { %3767 = vmatpush.bf16.msra.mxu3 %v6073_v60  ;;  %v6008_v60 = vld [vmem:[#allocation5 + $0xb48] sm:$0xf]  ;;  %v7744_v0 = vadd.f32 %v3515_v59, %v3503_v58  ;;  %v7189_v14 = vld [vmem:[#allocation5 + $0xa34] sm:$0xf0] }
 0x165   :  { %3729 = vmatpush.bf16.msra.mxu0 %v5673_v2  ;;  %v5881_v2 = vor.u32 %v7193_v57, %v5880_v56  ;;  %v6009_v10 = vor.u32 %v7225_v61, %v6008_v60  ;;  %v5864_v12 = vld [vmem:[#allocation5 + $0xa28] sm:$0xf]  ;;  %v7221_v17 = vld [vmem:[#allocation5 + $0xb34] sm:$0xf0] }
 0x166   :  { %3742 = vmatpush.bf16.msra.mxu1 %v5801_v3  ;;  %v5608_v3 = vld [vmem:[#allocation5 + $0x828] sm:$0xf]  ;;  %v7121_v28 = vld [vmem:[#allocation5 + $0x814] sm:$0xf0] }
 0x167   :  { %3755 = vmatpush.bf16.msra.mxu2 %v5929_v4  ;;  %v7125_v4 = vld [vmem:[#allocation5 + $0x834] sm:$0xf0]  ;;  %v5992_v16 = vld [vmem:[#allocation5 + $0xb28] sm:$0xf] }
 0x168   :  { %3768 = vmatpush.bf16.msra.mxu3 %v6057_v11  ;;  %v7157_v11 = vld [vmem:[#allocation5 + $0x934] sm:$0xf0]  ;;  %v5609_v21 = vor.u32 %v7125_v4, %v5608_v3  ;;  %v5720_v32 = vld [vmem:[#allocation5 + $0x908] sm:$0xf]  ;;  %v5993_v39 = vor.u32 %v7221_v17, %v5992_v16 }
 0x169   :  { %3730 = vmatpush.bf16.msra.mxu0 %v5657_v24  ;;  %v5592_v24 = vld [vmem:[#allocation5 + $0x808] sm:$0xf]  ;;  %v7153_v33 = vld [vmem:[#allocation5 + $0x914] sm:$0xf0]  ;;  %v3504_v36 = vpop.f32.mrf.mxu2 }
 0x16a   :  { %3743 = vmatpush.bf16.msra.mxu1 %v5785_v29  ;;  %v5737_v29 = vor.u32 %v7157_v11, %v5736_v5  ;;  %v5848_v35 = vld [vmem:[#allocation5 + $0xa08] sm:$0xf]  ;;  %v7217_v43 = vld [vmem:[#allocation5 + $0xb14] sm:$0xf0]  ;;  %v3517_v44 = vpop.f32.mrf.mxu3  ;;  %v5721_v54 = vor.u32 %v7153_v33, %v5720_v32 }
 0x16b   :  { %3756 = vmatpush.bf16.msra.mxu2 %v5913_v30  ;;  %v5865_v30 = vor.u32 %v7189_v14, %v5864_v12  ;;  %v5976_v42 = vld [vmem:[#allocation5 + $0xb08] sm:$0xf]  ;;  %v7277_v62 = vld [vmem:[#allocation5 + $0xcf4] sm:$0xf0] }
 0x16c   :  { %3769 = vmatpush.bf16.msra.mxu3 %v6041_v41  ;;  %v7185_v41 = vld [vmem:[#allocation5 + $0xa14] sm:$0xf0]  ;;  %v6216_v45 = vld [vmem:[#allocation5 + $0xce8] sm:$0xf]  ;;  %v5977_v55 = vor.u32 %v7217_v43, %v5976_v42 }
 0x16d   :  { %3731 = vmatpush.bf16.msra.mxu0 %v5641_v47  ;;  %v6344_v46 = vld [vmem:[#allocation5 + $0xde8] sm:$0xf]  ;;  %v5593_v47 = vor.u32 %v7121_v28, %v5592_v24  ;;  %v7341_v51 = vld [vmem:[#allocation5 + $0xef4] sm:$0xf0]  ;;  %v5849_v52 = vor.u32 %v7185_v41, %v5848_v35  ;;  %v6217_v56 = vor.u32 %v7277_v62, %v6216_v45 }
 0x16e   :  { %3744 = vmatpush.bf16.msra.mxu1 %v5769_v49  ;;  %v7309_v49 = vld [vmem:[#allocation5 + $0xdf4] sm:$0xf0]  ;;  %v6600_v53 = vld [vmem:[#allocation5 + $0xfe8] sm:$0xf] }
 0x16f   :  { %3757 = vmatpush.bf16.msra.mxu2 %v5897_v50  ;;  %v6472_v50 = vld [vmem:[#allocation5 + $0xee8] sm:$0xf]  ;;  %v6345_v57 = vor.u32 %v7309_v49, %v6344_v46  ;;  %v7273_v60 = vld [vmem:[#allocation5 + $0xcd4] sm:$0xf0] }
 0x170   :  { %3770 = vmatpush.bf16.msra.mxu3 %v6025_v48  ;;  %v7373_v48 = vld [vmem:[#allocation5 + $0xff4] sm:$0xf0]  ;;  %v6473_v58 = vor.u32 %v7341_v51, %v6472_v50  ;;  %v6200_v59 = vld [vmem:[#allocation5 + $0xcc8] sm:$0xf] }
 0x171   :  { %3732 = vmatpush.bf16.msra.mxu0 %v5625_v63  ;;  %v6328_v61 = vld [vmem:[#allocation5 + $0xdc8] sm:$0xf]  ;;  %v6601_v63 = vor.u32 %v7373_v48, %v6600_v53  ;;  %v7305_v1 = vld [vmem:[#allocation5 + $0xdd4] sm:$0xf0]  ;;  %v6201_v5 = vor.u32 %v7273_v60, %v6200_v59 }
 0x172   :  { %3745 = vmatpush.bf16.msra.mxu1 %v5753_v6  ;;  %v6456_v6 = vld [vmem:[#allocation5 + $0xec8] sm:$0xf]  ;;  %v7369_v4 = vld [vmem:[#allocation5 + $0xfd4] sm:$0xf0]  ;;  %v6329_v7 = vor.u32 %v7305_v1, %v6328_v61 }
 0x173   :  { %3758 = vmatpush.bf16.msra.mxu2 %v5881_v2  ;;  %v7337_v2 = vld [vmem:[#allocation5 + $0xed4] sm:$0xf0]  ;;  %v6584_v3 = vld [vmem:[#allocation5 + $0xfc8] sm:$0xf] }
 0x174   :  { %3771 = vmatpush.bf16.msra.mxu3 %v6009_v10  ;;  %v6457_v10 = vor.u32 %v7337_v2, %v6456_v6  ;;  %v6184_v11 = vld [vmem:[#allocation5 + $0xca8] sm:$0xf]  ;;  %v7269_v12 = vld [vmem:[#allocation5 + $0xcb4] sm:$0xf0]  ;;  %v6585_v16 = vor.u32 %v7369_v4, %v6584_v3 }
 0x175   :  { %3733 = vmatpush.bf16.msra.mxu0 %v5609_v21  ;;  %v6312_v14 = vld [vmem:[#allocation5 + $0xda8] sm:$0xf]  ;;  %v7301_v17 = vld [vmem:[#allocation5 + $0xdb4] sm:$0xf0] }
 0x176   :  { %3746 = vmatpush.bf16.msra.mxu1 %v5737_v29  ;;  %v6440_v21 = vld [vmem:[#allocation5 + $0xea8] sm:$0xf]  ;;  %v7333_v24 = vld [vmem:[#allocation5 + $0xeb4] sm:$0xf0]  ;;  %v6313_v32 = vor.u32 %v7301_v17, %v6312_v14 }
 0x177   :  { %3759 = vmatpush.bf16.msra.mxu2 %v5865_v30  ;;  %v6568_v28 = vld [vmem:[#allocation5 + $0xfa8] sm:$0xf]  ;;  %v7365_v29 = vld [vmem:[#allocation5 + $0xfb4] sm:$0xf0]  ;;  %v6185_v30 = vor.u32 %v7269_v12, %v6184_v11  ;;  %v6441_v33 = vor.u32 %v7333_v24, %v6440_v21 }
 0x178   :  { %3772 = vmatpush.bf16.msra.mxu3 %v5993_v39  ;;  %v6168_v35 = vld [vmem:[#allocation5 + $0xc88] sm:$0xf]  ;;  %v7265_v36 = vld [vmem:[#allocation5 + $0xc94] sm:$0xf0]  ;;  %v6569_v41 = vor.u32 %v7365_v29, %v6568_v28 }
 0x179   :  { %3734 = vmatpush.bf16.msra.mxu0 %v5593_v47  ;;  %v6296_v39 = vld [vmem:[#allocation5 + $0xd88] sm:$0xf]  ;;  %v7297_v42 = vld [vmem:[#allocation5 + $0xd94] sm:$0xf0]  ;;  %v3528_v45 = vpop.f32.mrf.mxu0  ;;  %v6169_v49 = vor.u32 %v7265_v36, %v6168_v35 }
 0x17a   :  { %3747 = vmatpush.bf16.msra.mxu1 %v5721_v54  ;;  %v6424_v43 = vld [vmem:[#allocation5 + $0xe88] sm:$0xf]  ;;  %v7329_v44 = vld [vmem:[#allocation5 + $0xe94] sm:$0xf0]  ;;  %v3529_v47 = vadd.f32 %v3528_v45, %v7744_v0  ;;  %v3541_v50 = vpop.f32.mrf.mxu1  ;;  %v6297_v51 = vor.u32 %v7297_v42, %v6296_v39 }
 0x17b   :  { %3760 = vmatpush.bf16.msra.mxu2 %v5849_v52  ;;  %v6552_v62 = vld [vmem:[#allocation5 + $0xf88] sm:$0xf]  ;;  %v7361_v46 = vld [vmem:[#allocation5 + $0xf94] sm:$0xf0]  ;;  %v6425_v54 = vor.u32 %v7329_v44, %v6424_v43 }
 0x17c   :  { %3773 = vmatpush.bf16.msra.mxu3 %v5977_v55  ;;  %3735 = vmatmul.bf16.vlgmr.msra.gmra.mxu0 %v7682_v18  ;;  %v6152_v52 = vld [vmem:[#allocation5 + $0xc68] sm:$0xf]  ;;  %v7261_v53 = vld [vmem:[#allocation5 + $0xc74] sm:$0xf0]  ;;  %v6553_v55 = vor.u32 %v7361_v46, %v6552_v62 }
 0x17d   :  { %3779 = vmatpush.bf16.msrb.mxu0 %v6217_v56  ;;  %3748 = vmatmul.bf16.vlgmr.msra.gmra.mxu1 %v7686_v23  ;;  %v6280_v48 = vld [vmem:[#allocation5 + $0xd68] sm:$0xf]  ;;  %v3542_v56 = vadd.f32 %v3541_v50, %v3529_v47  ;;  %v7325_v59 = vld [vmem:[#allocation5 + $0xe74] sm:$0xf0] }
 0x17e   :  { %3792 = vmatpush.bf16.msrb.mxu1 %v6345_v57  ;;  %3761 = vmatmul.bf16.vlgmr.msra.gmra.mxu2 %v7684_v22  ;;  %v7293_v57 = vld [vmem:[#allocation5 + $0xd74] sm:$0xf0]  ;;  %v6536_v60 = vld [vmem:[#allocation5 + $0xf68] sm:$0xf] }
 0x17f   :  { %3805 = vmatpush.bf16.msrb.mxu2 %v6473_v58  ;;  %3774 = vmatmul.bf16.vlgmr.msra.gmra.mxu3 %v7688_v27  ;;  %v6408_v58 = vld [vmem:[#allocation5 + $0xe68] sm:$0xf]  ;;  %v7357_v61 = vld [vmem:[#allocation5 + $0xf74] sm:$0xf0]  ;;  %v6281_v0 = vor.u32 %v7293_v57, %v6280_v48 }
 0x180   :  { %3818 = vmatpush.bf16.msrb.mxu3 %v6601_v63  ;;  %v6153_v63 = vor.u32 %v7261_v53, %v6152_v52  ;;  %v6409_v1 = vor.u32 %v7325_v59, %v6408_v58  ;;  %v6136_v6 = vld [vmem:[#allocation5 + $0xc48] sm:$0xf]  ;;  %v7257_v2 = vld [vmem:[#allocation5 + $0xc54] sm:$0xf0]  ;;  %v6537_v4 = vor.u32 %v7357_v61, %v6536_v60  ;;  %v6891_v58 = vld [vmem:[#allocation5 + $0xec] sm:$0xf] }
 0x181   :  { %3780 = vmatpush.bf16.msrb.mxu0 %v6201_v5  ;;  %v6264_v3 = vld [vmem:[#allocation5 + $0xd48] sm:$0xf]  ;;  %v3554_v5 = vpop.f32.mrf.mxu2  ;;  %v7321_v11 = vld [vmem:[#allocation5 + $0xe54] sm:$0xf0]  ;;  %v3530_v21 = vpop.f32.mrf.mxu0  ;;  %v6137_v24 = vor.u32 %v7257_v2, %v6136_v6  ;;  %v4682_v59 = vld [vmem:[#allocation5 + $0xf8] sm:$0xf0] }
 0x182   :  { %3793 = vmatpush.bf16.msrb.mxu1 %v6329_v7  ;;  %v7289_v7 = vld [vmem:[#allocation5 + $0xd54] sm:$0xf0]  ;;  %v3555_v12 = vadd.f32 %v3554_v5, %v3542_v56  ;;  %v3567_v14 = vpop.f32.mrf.mxu3  ;;  %v3543_v28 = vpop.f32.mrf.mxu1  ;;  %v6248_v36 = vld [vmem:[#allocation5 + $0xd28] sm:$0xf]  ;;  %v6923_v60 = vld [vmem:[#allocation5 + $0x1ec] sm:$0xf] }
 0x183   :  { %3806 = vmatpush.bf16.msrb.mxu2 %v6457_v10  ;;  %v6392_v10 = vld [vmem:[#allocation5 + $0xe48] sm:$0xf]  ;;  %v7353_v17 = vld [vmem:[#allocation5 + $0xf54] sm:$0xf0]  ;;  %v4938_v6 = vld [vmem:[#allocation5 + $0x2f8] sm:$0xf0] }
 0x184   :  { %3819 = vmatpush.bf16.msrb.mxu3 %v6585_v16  ;;  %v6520_v16 = vld [vmem:[#allocation5 + $0xf48] sm:$0xf]  ;;  %v7751_v29 = vadd.f32 %v3567_v14, %v3555_v12  ;;  %v7253_v35 = vld [vmem:[#allocation5 + $0xc34] sm:$0xf0]  ;;  %v5066_v5 = vld [vmem:[#allocation5 + $0x3f8] sm:$0xf0] }
 0x185   :  { %3781 = vmatpush.bf16.msrb.mxu0 %v6185_v30  ;;  %v6265_v30 = vor.u32 %v7289_v7, %v6264_v3  ;;  %v6521_v39 = vor.u32 %v7353_v17, %v6520_v16  ;;  %v6376_v42 = vld [vmem:[#allocation5 + $0xe28] sm:$0xf]  ;;  %v7317_v43 = vld [vmem:[#allocation5 + $0xe34] sm:$0xf0]  ;;  %v6887_v14 = vld [vmem:[#allocation5 + $0xcc] sm:$0xf] }
 0x186   :  { %3794 = vmatpush.bf16.msrb.mxu1 %v6313_v32  ;;  %v6393_v32 = vor.u32 %v7321_v11, %v6392_v10  ;;  %v6504_v44 = vld [vmem:[#allocation5 + $0xf28] sm:$0xf]  ;;  %v7349_v45 = vld [vmem:[#allocation5 + $0xf34] sm:$0xf0]  ;;  %v6377_v50 = vor.u32 %v7317_v43, %v6376_v42  ;;  %v4685_v10 = vor.u32 %v6891_v58, %v4682_v59  ;;  %v4666_v16 = vld [vmem:[#allocation5 + $0xd8] sm:$0xf0] }
 0x187   :  { %3807 = vmatpush.bf16.msrb.mxu2 %v6441_v33  ;;  %v6120_v33 = vld [vmem:[#allocation5 + $0xc28] sm:$0xf]  ;;  %v7249_v47 = vld [vmem:[#allocation5 + $0xc14] sm:$0xf0]  ;;  %v6505_v53 = vor.u32 %v7349_v45, %v6504_v44  ;;  %v6919_v17 = vld [vmem:[#allocation5 + $0x1cc] sm:$0xf] }
 0x188   :  { %3820 = vmatpush.bf16.msrb.mxu3 %v6569_v41  ;;  %v7285_v41 = vld [vmem:[#allocation5 + $0xd34] sm:$0xf0]  ;;  %v6121_v62 = vor.u32 %v7253_v35, %v6120_v33  ;;  %v6104_v46 = vld [vmem:[#allocation5 + $0xc08] sm:$0xf]  ;;  %v6951_v28 = vld [vmem:[#allocation5 + $0x2cc] sm:$0xf]  ;;  %v4669_v35 = vor.u32 %v6887_v14, %v4666_v16 }
 0x189   :  { %3782 = vmatpush.bf16.msrb.mxu0 %v6169_v49  ;;  %v6249_v49 = vor.u32 %v7285_v41, %v6248_v36  ;;  %v6360_v52 = vld [vmem:[#allocation5 + $0xe08] sm:$0xf]  ;;  %v7313_v48 = vld [vmem:[#allocation5 + $0xe14] sm:$0xf0]  ;;  %v3556_v57 = vpop.f32.mrf.mxu2  ;;  %v5050_v33 = vld [vmem:[#allocation5 + $0x3d8] sm:$0xf0] }
 0x18a   :  { %3795 = vmatpush.bf16.msrb.mxu1 %v6297_v51  ;;  %v6232_v51 = vld [vmem:[#allocation5 + $0xd08] sm:$0xf]  ;;  %v7345_v56 = vld [vmem:[#allocation5 + $0xf14] sm:$0xf0]  ;;  %v3569_v61 = vpop.f32.mrf.mxu3  ;;  %v6361_v3 = vor.u32 %v7313_v48, %v6360_v52  ;;  %v6883_v41 = vld [vmem:[#allocation5 + $0xac] sm:$0xf] }
 0x18b   :  { %3808 = vmatpush.bf16.msrb.mxu2 %v6425_v54  ;;  %v7281_v54 = vld [vmem:[#allocation5 + $0xd14] sm:$0xf0]  ;;  %v4650_v42 = vld [vmem:[#allocation5 + $0xb8] sm:$0xf0]  ;;  %v6915_v43 = vld [vmem:[#allocation5 + $0x1ac] sm:$0xf] }
 0x18c   :  { %3821 = vmatpush.bf16.msrb.mxu3 %v6553_v55  ;;  %v6488_v55 = vld [vmem:[#allocation5 + $0xf08] sm:$0xf]  ;;  %v6233_v2 = vor.u32 %v7281_v54, %v6232_v51  ;;  %v4778_v45 = vld [vmem:[#allocation5 + $0x1b8] sm:$0xf0]  ;;  %v6879_v52 = vld [vmem:[#allocation5 + $0x8c] sm:$0xf] }
 0x18d   :  { %3783 = vmatpush.bf16.msrb.mxu0 %v6153_v63  ;;  %v6105_v63 = vor.u32 %v7249_v47, %v6104_v46  ;;  %v6489_v7 = vor.u32 %v7345_v56, %v6488_v55  ;;  %v4906_v46 = vld [vmem:[#allocation5 + $0x2b8] sm:$0xf0]  ;;  %v6979_v47 = vld [vmem:[#allocation5 + $0x3ac] sm:$0xf]  ;;  %v4781_v51 = vor.u32 %v6915_v43, %v4778_v45 }
 0x18e   :  { %3796 = vmatpush.bf16.msrb.mxu1 %v6281_v0  ;;  %v4810_v0 = vld [vmem:[#allocation5 + $0x1f8] sm:$0xf0]  ;;  %v6911_v48 = vld [vmem:[#allocation5 + $0x18c] sm:$0xf] }
 0x18f   :  { %3809 = vmatpush.bf16.msrb.mxu2 %v6409_v1  ;;  %v6955_v1 = vld [vmem:[#allocation5 + $0x2ec] sm:$0xf]  ;;  %v4813_v11 = vor.u32 %v6923_v60, %v4810_v0  ;;  %v4762_v56 = vld [vmem:[#allocation5 + $0x198] sm:$0xf0] }
 0x190   :  { %3822 = vmatpush.bf16.msrb.mxu3 %v6537_v4  ;;  %v6987_v4 = vld [vmem:[#allocation5 + $0x3ec] sm:$0xf]  ;;  %v4941_v12 = vor.u32 %v6955_v1, %v4938_v6  ;;  %v4890_v58 = vld [vmem:[#allocation5 + $0x298] sm:$0xf0]  ;;  %v4765_v6 = vor.u32 %v6911_v48, %v4762_v56 }
 0x191   :  { %3784 = vmatpush.bf16.msrb.mxu0 %v6137_v24  ;;  %v5069_v21 = vor.u32 %v6987_v4, %v5066_v5  ;;  %v4794_v24 = vld [vmem:[#allocation5 + $0x1d8] sm:$0xf0]  ;;  %v6943_v57 = vld [vmem:[#allocation5 + $0x28c] sm:$0xf] }
 0x192   :  { %3797 = vmatpush.bf16.msrb.mxu1 %v6265_v30  ;;  %v4922_v30 = vld [vmem:[#allocation5 + $0x2d8] sm:$0xf0]  ;;  %v4797_v36 = vor.u32 %v6919_v17, %v4794_v24  ;;  %v6975_v60 = vld [vmem:[#allocation5 + $0x38c] sm:$0xf] }
 0x193   :  { %3810 = vmatpush.bf16.msrb.mxu2 %v6393_v32  ;;  %v6983_v32 = vld [vmem:[#allocation5 + $0x3cc] sm:$0xf]  ;;  %v5018_v61 = vld [vmem:[#allocation5 + $0x398] sm:$0xf0] }
 0x194   :  { %3823 = vmatpush.bf16.msrb.mxu3 %v6521_v39  ;;  %v4925_v39 = vor.u32 %v6951_v28, %v4922_v30  ;;  %v5053_v44 = vor.u32 %v6983_v32, %v5050_v33  ;;  %v4618_v4 = vld [vmem:[#allocation5 + $0x78] sm:$0xf0]  ;;  %v6907_v5 = vld [vmem:[#allocation5 + $0x16c] sm:$0xf] }
 0x195   :  { %3785 = vmatpush.bf16.msrb.mxu0 %v6121_v62  ;;  %v6947_v62 = vld [vmem:[#allocation5 + $0x2ac] sm:$0xf]  ;;  %v4874_v14 = vld [vmem:[#allocation5 + $0x278] sm:$0xf0] }
 0x196   :  { %3798 = vmatpush.bf16.msrb.mxu1 %v6249_v49  ;;  %v5034_v49 = vld [vmem:[#allocation5 + $0x3b8] sm:$0xf0]  ;;  %v4909_v54 = vor.u32 %v6947_v62, %v4906_v46  ;;  %v6971_v16 = vld [vmem:[#allocation5 + $0x36c] sm:$0xf] }
 0x197   :  { %3811 = vmatpush.bf16.msrb.mxu2 %v6377_v50  ;;  %v4653_v50 = vor.u32 %v6883_v41, %v4650_v42  ;;  %v5037_v55 = vor.u32 %v6979_v47, %v5034_v49  ;;  %v5002_v17 = vld [vmem:[#allocation5 + $0x378] sm:$0xf0]  ;;  %v6871_v28 = vld [vmem:[#allocation5 + $0x4c] sm:$0xf] }
 0x198   :  { %3824 = vmatpush.bf16.msrb.mxu3 %v6505_v53  ;;  %v4634_v53 = vld [vmem:[#allocation5 + $0x98] sm:$0xf0]  ;;  %v6903_v32 = vld [vmem:[#allocation5 + $0x14c] sm:$0xf]  ;;  %v5005_v33 = vor.u32 %v6971_v16, %v5002_v17 }
 0x199   :  { %3786 = vmatpush.bf16.msrb.mxu0 %v6105_v63  ;;  %v3580_v59 = vpop.f32.mrf.mxu0  ;;  %v4637_v0 = vor.u32 %v6879_v52, %v4634_v53  ;;  %v4602_v30 = vld [vmem:[#allocation5 + $0x58] sm:$0xf0]  ;;  %v6899_v53 = vld [vmem:[#allocation5 + $0x12c] sm:$0xf] }
 0x19a   :  { %3799 = vmatpush.bf16.msrb.mxu1 %v6233_v2  ;;  %v3581_v63 = vadd.f32 %v3580_v59, %v7751_v29  ;;  %v3593_v1 = vpop.f32.mrf.mxu1  ;;  %v4893_v2 = vor.u32 %v6943_v57, %v4890_v58  ;;  %v4858_v41 = vld [vmem:[#allocation5 + $0x258] sm:$0xf0]  ;;  %v4605_v46 = vor.u32 %v6871_v28, %v4602_v30  ;;  %v6931_v56 = vld [vmem:[#allocation5 + $0x22c] sm:$0xf] }
 0x19b   :  { %3812 = vmatpush.bf16.msrb.mxu2 %v6361_v3  ;;  %v6875_v3 = vld [vmem:[#allocation5 + $0x6c] sm:$0xf]  ;;  %v4986_v45 = vld [vmem:[#allocation5 + $0x358] sm:$0xf0] }
 0x19c   :  { %3825 = vmatpush.bf16.msrb.mxu3 %v6489_v7  ;;  %3787 = vmatmul.bf16.vlgmr.msrb.gmra.mxu0 %v7694_v13  ;;  %v5021_v7 = vor.u32 %v6975_v60, %v5018_v61  ;;  %v4586_v52 = vld [vmem:[#allocation5 + $0x38] sm:$0xf0]  ;;  %v6963_v58 = vld [vmem:[#allocation5 + $0x32c] sm:$0xf] }
 0x19d   :  { %3831 = vmatpush.bf16.msra.mxu0 %v4685_v10  ;;  %3800 = vmatmul.bf16.vlgmr.msrb.gmra.mxu1 %v7698_v20  ;;  %v3594_v10 = vadd.f32 %v3593_v1, %v3581_v63  ;;  %v4842_v57 = vld [vmem:[#allocation5 + $0x238] sm:$0xf0]  ;;  %v6863_v61 = vld [vmem:[#allocation5 + $0xc] sm:$0xf] }
 0x19e   :  { %3844 = vmatpush.bf16.msra.mxu1 %v4813_v11  ;;  %3813 = vmatmul.bf16.vlgmr.msrb.gmra.mxu2 %v7696_v19  ;;  %v4746_v11 = vld [vmem:[#allocation5 + $0x178] sm:$0xf0]  ;;  %v4845_v1 = vor.u32 %v6931_v56, %v4842_v57  ;;  %v7051_v16 = vld [vmem:[#allocation5 + $0x5ec] sm:$0xf] }
 0x19f   :  { %3857 = vmatpush.bf16.msra.mxu2 %v4941_v12  ;;  %3826 = vmatmul.bf16.vlgmr.msrb.gmra.mxu3 %v7700_v26  ;;  %v6939_v12 = vld [vmem:[#allocation5 + $0x26c] sm:$0xf]  ;;  %v4749_v29 = vor.u32 %v6907_v5, %v4746_v11  ;;  %v4970_v59 = vld [vmem:[#allocation5 + $0x338] sm:$0xf0] }
 0x1a0   :  { %3870 = vmatpush.bf16.msra.mxu3 %v5069_v21  ;;  %v4621_v21 = vor.u32 %v6875_v3, %v4618_v4  ;;  %v4877_v24 = vor.u32 %v6939_v12, %v4874_v14  ;;  %v4570_v63 = vld [vmem:[#allocation5 + $0x18] sm:$0xf0]  ;;  %v6927_v3 = vld [vmem:[#allocation5 + $0x20c] sm:$0xf]  ;;  %v4973_v4 = vor.u32 %v6963_v58, %v4970_v59 }
 0x1a1   :  { %3832 = vmatpush.bf16.msra.mxu0 %v4669_v35  ;;  %v3606_v35 = vpop.f32.mrf.mxu2  ;;  %v3582_v62 = vpop.f32.mrf.mxu0  ;;  %v4826_v5 = vld [vmem:[#allocation5 + $0x218] sm:$0xf0]  ;;  %v7019_v12 = vld [vmem:[#allocation5 + $0x4ec] sm:$0xf] }
 0x1a2   :  { %3845 = vmatpush.bf16.msra.mxu1 %v4797_v36  ;;  %v4730_v36 = vld [vmem:[#allocation5 + $0x158] sm:$0xf0]  ;;  %v3607_v42 = vadd.f32 %v3606_v35, %v3594_v10  ;;  %v3619_v43 = vpop.f32.mrf.mxu3  ;;  %v3595_v47 = vpop.f32.mrf.mxu1  ;;  %v7043_v57 = vld [vmem:[#allocation5 + $0x5ac] sm:$0xf] }
 0x1a3   :  { %3858 = vmatpush.bf16.msra.mxu2 %v4925_v39  ;;  %v6935_v39 = vld [vmem:[#allocation5 + $0x24c] sm:$0xf]  ;;  %v4954_v10 = vld [vmem:[#allocation5 + $0x318] sm:$0xf0] }
 0x1a4   :  { %3871 = vmatpush.bf16.msra.mxu3 %v5053_v44  ;;  %v6967_v44 = vld [vmem:[#allocation5 + $0x34c] sm:$0xf]  ;;  %v7758_v49 = vadd.f32 %v3619_v43, %v3607_v42  ;;  %v5194_v14 = vld [vmem:[#allocation5 + $0x4f8] sm:$0xf0] }
 0x1a5   :  { %3833 = vmatpush.bf16.msra.mxu0 %v4653_v50  ;;  %v4733_v50 = vor.u32 %v6903_v32, %v4730_v36  ;;  %v4989_v48 = vor.u32 %v6967_v44, %v4986_v45  ;;  %v5450_v28 = vld [vmem:[#allocation5 + $0x6f8] sm:$0xf0]  ;;  %v4829_v32 = vor.u32 %v6927_v3, %v4826_v5  ;;  %v7015_v43 = vld [vmem:[#allocation5 + $0x4cc] sm:$0xf] }
 0x1a6   :  { %3846 = vmatpush.bf16.msra.mxu1 %v4781_v51  ;;  %v4861_v51 = vor.u32 %v6935_v39, %v4858_v41  ;;  %v5578_v35 = vld [vmem:[#allocation5 + $0x7f8] sm:$0xf0]  ;;  %v5197_v39 = vor.u32 %v7019_v12, %v5194_v14  ;;  %v7047_v45 = vld [vmem:[#allocation5 + $0x5cc] sm:$0xf] }
 0x1a7   :  { %3859 = vmatpush.bf16.msra.mxu2 %v4909_v54  ;;  %v6867_v54 = vld [vmem:[#allocation5 + $0x2c] sm:$0xf]  ;;  %v5178_v44 = vld [vmem:[#allocation5 + $0x4d8] sm:$0xf0] }
 0x1a8   :  { %3872 = vmatpush.bf16.msra.mxu3 %v5037_v55  ;;  %v4714_v55 = vld [vmem:[#allocation5 + $0x138] sm:$0xf0]  ;;  %v4589_v60 = vor.u32 %v6867_v54, %v4586_v52  ;;  %v7079_v47 = vld [vmem:[#allocation5 + $0x6cc] sm:$0xf]  ;;  %v5181_v52 = vor.u32 %v7015_v43, %v5178_v44 }
 0x1a9   :  { %3834 = vmatpush.bf16.msra.mxu0 %v4637_v0  ;;  %v4717_v0 = vor.u32 %v6899_v53, %v4714_v55  ;;  %v3608_v11 = vpop.f32.mrf.mxu2  ;;  %v5562_v54 = vld [vmem:[#allocation5 + $0x7d8] sm:$0xf0]  ;;  %v7011_v55 = vld [vmem:[#allocation5 + $0x4ac] sm:$0xf] }
 0x1aa   :  { %3847 = vmatpush.bf16.msra.mxu1 %v4765_v6  ;;  %v6895_v6 = vld [vmem:[#allocation5 + $0x10c] sm:$0xf]  ;;  %v3621_v17 = vpop.f32.mrf.mxu3  ;;  %v5162_v56 = vld [vmem:[#allocation5 + $0x4b8] sm:$0xf0] }
 0x1ab   :  { %3860 = vmatpush.bf16.msra.mxu2 %v4893_v2  ;;  %v4698_v2 = vld [vmem:[#allocation5 + $0x118] sm:$0xf0]  ;;  %v7039_v5 = vld [vmem:[#allocation5 + $0x58c] sm:$0xf] }
 0x1ac   :  { %3873 = vmatpush.bf16.msra.mxu3 %v5021_v7  ;;  %v6959_v7 = vld [vmem:[#allocation5 + $0x30c] sm:$0xf]  ;;  %v4701_v30 = vor.u32 %v6895_v6, %v4698_v2  ;;  %v5290_v59 = vld [vmem:[#allocation5 + $0x5b8] sm:$0xf0] }
 0x1ad   :  { %3835 = vmatpush.bf16.msra.mxu0 %v4621_v21  ;;  %v4573_v21 = vor.u32 %v6863_v61, %v4570_v63  ;;  %v4957_v36 = vor.u32 %v6959_v7, %v4954_v10  ;;  %v5418_v61 = vld [vmem:[#allocation5 + $0x6b8] sm:$0xf0]  ;;  %v7107_v63 = vld [vmem:[#allocation5 + $0x7ac] sm:$0xf]  ;;  %v5293_v2 = vor.u32 %v7043_v57, %v5290_v59  ;;  %v7449_v7 = vld [vmem:[#allocation7] sm:$0xf] }
 0x1ae   :  { %3848 = vmatpush.bf16.msra.mxu1 %v4749_v29  ;;  %v5322_v29 = vld [vmem:[#allocation5 + $0x5f8] sm:$0xf0]  ;;  %v7007_v6 = vld [vmem:[#allocation5 + $0x48c] sm:$0xf]  ;;  %v641_v10 = vperm.slane %v7449_v7, 2 }
 0x1af   :  { %3861 = vmatpush.bf16.msra.mxu2 %v4877_v24  ;;  %v7083_v24 = vld [vmem:[#allocation5 + $0x6ec] sm:$0xf]  ;;  %v5325_v41 = vor.u32 %v7051_v16, %v5322_v29  ;;  %v5274_v11 = vld [vmem:[#allocation5 + $0x598] sm:$0xf0] }
 0x1b0   :  { %3874 = vmatpush.bf16.msra.mxu3 %v5005_v33  ;;  %v7115_v33 = vld [vmem:[#allocation5 + $0x7ec] sm:$0xf]  ;;  %v5453_v42 = vor.u32 %v7083_v24, %v5450_v28  ;;  %v5130_v24 = vld [vmem:[#allocation5 + $0x478] sm:$0xf0] }
 0x1b1   :  { %3836 = vmatpush.bf16.msra.mxu0 %v4605_v46  ;;  %v5581_v62 = vor.u32 %v7115_v33, %v5578_v35  ;;  %v5306_v46 = vld [vmem:[#allocation5 + $0x5d8] sm:$0xf0]  ;;  %v7071_v12 = vld [vmem:[#allocation5 + $0x68c] sm:$0xf] }
 0x1b2   :  { %3849 = vmatpush.bf16.msra.mxu1 %v4733_v50  ;;  %v5434_v50 = vld [vmem:[#allocation5 + $0x6d8] sm:$0xf0]  ;;  %v5309_v53 = vor.u32 %v7047_v45, %v5306_v46  ;;  %v7103_v14 = vld [vmem:[#allocation5 + $0x78c] sm:$0xf] }
 0x1b3   :  { %3862 = vmatpush.bf16.msra.mxu2 %v4861_v51  ;;  %v7111_v51 = vld [vmem:[#allocation5 + $0x7cc] sm:$0xf]  ;;  %v5258_v35 = vld [vmem:[#allocation5 + $0x578] sm:$0xf0] }
 0x1b4   :  { %3875 = vmatpush.bf16.msra.mxu3 %v4989_v48  ;;  %v5437_v48 = vor.u32 %v7079_v47, %v5434_v50  ;;  %v5565_v58 = vor.u32 %v7111_v51, %v5562_v54  ;;  %v7003_v29 = vld [vmem:[#allocation5 + $0x46c] sm:$0xf]  ;;  %v5114_v47 = vld [vmem:[#allocation5 + $0x458] sm:$0xf0] }
 0x1b5   :  { %3837 = vmatpush.bf16.msra.mxu0 %v4589_v60  ;;  %v7075_v60 = vld [vmem:[#allocation5 + $0x6ac] sm:$0xf]  ;;  %v5133_v44 = vor.u32 %v7003_v29, %v5130_v24 }
 0x1b6   :  { %3850 = vmatpush.bf16.msra.mxu1 %v4717_v0  ;;  %v5546_v0 = vld [vmem:[#allocation5 + $0x7b8] sm:$0xf0]  ;;  %v5421_v3 = vor.u32 %v7075_v60, %v5418_v61  ;;  %v7035_v28 = vld [vmem:[#allocation5 + $0x56c] sm:$0xf] }
 0x1b7   :  { %3863 = vmatpush.bf16.msra.mxu2 %v4845_v1  ;;  %v5165_v1 = vor.u32 %v7011_v55, %v5162_v56  ;;  %v5261_v45 = vor.u32 %v7035_v28, %v5258_v35  ;;  %v6999_v46 = vld [vmem:[#allocation5 + $0x44c] sm:$0xf]  ;;  %v5338_v28 = vld [vmem:[#allocation5 + $0x618] sm:$0xf0] }
 0x1b8   :  { %3876 = vmatpush.bf16.msra.mxu3 %v4973_v4  ;;  %v5146_v4 = vld [vmem:[#allocation5 + $0x498] sm:$0xf0]  ;;  %v7031_v50 = vld [vmem:[#allocation5 + $0x54c] sm:$0xf]  ;;  %v5117_v59 = vor.u32 %v6999_v46, %v5114_v47 }
 0x1b9   :  { %3838 = vmatpush.bf16.msra.mxu0 %v4573_v21  ;;  %v5149_v16 = vor.u32 %v7007_v6, %v5146_v4  ;;  %v3632_v17 = vpop.f32.mrf.mxu0  ;;  %v7095_v57 = vld [vmem:[#allocation5 + $0x74c] sm:$0xf]  ;;  %v5098_v6 = vld [vmem:[#allocation5 + $0x438] sm:$0xf0] }
 0x1ba   :  { %3851 = vmatpush.bf16.msra.mxu1 %v4701_v30  ;;  %v3633_v30 = vadd.f32 %v3632_v17, %v641_v10  ;;  %v7059_v7 = vld [vmem:[#allocation5 + $0x62c] sm:$0xf]  ;;  %v5354_v10 = vld [vmem:[#allocation5 + $0x638] sm:$0xf0] }
 0x1bb   :  { %3864 = vmatpush.bf16.msra.mxu2 %v4829_v32  ;;  %v3645_v32 = vpop.f32.mrf.mxu1  ;;  %v7023_v17 = vld [vmem:[#allocation5 + $0x50c] sm:$0xf]  ;;  %v6090_v47 = vld [vmem:[#allocation5 + $0xbf8] sm:$0xf0] }
 0x1bc   :  { %3877 = vmatpush.bf16.msra.mxu3 %v4957_v36  ;;  %3839 = vmatmul.bf16.vlgmr.msra.gmra.mxu0 %v7660_v9  ;;  %v5402_v9 = vld [vmem:[#allocation5 + $0x698] sm:$0xf0]  ;;  %v7067_v36 = vld [vmem:[#allocation5 + $0x66c] sm:$0xf]  ;;  %v3646_v43 = vadd.f32 %v3645_v32, %v3633_v30 }
 0x1bd   :  { %3883 = vmatpush.bf16.msrb.mxu0 %v5197_v39  ;;  %3852 = vmatmul.bf16.vlgmr.msra.gmra.mxu1 %v7667_v25  ;;  %v5277_v25 = vor.u32 %v7039_v5, %v5274_v11  ;;  %v5405_v21 = vor.u32 %v7071_v12, %v5402_v9  ;;  %v5386_v39 = vld [vmem:[#allocation5 + $0x678] sm:$0xf0]  ;;  %v6991_v9 = vld [vmem:[#allocation5 + $0x40c] sm:$0xf] }
 0x1be   :  { %3896 = vmatpush.bf16.msrb.mxu1 %v5325_v41  ;;  %3865 = vmatmul.bf16.vlgmr.msra.gmra.mxu2 %v7658_v8  ;;  %v5549_v8 = vor.u32 %v7107_v63, %v5546_v0  ;;  %v7099_v41 = vld [vmem:[#allocation5 + $0x76c] sm:$0xf]  ;;  %v5226_v5 = vld [vmem:[#allocation5 + $0x538] sm:$0xf0] }
 0x1bf   :  { %3909 = vmatpush.bf16.msrb.mxu2 %v5453_v42  ;;  %3878 = vmatmul.bf16.vlgmr.msra.gmra.mxu3 %v7662_v15  ;;  %v5530_v15 = vld [vmem:[#allocation5 + $0x798] sm:$0xf0]  ;;  %v7087_v30 = vld [vmem:[#allocation5 + $0x70c] sm:$0xf] }
 0x1c0   :  { %3922 = vmatpush.bf16.msrb.mxu3 %v5581_v62  ;;  %v5533_v33 = vor.u32 %v7103_v14, %v5530_v15  ;;  %v5514_v42 = vld [vmem:[#allocation5 + $0x778] sm:$0xf0]  ;;  %v5389_v62 = vor.u32 %v7067_v36, %v5386_v39  ;;  %v7147_v35 = vld [vmem:[#allocation5 + $0x8ec] sm:$0xf] }
 0x1c1   :  { %3884 = vmatpush.bf16.msrb.mxu0 %v5181_v52  ;;  %v3658_v51 = vpop.f32.mrf.mxu2  ;;  %v5517_v54 = vor.u32 %v7099_v41, %v5514_v42  ;;  %v5242_v52 = vld [vmem:[#allocation5 + $0x558] sm:$0xf0]  ;;  %v3634_v61 = vpop.f32.mrf.mxu0  ;;  %v7179_v39 = vld [vmem:[#allocation5 + $0x9ec] sm:$0xf] }
 0x1c2   :  { %3897 = vmatpush.bf16.msrb.mxu1 %v5309_v53  ;;  %v7063_v53 = vld [vmem:[#allocation5 + $0x64c] sm:$0xf]  ;;  %v3659_v55 = vadd.f32 %v3658_v51, %v3646_v43  ;;  %v3671_v56 = vpop.f32.mrf.mxu3  ;;  %v5245_v63 = vor.u32 %v7031_v50, %v5242_v52  ;;  %v5482_v11 = vld [vmem:[#allocation5 + $0x738] sm:$0xf0] }
 0x1c3   :  { %3910 = vmatpush.bf16.msrb.mxu2 %v5437_v48  ;;  %v5370_v48 = vld [vmem:[#allocation5 + $0x658] sm:$0xf0]  ;;  %v7211_v43 = vld [vmem:[#allocation5 + $0xaec] sm:$0xf] }
 0x1c4   :  { %3923 = vmatpush.bf16.msrb.mxu3 %v5565_v58  ;;  %v5498_v58 = vld [vmem:[#allocation5 + $0x758] sm:$0xf0]  ;;  %v7764_v60 = vadd.f32 %v3671_v56, %v3659_v55  ;;  %v5373_v0 = vor.u32 %v7063_v53, %v5370_v48  ;;  %v7243_v46 = vld [vmem:[#allocation5 + $0xbec] sm:$0xf] }
 0x1c5   :  { %3885 = vmatpush.bf16.msrb.mxu0 %v5165_v1  ;;  %v6995_v1 = vld [vmem:[#allocation5 + $0x42c] sm:$0xf]  ;;  %v5501_v4 = vor.u32 %v7095_v57, %v5498_v58  ;;  %v5082_v14 = vld [vmem:[#allocation5 + $0x418] sm:$0xf0]  ;;  %v6093_v56 = vor.u32 %v7243_v46, %v6090_v47 }
 0x1c6   :  { %3898 = vmatpush.bf16.msrb.mxu1 %v5293_v2  ;;  %v7027_v2 = vld [vmem:[#allocation5 + $0x52c] sm:$0xf]  ;;  %v5101_v12 = vor.u32 %v6995_v1, %v5098_v6  ;;  %v5466_v32 = vld [vmem:[#allocation5 + $0x718] sm:$0xf0]  ;;  %v5085_v41 = vor.u32 %v6991_v9, %v5082_v14 }
 0x1c7   :  { %3911 = vmatpush.bf16.msrb.mxu2 %v5421_v3  ;;  %v3647_v3 = vpop.f32.mrf.mxu1  ;;  %v5229_v15 = vor.u32 %v7027_v2, %v5226_v5  ;;  %v5706_v36 = vld [vmem:[#allocation5 + $0x8f8] sm:$0xf0]  ;;  %v5469_v50 = vor.u32 %v7087_v30, %v5466_v32  ;;  %v7143_v53 = vld [vmem:[#allocation5 + $0x8cc] sm:$0xf] }
 0x1c8   :  { %3924 = vmatpush.bf16.msrb.mxu3 %v5549_v8  ;;  %v7091_v8 = vld [vmem:[#allocation5 + $0x72c] sm:$0xf]  ;;  %v5834_v42 = vld [vmem:[#allocation5 + $0x9f8] sm:$0xf0]  ;;  %v5709_v51 = vor.u32 %v7147_v35, %v5706_v36 }
 0x1c9   :  { %3886 = vmatpush.bf16.msrb.mxu0 %v5149_v16  ;;  %v5357_v16 = vor.u32 %v7059_v7, %v5354_v10  ;;  %v3660_v29 = vpop.f32.mrf.mxu2  ;;  %v5485_v24 = vor.u32 %v7091_v8, %v5482_v11  ;;  %v5690_v48 = vld [vmem:[#allocation5 + $0x8d8] sm:$0xf0]  ;;  %v7175_v55 = vld [vmem:[#allocation5 + $0x9cc] sm:$0xf] }
 0x1ca   :  { %3899 = vmatpush.bf16.msrb.mxu1 %v5277_v25  ;;  %v5210_v25 = vld [vmem:[#allocation5 + $0x518] sm:$0xf0]  ;;  %v7207_v58 = vld [vmem:[#allocation5 + $0xacc] sm:$0xf] }
 0x1cb   :  { %3912 = vmatpush.bf16.msrb.mxu2 %v5405_v21  ;;  %v7055_v21 = vld [vmem:[#allocation5 + $0x60c] sm:$0xf]  ;;  %v5818_v57 = vld [vmem:[#allocation5 + $0x9d8] sm:$0xf0] }
 0x1cc   :  { %3925 = vmatpush.bf16.msrb.mxu3 %v5533_v33  ;;  %v3673_v33 = vpop.f32.mrf.mxu3  ;;  %v7239_v61 = vld [vmem:[#allocation5 + $0xbcc] sm:$0xf]  ;;  %v5821_v1 = vor.u32 %v7175_v55, %v5818_v57  ;;  %v5674_v3 = vld [vmem:[#allocation5 + $0x8b8] sm:$0xf0] }
 0x1cd   :  { %3887 = vmatpush.bf16.msrb.mxu0 %v5133_v44  ;;  %v5962_v44 = vld [vmem:[#allocation5 + $0xaf8] sm:$0xf0]  ;;  %v7139_v2 = vld [vmem:[#allocation5 + $0x8ac] sm:$0xf] }
 0x1ce   :  { %3900 = vmatpush.bf16.msrb.mxu1 %v5261_v45  ;;  %v5213_v45 = vor.u32 %v7023_v17, %v5210_v25  ;;  %v5965_v52 = vor.u32 %v7211_v43, %v5962_v44  ;;  %v5802_v7 = vld [vmem:[#allocation5 + $0x9b8] sm:$0xf0]  ;;  %v7203_v10 = vld [vmem:[#allocation5 + $0xaac] sm:$0xf]  ;;  %v5677_v9 = vor.u32 %v7139_v2, %v5674_v3 }
 0x1cf   :  { %3913 = vmatpush.bf16.msrb.mxu2 %v5389_v62  ;;  %v5341_v62 = vor.u32 %v7055_v21, %v5338_v28  ;;  %v5930_v8 = vld [vmem:[#allocation5 + $0xab8] sm:$0xf0]  ;;  %v7235_v11 = vld [vmem:[#allocation5 + $0xbac] sm:$0xf] }
 0x1d0   :  { %3926 = vmatpush.bf16.msrb.mxu3 %v5517_v54  ;;  %v5837_v54 = vor.u32 %v7179_v39, %v5834_v42  ;;  %v5658_v17 = vld [vmem:[#allocation5 + $0x898] sm:$0xf0]  ;;  %v7199_v29 = vld [vmem:[#allocation5 + $0xa8c] sm:$0xf] }
 0x1d1   :  { %3888 = vmatpush.bf16.msrb.mxu0 %v5117_v59  ;;  %v5946_v59 = vld [vmem:[#allocation5 + $0xad8] sm:$0xf0]  ;;  %v7231_v28 = vld [vmem:[#allocation5 + $0xb8c] sm:$0xf] }
 0x1d2   :  { %3901 = vmatpush.bf16.msrb.mxu1 %v5245_v63  ;;  %v6074_v63 = vld [vmem:[#allocation5 + $0xbd8] sm:$0xf0]  ;;  %v5949_v6 = vor.u32 %v7207_v58, %v5946_v59  ;;  %v7131_v33 = vld [vmem:[#allocation5 + $0x86c] sm:$0xf] }
 0x1d3   :  { %3914 = vmatpush.bf16.msrb.mxu2 %v5373_v0  ;;  %v5693_v0 = vor.u32 %v7143_v53, %v5690_v48  ;;  %v6077_v5 = vor.u32 %v7239_v61, %v6074_v63  ;;  %v5786_v21 = vld [vmem:[#allocation5 + $0x998] sm:$0xf0]  ;;  %v7163_v36 = vld [vmem:[#allocation5 + $0x96c] sm:$0xf] }
 0x1d4   :  { %3927 = vmatpush.bf16.msrb.mxu3 %v5501_v4  ;;  %v7171_v4 = vld [vmem:[#allocation5 + $0x9ac] sm:$0xf]  ;;  %v5642_v35 = vld [vmem:[#allocation5 + $0x878] sm:$0xf0] }
 0x1d5   :  { %3889 = vmatpush.bf16.msrb.mxu0 %v5101_v12  ;;  %v6058_v12 = vld [vmem:[#allocation5 + $0xbb8] sm:$0xf0]  ;;  %v5805_v14 = vor.u32 %v7171_v4, %v5802_v7  ;;  %v7195_v43 = vld [vmem:[#allocation5 + $0xa6c] sm:$0xf]  ;;  %v5645_v46 = vor.u32 %v7131_v33, %v5642_v35 }
 0x1d6   :  { %3902 = vmatpush.bf16.msrb.mxu1 %v5229_v15  ;;  %v5933_v15 = vor.u32 %v7203_v10, %v5930_v8  ;;  %v6061_v25 = vor.u32 %v7235_v11, %v6058_v12  ;;  %v5770_v42 = vld [vmem:[#allocation5 + $0x978] sm:$0xf0]  ;;  %v7223_v59 = vld [vmem:[#allocation5 + $0xb4c] sm:$0xf] }
 0x1d7   :  { %3915 = vmatpush.bf16.msrb.mxu2 %v5357_v16  ;;  %v7135_v16 = vld [vmem:[#allocation5 + $0x88c] sm:$0xf]  ;;  %v5898_v44 = vld [vmem:[#allocation5 + $0xa78] sm:$0xf0]  ;;  %v5773_v47 = vor.u32 %v7163_v36, %v5770_v42 }
 0x1d8   :  { %3928 = vmatpush.bf16.msrb.mxu3 %v5485_v24  ;;  %v5914_v24 = vld [vmem:[#allocation5 + $0xa98] sm:$0xf0]  ;;  %v7123_v2 = vld [vmem:[#allocation5 + $0x82c] sm:$0xf] }
 0x1d9   :  { %3890 = vmatpush.bf16.msrb.mxu0 %v5085_v41  ;;  %v7770_v30 = vpop.f32.mrf.mxu0  ;;  %v5917_v32 = vor.u32 %v7199_v29, %v5914_v24  ;;  %v5754_v55 = vld [vmem:[#allocation5 + $0x958] sm:$0xf0]  ;;  %v7155_v4 = vld [vmem:[#allocation5 + $0x92c] sm:$0xf] }
 0x1da   :  { %3903 = vmatpush.bf16.msrb.mxu1 %v5213_v45  ;;  %v7772_v39 = vpop.f32.mrf.mxu1  ;;  %v7227_v45 = vld [vmem:[#allocation5 + $0xb6c] sm:$0xf]  ;;  %v5882_v57 = vld [vmem:[#allocation5 + $0xa58] sm:$0xf0] }
 0x1db   :  { %3916 = vmatpush.bf16.msrb.mxu2 %v5341_v62  ;;  %v6026_v62 = vld [vmem:[#allocation5 + $0xb78] sm:$0xf0]  ;;  %v7187_v8 = vld [vmem:[#allocation5 + $0xa2c] sm:$0xf] }
 0x1dc   :  { %3929 = vmatpush.bf16.msrb.mxu3 %v5469_v50  ;;  %3891 = vmatmul.bf16.vlgmr.msrb.gmra.mxu0 %v7672_v37  ;;  %v6042_v37 = vld [vmem:[#allocation5 + $0xb98] sm:$0xf0]  ;;  %v5901_v50 = vor.u32 %v7195_v43, %v5898_v44  ;;  %v6029_v48 = vor.u32 %v7227_v45, %v6026_v62  ;;  %v7219_v12 = vld [vmem:[#allocation5 + $0xb2c] sm:$0xf] }
 0x1dd   :  { %3935 = vmatpush.bf16.msra.mxu0 %v5709_v51  ;;  %3904 = vmatmul.bf16.vlgmr.msrb.gmra.mxu1 %v7676_v40  ;;  %v6045_v41 = vor.u32 %v7231_v28, %v6042_v37  ;;  %v7127_v51 = vld [vmem:[#allocation5 + $0x84c] sm:$0xf]  ;;  %v6010_v61 = vld [vmem:[#allocation5 + $0xb58] sm:$0xf0] }
 0x1de   :  { %3948 = vmatpush.bf16.msra.mxu1 %v5837_v54  ;;  %3917 = vmatmul.bf16.vlgmr.msrb.gmra.mxu2 %v7670_v34  ;;  %v7167_v34 = vld [vmem:[#allocation5 + $0x98c] sm:$0xf]  ;;  %v5626_v54 = vld [vmem:[#allocation5 + $0x858] sm:$0xf0]  ;;  %v6013_v7 = vor.u32 %v7223_v59, %v6010_v61 }
 0x1df   :  { %3961 = vmatpush.bf16.msra.mxu2 %v5965_v52  ;;  %3930 = vmatmul.bf16.vlgmr.msrb.gmra.mxu3 %v7674_v38  ;;  %v5661_v38 = vor.u32 %v7135_v16, %v5658_v17  ;;  %v5789_v40 = vor.u32 %v7167_v34, %v5786_v21  ;;  %v7159_v52 = vld [vmem:[#allocation5 + $0x94c] sm:$0xf]  ;;  %v5629_v63 = vor.u32 %v7127_v51, %v5626_v54  ;;  %v5610_v3 = vld [vmem:[#allocation5 + $0x838] sm:$0xf0] }
 0x1e0   :  { %3974 = vmatpush.bf16.msra.mxu3 %v6093_v56  ;;  %v7191_v56 = vld [vmem:[#allocation5 + $0xa4c] sm:$0xf]  ;;  %v5738_v10 = vld [vmem:[#allocation5 + $0x938] sm:$0xf0] }
 0x1e1   :  { %3936 = vmatpush.bf16.msra.mxu0 %v5693_v0  ;;  %v7774_v53 = vpop.f32.mrf.mxu2  ;;  %v3686_v0 = vpop.f32.mrf.mxu0  ;;  %v5866_v11 = vld [vmem:[#allocation5 + $0xa38] sm:$0xf0]  ;;  %v5741_v17 = vor.u32 %v7155_v4, %v5738_v10  ;;  %v7183_v29 = vld [vmem:[#allocation5 + $0xa0c] sm:$0xf] }
 0x1e2   :  { %3949 = vmatpush.bf16.msra.mxu1 %v5821_v1  ;;  %v7776_v58 = vpop.f32.mrf.mxu3  ;;  %v5757_v1 = vor.u32 %v7159_v52, %v5754_v55  ;;  %v5594_v16 = vld [vmem:[#allocation5 + $0x818] sm:$0xf0]  ;;  %v5869_v34 = vor.u32 %v7187_v8, %v5866_v11  ;;  %v7275_v33 = vld [vmem:[#allocation5 + $0xcec] sm:$0xf] }
 0x1e3   :  { %3962 = vmatpush.bf16.msra.mxu2 %v5949_v6  ;;  %v5885_v6 = vor.u32 %v7191_v56, %v5882_v57  ;;  %v5722_v21 = vld [vmem:[#allocation5 + $0x918] sm:$0xf0]  ;;  %v7307_v36 = vld [vmem:[#allocation5 + $0xdec] sm:$0xf] }
 0x1e4   :  { %3975 = vmatpush.bf16.msra.mxu3 %v6077_v5  ;;  %v3699_v5 = vpop.f32.mrf.mxu1  ;;  %v5850_v37 = vld [vmem:[#allocation5 + $0xa18] sm:$0xf0]  ;;  %v7339_v43 = vld [vmem:[#allocation5 + $0xeec] sm:$0xf] }
 0x1e5   :  { %3937 = vmatpush.bf16.msra.mxu0 %v5677_v9  ;;  %v5994_v9 = vld [vmem:[#allocation5 + $0xb38] sm:$0xf0]  ;;  %v5853_v62 = vor.u32 %v7183_v29, %v5850_v37  ;;  %v7303_v56 = vld [vmem:[#allocation5 + $0xdcc] sm:$0xf] }
 0x1e6   :  { %3950 = vmatpush.bf16.msra.mxu1 %v5805_v14  ;;  %v5613_v14 = vor.u32 %v7123_v2, %v5610_v3  ;;  %v5997_v28 = vor.u32 %v7219_v12, %v5994_v9  ;;  %v6218_v35 = vld [vmem:[#allocation5 + $0xcf8] sm:$0xf0]  ;;  %v7335_v61 = vld [vmem:[#allocation5 + $0xecc] sm:$0xf] }
 0x1e7   :  { %3963 = vmatpush.bf16.msra.mxu2 %v5933_v15  ;;  %v7119_v15 = vld [vmem:[#allocation5 + $0x80c] sm:$0xf]  ;;  %v6346_v42 = vld [vmem:[#allocation5 + $0xdf8] sm:$0xf0]  ;;  %v6221_v51 = vor.u32 %v7275_v33, %v6218_v35 }
 0x1e8   :  { %3976 = vmatpush.bf16.msra.mxu3 %v6061_v25  ;;  %v7151_v25 = vld [vmem:[#allocation5 + $0x90c] sm:$0xf]  ;;  %v6474_v44 = vld [vmem:[#allocation5 + $0xef8] sm:$0xf0]  ;;  %v6349_v54 = vor.u32 %v7307_v36, %v6346_v42 }
 0x1e9   :  { %3938 = vmatpush.bf16.msra.mxu0 %v5661_v38  ;;  %v3712_v24 = vpop.f32.mrf.mxu2  ;;  %v7215_v38 = vld [vmem:[#allocation5 + $0xb0c] sm:$0xf]  ;;  %v5725_v45 = vor.u32 %v7151_v25, %v5722_v21  ;;  %v6477_v52 = vor.u32 %v7339_v43, %v6474_v44  ;;  %v6202_v55 = vld [vmem:[#allocation5 + $0xcd8] sm:$0xf0] }
 0x1ea   :  { %3951 = vmatpush.bf16.msra.mxu1 %v5789_v40  ;;  %v5978_v40 = vld [vmem:[#allocation5 + $0xb18] sm:$0xf0]  ;;  %v7367_v0 = vld [vmem:[#allocation5 + $0xfcc] sm:$0xf] }
 0x1eb   :  { %3964 = vmatpush.bf16.msra.mxu2 %v5917_v32  ;;  %v3725_v32 = vpop.f32.mrf.mxu3  ;;  %v6330_v59 = vld [vmem:[#allocation5 + $0xdd8] sm:$0xf0]  ;;  %v7267_v4 = vld [vmem:[#allocation5 + $0xcac] sm:$0xf] }
 0x1ec   :  { %3977 = vmatpush.bf16.msra.mxu3 %v6045_v41  ;;  %v5597_v41 = vor.u32 %v7119_v15, %v5594_v16  ;;  %v6333_v2 = vor.u32 %v7303_v56, %v6330_v59  ;;  %v6186_v5 = vld [vmem:[#allocation5 + $0xcb8] sm:$0xf0]  ;;  %v7331_v11 = vld [vmem:[#allocation5 + $0xeac] sm:$0xf] }
 0x1ed   :  { %3939 = vmatpush.bf16.msra.mxu0 %v5645_v46  ;;  %v7371_v46 = vld [vmem:[#allocation5 + $0xfec] sm:$0xf]  ;;  %v6314_v8 = vld [vmem:[#allocation5 + $0xdb8] sm:$0xf0]  ;;  %v6189_v15 = vor.u32 %v7267_v4, %v6186_v5 }
 0x1ee   :  { %3952 = vmatpush.bf16.msra.mxu1 %v5773_v47  ;;  %v6602_v47 = vld [vmem:[#allocation5 + $0xff8] sm:$0xf0]  ;;  %v7363_v9 = vld [vmem:[#allocation5 + $0xfac] sm:$0xf] }
 0x1ef   :  { %3965 = vmatpush.bf16.msra.mxu2 %v5901_v50  ;;  %v5981_v50 = vor.u32 %v7215_v38, %v5978_v40  ;;  %v6605_v57 = vor.u32 %v7371_v46, %v6602_v47  ;;  %v6442_v12 = vld [vmem:[#allocation5 + $0xeb8] sm:$0xf0]  ;;  %v7295_v25 = vld [vmem:[#allocation5 + $0xd8c] sm:$0xf] }
 0x1f0   :  { %3978 = vmatpush.bf16.msra.mxu3 %v6029_v48  ;;  %v7271_v48 = vld [vmem:[#allocation5 + $0xccc] sm:$0xf]  ;;  %v6298_v29 = vld [vmem:[#allocation5 + $0xd98] sm:$0xf0] }
 0x1f1   :  { %3940 = vmatpush.bf16.msra.mxu0 %v5629_v63  ;;  %v6458_v63 = vld [vmem:[#allocation5 + $0xed8] sm:$0xf0]  ;;  %v7327_v24 = vld [vmem:[#allocation5 + $0xe8c] sm:$0xf]  ;;  %v6301_v40 = vor.u32 %v7295_v25, %v6298_v29 }
 0x1f2   :  { %3953 = vmatpush.bf16.msra.mxu1 %v5757_v1  ;;  %v6586_v1 = vld [vmem:[#allocation5 + $0xfd8] sm:$0xf0]  ;;  %v6461_v3 = vor.u32 %v7335_v61, %v6458_v63  ;;  %v7259_v33 = vld [vmem:[#allocation5 + $0xc6c] sm:$0xf] }
 0x1f3   :  { %3966 = vmatpush.bf16.msra.mxu2 %v5885_v6  ;;  %v6205_v6 = vor.u32 %v7271_v48, %v6202_v55  ;;  %v6589_v10 = vor.u32 %v7367_v0, %v6586_v1  ;;  %v6554_v37 = vld [vmem:[#allocation5 + $0xf98] sm:$0xf0]  ;;  %v7291_v36 = vld [vmem:[#allocation5 + $0xd6c] sm:$0xf] }
 0x1f4   :  { %3979 = vmatpush.bf16.msra.mxu3 %v6013_v7  ;;  %v7299_v7 = vld [vmem:[#allocation5 + $0xdac] sm:$0xf]  ;;  %v6154_v35 = vld [vmem:[#allocation5 + $0xc78] sm:$0xf0] }
 0x1f5   :  { %3941 = vmatpush.bf16.msra.mxu0 %v5613_v14  ;;  %v6570_v14 = vld [vmem:[#allocation5 + $0xfb8] sm:$0xf0]  ;;  %v6317_v16 = vor.u32 %v7299_v7, %v6314_v8  ;;  %v7323_v43 = vld [vmem:[#allocation5 + $0xe6c] sm:$0xf]  ;;  %v6157_v46 = vor.u32 %v7259_v33, %v6154_v35  ;;  %v6664_v33 = vld [vmem:[#allocation8 + $0x70] sm:$0xf] }
 0x1f6   :  { %3954 = vmatpush.bf16.msra.mxu1 %v5741_v17  ;;  %v6445_v17 = vor.u32 %v7331_v11, %v6442_v12  ;;  %v6573_v21 = vor.u32 %v7363_v9, %v6570_v14  ;;  %v6282_v42 = vld [vmem:[#allocation5 + $0xd78] sm:$0xf0]  ;;  %v7351_v63 = vld [vmem:[#allocation5 + $0xf4c] sm:$0xf] }
 0x1f7   :  { %3967 = vmatpush.bf16.msra.mxu2 %v5869_v34  ;;  %v7263_v34 = vld [vmem:[#allocation5 + $0xc8c] sm:$0xf]  ;;  %v6410_v44 = vld [vmem:[#allocation5 + $0xe78] sm:$0xf0]  ;;  %v6285_v47 = vor.u32 %v7291_v36, %v6282_v42 }
 0x1f8   :  { %3980 = vmatpush.bf16.msra.mxu3 %v5997_v28  ;;  %v6266_v56 = vld [vmem:[#allocation5 + $0xd58] sm:$0xf0]  ;;  %v7251_v5 = vld [vmem:[#allocation5 + $0xc2c] sm:$0xf] }
 0x1f9   :  { %3942 = vmatpush.bf16.msra.mxu0 %v5597_v41  ;;  %v7782_v28 = vpop.f32.mrf.mxu0  ;;  %v6394_v59 = vld [vmem:[#allocation5 + $0xe58] sm:$0xf0]  ;;  %v7315_v12 = vld [vmem:[#allocation5 + $0xe2c] sm:$0xf] }
 0x1fa   :  { %3955 = vmatpush.bf16.msra.mxu1 %v5725_v45  ;;  %v7784_v38 = vpop.f32.mrf.mxu1  ;;  %v7355_v45 = vld [vmem:[#allocation5 + $0xf6c] sm:$0xf]  ;;  %v6522_v0 = vld [vmem:[#allocation5 + $0xf58] sm:$0xf0] }
 0x1fb   :  { %3968 = vmatpush.bf16.msra.mxu2 %v5853_v62  ;;  %v6538_v62 = vld [vmem:[#allocation5 + $0xf78] sm:$0xf0]  ;;  %v6525_v8 = vor.u32 %v7351_v63, %v6522_v0  ;;  %v7347_v14 = vld [vmem:[#allocation5 + $0xf2c] sm:$0xf] }
 0x1fc   :  { %3981 = vmatpush.bf16.msra.mxu3 %v5981_v50  ;;  %3943 = vmatmul.bf16.vlgmr.msra.gmra.mxu0 %v7682_v18  ;;  %v6170_v18 = vld [vmem:[#allocation5 + $0xc98] sm:$0xf0]  ;;  %v6413_v50 = vor.u32 %v7323_v43, %v6410_v44  ;;  %v6541_v48 = vor.u32 %v7355_v45, %v6538_v62  ;;  %v7279_v29 = vld [vmem:[#allocation5 + $0xd0c] sm:$0xf]  ;;  %v6792_v43 = vld [vmem:[#allocation8 + $0x170] sm:$0xf] }
 0x1fd   :  { %3987 = vmatpush.bf16.msrb.mxu0 %v6221_v51  ;;  %3956 = vmatmul.bf16.vlgmr.msra.gmra.mxu1 %v7686_v23  ;;  %v7359_v23 = vld [vmem:[#allocation5 + $0xf8c] sm:$0xf]  ;;  %v6122_v7 = vld [vmem:[#allocation5 + $0xc38] sm:$0xf0] }
 0x1fe   :  { %4000 = vmatpush.bf16.msrb.mxu1 %v6349_v54  ;;  %3969 = vmatmul.bf16.vlgmr.msra.gmra.mxu2 %v7684_v22  ;;  %v6426_v22 = vld [vmem:[#allocation5 + $0xe98] sm:$0xf0]  ;;  %v6557_v41 = vor.u32 %v7359_v23, %v6554_v37  ;;  %v7255_v51 = vld [vmem:[#allocation5 + $0xc4c] sm:$0xf] }
 0x1ff   :  { %4013 = vmatpush.bf16.msrb.mxu2 %v6477_v52  ;;  %3982 = vmatmul.bf16.vlgmr.msra.gmra.mxu3 %v7688_v27  ;;  %v6173_v27 = vor.u32 %v7263_v34, %v6170_v18  ;;  %v6429_v32 = vor.u32 %v7327_v24, %v6426_v22  ;;  %v6138_v54 = vld [vmem:[#allocation5 + $0xc58] sm:$0xf0]  ;;  %v7287_v52 = vld [vmem:[#allocation5 + $0xd4c] sm:$0xf] }
 0x200   :  { %4026 = vmatpush.bf16.msrb.mxu3 %v6605_v57  ;;  %v7319_v57 = vld [vmem:[#allocation5 + $0xe4c] sm:$0xf]  ;;  %v6250_v11 = vld [vmem:[#allocation5 + $0xd38] sm:$0xf0] }
 0x201   :  { %3988 = vmatpush.bf16.msrb.mxu0 %v6205_v6  ;;  %v7786_v55 = vpop.f32.mrf.mxu2  ;;  %v3738_v1 = vpop.f32.mrf.mxu0  ;;  %v6141_v6 = vor.u32 %v7255_v51, %v6138_v54  ;;  %v6397_v4 = vor.u32 %v7319_v57, %v6394_v59  ;;  %v6378_v9 = vld [vmem:[#allocation5 + $0xe38] sm:$0xf0]  ;;  %v7247_v34 = vld [vmem:[#allocation5 + $0xc0c] sm:$0xf]  ;;  %v6656_v54 = vld [vmem:[#allocation8 + $0x60] sm:$0xf] }
 0x202   :  { %4001 = vmatpush.bf16.msrb.mxu1 %v6333_v2  ;;  %v7788_v61 = vpop.f32.mrf.mxu3  ;;  %v3751_v2 = vpop.f32.mrf.mxu1  ;;  %v6106_v18 = vld [vmem:[#allocation5 + $0xc18] sm:$0xf0]  ;;  %v7311_v22 = vld [vmem:[#allocation5 + $0xe0c] sm:$0xf]  ;;  %v6784_v57 = vld [vmem:[#allocation8 + $0x160] sm:$0xf] }
 0x203   :  { %4014 = vmatpush.bf16.msrb.mxu2 %v6461_v3  ;;  %v6269_v3 = vor.u32 %v7287_v52, %v6266_v56  ;;  %v6234_v24 = vld [vmem:[#allocation5 + $0xd18] sm:$0xf0]  ;;  %v7387_v52 = vld [vmem:[#allocation8 + $0x64] sm:$0xf0] }
 0x204   :  { %4027 = vmatpush.bf16.msrb.mxu3 %v6589_v10  ;;  %v7283_v10 = vld [vmem:[#allocation5 + $0xd2c] sm:$0xf]  ;;  %v6362_v37 = vld [vmem:[#allocation5 + $0xe18] sm:$0xf0]  ;;  %v6237_v45 = vor.u32 %v7279_v29, %v6234_v24  ;;  %v6657_v63 = vor.u32 %v7387_v52, %v6656_v54  ;;  %v6744_v52 = vld [vmem:[#allocation8 + $0x110] sm:$0xf] }
 0x205   :  { %3989 = vmatpush.bf16.msrb.mxu0 %v6189_v15  ;;  %v6506_v15 = vld [vmem:[#allocation5 + $0xf38] sm:$0xf0]  ;;  %v6253_v25 = vor.u32 %v7283_v10, %v6250_v11  ;;  %v6365_v62 = vor.u32 %v7311_v22, %v6362_v37  ;;  %v7419_v59 = vld [vmem:[#allocation8 + $0x164] sm:$0xf0]  ;;  %v6760_v22 = vld [vmem:[#allocation8 + $0x130] sm:$0xf] }
 0x206   :  { %4002 = vmatpush.bf16.msrb.mxu1 %v6317_v16  ;;  %v3685_v16 = vadd.f32 %v7770_v30, %v7764_v60  ;;  %v6509_v23 = vor.u32 %v7347_v14, %v6506_v15  ;;  %v7389_v35 = vld [vmem:[#allocation8 + $0x74] sm:$0xf0]  ;;  %v6728_v60 = vld [vmem:[#allocation8 + $0xf0] sm:$0xf]  ;;  %v6785_v1 = vor.u32 %v7419_v59, %v6784_v57  ;;  %v7399_v14 = vld [vmem:[#allocation8 + $0xc4] sm:$0xf0] }
 0x207   :  { %4015 = vmatpush.bf16.msrb.mxu2 %v6445_v17  ;;  %v6125_v17 = vor.u32 %v7251_v5, %v6122_v7  ;;  %v7405_v42 = vld [vmem:[#allocation8 + $0xf4] sm:$0xf0]  ;;  %v6776_v5 = vld [vmem:[#allocation8 + $0x150] sm:$0xf]  ;;  %v7415_v15 = vld [vmem:[#allocation8 + $0x144] sm:$0xf0] }
 0x208   :  { %4028 = vmatpush.bf16.msrb.mxu3 %v6573_v21  ;;  %v6381_v21 = vor.u32 %v7315_v12, %v6378_v9  ;;  %v3698_v36 = vadd.f32 %v7772_v39, %v3685_v16  ;;  %v7421_v44 = vld [vmem:[#allocation8 + $0x174] sm:$0xf0]  ;;  %v7403_v39 = vld [vmem:[#allocation8 + $0xe4] sm:$0xf0] }
 0x209   :  { %3990 = vmatpush.bf16.msrb.mxu0 %v6173_v27  ;;  %v7343_v27 = vld [vmem:[#allocation5 + $0xf0c] sm:$0xf]  ;;  %v6793_v51 = vor.u32 %v7421_v44, %v6792_v43  ;;  %v7385_v2 = vld [vmem:[#allocation8 + $0x54] sm:$0xf0] }
 0x20a   :  { %4003 = vmatpush.bf16.msrb.mxu1 %v6301_v40  ;;  %v6490_v40 = vld [vmem:[#allocation5 + $0xf18] sm:$0xf0]  ;;  %v3777_v30 = vpop.f32.mrf.mxu3  ;;  %v3711_v56 = vadd.f32 %v7774_v53, %v3698_v36  ;;  %v7383_v9 = vld [vmem:[#allocation8 + $0x44] sm:$0xf0]  ;;  %v6752_v36 = vld [vmem:[#allocation8 + $0x120] sm:$0xf] }
 0x20b   :  { %4016 = vmatpush.bf16.msrb.mxu2 %v6429_v32  ;;  %v3764_v32 = vpop.f32.mrf.mxu2  ;;  %v7401_v53 = vld [vmem:[#allocation8 + $0xd4] sm:$0xf0]  ;;  %v7395_v30 = vld [vmem:[#allocation8 + $0xa4] sm:$0xf0] }
 0x20c   :  { %4029 = vmatpush.bf16.msrb.mxu3 %v6557_v41  ;;  %v6109_v41 = vor.u32 %v7247_v34, %v6106_v18  ;;  %v7417_v7 = vld [vmem:[#allocation8 + $0x154] sm:$0xf0]  ;;  %v6632_v18 = vld [vmem:[#allocation8 + $0x30] sm:$0xf]  ;;  %v7379_v32 = vld [vmem:[#allocation8 + $0x24] sm:$0xf0] }
 0x20d   :  { %3991 = vmatpush.bf16.msrb.mxu0 %v6157_v46  ;;  %v6493_v46 = vor.u32 %v7343_v27, %v6490_v40  ;;  %v6777_v12 = vor.u32 %v7417_v7, %v6776_v5  ;;  %v7397_v24 = vld [vmem:[#allocation8 + $0xb4] sm:$0xf0]  ;;  %v6624_v40 = vld [vmem:[#allocation8 + $0x20] sm:$0xf]  ;;  %v6666_v5 = vld [vmem:[#allocation8 + $0x78] sm:$0xf0] }
 0x20e   :  { %4004 = vmatpush.bf16.msrb.mxu1 %v6285_v47  ;;  %v6665_v47 = vor.u32 %v7389_v35, %v6664_v33  ;;  %v6688_v33 = vld [vmem:[#allocation8 + $0xa0] sm:$0xf]  ;;  %v6625_v44 = vor.u32 %v7379_v32, %v6624_v40  ;;  %v7393_v54 = vld [vmem:[#allocation8 + $0x94] sm:$0xf0]  ;;  %v7404_v7 = vld [vmem:[#allocation8 + $0xf4] sm:$0xf] }
 0x20f   :  { %4017 = vmatpush.bf16.msrb.mxu2 %v6413_v50  ;;  %v6729_v50 = vor.u32 %v7405_v42, %v6728_v60  ;;  %v6778_v40 = vld [vmem:[#allocation8 + $0x158] sm:$0xf0] }
 0x210   :  { %4030 = vmatpush.bf16.msrb.mxu3 %v6541_v48  ;;  %v6720_v48 = vld [vmem:[#allocation8 + $0xe0] sm:$0xf] }
 0x211   :  { %3992 = vmatpush.bf16.msrb.mxu0 %v6141_v6  ;;  %v6721_v0 = vor.u32 %v7403_v39, %v6720_v48  ;;  %v6648_v6 = vld [vmem:[#allocation8 + $0x50] sm:$0xf]  ;;  %v6608_v39 = vld [vmem:[#allocation8] sm:$0xf] }
 0x212   :  { %4005 = vmatpush.bf16.msrb.mxu1 %v6269_v3  ;;  %v6712_v3 = vld [vmem:[#allocation8 + $0xd0] sm:$0xf] }
 0x213   :  { %4018 = vmatpush.bf16.msrb.mxu2 %v6397_v4  ;;  %v3724_v4 = vadd.f32 %v7776_v58, %v3711_v56  ;;  %v6713_v11 = vor.u32 %v7401_v53, %v6712_v3  ;;  %v6640_v58 = vld [vmem:[#allocation8 + $0x40] sm:$0xf]  ;;  %v7407_v3 = vld [vmem:[#allocation8 + $0x104] sm:$0xf0] }
 0x214   :  { %4031 = vmatpush.bf16.msrb.mxu3 %v6525_v8  ;;  %v6649_v8 = vor.u32 %v7385_v2, %v6648_v6  ;;  %v6736_v2 = vld [vmem:[#allocation8 + $0x100] sm:$0xf] }
 0x215   :  { %3993 = vmatpush.bf16.msrb.mxu0 %v6125_v17  ;;  %v3737_v10 = vadd.f32 %v7782_v28, %v3724_v4  ;;  %v7388_v4 = vld [vmem:[#allocation8 + $0x74] sm:$0xf] }
 0x216   :  { %4006 = vmatpush.bf16.msrb.mxu1 %v6253_v25  ;;  %v7381_v25 = vld [vmem:[#allocation8 + $0x34] sm:$0xf0] }
 0x217   :  { %4019 = vmatpush.bf16.msrb.mxu2 %v6381_v21  ;;  %v3750_v17 = vadd.f32 %v7784_v38, %v3737_v10  ;;  %v6696_v21 = vld [vmem:[#allocation8 + $0xb0] sm:$0xf]  ;;  %v6633_v37 = vor.u32 %v7381_v25, %v6632_v18  ;;  %v6730_v10 = vld [vmem:[#allocation8 + $0xf8] sm:$0xf0]  ;;  %v6786_v18 = vld [vmem:[#allocation8 + $0x168] sm:$0xf0]  ;;  %v7805_v25 = vpack.c.bf16 %v7731_v31, %v7731_v31 }
 0x218   :  { %4032 = vmatpush.bf16.msrb.mxu3 %v6509_v23  ;;  %v7413_v23 = vld [vmem:[#allocation8 + $0x134] sm:$0xf0]  ;;  %v6697_v38 = vor.u32 %v7397_v24, %v6696_v21  ;;  %v7809_v21 = vpack.c.bf16 %v7758_v49, %v7758_v49  ;;  %v7400_v31 = vld [vmem:[#allocation8 + $0xd4] sm:$0xf] }
 0x219   :  { %3994 = vmatpush.bf16.msrb.mxu0 %v6109_v41  ;;  %v3788_v16 = vpop.f32.mrf.mxu0  ;;  %v3763_v29 = vadd.f32 %v7786_v55, %v3750_v17  ;;  %v6761_v27 = vor.u32 %v7413_v23, %v6760_v22  ;;  %v7411_v41 = vld [vmem:[#allocation8 + $0x124] sm:$0xf0]  ;;  %v7384_v23 = vld [vmem:[#allocation8 + $0x54] sm:$0xf] }
 0x21a   :  { %4007 = vmatpush.bf16.msrb.mxu1 %v6237_v45  ;;  %v7416_v49 = vld [vmem:[#allocation8 + $0x154] sm:$0xf] }
 0x21b   :  { %4020 = vmatpush.bf16.msrb.mxu2 %v6365_v62  ;;  %v3776_v35 = vadd.f32 %v7788_v61, %v3763_v29  ;;  %v6689_v62 = vor.u32 %v7395_v30, %v6688_v33  ;;  %v7409_v61 = vld [vmem:[#allocation8 + $0x114] sm:$0xf0]  ;;  %v6781_v30 = vor.u32 %v7416_v49, %v6778_v40  ;;  %v7406_v49 = vld [vmem:[#allocation8 + $0x104] sm:$0xf]  ;;  %v6738_v40 = vld [vmem:[#allocation8 + $0x108] sm:$0xf0] }
 0x21c   :  { %4033 = vmatpush.bf16.msrb.mxu3 %v6493_v46  ;;  %3995 = vmatmul.bf16.vlgmr.msrb.gmra.mxu0 %v7694_v13  ;;  %v6704_v13 = vld [vmem:[#allocation8 + $0xc0] sm:$0xf]  ;;  %v6753_v46 = vor.u32 %v7411_v41, %v6752_v36  ;;  %v6745_v59 = vor.u32 %v7409_v61, %v6744_v52  ;;  %v7398_v36 = vld [vmem:[#allocation8 + $0xc4] sm:$0xf]  ;;  %v6706_v41 = vld [vmem:[#allocation8 + $0xc8] sm:$0xf0] }
 0x21d   :  { %4433 = vmatpush.bf16.msra.mxu0 %v6665_v47  ;;  %4008 = vmatmul.bf16.vlgmr.msrb.gmra.mxu1 %v7698_v20  ;;  %v6768_v20 = vld [vmem:[#allocation8 + $0x140] sm:$0xf]  ;;  %v6705_v28 = vor.u32 %v7399_v14, %v6704_v13  ;;  %v3789_v43 = vadd.f32 %v3788_v16, %v3776_v35  ;;  %v6616_v47 = vld [vmem:[#allocation8 + $0x10] sm:$0xf]  ;;  %v6737_v13 = vor.u32 %v7407_v3, %v6736_v2  ;;  %v7386_v16 = vld [vmem:[#allocation8 + $0x64] sm:$0xf] }
 0x21e   :  { %4446 = vmatpush.bf16.msra.mxu1 %v6729_v50  ;;  %4021 = vmatmul.bf16.vlgmr.msrb.gmra.mxu2 %v7696_v19  ;;  %v6641_v19 = vor.u32 %v7383_v9, %v6640_v58  ;;  %v6769_v34 = vor.u32 %v7415_v15, %v6768_v20  ;;  %v7377_v50 = vld [vmem:[#allocation8 + $0x14] sm:$0xf0]  ;;  %v6794_v58 = vld [vmem:[#allocation8 + $0x178] sm:$0xf0]  ;;  %v6669_v20 = vor.u32 %v7388_v4, %v6666_v5  ;;  %v7382_v35 = vld [vmem:[#allocation8 + $0x44] sm:$0xf] }
 0x21f   :  { %4459 = vmatpush.bf16.msra.mxu2 %v6793_v51  ;;  %4034 = vmatmul.bf16.vlgmr.msrb.gmra.mxu3 %v7700_v26  ;;  %v3801_v26 = vpop.f32.mrf.mxu1  ;;  %v6680_v51 = vld [vmem:[#allocation8 + $0x90] sm:$0xf]  ;;  %v6617_v56 = vor.u32 %v7377_v50, %v6616_v47  ;;  %v6733_v15 = vor.u32 %v7404_v7, %v6730_v10  ;;  %v6698_v52 = vld [vmem:[#allocation8 + $0xb8] sm:$0xf0]  ;;  %v7394_v2 = vld [vmem:[#allocation8 + $0xa4] sm:$0xf] }
 0x220   :  { %v3802_v48 = vadd.f32 %v3801_v26, %v3789_v43  ;;  %v6681_v57 = vor.u32 %v7393_v54, %v6680_v51  ;;  %v7402_v26 = vld [vmem:[#allocation8 + $0xe4] sm:$0xf]  ;;  %v6634_v51 = vld [vmem:[#allocation8 + $0x38] sm:$0xf0]  ;;  %v7396_v54 = vld [vmem:[#allocation8 + $0xb4] sm:$0xf] }
 0x221   :  { %4434 = vmatpush.bf16.msra.mxu0 %v6657_v63  ;;  %v3814_v60 = vpop.f32.mrf.mxu2  ;;  %v3790_v55 = vpop.f32.mrf.mxu0  ;;  %v7375_v63 = vld [vmem:[#allocation8 + $0x4] sm:$0xf0]  ;;  %v7414_v43 = vld [vmem:[#allocation8 + $0x144] sm:$0xf]  ;;  %v6690_v3 = vld [vmem:[#allocation8 + $0xa8] sm:$0xf0] }
 0x222   :  { %4447 = vmatpush.bf16.msra.mxu1 %v6721_v0  ;;  %v3827_v42 = vpop.f32.mrf.mxu3  ;;  %v6672_v0 = vld [vmem:[#allocation8 + $0x80] sm:$0xf]  ;;  %v3815_v6 = vadd.f32 %v3814_v60, %v3802_v48  ;;  %v6642_v60 = vld [vmem:[#allocation8 + $0x48] sm:$0xf0] }
 0x223   :  { %4460 = vmatpush.bf16.msra.mxu2 %v6785_v1  ;;  %v7391_v1 = vld [vmem:[#allocation8 + $0x84] sm:$0xf0]  ;;  %v6754_v5 = vld [vmem:[#allocation8 + $0x128] sm:$0xf0] }
 0x224   :  { %v6673_v9 = vor.u32 %v7391_v1, %v6672_v0  ;;  %v3828_v14 = vadd.f32 %v3827_v42, %v3815_v6  ;;  %v7450_v42 = vld [vmem:[#allocation7] sm:$0xf]  ;;  %v7378_v0 = vld [vmem:[#allocation8 + $0x24] sm:$0xf]  ;;  %v6626_v6 = vld [vmem:[#allocation8 + $0x28] sm:$0xf0] }
 0x225   :  { %4435 = vmatpush.bf16.msra.mxu0 %v6649_v8  ;;  %v642_v55 = vperm.slane %v7450_v42, 3 }
 0x226   :  { %4448 = vmatpush.bf16.msra.mxu1 %v6713_v11  ;;  %v6609_v11 = vor.u32 %v7375_v63, %v6608_v39  ;;  %v7811_v29 = vpack.c.bf16 %v3828_v14, %v3828_v14  ;;  %v6762_v39 = vld [vmem:[#allocation8 + $0x138] sm:$0xf0]  ;;  %v6701_v63 = vor.u32 %v7396_v54, %v6698_v52 }
 0x227   :  { %4461 = vmatpush.bf16.msra.mxu2 %v6777_v12  ;;  %v3803_v45 = vpop.f32.mrf.mxu1  ;;  %v7420_v12 = vld [vmem:[#allocation8 + $0x174] sm:$0xf]  ;;  %v6618_v14 = vld [vmem:[#allocation8 + $0x18] sm:$0xf0] }
 0x228   :  { %v6797_v17 = vor.u32 %v7420_v12, %v6794_v58  ;;  %v6645_v45 = vor.u32 %v7382_v35, %v6642_v60  ;;  %v7376_v12 = vld [vmem:[#allocation8 + $0x14] sm:$0xf]  ;;  %v6741_v60 = vor.u32 %v7406_v49, %v6738_v40  ;;  %v6810_v49 = vld [vmem:[#allocation8 + $0x198] sm:$0xf0] }
 0x229   :  { %4436 = vmatpush.bf16.msra.mxu0 %v6641_v19  ;;  %v3816_v53 = vpop.f32.mrf.mxu2  ;;  %v6658_v19 = vld [vmem:[#allocation8 + $0x68] sm:$0xf0] }
 0x22a   :  { %4449 = vmatpush.bf16.msra.mxu1 %v6705_v28  ;;  %v3829_v8 = vpop.f32.mrf.mxu3  ;;  %v6722_v28 = vld [vmem:[#allocation8 + $0xe8] sm:$0xf0]  ;;  %v6661_v24 = vor.u32 %v7386_v16, %v6658_v19  ;;  %v7410_v53 = vld [vmem:[#allocation8 + $0x124] sm:$0xf]  ;;  %v6746_v19 = vld [vmem:[#allocation8 + $0x118] sm:$0xf0] }
 0x22b   :  { %4462 = vmatpush.bf16.msra.mxu2 %v6769_v34  ;;  %v7418_v34 = vld [vmem:[#allocation8 + $0x164] sm:$0xf]  ;;  %v6725_v22 = vor.u32 %v7402_v26, %v6722_v28  ;;  %v6629_v8 = vor.u32 %v7378_v0, %v6626_v6  ;;  %v6856_v26 = vld [vmem:[#allocation8 + $0x1f0] sm:$0xf]  ;;  %v7437_v28 = vld [vmem:[#allocation8 + $0x1f4] sm:$0xf0] }
 0x22c   :  { %v7423_v6 = vld [vmem:[#allocation8 + $0x184] sm:$0xf0] }
 0x22d   :  { %4437 = vmatpush.bf16.msra.mxu0 %v6633_v37  ;;  %v6789_v37 = vor.u32 %v7418_v34, %v6786_v18  ;;  %v6621_v34 = vor.u32 %v7376_v12, %v6618_v14  ;;  %v7432_v12 = vld [vmem:[#allocation8 + $0x1d4] sm:$0xf] }
 0x22e   :  { %4450 = vmatpush.bf16.msra.mxu1 %v6697_v38  ;;  %v6650_v38 = vld [vmem:[#allocation8 + $0x58] sm:$0xf0] }
 0x22f   :  { %4463 = vmatpush.bf16.msra.mxu2 %v6761_v27  ;;  %v6714_v27 = vld [vmem:[#allocation8 + $0xd8] sm:$0xf0]  ;;  %v6653_v32 = vor.u32 %v7384_v23, %v6650_v38  ;;  %v7390_v38 = vld [vmem:[#allocation8 + $0x84] sm:$0xf] }
 0x230   :  { %v6717_v33 = vor.u32 %v7400_v31, %v6714_v27  ;;  %v6674_v31 = vld [vmem:[#allocation8 + $0x88] sm:$0xf0] }
 0x231   :  { %4438 = vmatpush.bf16.msra.mxu0 %v6625_v44  ;;  %v6770_v44 = vld [vmem:[#allocation8 + $0x148] sm:$0xf0]  ;;  %v6677_v35 = vor.u32 %v7390_v38, %v6674_v31 }
 0x232   :  { %4451 = vmatpush.bf16.msra.mxu1 %v6689_v62  ;;  %v6709_v62 = vor.u32 %v7398_v36, %v6706_v41  ;;  %v6773_v50 = vor.u32 %v7414_v43, %v6770_v44  ;;  %v7435_v36 = vld [vmem:[#allocation8 + $0x1e4] sm:$0xf0]  ;;  %v6840_v43 = vld [vmem:[#allocation8 + $0x1d0] sm:$0xf]  ;;  %v7433_v44 = vld [vmem:[#allocation8 + $0x1d4] sm:$0xf0] }
 0x233   :  { %4464 = vmatpush.bf16.msra.mxu2 %v6753_v46  ;;  %v7380_v46 = vld [vmem:[#allocation8 + $0x34] sm:$0xf] }
 0x235   :  { %4439 = vmatpush.bf16.msra.mxu0 %v6617_v56  ;;  %v7412_v56 = vld [vmem:[#allocation8 + $0x134] sm:$0xf] }
 0x236   :  { %4452 = vmatpush.bf16.msra.mxu1 %v6681_v57  ;;  %v6765_v1 = vor.u32 %v7412_v56, %v6762_v39 }
 0x237   :  { %4465 = vmatpush.bf16.msra.mxu2 %v6745_v59  ;;  %v6637_v59 = vor.u32 %v7380_v46, %v6634_v51  ;;  %v6824_v51 = vld [vmem:[#allocation8 + $0x1b0] sm:$0xf] }
 0x239   :  { %4440 = vmatpush.bf16.msra.mxu0 %v6609_v11  ;;  %v3840_v47 = vpop.f32.mrf.mxu0  ;;  %v6693_v11 = vor.u32 %v7394_v2, %v6690_v3  ;;  %v7436_v2 = vld [vmem:[#allocation8 + $0x1f4] sm:$0xf]  ;;  %v6858_v3 = vld [vmem:[#allocation8 + $0x1f8] sm:$0xf0] }
 0x23a   :  { %4453 = vmatpush.bf16.msra.mxu1 %v6673_v9  ;;  %v3841_v61 = vadd.f32 %v3840_v47, %v642_v55  ;;  %v3853_v48 = vpop.f32.mrf.mxu1  ;;  %v6832_v47 = vld [vmem:[#allocation8 + $0x1c0] sm:$0xf] }
 0x23b   :  { %4466 = vmatpush.bf16.msra.mxu2 %v6737_v13  ;;  %v6757_v13 = vor.u32 %v7410_v53, %v6754_v5  ;;  %v6861_v53 = vor.u32 %v7436_v2, %v6858_v3  ;;  %v7434_v5 = vld [vmem:[#allocation8 + $0x1e4] sm:$0xf] }
 0x23c   :  { %4441 = vmatmul.bf16.vlgmr.msra.gmra.mxu0 %v7805_v25  ;;  %v3854_v57 = vadd.f32 %v3853_v48, %v3841_v61  ;;  %v6816_v61 = vld [vmem:[#allocation8 + $0x1a0] sm:$0xf]  ;;  %v7427_v48 = vld [vmem:[#allocation8 + $0x1a4] sm:$0xf0] }
 0x23d   :  { %4485 = vmatpush.bf16.msrb.mxu0 %v6669_v20  ;;  %4454 = vmatmul.bf16.vlgmr.msra.gmra.mxu1 %v7809_v21  ;;  %v7392_v20 = vld [vmem:[#allocation8 + $0x94] sm:$0xf] }
 0x23e   :  { %4498 = vmatpush.bf16.msrb.mxu1 %v6733_v15  ;;  %4467 = vmatmul.bf16.vlgmr.msra.gmra.mxu2 %v7811_v29  ;;  %v6682_v15 = vld [vmem:[#allocation8 + $0x98] sm:$0xf0] }
 0x23f   :  { %4511 = vmatpush.bf16.msrb.mxu2 %v6797_v17  ;;  %v7408_v17 = vld [vmem:[#allocation8 + $0x114] sm:$0xf]  ;;  %v6685_v18 = vor.u32 %v7392_v20, %v6682_v15  ;;  %v7430_v15 = vld [vmem:[#allocation8 + $0x1c4] sm:$0xf] }
 0x240   :  { %v6749_v23 = vor.u32 %v7408_v17, %v6746_v19 }
 0x241   :  { %4486 = vmatpush.bf16.msrb.mxu0 %v6661_v24  ;;  %v3866_v4 = vpop.f32.mrf.mxu2  ;;  %v3842_v9 = vpop.f32.mrf.mxu0  ;;  %v7374_v24 = vld [vmem:[#allocation8 + $0x4] sm:$0xf] }
 0x242   :  { %4499 = vmatpush.bf16.msrb.mxu1 %v6725_v22  ;;  %v3867_v7 = vadd.f32 %v3866_v4, %v3854_v57  ;;  %v3879_v10 = vpop.f32.mrf.mxu3  ;;  %v3855_v16 = vpop.f32.mrf.mxu1  ;;  %v6857_v22 = vor.u32 %v7437_v28, %v6856_v26  ;;  %v6817_v57 = vor.u32 %v7427_v48, %v6816_v61  ;;  %v6842_v9 = vld [vmem:[#allocation8 + $0x1d8] sm:$0xf0]  ;;  %v4107_v61 = vld [vmem:[#allocation10] sm:$0x3] }
 0x243   :  { %4512 = vmatpush.bf16.msrb.mxu2 %v6789_v37  ;;  %v6610_v37 = vld [vmem:[#allocation8 + $0x8] sm:$0xf0]  ;;  %v4109_v48 = vperm.slane %v4107_v61, 0  ;;  %v4110_v3 = vperm.slane %v4107_v61, 1 }
 0x244   :  { %v7816_v58 = vadd.f32 %v3879_v10, %v3867_v7  ;;  %4472 = vmatpush.bf16.msra.mxu3 %v6857_v22  ;;  %v6850_v7 = vld [vmem:[#allocation8 + $0x1e8] sm:$0xf0] }
 0x245   :  { %4487 = vmatpush.bf16.msrb.mxu0 %v6653_v32  ;;  %v6834_v16 = vld [vmem:[#allocation8 + $0x1c8] sm:$0xf0] }
 0x246   :  { %4500 = vmatpush.bf16.msrb.mxu1 %v6717_v33  ;;  %v6613_v33 = vor.u32 %v7374_v24, %v6610_v37  ;;  %v6837_v26 = vor.u32 %v7430_v15, %v6834_v16  ;;  %v6826_v24 = vld [vmem:[#allocation8 + $0x1b8] sm:$0xf0]  ;;  %v6818_v37 = vld [vmem:[#allocation8 + $0x1a8] sm:$0xf0] }
 0x247   :  { %4513 = vmatpush.bf16.msrb.mxu2 %v6781_v30  ;;  %v6848_v30 = vld [vmem:[#allocation8 + $0x1e0] sm:$0xf] }
 0x248   :  { %v6849_v42 = vor.u32 %v7435_v36, %v6848_v30 }
 0x249   :  { %4488 = vmatpush.bf16.msrb.mxu0 %v6645_v45  ;;  %v3868_v27 = vpop.f32.mrf.mxu2  ;;  %v6841_v45 = vor.u32 %v7433_v44, %v6840_v43 }
 0x24a   :  { %4501 = vmatpush.bf16.msrb.mxu1 %v6709_v62  ;;  %v3881_v32 = vpop.f32.mrf.mxu3  ;;  %4473 = vmatpush.bf16.msra.mxu3 %v6849_v42 }
 0x24b   :  { %4514 = vmatpush.bf16.msrb.mxu2 %v6773_v50  ;;  %v7431_v50 = vld [vmem:[#allocation8 + $0x1c4] sm:$0xf0] }
 0x24c   :  { %v6833_v54 = vor.u32 %v7431_v50, %v6832_v47 }
 0x24d   :  { %4489 = vmatpush.bf16.msrb.mxu0 %v6637_v59  ;;  %v6808_v59 = vld [vmem:[#allocation8 + $0x190] sm:$0xf] }
 0x24e   :  { %4502 = vmatpush.bf16.msrb.mxu1 %v6701_v63  ;;  %4474 = vmatpush.bf16.msra.mxu3 %v6841_v45  ;;  %v7425_v63 = vld [vmem:[#allocation8 + $0x194] sm:$0xf0] }
 0x24f   :  { %4515 = vmatpush.bf16.msrb.mxu2 %v6765_v1  ;;  %v6809_v0 = vor.u32 %v7425_v63, %v6808_v59  ;;  %v6800_v1 = vld [vmem:[#allocation8 + $0x180] sm:$0xf] }
 0x250   :  { %v6801_v4 = vor.u32 %v7423_v6, %v6800_v1 }
 0x251   :  { %4490 = vmatpush.bf16.msrb.mxu0 %v6629_v8  ;;  %v6853_v8 = vor.u32 %v7434_v5, %v6850_v7 }
 0x252   :  { %4503 = vmatpush.bf16.msrb.mxu1 %v6693_v11  ;;  %4475 = vmatpush.bf16.msra.mxu3 %v6833_v54 }
 0x253   :  { %4516 = vmatpush.bf16.msrb.mxu2 %v6757_v13  ;;  %v6845_v13 = vor.u32 %v7432_v12, %v6842_v9 }
 0x255   :  { %4491 = vmatpush.bf16.msrb.mxu0 %v6621_v34 }
 0x256   :  { %4504 = vmatpush.bf16.msrb.mxu1 %v6685_v18  ;;  %v7428_v18 = vld [vmem:[#allocation8 + $0x1b4] sm:$0xf] }
 0x257   :  { %4517 = vmatpush.bf16.msrb.mxu2 %v6749_v23  ;;  %v6829_v22 = vor.u32 %v7428_v18, %v6826_v24  ;;  %v7426_v23 = vld [vmem:[#allocation8 + $0x1a4] sm:$0xf] }
 0x258   :  { %v6821_v31 = vor.u32 %v7426_v23, %v6818_v37 }
 0x259   :  { %4492 = vmatpush.bf16.msrb.mxu0 %v6613_v33  ;;  %v3892_v41 = vpop.f32.mrf.mxu0 }
 0x25a   :  { %4505 = vmatpush.bf16.msrb.mxu1 %v6677_v35  ;;  %v3905_v55 = vpop.f32.mrf.mxu1  ;;  %v3893_v14 = vadd.f32 %v3892_v41, %v7816_v58  ;;  %v7424_v58 = vld [vmem:[#allocation8 + $0x194] sm:$0xf]  ;;  %v7422_v35 = vld [vmem:[#allocation8 + $0x184] sm:$0xf] }
 0x25b   :  { %4518 = vmatpush.bf16.msrb.mxu2 %v6741_v60  ;;  %v6813_v33 = vor.u32 %v7424_v58, %v6810_v49  ;;  %v6802_v60 = vld [vmem:[#allocation8 + $0x188] sm:$0xf0] }
 0x25c   :  { %4493 = vmatmul.bf16.vlgmr.msrb.gmra.mxu0 %v7805_v25  ;;  %v3906_v34 = vadd.f32 %v3905_v55, %v3893_v14  ;;  %v6805_v36 = vor.u32 %v7422_v35, %v6802_v60 }
 0x25d   :  { %4506 = vmatmul.bf16.vlgmr.msrb.gmra.mxu1 %v7809_v21  ;;  %v7429_v21 = vld [vmem:[#allocation8 + $0x1b4] sm:$0xf0] }
 0x25e   :  { %4519 = vmatmul.bf16.vlgmr.msrb.gmra.mxu2 %v7811_v29  ;;  %v6825_v29 = vor.u32 %v7429_v21, %v6824_v51 }
 0x260   :  { %4476 = vmatpush.bf16.msra.mxu3 %v6825_v29 }
 0x261   :  { %v3918_v62 = vpop.f32.mrf.mxu2  ;;  %v3894_v25 = vpop.f32.mrf.mxu0 }
 0x262   :  { %v3931_v46 = vpop.f32.mrf.mxu3  ;;  %v3907_v52 = vpop.f32.mrf.mxu1  ;;  %v3919_v38 = vadd.f32 %v3918_v62, %v3906_v34 }
 0x264   :  { %4477 = vmatpush.bf16.msra.mxu3 %v6817_v57  ;;  %v3932_v32 = vadd.f32 %v3931_v46, %v3919_v38 }
 0x268   :  { %4478 = vmatpush.bf16.msra.mxu3 %v6809_v0 }
 0x269   :  { %v3920_v56 = vpop.f32.mrf.mxu2 }
 0x26a   :  { %v3933_v39 = vpop.f32.mrf.mxu3 }
 0x26c   :  { %4479 = vmatpush.bf16.msra.mxu3 %v6801_v4 }
 0x270   :  { %4524 = vmatpush.bf16.msrb.mxu3 %v6861_v53 }
 0x274   :  { %4525 = vmatpush.bf16.msrb.mxu3 %v6853_v8 }
 0x278   :  { %4526 = vmatpush.bf16.msrb.mxu3 %v6845_v13 }
 0x279   :  { %v3944_v10 = vpop.f32.mrf.mxu0 }
 0x27a   :  { %v3957_v11 = vpop.f32.mrf.mxu1  ;;  %v3945_v30 = vadd.f32 %v3944_v10, %v3932_v32 }
 0x27c   :  { %4527 = vmatpush.bf16.msrb.mxu3 %v6837_v26  ;;  %v3958_v41 = vadd.f32 %v3957_v11, %v3945_v30 }
 0x280   :  { %4528 = vmatpush.bf16.msrb.mxu3 %v6829_v22 }
 0x281   :  { %v3970_v20 = vpop.f32.mrf.mxu2  ;;  %v3946_v19 = vpop.f32.mrf.mxu0 }
 0x282   :  { %v3983_v17 = vpop.f32.mrf.mxu3  ;;  %v3959_v28 = vpop.f32.mrf.mxu1  ;;  %v3971_v42 = vadd.f32 %v3970_v20, %v3958_v41 }
 0x284   :  { %4529 = vmatpush.bf16.msrb.mxu3 %v6821_v31  ;;  %v3984_v55 = vadd.f32 %v3983_v17, %v3971_v42 }
 0x288   :  { %4530 = vmatpush.bf16.msrb.mxu3 %v6813_v33 }
 0x289   :  { %v3972_v27 = vpop.f32.mrf.mxu2 }
 0x28a   :  { %v3985_v40 = vpop.f32.mrf.mxu3 }
 0x28c   :  { %4531 = vmatpush.bf16.msrb.mxu3 %v6805_v36 }
 0x299   :  { %v3996_v43 = vpop.f32.mrf.mxu0 }
 0x29a   :  { %v4009_v44 = vpop.f32.mrf.mxu1  ;;  %v3997_v45 = vadd.f32 %v3996_v43, %v3984_v55 }
 0x29c   :  { %v4010_v62 = vadd.f32 %v4009_v44, %v3997_v45 }
 0x2a1   :  { %v4022_v47 = vpop.f32.mrf.mxu2  ;;  %v3998_v25 = vpop.f32.mrf.mxu0 }
 0x2a2   :  { %v4035_v50 = vpop.f32.mrf.mxu3  ;;  %v4023_v51 = vadd.f32 %v4022_v47, %v4010_v62  ;;  %v4011_v46 = vpop.f32.mrf.mxu1 }
 0x2a4   :  { %v4036_v54 = vadd.f32 %v4035_v50, %v4023_v51 }
 0x2a6   :  { %v4042_v21 = vpack.c.bf16 %v4036_v54, %v4036_v54 }
 0x2a8   :  { %4480 = vmatmul.bf16.vlgmr.msra.gmra.mxu3 %v4042_v21 }
 0x2a9   :  { %v4024_v52 = vpop.f32.mrf.mxu2 }
 0x2aa   :  { %v4037_v29 = vpop.f32.mrf.mxu3 }
 0x2b8   :  { %4532 = vmatmul.bf16.vlgmr.msrb.gmra.mxu3 %v4042_v21 }
 0x2b9   :  { %v4442_v56 = vpop.f32.mrf.mxu0 }
 0x2ba   :  { %v4443_v39 = vadd.f32 %v4442_v56, %v4109_v48  ;;  %v4455_v57 = vpop.f32.mrf.mxu1 }
 0x2bc   :  { %v4456_v59 = vadd.f32 %v4455_v57, %v4443_v39 }
 0x2c1   :  { %v4468_v63 = vpop.f32.mrf.mxu2  ;;  %v4444_v1 = vpop.f32.mrf.mxu0 }
 0x2c2   :  { %v4469_v0 = vadd.f32 %v4468_v63, %v4456_v59  ;;  %v4457_v6 = vpop.f32.mrf.mxu1 }
 0x2c9   :  { %v4470_v2 = vpop.f32.mrf.mxu2 }
 0x2d9   :  { %v4494_v4 = vpop.f32.mrf.mxu0 }
 0x2da   :  { %v4507_v53 = vpop.f32.mrf.mxu1  ;;  %v4495_v5 = vadd.f32 %v4494_v4, %v4110_v3 }
 0x2dc   :  { %v4508_v7 = vadd.f32 %v4507_v53, %v4495_v5 }
 0x2e1   :  { %v4520_v10 = vpop.f32.mrf.mxu2  ;;  %v4496_v11 = vpop.f32.mrf.mxu0 }
 0x2e2   :  { %v4521_v8 = vadd.f32 %v4520_v10, %v4508_v7  ;;  %v4509_v12 = vpop.f32.mrf.mxu1 }
 0x2e9   :  { %v4522_v9 = vpop.f32.mrf.mxu2 }
 0x32b   :  { %v4481_v13 = vpop.f32.mrf.mxu3 }
 0x32c   :  { %v4482_v15 = vadd.f32 %v4481_v13, %v4469_v0 }
 0x333   :  { %v4483_v14 = vpop.f32.mrf.mxu3 }
 0x33b   :  { %v4533_v20 = vpop.f32.mrf.mxu3 }
 0x33c   :  { %v4534_v16 = vadd.f32 %v4533_v20, %v4521_v8 }
 0x33e   :  { %v4537_v17 = vpack.c.bf16 %v4534_v16, %v4482_v15 }
 0x340   :  { %4538 = vst [vmem:[#allocation11] sm:$0xff] %v4537_v17 }
 0x341   :  { %4549 = dma.vmem_to_hbm [thread:$0]  %s4545_s4, 128, %s4547_s21, [#allocation4]  }
 0x343   :  { %v4535_v19 = vpop.f32.mrf.mxu3 }
 0x344   :  { %7601 = dma.done.wait [#allocation4], 128  }
 0x345   :  { %7602 = vsyncadd [#allocation4], 4294967168 }
 0x346   :  { %4554 = vsyncpa [#allocation3], 1 }
 0x347   :  { %4555 = vsyncpa [#allocation6], 1 }
 0x348   :  { %4556 = vsyncpa [#allocation9], 1 }
 0x349   :  { %4557 = vsyncpa [#allocation4], 1 }

</bundles_post_ra>
